<compile_context>
chip_gen: v6e
topology: v6e:2x2x1
jax: 0.10.0
libtpu: 0.0.40
codegen_flags: <defaults>
</compile_context>

<pallas_src>
import jax
import jax.numpy as jnp
from jax.experimental import pallas as pl
from jax.experimental.pallas import tpu as pltpu

# Below v7x's 64 MiB per-core physical VMEM, far above the tile working sets here.
_VMEM_LIMIT_BYTES = 48 * 1024 * 1024


def _round_up(x, m):
    return (x + m - 1) // m * m


def _pick_tk(k_dim):
    """K tile: a multiple of 128 that divides K (pipelined reduction), else full K."""
    if k_dim <= 1024 or k_dim % 128 != 0:
        return k_dim
    for tk in (512, 384, 256, 128):
        if k_dim % tk == 0:
            return tk
    return k_dim


# ----------------------------- Pallas kernels ------------------------------ #

def _make_conv_kernel(relu, has_res, has_down):
    """Tiled GEMM with f32 accumulator over the K grid axis.

    Epilogue at the last K step: + folded-BN bias
      [+ fused 1x1-downsample matmul + its bias] [+ residual tensor] [+ ReLU],
    then cast to the (bf16) output dtype — all in f32 on the VPU.
    """

    def kernel(*refs):
        a_ref, w_ref, b_ref = refs[0], refs[1], refs[2]
        pos = 3
        r_ref = None
        if has_res:
            r_ref = refs[pos]
            pos += 1
        da_ref = dw_ref = db_ref = None
        if has_down:
            da_ref, dw_ref, db_ref = refs[pos], refs[pos + 1], refs[pos + 2]
            pos += 3
        o_ref, acc_ref = refs[pos], refs[pos + 1]

        k = pl.program_id(2)

        @pl.when(k == 0)
        def _init():
            acc_ref[...] = jnp.zeros_like(acc_ref)

        acc_ref[...] += jnp.dot(a_ref[...], w_ref[...],
                                preferred_element_type=jnp.float32)

        @pl.when(k == pl.num_programs(2) - 1)
        def _finalize():
            acc = acc_ref[...] + b_ref[...]
            if has_down:
                acc = acc + jnp.dot(da_ref[...], dw_ref[...],
                                    preferred_element_type=jnp.float32)
                acc = acc + db_ref[...]
            if has_res:
                acc = acc + r_ref[...].astype(jnp.float32)
            if relu:
                acc = jnp.maximum(acc, 0.0)
            o_ref[...] = acc.astype(o_ref.dtype)

    return kernel


def _avgpool_kernel(x_ref, o_ref):
    """Global average pool over the flattened spatial axis (per channel tile)."""
    x = x_ref[...].astype(jnp.float32)
    o_ref[...] = jnp.sum(x, axis=1) * (1.0 / x.shape[1])


# ----------------------------- Pallas wrappers ----------------------------- #

def fused_conv_matmul(a, w, b, *, relu, residual=None, down=None,
                      out_dtype=jnp.bfloat16):
    """a:(M,K)bf16 @ w:(K,N)bf16 + b:(N,)f32 [+ down gemm] [+ residual] [ReLU].

    Tiled over (M//tm, N//tn, K//tk) with an f32 VMEM accumulator (pipelined,
    megacore-shardable on the parallel M/N axes).
    """
    M, K = a.shape
    K2, N = w.shape
    assert K == K2

    # Tile choices: lane-dense N tiles (multiples of 128), sublane-aligned M tiles.
    if N % 256 == 0:
        tn = 256
    elif N % 128 == 0:
        tn = 128
    else:
        tn = N
    tm = 256 if M >= 256 else _round_up(M, 16)
    m_pad = _round_up(M, tm)
    tk = _pick_tk(K)
    nk = K // tk

    if m_pad != M:
        a = jnp.pad(a, ((0, m_pad - M), (0, 0)))
        if residual is not None:
            residual = jnp.pad(residual, ((0, m_pad - M), (0, 0)))

    b2 = b.reshape(1, N).astype(jnp.float32)

    in_specs = [pl.BlockSpec((tm, tk), lambda i, j, k: (i, k)),
                pl.BlockSpec((tk, tn), lambda i, j, k: (k, j)),
                pl.BlockSpec((1, tn), lambda i, j, k: (0, j))]
    args = [a, w, b2]

    if residual is not None:
        in_specs.append(pl.BlockSpec((tm, tn), lambda i, j, k: (i, j)))
        args.append(residual)          # bf16, no wrapper-side f32 copy

    if down is not None:
        d_a, d_w, d_b = down
        if m_pad != M:
            d_a = jnp.pad(d_a, ((0, m_pad - M), (0, 0)))
        kd = d_a.shape[1]
        in_specs += [pl.BlockSpec((tm, kd), lambda i, j, k: (i, 0)),
                     pl.BlockSpec((kd, tn), lambda i, j, k: (0, j)),
                     pl.BlockSpec((1, tn), lambda i, j, k: (0, j))]
        args += [d_a, d_w, d_b.reshape(1, N).astype(jnp.float32)]

    kernel = _make_conv_kernel(relu, residual is not None, down is not None)
    out = pl.pallas_call(
        kernel,
        out_shape=jax.ShapeDtypeStruct((m_pad, N), out_dtype),
        grid=(m_pad // tm, N // tn, nk),
        in_specs=in_specs,
        out_specs=pl.BlockSpec((tm, tn), lambda i, j, k: (i, j)),
        scratch_shapes=[pltpu.VMEM((tm, tn), jnp.float32)],
        compiler_params=pltpu.CompilerParams(
            dimension_semantics=("parallel", "parallel", "arbitrary"),
            vmem_limit_bytes=_VMEM_LIMIT_BYTES),
    )(*args)
    return out[:M] if m_pad != M else out


def global_avgpool(x):
    """NHWC -> (B, C) global average pool, tiled (and pipelined) over channels."""
    B, H, W, C = x.shape
    hw = H * W
    xf = x.reshape(B, hw, C)
    tc = 128 if C % 128 == 0 else C
    return pl.pallas_call(
        _avgpool_kernel,
        out_shape=jax.ShapeDtypeStruct((B, C), jnp.float32),
        grid=(C // tc,),
        in_specs=[pl.BlockSpec((B, hw, tc), lambda c: (0, 0, c))],
        out_specs=pl.BlockSpec((B, tc), lambda c: (0, c)),
        compiler_params=pltpu.CompilerParams(
            dimension_semantics=("parallel",),
            vmem_limit_bytes=_VMEM_LIMIT_BYTES),
    )(xf)


# ------------------------------- JAX glue ---------------------------------- #

def maxpool_3x3_s2(x):
    """3x3 / stride-2 / pad-1 max pool on NHWC (ResNet stem pool).

    Review-approved form: running jnp.maximum over the 9 strided views — XLA
    fuses this into one pass, no 9x stacked materialization in HBM.
    """
    B, H, W, C = x.shape
    k, s, pad = 3, 2, 1
    ho = (H + 2 * pad - k) // s + 1
    wo = (W + 2 * pad - k) // s + 1
    xp = jnp.pad(x, ((0, 0), (pad, pad), (pad, pad), (0, 0)),
                 constant_values=-jnp.inf)
    out = None
    for dh in range(k):
        for dw in range(k):
            v = jax.lax.slice(
                xp, (0, dh, dw, 0),
                (B, dh + (ho - 1) * s + 1, dw + (wo - 1) * s + 1, C),
                (1, s, s, 1))
            out = v if out is None else jnp.maximum(out, v)
    return out


def _im2col(x, kh, kw, stride, pad):
    """NHWC (bf16) -> (B*Ho*Wo, kh*kw*C) patch matrix (patch order: kh, kw, C)."""
    B, H, W, C = x.shape
    xp = jnp.pad(x, ((0, 0), (pad, pad), (pad, pad), (0, 0)))
    ho = (H + 2 * pad - kh) // stride + 1
    wo = (W + 2 * pad - kw) // stride + 1
    cols = []
    for dh in range(kh):
        for dw in range(kw):
            sl = jax.lax.slice(
                xp, (0, dh, dw, 0),
                (B, dh + (ho - 1) * stride + 1, dw + (wo - 1) * stride + 1, C),
                (1, stride, stride, 1))
            cols.append(sl)
    patches = jnp.concatenate(cols, axis=-1)  # (B, Ho, Wo, kh*kw*C) bf16
    return patches.reshape(B * ho * wo, kh * kw * C), (B, ho, wo)


def conv_bn(x, w_mat, b, ksize, stride, pad, relu, residual=None, down=None):
    patches, (B, ho, wo) = _im2col(x, ksize, ksize, stride, pad)
    N = w_mat.shape[1]
    res_flat = None if residual is None else residual.reshape(B * ho * wo, N)
    out = fused_conv_matmul(patches, w_mat, b, relu=relu,
                            residual=res_flat, down=down)
    return out.reshape(B, ho, wo, N)


def basic_block(x, bp, stride):
    # conv1 -> bn1 -> relu
    out = conv_bn(x, bp["w1"], bp["b1"], 3, stride, 1, relu=True)
    if bp["down"] is not None:
        # Fold the 1x1-stride-s downsample into conv2's epilogue: its "patches"
        # are just the stride-s spatial subsample of x (no im2col expansion).
        dw_mat, db = bp["down"]
        da = x[:, ::stride, ::stride, :]
        da = da.reshape(-1, da.shape[-1])
        out = conv_bn(out, bp["w2"], bp["b2"], 3, 1, 1, relu=True,
                      down=(da, dw_mat, db))
    else:
        # conv2 + bn2 + residual add + relu fused in one Pallas GEMM epilogue.
        out = conv_bn(out, bp["w2"], bp["b2"], 3, 1, 1, relu=True, residual=x)
    return out


# --------------------------- parameter construction ------------------------ #

def _cpad(c):
    """Pad 64-channel maps to 128 so every N (lane) dim is >= 128."""
    return 128 if c == 64 else c


def _fold_conv_bn(w, gamma, beta, mean, var, cin_pad, cout_pad, eps=1e-5):
    """Fold inference BatchNorm into the conv; emit zero-channel-padded bf16 GEMM W."""
    scale = gamma / jnp.sqrt(var + eps)                    # (C_out,)
    w_f = w * scale[:, None, None, None]                   # (C_out, C_in, kh, kw)
    b_f = beta - mean * scale                              # (C_out,)
    c_out, c_in, kh, kw = w.shape
    w_hwio = jnp.transpose(w_f, (2, 3, 1, 0))              # (kh, kw, C_in, C_out)
    w_hwio = jnp.pad(w_hwio, ((0, 0), (0, 0),
                              (0, cin_pad - c_in), (0, cout_pad - c_out)))
    b_p = jnp.pad(b_f, (0, cout_pad - c_out))
    w_mat = w_hwio.reshape(kh * kw * cin_pad, cout_pad).astype(jnp.bfloat16)
    return w_mat, b_p.astype(jnp.float32)


def init_resnet18_params(key):
    keys = iter(jax.random.split(key, 128))

    def conv_bn_fold(c_out, c_in, k):
        w = jax.random.normal(next(keys), (c_out, c_in, k, k), jnp.float32) * 0.05
        gamma = 1.0 + 0.1 * jax.random.normal(next(keys), (c_out,), jnp.float32)
        beta = 0.1 * jax.random.normal(next(keys), (c_out,), jnp.float32)
        mean = jnp.zeros((c_out,), jnp.float32)
        var = jnp.ones((c_out,), jnp.float32)
        cin_pad = c_in if c_in == 3 else _cpad(c_in)
        return _fold_conv_bn(w, gamma, beta, mean, var, cin_pad, _cpad(c_out))

    params = {"stem": conv_bn_fold(64, 3, 7), "layers": []}
    in_c = 64
    for c_out, stride in [(64, 1), (128, 2), (256, 2), (512, 2)]:
        blocks = []
        for bidx in range(2):
            s = stride if bidx == 0 else 1
            cin = in_c if bidx == 0 else c_out
            w1, b1 = conv_bn_fold(c_out, cin, 3)
            w2, b2 = conv_bn_fold(c_out, c_out, 3)
            down = None
            if bidx == 0 and (s != 1 or in_c != c_out):
                down = conv_bn_fold(c_out, in_c, 1)
            blocks.append(dict(w1=w1, b1=b1, w2=w2, b2=b2, down=down))
        params["layers"].append(blocks)
        in_c = c_out
    return params


# ------------------------------ model forward ------------------------------ #

def multi_task_net_forward(params, x_nchw):
    """Eval-mode MultiTastNet.forward: returns the 512-d backbone embedding."""
    # TODO(synk): training-branch margin class heads (ArcMargin/AddMargin/Sphere/
    # Linear) and the unused bbox_head depend on external sub-modules + labels;
    # the eval-mode forward (self.training == False) returns the backbone output.
    x = jnp.transpose(x_nchw, (0, 2, 3, 1)).astype(jnp.bfloat16)  # NCHW -> NHWC bf16
    w, b = params["stem"]
    x = conv_bn(x, w, b, 7, 2, 3, relu=True)
    x = maxpool_3x3_s2(x)
    for li, blocks in enumerate(params["layers"]):
        for bi, bp in enumerate(blocks):
            stride = 2 if (li > 0 and bi == 0) else 1   # ResNet-18 static strides
            x = basic_block(x, bp, stride)
    return global_avgpool(x)  # (B, 512) f32


if __name__ == "__main__":
    key = jax.random.PRNGKey(0)
    pkey, xkey = jax.random.split(key)
    params = init_resnet18_params(pkey)
    x = jax.random.normal(xkey, (2, 3, 32, 32), jnp.float32)  # NCHW, like PyTorch
    fwd = jax.jit(multi_task_net_forward)
    emb = jax.block_until_ready(fwd(params, x))
    assert emb.shape == (2, 512), emb.shape
    assert bool(jnp.all(jnp.isfinite(emb)))
    print("KERNEL_OK")
</pallas_src>

<mosaic_0001>
module attributes {stable_mosaic.version = 11 : i64} {
  func.func @kernel(%arg0: i32, %arg1: i32, %arg2: i32, %arg3: memref<256x147xbf16, #tpu.memory_space<vmem>>, %arg4: memref<147x128xbf16, #tpu.memory_space<vmem>>, %arg5: memref<1x128xf32, #tpu.memory_space<vmem>>, %arg6: memref<256x128xbf16, #tpu.memory_space<vmem>>, %arg7: memref<256x128xf32, #tpu.memory_space<vmem>>) attributes {dimension_semantics = [#tpu.dimension_semantics<parallel>, #tpu.dimension_semantics<parallel>, #tpu.dimension_semantics<arbitrary>], iteration_bounds = array<i64: 2, 1, 1>, scalar_prefetch = 0 : i64, scratch_operands = 1 : i64, tpu.core_type = #tpu.core_type<tc>, window_params = [{transform_indices = @transform_0, window_bounds = array<i64: 256, 147>}, {transform_indices = @transform_1, window_bounds = array<i64: 147, 128>}, {transform_indices = @transform_2, window_bounds = array<i64: 1, 128>}, {transform_indices = @transform_3, window_bounds = array<i64: 256, 128>}]} {
    %c0_i32 = arith.constant 0 : i32
    %0 = arith.cmpi eq, %arg2, %c0_i32 : i32
    %1 = arith.extui %0 : i1 to i32
    %c0_i32_0 = arith.constant 0 : i32
    %2 = arith.cmpi ne, %1, %c0_i32_0 : i32
    scf.if %2 {
      %cst_10 = arith.constant 0.000000e+00 : f32
      %12 = vector.broadcast %cst_10 : f32 to vector<256x128xf32>
      %c0_11 = arith.constant 0 : index
      %c0_12 = arith.constant 0 : index
      %13 = vector.load %arg7[%c0_11, %c0_12] : memref<256x128xf32, #tpu.memory_space<vmem>>, vector<256x128xf32>
      tpu.vector_store %arg7[%c0_11, %c0_12], %12 {strides = array<i32>} : memref<256x128xf32, #tpu.memory_space<vmem>>, vector<256x128xf32>,
    } else {
    }
    %c0 = arith.constant 0 : index
    %c0_1 = arith.constant 0 : index
    %3 = vector.load %arg7[%c0, %c0_1] : memref<256x128xf32, #tpu.memory_space<vmem>>, vector<256x128xf32>
    %c0_2 = arith.constant 0 : index
    %c0_3 = arith.constant 0 : index
    %4 = vector.load %arg3[%c0_2, %c0_3] : memref<256x147xbf16, #tpu.memory_space<vmem>>, vector<256x147xbf16>
    %c0_4 = arith.constant 0 : index
    %c0_5 = arith.constant 0 : index
    %5 = vector.load %arg4[%c0_4, %c0_5] : memref<147x128xbf16, #tpu.memory_space<vmem>>, vector<147x128xbf16>
    %cst = arith.constant dense<0.000000e+00> : vector<256x128xf32>
    %6 = tpu.matmul %4, %5, %cst {dimension_numbers = #tpu.dot_dimension_numbers<[1], [0], [0], [1], [0, 0, 1, 1], [], []>} : vector<256x147xbf16>, vector<147x128xbf16>, vector<256x128xf32> -> vector<256x128xf32>
    %7 = arith.addf %3, %6 : vector<256x128xf32>
    %c0_6 = arith.constant 0 : index
    %c0_7 = arith.constant 0 : index
    %8 = vector.load %arg7[%c0_6, %c0_7] : memref<256x128xf32, #tpu.memory_space<vmem>>, vector<256x128xf32>
    tpu.vector_store %arg7[%c0_6, %c0_7], %7 {strides = array<i32>} : memref<256x128xf32, #tpu.memory_space<vmem>>, vector<256x128xf32>,
    %c0_i32_8 = arith.constant 0 : i32
    %9 = arith.cmpi eq, %arg2, %c0_i32_8 : i32
    %10 = arith.extui %9 : i1 to i32
    %c0_i32_9 = arith.constant 0 : i32
    %11 = arith.cmpi ne, %10, %c0_i32_9 : i32
    scf.if %11 {
      %c0_10 = arith.constant 0 : index
      %c0_11 = arith.constant 0 : index
      %12 = vector.load %arg7[%c0_10, %c0_11] : memref<256x128xf32, #tpu.memory_space<vmem>>, vector<256x128xf32>
      %c0_12 = arith.constant 0 : index
      %c0_13 = arith.constant 0 : index
      %13 = vector.load %arg5[%c0_12, %c0_13] : memref<1x128xf32, #tpu.memory_space<vmem>>, vector<1x128xf32>
      %14 = vector.broadcast %13 : vector<1x128xf32> to vector<256x128xf32>
      %15 = arith.addf %12, %14 : vector<256x128xf32>
      %cst_14 = arith.constant 0.000000e+00 : f32
      %16 = vector.broadcast %cst_14 : f32 to vector<256x128xf32>
      %17 = arith.maximumf %15, %16 : vector<256x128xf32>
      %18 = arith.truncf %17 : vector<256x128xf32> to vector<256x128xbf16>
      %c0_15 = arith.constant 0 : index
      %c0_16 = arith.constant 0 : index
      %19 = vector.load %arg6[%c0_15, %c0_16] : memref<256x128xbf16, #tpu.memory_space<vmem>>, vector<256x128xbf16>
      tpu.vector_store %arg6[%c0_15, %c0_16], %18 {strides = array<i32>} : memref<256x128xbf16, #tpu.memory_space<vmem>>, vector<256x128xbf16>,
    } else {
    }
    return
  }
  func.func @transform_0(%arg0: i32, %arg1: i32, %arg2: i32) -> (i32, i32) {
    %c0_i32 = arith.constant 0 : i32
    return %arg0, %arg2 : i32, i32
  }
  func.func @transform_1(%arg0: i32, %arg1: i32, %arg2: i32) -> (i32, i32) {
    %c0_i32 = arith.constant 0 : i32
    return %arg2, %arg1 : i32, i32
  }
  func.func @transform_2(%arg0: i32, %arg1: i32, %arg2: i32) -> (i32, i32) {
    %c0_i32 = arith.constant 0 : i32
    %c0_i32_0 = arith.constant 0 : i32
    return %c0_i32, %arg1 : i32, i32
  }
  func.func @transform_3(%arg0: i32, %arg1: i32, %arg2: i32) -> (i32, i32) {
    %c0_i32 = arith.constant 0 : i32
    return %arg0, %arg1 : i32, i32
  }
}

module attributes {stable_mosaic.version = 11 : i64} {
  func.func @kernel(%arg0: i32, %arg1: i32, %arg2: i32, %arg3: memref<128x384xbf16, #tpu.memory_space<vmem>>, %arg4: memref<384x128xbf16, #tpu.memory_space<vmem>>, %arg5: memref<1x128xf32, #tpu.memory_space<vmem>>, %arg6: memref<128x128xbf16, #tpu.memory_space<vmem>>, %arg7: memref<128x128xf32, #tpu.memory_space<vmem>>) attributes {dimension_semantics = [#tpu.dimension_semantics<parallel>, #tpu.dimension_semantics<parallel>, #tpu.dimension_semantics<arbitrary>], iteration_bounds = array<i64: 1, 1, 3>, scalar_prefetch = 0 : i64, scratch_operands = 1 : i64, tpu.core_type = #tpu.core_type<tc>, window_params = [{transform_indices = @transform_0, window_bounds = array<i64: 128, 384>}, {transform_indices = @transform_1, window_bounds = array<i64: 384, 128>}, {transform_indices = @transform_2, window_bounds = array<i64: 1, 128>}, {transform_indices = @transform_3, window_bounds = array<i64: 128, 128>}]} {
    %c0_i32 = arith.constant 0 : i32
    %0 = arith.cmpi eq, %arg2, %c0_i32 : i32
    %1 = arith.extui %0 : i1 to i32
    %c0_i32_0 = arith.constant 0 : i32
    %2 = arith.cmpi ne, %1, %c0_i32_0 : i32
    scf.if %2 {
      %cst_9 = arith.constant 0.000000e+00 : f32
      %12 = vector.broadcast %cst_9 : f32 to vector<128x128xf32>
      %c0_10 = arith.constant 0 : index
      %c0_11 = arith.constant 0 : index
      %13 = vector.load %arg7[%c0_10, %c0_11] : memref<128x128xf32, #tpu.memory_space<vmem>>, vector<128x128xf32>
      tpu.vector_store %arg7[%c0_10, %c0_11], %12 {strides = array<i32>} : memref<128x128xf32, #tpu.memory_space<vmem>>, vector<128x128xf32>,
    } else {
    }
    %c0 = arith.constant 0 : index
    %c0_1 = arith.constant 0 : index
    %3 = vector.load %arg7[%c0, %c0_1] : memref<128x128xf32, #tpu.memory_space<vmem>>, vector<128x128xf32>
    %c0_2 = arith.constant 0 : index
    %c0_3 = arith.constant 0 : index
    %4 = vector.load %arg3[%c0_2, %c0_3] : memref<128x384xbf16, #tpu.memory_space<vmem>>, vector<128x384xbf16>
    %c0_4 = arith.constant 0 : index
    %c0_5 = arith.constant 0 : index
    %5 = vector.load %arg4[%c0_4, %c0_5] : memref<384x128xbf16, #tpu.memory_space<vmem>>, vector<384x128xbf16>
    %cst = arith.constant dense<0.000000e+00> : vector<128x128xf32>
    %6 = tpu.matmul %4, %5, %cst {dimension_numbers = #tpu.dot_dimension_numbers<[1], [0], [0], [1], [0, 0, 1, 1], [], []>} : vector<128x384xbf16>, vector<384x128xbf16>, vector<128x128xf32> -> vector<128x128xf32>
    %7 = arith.addf %3, %6 : vector<128x128xf32>
    %c0_6 = arith.constant 0 : index
    %c0_7 = arith.constant 0 : index
    %8 = vector.load %arg7[%c0_6, %c0_7] : memref<128x128xf32, #tpu.memory_space<vmem>>, vector<128x128xf32>
    tpu.vector_store %arg7[%c0_6, %c0_7], %7 {strides = array<i32>} : memref<128x128xf32, #tpu.memory_space<vmem>>, vector<128x128xf32>,
    %c2_i32 = arith.constant 2 : i32
    %9 = arith.cmpi eq, %arg2, %c2_i32 : i32
    %10 = arith.extui %9 : i1 to i32
    %c0_i32_8 = arith.constant 0 : i32
    %11 = arith.cmpi ne, %10, %c0_i32_8 : i32
    scf.if %11 {
      %c0_9 = arith.constant 0 : index
      %c0_10 = arith.constant 0 : index
      %12 = vector.load %arg7[%c0_9, %c0_10] : memref<128x128xf32, #tpu.memory_space<vmem>>, vector<128x128xf32>
      %c0_11 = arith.constant 0 : index
      %c0_12 = arith.constant 0 : index
      %13 = vector.load %arg5[%c0_11, %c0_12] : memref<1x128xf32, #tpu.memory_space<vmem>>, vector<1x128xf32>
      %14 = vector.broadcast %13 : vector<1x128xf32> to vector<128x128xf32>
      %15 = arith.addf %12, %14 : vector<128x128xf32>
      %cst_13 = arith.constant 0.000000e+00 : f32
      %16 = vector.broadcast %cst_13 : f32 to vector<128x128xf32>
      %17 = arith.maximumf %15, %16 : vector<128x128xf32>
      %18 = arith.truncf %17 : vector<128x128xf32> to vector<128x128xbf16>
      %c0_14 = arith.constant 0 : index
      %c0_15 = arith.constant 0 : index
      %19 = vector.load %arg6[%c0_14, %c0_15] : memref<128x128xbf16, #tpu.memory_space<vmem>>, vector<128x128xbf16>
      tpu.vector_store %arg6[%c0_14, %c0_15], %18 {strides = array<i32>} : memref<128x128xbf16, #tpu.memory_space<vmem>>, vector<128x128xbf16>,
    } else {
    }
    return
  }
  func.func @transform_0(%arg0: i32, %arg1: i32, %arg2: i32) -> (i32, i32) {
    %c0_i32 = arith.constant 0 : i32
    return %arg0, %arg2 : i32, i32
  }
  func.func @transform_1(%arg0: i32, %arg1: i32, %arg2: i32) -> (i32, i32) {
    %c0_i32 = arith.constant 0 : i32
    return %arg2, %arg1 : i32, i32
  }
  func.func @transform_2(%arg0: i32, %arg1: i32, %arg2: i32) -> (i32, i32) {
    %c0_i32 = arith.constant 0 : i32
    %c0_i32_0 = arith.constant 0 : i32
    return %c0_i32, %arg1 : i32, i32
  }
  func.func @transform_3(%arg0: i32, %arg1: i32, %arg2: i32) -> (i32, i32) {
    %c0_i32 = arith.constant 0 : i32
    return %arg0, %arg1 : i32, i32
  }
}

module attributes {stable_mosaic.version = 11 : i64} {
  func.func @kernel(%arg0: i32, %arg1: i32, %arg2: i32, %arg3: memref<128x384xbf16, #tpu.memory_space<vmem>>, %arg4: memref<384x128xbf16, #tpu.memory_space<vmem>>, %arg5: memref<1x128xf32, #tpu.memory_space<vmem>>, %arg6: memref<128x128xbf16, #tpu.memory_space<vmem>>, %arg7: memref<128x128xbf16, #tpu.memory_space<vmem>>, %arg8: memref<128x128xf32, #tpu.memory_space<vmem>>) attributes {dimension_semantics = [#tpu.dimension_semantics<parallel>, #tpu.dimension_semantics<parallel>, #tpu.dimension_semantics<arbitrary>], iteration_bounds = array<i64: 1, 1, 3>, scalar_prefetch = 0 : i64, scratch_operands = 1 : i64, tpu.core_type = #tpu.core_type<tc>, window_params = [{transform_indices = @transform_0, window_bounds = array<i64: 128, 384>}, {transform_indices = @transform_1, window_bounds = array<i64: 384, 128>}, {transform_indices = @transform_2, window_bounds = array<i64: 1, 128>}, {transform_indices = @transform_3, window_bounds = array<i64: 128, 128>}, {transform_indices = @transform_4, window_bounds = array<i64: 128, 128>}]} {
    %c0_i32 = arith.constant 0 : i32
    %0 = arith.cmpi eq, %arg2, %c0_i32 : i32
    %1 = arith.extui %0 : i1 to i32
    %c0_i32_0 = arith.constant 0 : i32
    %2 = arith.cmpi ne, %1, %c0_i32_0 : i32
    scf.if %2 {
      %cst_9 = arith.constant 0.000000e+00 : f32
      %12 = vector.broadcast %cst_9 : f32 to vector<128x128xf32>
      %c0_10 = arith.constant 0 : index
      %c0_11 = arith.constant 0 : index
      %13 = vector.load %arg8[%c0_10, %c0_11] : memref<128x128xf32, #tpu.memory_space<vmem>>, vector<128x128xf32>
      tpu.vector_store %arg8[%c0_10, %c0_11], %12 {strides = array<i32>} : memref<128x128xf32, #tpu.memory_space<vmem>>, vector<128x128xf32>,
    } else {
    }
    %c0 = arith.constant 0 : index
    %c0_1 = arith.constant 0 : index
    %3 = vector.load %arg8[%c0, %c0_1] : memref<128x128xf32, #tpu.memory_space<vmem>>, vector<128x128xf32>
    %c0_2 = arith.constant 0 : index
    %c0_3 = arith.constant 0 : index
    %4 = vector.load %arg3[%c0_2, %c0_3] : memref<128x384xbf16, #tpu.memory_space<vmem>>, vector<128x384xbf16>
    %c0_4 = arith.constant 0 : index
    %c0_5 = arith.constant 0 : index
    %5 = vector.load %arg4[%c0_4, %c0_5] : memref<384x128xbf16, #tpu.memory_space<vmem>>, vector<384x128xbf16>
    %cst = arith.constant dense<0.000000e+00> : vector<128x128xf32>
    %6 = tpu.matmul %4, %5, %cst {dimension_numbers = #tpu.dot_dimension_numbers<[1], [0], [0], [1], [0, 0, 1, 1], [], []>} : vector<128x384xbf16>, vector<384x128xbf16>, vector<128x128xf32> -> vector<128x128xf32>
    %7 = arith.addf %3, %6 : vector<128x128xf32>
    %c0_6 = arith.constant 0 : index
    %c0_7 = arith.constant 0 : index
    %8 = vector.load %arg8[%c0_6, %c0_7] : memref<128x128xf32, #tpu.memory_space<vmem>>, vector<128x128xf32>
    tpu.vector_store %arg8[%c0_6, %c0_7], %7 {strides = array<i32>} : memref<128x128xf32, #tpu.memory_space<vmem>>, vector<128x128xf32>,
    %c2_i32 = arith.constant 2 : i32
    %9 = arith.cmpi eq, %arg2, %c2_i32 : i32
    %10 = arith.extui %9 : i1 to i32
    %c0_i32_8 = arith.constant 0 : i32
    %11 = arith.cmpi ne, %10, %c0_i32_8 : i32
    scf.if %11 {
      %c0_9 = arith.constant 0 : index
      %c0_10 = arith.constant 0 : index
      %12 = vector.load %arg8[%c0_9, %c0_10] : memref<128x128xf32, #tpu.memory_space<vmem>>, vector<128x128xf32>
      %c0_11 = arith.constant 0 : index
      %c0_12 = arith.constant 0 : index
      %13 = vector.load %arg5[%c0_11, %c0_12] : memref<1x128xf32, #tpu.memory_space<vmem>>, vector<1x128xf32>
      %14 = vector.broadcast %13 : vector<1x128xf32> to vector<128x128xf32>
      %15 = arith.addf %12, %14 : vector<128x128xf32>
      %c0_13 = arith.constant 0 : index
      %c0_14 = arith.constant 0 : index
      %16 = vector.load %arg6[%c0_13, %c0_14] : memref<128x128xbf16, #tpu.memory_space<vmem>>, vector<128x128xbf16>
      %17 = arith.extf %16 : vector<128x128xbf16> to vector<128x128xf32>
      %18 = arith.addf %15, %17 : vector<128x128xf32>
      %cst_15 = arith.constant 0.000000e+00 : f32
      %19 = vector.broadcast %cst_15 : f32 to vector<128x128xf32>
      %20 = arith.maximumf %18, %19 : vector<128x128xf32>
      %21 = arith.truncf %20 : vector<128x128xf32> to vector<128x128xbf16>
      %c0_16 = arith.constant 0 : index
      %c0_17 = arith.constant 0 : index
      %22 = vector.load %arg7[%c0_16, %c0_17] : memref<128x128xbf16, #tpu.memory_space<vmem>>, vector<128x128xbf16>
      tpu.vector_store %arg7[%c0_16, %c0_17], %21 {strides = array<i32>} : memref<128x128xbf16, #tpu.memory_space<vmem>>, vector<128x128xbf16>,
    } else {
    }
    return
  }
  func.func @transform_0(%arg0: i32, %arg1: i32, %arg2: i32) -> (i32, i32) {
    %c0_i32 = arith.constant 0 : i32
    return %arg0, %arg2 : i32, i32
  }
  func.func @transform_1(%arg0: i32, %arg1: i32, %arg2: i32) -> (i32, i32) {
    %c0_i32 = arith.constant 0 : i32
    return %arg2, %arg1 : i32, i32
  }
  func.func @transform_2(%arg0: i32, %arg1: i32, %arg2: i32) -> (i32, i32) {
    %c0_i32 = arith.constant 0 : i32
    %c0_i32_0 = arith.constant 0 : i32
    return %c0_i32, %arg1 : i32, i32
  }
  func.func @transform_3(%arg0: i32, %arg1: i32, %arg2: i32) -> (i32, i32) {
    %c0_i32 = arith.constant 0 : i32
    return %arg0, %arg1 : i32, i32
  }
  func.func @transform_4(%arg0: i32, %arg1: i32, %arg2: i32) -> (i32, i32) {
    %c0_i32 = arith.constant 0 : i32
    return %arg0, %arg1 : i32, i32
  }
}

module attributes {stable_mosaic.version = 11 : i64} {
  func.func @kernel(%arg0: i32, %arg1: i32, %arg2: i32, %arg3: memref<32x384xbf16, #tpu.memory_space<vmem>>, %arg4: memref<384x128xbf16, #tpu.memory_space<vmem>>, %arg5: memref<1x128xf32, #tpu.memory_space<vmem>>, %arg6: memref<32x128xbf16, #tpu.memory_space<vmem>>, %arg7: memref<32x128xf32, #tpu.memory_space<vmem>>) attributes {dimension_semantics = [#tpu.dimension_semantics<parallel>, #tpu.dimension_semantics<parallel>, #tpu.dimension_semantics<arbitrary>], iteration_bounds = array<i64: 1, 1, 3>, scalar_prefetch = 0 : i64, scratch_operands = 1 : i64, tpu.core_type = #tpu.core_type<tc>, window_params = [{transform_indices = @transform_0, window_bounds = array<i64: 32, 384>}, {transform_indices = @transform_1, window_bounds = array<i64: 384, 128>}, {transform_indices = @transform_2, window_bounds = array<i64: 1, 128>}, {transform_indices = @transform_3, window_bounds = array<i64: 32, 128>}]} {
    %c0_i32 = arith.constant 0 : i32
    %0 = arith.cmpi eq, %arg2, %c0_i32 : i32
    %1 = arith.extui %0 : i1 to i32
    %c0_i32_0 = arith.constant 0 : i32
    %2 = arith.cmpi ne, %1, %c0_i32_0 : i32
    scf.if %2 {
      %cst_9 = arith.constant 0.000000e+00 : f32
      %12 = vector.broadcast %cst_9 : f32 to vector<32x128xf32>
      %c0_10 = arith.constant 0 : index
      %c0_11 = arith.constant 0 : index
      %13 = vector.load %arg7[%c0_10, %c0_11] : memref<32x128xf32, #tpu.memory_space<vmem>>, vector<32x128xf32>
      tpu.vector_store %arg7[%c0_10, %c0_11], %12 {strides = array<i32>} : memref<32x128xf32, #tpu.memory_space<vmem>>, vector<32x128xf32>,
    } else {
    }
    %c0 = arith.constant 0 : index
    %c0_1 = arith.constant 0 : index
    %3 = vector.load %arg7[%c0, %c0_1] : memref<32x128xf32, #tpu.memory_space<vmem>>, vector<32x128xf32>
    %c0_2 = arith.constant 0 : index
    %c0_3 = arith.constant 0 : index
    %4 = vector.load %arg3[%c0_2, %c0_3] : memref<32x384xbf16, #tpu.memory_space<vmem>>, vector<32x384xbf16>
    %c0_4 = arith.constant 0 : index
    %c0_5 = arith.constant 0 : index
    %5 = vector.load %arg4[%c0_4, %c0_5] : memref<384x128xbf16, #tpu.memory_space<vmem>>, vector<384x128xbf16>
    %cst = arith.constant dense<0.000000e+00> : vector<32x128xf32>
    %6 = tpu.matmul %4, %5, %cst {dimension_numbers = #tpu.dot_dimension_numbers<[1], [0], [0], [1], [0, 0, 1, 1], [], []>} : vector<32x384xbf16>, vector<384x128xbf16>, vector<32x128xf32> -> vector<32x128xf32>
    %7 = arith.addf %3, %6 : vector<32x128xf32>
    %c0_6 = arith.constant 0 : index
    %c0_7 = arith.constant 0 : index
    %8 = vector.load %arg7[%c0_6, %c0_7] : memref<32x128xf32, #tpu.memory_space<vmem>>, vector<32x128xf32>
    tpu.vector_store %arg7[%c0_6, %c0_7], %7 {strides = array<i32>} : memref<32x128xf32, #tpu.memory_space<vmem>>, vector<32x128xf32>,
    %c2_i32 = arith.constant 2 : i32
    %9 = arith.cmpi eq, %arg2, %c2_i32 : i32
    %10 = arith.extui %9 : i1 to i32
    %c0_i32_8 = arith.constant 0 : i32
    %11 = arith.cmpi ne, %10, %c0_i32_8 : i32
    scf.if %11 {
      %c0_9 = arith.constant 0 : index
      %c0_10 = arith.constant 0 : index
      %12 = vector.load %arg7[%c0_9, %c0_10] : memref<32x128xf32, #tpu.memory_space<vmem>>, vector<32x128xf32>
      %c0_11 = arith.constant 0 : index
      %c0_12 = arith.constant 0 : index
      %13 = vector.load %arg5[%c0_11, %c0_12] : memref<1x128xf32, #tpu.memory_space<vmem>>, vector<1x128xf32>
      %14 = vector.broadcast %13 : vector<1x128xf32> to vector<32x128xf32>
      %15 = arith.addf %12, %14 : vector<32x128xf32>
      %cst_13 = arith.constant 0.000000e+00 : f32
      %16 = vector.broadcast %cst_13 : f32 to vector<32x128xf32>
      %17 = arith.maximumf %15, %16 : vector<32x128xf32>
      %18 = arith.truncf %17 : vector<32x128xf32> to vector<32x128xbf16>
      %c0_14 = arith.constant 0 : index
      %c0_15 = arith.constant 0 : index
      %19 = vector.load %arg6[%c0_14, %c0_15] : memref<32x128xbf16, #tpu.memory_space<vmem>>, vector<32x128xbf16>
      tpu.vector_store %arg6[%c0_14, %c0_15], %18 {strides = array<i32>} : memref<32x128xbf16, #tpu.memory_space<vmem>>, vector<32x128xbf16>,
    } else {
    }
    return
  }
  func.func @transform_0(%arg0: i32, %arg1: i32, %arg2: i32) -> (i32, i32) {
    %c0_i32 = arith.constant 0 : i32
    return %arg0, %arg2 : i32, i32
  }
  func.func @transform_1(%arg0: i32, %arg1: i32, %arg2: i32) -> (i32, i32) {
    %c0_i32 = arith.constant 0 : i32
    return %arg2, %arg1 : i32, i32
  }
  func.func @transform_2(%arg0: i32, %arg1: i32, %arg2: i32) -> (i32, i32) {
    %c0_i32 = arith.constant 0 : i32
    %c0_i32_0 = arith.constant 0 : i32
    return %c0_i32, %arg1 : i32, i32
  }
  func.func @transform_3(%arg0: i32, %arg1: i32, %arg2: i32) -> (i32, i32) {
    %c0_i32 = arith.constant 0 : i32
    return %arg0, %arg1 : i32, i32
  }
}

module attributes {stable_mosaic.version = 11 : i64} {
  func.func @kernel(%arg0: i32, %arg1: i32, %arg2: i32, %arg3: memref<32x384xbf16, #tpu.memory_space<vmem>>, %arg4: memref<384x128xbf16, #tpu.memory_space<vmem>>, %arg5: memref<1x128xf32, #tpu.memory_space<vmem>>, %arg6: memref<32x128xbf16, #tpu.memory_space<vmem>>, %arg7: memref<128x128xbf16, #tpu.memory_space<vmem>>, %arg8: memref<1x128xf32, #tpu.memory_space<vmem>>, %arg9: memref<32x128xbf16, #tpu.memory_space<vmem>>, %arg10: memref<32x128xf32, #tpu.memory_space<vmem>>) attributes {dimension_semantics = [#tpu.dimension_semantics<parallel>, #tpu.dimension_semantics<parallel>, #tpu.dimension_semantics<arbitrary>], iteration_bounds = array<i64: 1, 1, 3>, scalar_prefetch = 0 : i64, scratch_operands = 1 : i64, tpu.core_type = #tpu.core_type<tc>, window_params = [{transform_indices = @transform_0, window_bounds = array<i64: 32, 384>}, {transform_indices = @transform_1, window_bounds = array<i64: 384, 128>}, {transform_indices = @transform_2, window_bounds = array<i64: 1, 128>}, {transform_indices = @transform_3, window_bounds = array<i64: 32, 128>}, {transform_indices = @transform_4, window_bounds = array<i64: 128, 128>}, {transform_indices = @transform_5, window_bounds = array<i64: 1, 128>}, {transform_indices = @transform_6, window_bounds = array<i64: 32, 128>}]} {
    %c0_i32 = arith.constant 0 : i32
    %0 = arith.cmpi eq, %arg2, %c0_i32 : i32
    %1 = arith.extui %0 : i1 to i32
    %c0_i32_0 = arith.constant 0 : i32
    %2 = arith.cmpi ne, %1, %c0_i32_0 : i32
    scf.if %2 {
      %cst_9 = arith.constant 0.000000e+00 : f32
      %12 = vector.broadcast %cst_9 : f32 to vector<32x128xf32>
      %c0_10 = arith.constant 0 : index
      %c0_11 = arith.constant 0 : index
      %13 = vector.load %arg10[%c0_10, %c0_11] : memref<32x128xf32, #tpu.memory_space<vmem>>, vector<32x128xf32>
      tpu.vector_store %arg10[%c0_10, %c0_11], %12 {strides = array<i32>} : memref<32x128xf32, #tpu.memory_space<vmem>>, vector<32x128xf32>,
    } else {
    }
    %c0 = arith.constant 0 : index
    %c0_1 = arith.constant 0 : index
    %3 = vector.load %arg10[%c0, %c0_1] : memref<32x128xf32, #tpu.memory_space<vmem>>, vector<32x128xf32>
    %c0_2 = arith.constant 0 : index
    %c0_3 = arith.constant 0 : index
    %4 = vector.load %arg3[%c0_2, %c0_3] : memref<32x384xbf16, #tpu.memory_space<vmem>>, vector<32x384xbf16>
    %c0_4 = arith.constant 0 : index
    %c0_5 = arith.constant 0 : index
    %5 = vector.load %arg4[%c0_4, %c0_5] : memref<384x128xbf16, #tpu.memory_space<vmem>>, vector<384x128xbf16>
    %cst = arith.constant dense<0.000000e+00> : vector<32x128xf32>
    %6 = tpu.matmul %4, %5, %cst {dimension_numbers = #tpu.dot_dimension_numbers<[1], [0], [0], [1], [0, 0, 1, 1], [], []>} : vector<32x384xbf16>, vector<384x128xbf16>, vector<32x128xf32> -> vector<32x128xf32>
    %7 = arith.addf %3, %6 : vector<32x128xf32>
    %c0_6 = arith.constant 0 : index
    %c0_7 = arith.constant 0 : index
    %8 = vector.load %arg10[%c0_6, %c0_7] : memref<32x128xf32, #tpu.memory_space<vmem>>, vector<32x128xf32>
    tpu.vector_store %arg10[%c0_6, %c0_7], %7 {strides = array<i32>} : memref<32x128xf32, #tpu.memory_space<vmem>>, vector<32x128xf32>,
    %c2_i32 = arith.constant 2 : i32
    %9 = arith.cmpi eq, %arg2, %c2_i32 : i32
    %10 = arith.extui %9 : i1 to i32
    %c0_i32_8 = arith.constant 0 : i32
    %11 = arith.cmpi ne, %10, %c0_i32_8 : i32
    scf.if %11 {
      %c0_9 = arith.constant 0 : index
      %c0_10 = arith.constant 0 : index
      %12 = vector.load %arg10[%c0_9, %c0_10] : memref<32x128xf32, #tpu.memory_space<vmem>>, vector<32x128xf32>
      %c0_11 = arith.constant 0 : index
      %c0_12 = arith.constant 0 : index
      %13 = vector.load %arg5[%c0_11, %c0_12] : memref<1x128xf32, #tpu.memory_space<vmem>>, vector<1x128xf32>
      %14 = vector.broadcast %13 : vector<1x128xf32> to vector<32x128xf32>
      %15 = arith.addf %12, %14 : vector<32x128xf32>
      %c0_13 = arith.constant 0 : index
      %c0_14 = arith.constant 0 : index
      %16 = vector.load %arg6[%c0_13, %c0_14] : memref<32x128xbf16, #tpu.memory_space<vmem>>, vector<32x128xbf16>
      %c0_15 = arith.constant 0 : index
      %c0_16 = arith.constant 0 : index
      %17 = vector.load %arg7[%c0_15, %c0_16] : memref<128x128xbf16, #tpu.memory_space<vmem>>, vector<128x128xbf16>
      %cst_17 = arith.constant dense<0.000000e+00> : vector<32x128xf32>
      %18 = tpu.matmul %16, %17, %cst_17 {dimension_numbers = #tpu.dot_dimension_numbers<[1], [0], [0], [1], [0, 0, 1, 1], [], []>} : vector<32x128xbf16>, vector<128x128xbf16>, vector<32x128xf32> -> vector<32x128xf32>
      %19 = arith.addf %15, %18 : vector<32x128xf32>
      %c0_18 = arith.constant 0 : index
      %c0_19 = arith.constant 0 : index
      %20 = vector.load %arg8[%c0_18, %c0_19] : memref<1x128xf32, #tpu.memory_space<vmem>>, vector<1x128xf32>
      %21 = vector.broadcast %20 : vector<1x128xf32> to vector<32x128xf32>
      %22 = arith.addf %19, %21 : vector<32x128xf32>
      %cst_20 = arith.constant 0.000000e+00 : f32
      %23 = vector.broadcast %cst_20 : f32 to vector<32x128xf32>
      %24 = arith.maximumf %22, %23 : vector<32x128xf32>
      %25 = arith.truncf %24 : vector<32x128xf32> to vector<32x128xbf16>
      %c0_21 = arith.constant 0 : index
      %c0_22 = arith.constant 0 : index
      %26 = vector.load %arg9[%c0_21, %c0_22] : memref<32x128xbf16, #tpu.memory_space<vmem>>, vector<32x128xbf16>
      tpu.vector_store %arg9[%c0_21, %c0_22], %25 {strides = array<i32>} : memref<32x128xbf16, #tpu.memory_space<vmem>>, vector<32x128xbf16>,
    } else {
    }
    return
  }
  func.func @transform_0(%arg0: i32, %arg1: i32, %arg2: i32) -> (i32, i32) {
    %c0_i32 = arith.constant 0 : i32
    return %arg0, %arg2 : i32, i32
  }
  func.func @transform_1(%arg0: i32, %arg1: i32, %arg2: i32) -> (i32, i32) {
    %c0_i32 = arith.constant 0 : i32
    return %arg2, %arg1 : i32, i32
  }
  func.func @transform_2(%arg0: i32, %arg1: i32, %arg2: i32) -> (i32, i32) {
    %c0_i32 = arith.constant 0 : i32
    %c0_i32_0 = arith.constant 0 : i32
    return %c0_i32, %arg1 : i32, i32
  }
  func.func @transform_3(%arg0: i32, %arg1: i32, %arg2: i32) -> (i32, i32) {
    %c0_i32 = arith.constant 0 : i32
    %c0_i32_0 = arith.constant 0 : i32
    return %arg0, %c0_i32 : i32, i32
  }
  func.func @transform_4(%arg0: i32, %arg1: i32, %arg2: i32) -> (i32, i32) {
    %c0_i32 = arith.constant 0 : i32
    %c0_i32_0 = arith.constant 0 : i32
    return %c0_i32, %arg1 : i32, i32
  }
  func.func @transform_5(%arg0: i32, %arg1: i32, %arg2: i32) -> (i32, i32) {
    %c0_i32 = arith.constant 0 : i32
    %c0_i32_0 = arith.constant 0 : i32
    return %c0_i32, %arg1 : i32, i32
  }
  func.func @transform_6(%arg0: i32, %arg1: i32, %arg2: i32) -> (i32, i32) {
    %c0_i32 = arith.constant 0 : i32
    return %arg0, %arg1 : i32, i32
  }
}

module attributes {stable_mosaic.version = 11 : i64} {
  func.func @kernel(%arg0: i32, %arg1: i32, %arg2: i32, %arg3: memref<32x384xbf16, #tpu.memory_space<vmem>>, %arg4: memref<384x128xbf16, #tpu.memory_space<vmem>>, %arg5: memref<1x128xf32, #tpu.memory_space<vmem>>, %arg6: memref<32x128xbf16, #tpu.memory_space<vmem>>, %arg7: memref<32x128xbf16, #tpu.memory_space<vmem>>, %arg8: memref<32x128xf32, #tpu.memory_space<vmem>>) attributes {dimension_semantics = [#tpu.dimension_semantics<parallel>, #tpu.dimension_semantics<parallel>, #tpu.dimension_semantics<arbitrary>], iteration_bounds = array<i64: 1, 1, 3>, scalar_prefetch = 0 : i64, scratch_operands = 1 : i64, tpu.core_type = #tpu.core_type<tc>, window_params = [{transform_indices = @transform_0, window_bounds = array<i64: 32, 384>}, {transform_indices = @transform_1, window_bounds = array<i64: 384, 128>}, {transform_indices = @transform_2, window_bounds = array<i64: 1, 128>}, {transform_indices = @transform_3, window_bounds = array<i64: 32, 128>}, {transform_indices = @transform_4, window_bounds = array<i64: 32, 128>}]} {
    %c0_i32 = arith.constant 0 : i32
    %0 = arith.cmpi eq, %arg2, %c0_i32 : i32
    %1 = arith.extui %0 : i1 to i32
    %c0_i32_0 = arith.constant 0 : i32
    %2 = arith.cmpi ne, %1, %c0_i32_0 : i32
    scf.if %2 {
      %cst_9 = arith.constant 0.000000e+00 : f32
      %12 = vector.broadcast %cst_9 : f32 to vector<32x128xf32>
      %c0_10 = arith.constant 0 : index
      %c0_11 = arith.constant 0 : index
      %13 = vector.load %arg8[%c0_10, %c0_11] : memref<32x128xf32, #tpu.memory_space<vmem>>, vector<32x128xf32>
      tpu.vector_store %arg8[%c0_10, %c0_11], %12 {strides = array<i32>} : memref<32x128xf32, #tpu.memory_space<vmem>>, vector<32x128xf32>,
    } else {
    }
    %c0 = arith.constant 0 : index
    %c0_1 = arith.constant 0 : index
    %3 = vector.load %arg8[%c0, %c0_1] : memref<32x128xf32, #tpu.memory_space<vmem>>, vector<32x128xf32>
    %c0_2 = arith.constant 0 : index
    %c0_3 = arith.constant 0 : index
    %4 = vector.load %arg3[%c0_2, %c0_3] : memref<32x384xbf16, #tpu.memory_space<vmem>>, vector<32x384xbf16>
    %c0_4 = arith.constant 0 : index
    %c0_5 = arith.constant 0 : index
    %5 = vector.load %arg4[%c0_4, %c0_5] : memref<384x128xbf16, #tpu.memory_space<vmem>>, vector<384x128xbf16>
    %cst = arith.constant dense<0.000000e+00> : vector<32x128xf32>
    %6 = tpu.matmul %4, %5, %cst {dimension_numbers = #tpu.dot_dimension_numbers<[1], [0], [0], [1], [0, 0, 1, 1], [], []>} : vector<32x384xbf16>, vector<384x128xbf16>, vector<32x128xf32> -> vector<32x128xf32>
    %7 = arith.addf %3, %6 : vector<32x128xf32>
    %c0_6 = arith.constant 0 : index
    %c0_7 = arith.constant 0 : index
    %8 = vector.load %arg8[%c0_6, %c0_7] : memref<32x128xf32, #tpu.memory_space<vmem>>, vector<32x128xf32>
    tpu.vector_store %arg8[%c0_6, %c0_7], %7 {strides = array<i32>} : memref<32x128xf32, #tpu.memory_space<vmem>>, vector<32x128xf32>,
    %c2_i32 = arith.constant 2 : i32
    %9 = arith.cmpi eq, %arg2, %c2_i32 : i32
    %10 = arith.extui %9 : i1 to i32
    %c0_i32_8 = arith.constant 0 : i32
    %11 = arith.cmpi ne, %10, %c0_i32_8 : i32
    scf.if %11 {
      %c0_9 = arith.constant 0 : index
      %c0_10 = arith.constant 0 : index
      %12 = vector.load %arg8[%c0_9, %c0_10] : memref<32x128xf32, #tpu.memory_space<vmem>>, vector<32x128xf32>
      %c0_11 = arith.constant 0 : index
      %c0_12 = arith.constant 0 : index
      %13 = vector.load %arg5[%c0_11, %c0_12] : memref<1x128xf32, #tpu.memory_space<vmem>>, vector<1x128xf32>
      %14 = vector.broadcast %13 : vector<1x128xf32> to vector<32x128xf32>
      %15 = arith.addf %12, %14 : vector<32x128xf32>
      %c0_13 = arith.constant 0 : index
      %c0_14 = arith.constant 0 : index
      %16 = vector.load %arg6[%c0_13, %c0_14] : memref<32x128xbf16, #tpu.memory_space<vmem>>, vector<32x128xbf16>
      %17 = arith.extf %16 : vector<32x128xbf16> to vector<32x128xf32>
      %18 = arith.addf %15, %17 : vector<32x128xf32>
      %cst_15 = arith.constant 0.000000e+00 : f32
      %19 = vector.broadcast %cst_15 : f32 to vector<32x128xf32>
      %20 = arith.maximumf %18, %19 : vector<32x128xf32>
      %21 = arith.truncf %20 : vector<32x128xf32> to vector<32x128xbf16>
      %c0_16 = arith.constant 0 : index
      %c0_17 = arith.constant 0 : index
      %22 = vector.load %arg7[%c0_16, %c0_17] : memref<32x128xbf16, #tpu.memory_space<vmem>>, vector<32x128xbf16>
      tpu.vector_store %arg7[%c0_16, %c0_17], %21 {strides = array<i32>} : memref<32x128xbf16, #tpu.memory_space<vmem>>, vector<32x128xbf16>,
    } else {
    }
    return
  }
  func.func @transform_0(%arg0: i32, %arg1: i32, %arg2: i32) -> (i32, i32) {
    %c0_i32 = arith.constant 0 : i32
    return %arg0, %arg2 : i32, i32
  }
  func.func @transform_1(%arg0: i32, %arg1: i32, %arg2: i32) -> (i32, i32) {
    %c0_i32 = arith.constant 0 : i32
    return %arg2, %arg1 : i32, i32
  }
  func.func @transform_2(%arg0: i32, %arg1: i32, %arg2: i32) -> (i32, i32) {
    %c0_i32 = arith.constant 0 : i32
    %c0_i32_0 = arith.constant 0 : i32
    return %c0_i32, %arg1 : i32, i32
  }
  func.func @transform_3(%arg0: i32, %arg1: i32, %arg2: i32) -> (i32, i32) {
    %c0_i32 = arith.constant 0 : i32
    return %arg0, %arg1 : i32, i32
  }
  func.func @transform_4(%arg0: i32, %arg1: i32, %arg2: i32) -> (i32, i32) {
    %c0_i32 = arith.constant 0 : i32
    return %arg0, %arg1 : i32, i32
  }
}

module attributes {stable_mosaic.version = 11 : i64} {
  func.func @kernel(%arg0: i32, %arg1: i32, %arg2: i32, %arg3: memref<16x384xbf16, #tpu.memory_space<vmem>>, %arg4: memref<384x256xbf16, #tpu.memory_space<vmem>>, %arg5: memref<1x256xf32, #tpu.memory_space<vmem>>, %arg6: memref<16x256xbf16, #tpu.memory_space<vmem>>, %arg7: memref<16x256xf32, #tpu.memory_space<vmem>>) attributes {dimension_semantics = [#tpu.dimension_semantics<parallel>, #tpu.dimension_semantics<parallel>, #tpu.dimension_semantics<arbitrary>], iteration_bounds = array<i64: 1, 1, 3>, scalar_prefetch = 0 : i64, scratch_operands = 1 : i64, tpu.core_type = #tpu.core_type<tc>, window_params = [{transform_indices = @transform_0, window_bounds = array<i64: 16, 384>}, {transform_indices = @transform_1, window_bounds = array<i64: 384, 256>}, {transform_indices = @transform_2, window_bounds = array<i64: 1, 256>}, {transform_indices = @transform_3, window_bounds = array<i64: 16, 256>}]} {
    %c0_i32 = arith.constant 0 : i32
    %0 = arith.cmpi eq, %arg2, %c0_i32 : i32
    %1 = arith.extui %0 : i1 to i32
    %c0_i32_0 = arith.constant 0 : i32
    %2 = arith.cmpi ne, %1, %c0_i32_0 : i32
    scf.if %2 {
      %cst_9 = arith.constant 0.000000e+00 : f32
      %12 = vector.broadcast %cst_9 : f32 to vector<16x256xf32>
      %c0_10 = arith.constant 0 : index
      %c0_11 = arith.constant 0 : index
      %13 = vector.load %arg7[%c0_10, %c0_11] : memref<16x256xf32, #tpu.memory_space<vmem>>, vector<16x256xf32>
      tpu.vector_store %arg7[%c0_10, %c0_11], %12 {strides = array<i32>} : memref<16x256xf32, #tpu.memory_space<vmem>>, vector<16x256xf32>,
    } else {
    }
    %c0 = arith.constant 0 : index
    %c0_1 = arith.constant 0 : index
    %3 = vector.load %arg7[%c0, %c0_1] : memref<16x256xf32, #tpu.memory_space<vmem>>, vector<16x256xf32>
    %c0_2 = arith.constant 0 : index
    %c0_3 = arith.constant 0 : index
    %4 = vector.load %arg3[%c0_2, %c0_3] : memref<16x384xbf16, #tpu.memory_space<vmem>>, vector<16x384xbf16>
    %c0_4 = arith.constant 0 : index
    %c0_5 = arith.constant 0 : index
    %5 = vector.load %arg4[%c0_4, %c0_5] : memref<384x256xbf16, #tpu.memory_space<vmem>>, vector<384x256xbf16>
    %cst = arith.constant dense<0.000000e+00> : vector<16x256xf32>
    %6 = tpu.matmul %4, %5, %cst {dimension_numbers = #tpu.dot_dimension_numbers<[1], [0], [0], [1], [0, 0, 1, 1], [], []>} : vector<16x384xbf16>, vector<384x256xbf16>, vector<16x256xf32> -> vector<16x256xf32>
    %7 = arith.addf %3, %6 : vector<16x256xf32>
    %c0_6 = arith.constant 0 : index
    %c0_7 = arith.constant 0 : index
    %8 = vector.load %arg7[%c0_6, %c0_7] : memref<16x256xf32, #tpu.memory_space<vmem>>, vector<16x256xf32>
    tpu.vector_store %arg7[%c0_6, %c0_7], %7 {strides = array<i32>} : memref<16x256xf32, #tpu.memory_space<vmem>>, vector<16x256xf32>,
    %c2_i32 = arith.constant 2 : i32
    %9 = arith.cmpi eq, %arg2, %c2_i32 : i32
    %10 = arith.extui %9 : i1 to i32
    %c0_i32_8 = arith.constant 0 : i32
    %11 = arith.cmpi ne, %10, %c0_i32_8 : i32
    scf.if %11 {
      %c0_9 = arith.constant 0 : index
      %c0_10 = arith.constant 0 : index
      %12 = vector.load %arg7[%c0_9, %c0_10] : memref<16x256xf32, #tpu.memory_space<vmem>>, vector<16x256xf32>
      %c0_11 = arith.constant 0 : index
      %c0_12 = arith.constant 0 : index
      %13 = vector.load %arg5[%c0_11, %c0_12] : memref<1x256xf32, #tpu.memory_space<vmem>>, vector<1x256xf32>
      %14 = vector.broadcast %13 : vector<1x256xf32> to vector<16x256xf32>
      %15 = arith.addf %12, %14 : vector<16x256xf32>
      %cst_13 = arith.constant 0.000000e+00 : f32
      %16 = vector.broadcast %cst_13 : f32 to vector<16x256xf32>
      %17 = arith.maximumf %15, %16 : vector<16x256xf32>
      %18 = arith.truncf %17 : vector<16x256xf32> to vector<16x256xbf16>
      %c0_14 = arith.constant 0 : index
      %c0_15 = arith.constant 0 : index
      %19 = vector.load %arg6[%c0_14, %c0_15] : memref<16x256xbf16, #tpu.memory_space<vmem>>, vector<16x256xbf16>
      tpu.vector_store %arg6[%c0_14, %c0_15], %18 {strides = array<i32>} : memref<16x256xbf16, #tpu.memory_space<vmem>>, vector<16x256xbf16>,
    } else {
    }
    return
  }
  func.func @transform_0(%arg0: i32, %arg1: i32, %arg2: i32) -> (i32, i32) {
    %c0_i32 = arith.constant 0 : i32
    return %arg0, %arg2 : i32, i32
  }
  func.func @transform_1(%arg0: i32, %arg1: i32, %arg2: i32) -> (i32, i32) {
    %c0_i32 = arith.constant 0 : i32
    return %arg2, %arg1 : i32, i32
  }
  func.func @transform_2(%arg0: i32, %arg1: i32, %arg2: i32) -> (i32, i32) {
    %c0_i32 = arith.constant 0 : i32
    %c0_i32_0 = arith.constant 0 : i32
    return %c0_i32, %arg1 : i32, i32
  }
  func.func @transform_3(%arg0: i32, %arg1: i32, %arg2: i32) -> (i32, i32) {
    %c0_i32 = arith.constant 0 : i32
    return %arg0, %arg1 : i32, i32
  }
}

module attributes {stable_mosaic.version = 11 : i64} {
  func.func @kernel(%arg0: i32, %arg1: i32, %arg2: i32, %arg3: memref<16x384xbf16, #tpu.memory_space<vmem>>, %arg4: memref<384x256xbf16, #tpu.memory_space<vmem>>, %arg5: memref<1x256xf32, #tpu.memory_space<vmem>>, %arg6: memref<16x128xbf16, #tpu.memory_space<vmem>>, %arg7: memref<128x256xbf16, #tpu.memory_space<vmem>>, %arg8: memref<1x256xf32, #tpu.memory_space<vmem>>, %arg9: memref<16x256xbf16, #tpu.memory_space<vmem>>, %arg10: memref<16x256xf32, #tpu.memory_space<vmem>>) attributes {dimension_semantics = [#tpu.dimension_semantics<parallel>, #tpu.dimension_semantics<parallel>, #tpu.dimension_semantics<arbitrary>], iteration_bounds = array<i64: 1, 1, 6>, scalar_prefetch = 0 : i64, scratch_operands = 1 : i64, tpu.core_type = #tpu.core_type<tc>, window_params = [{transform_indices = @transform_0, window_bounds = array<i64: 16, 384>}, {transform_indices = @transform_1, window_bounds = array<i64: 384, 256>}, {transform_indices = @transform_2, window_bounds = array<i64: 1, 256>}, {transform_indices = @transform_3, window_bounds = array<i64: 16, 128>}, {transform_indices = @transform_4, window_bounds = array<i64: 128, 256>}, {transform_indices = @transform_5, window_bounds = array<i64: 1, 256>}, {transform_indices = @transform_6, window_bounds = array<i64: 16, 256>}]} {
    %c0_i32 = arith.constant 0 : i32
    %0 = arith.cmpi eq, %arg2, %c0_i32 : i32
    %1 = arith.extui %0 : i1 to i32
    %c0_i32_0 = arith.constant 0 : i32
    %2 = arith.cmpi ne, %1, %c0_i32_0 : i32
    scf.if %2 {
      %cst_9 = arith.constant 0.000000e+00 : f32
      %12 = vector.broadcast %cst_9 : f32 to vector<16x256xf32>
      %c0_10 = arith.constant 0 : index
      %c0_11 = arith.constant 0 : index
      %13 = vector.load %arg10[%c0_10, %c0_11] : memref<16x256xf32, #tpu.memory_space<vmem>>, vector<16x256xf32>
      tpu.vector_store %arg10[%c0_10, %c0_11], %12 {strides = array<i32>} : memref<16x256xf32, #tpu.memory_space<vmem>>, vector<16x256xf32>,
    } else {
    }
    %c0 = arith.constant 0 : index
    %c0_1 = arith.constant 0 : index
    %3 = vector.load %arg10[%c0, %c0_1] : memref<16x256xf32, #tpu.memory_space<vmem>>, vector<16x256xf32>
    %c0_2 = arith.constant 0 : index
    %c0_3 = arith.constant 0 : index
    %4 = vector.load %arg3[%c0_2, %c0_3] : memref<16x384xbf16, #tpu.memory_space<vmem>>, vector<16x384xbf16>
    %c0_4 = arith.constant 0 : index
    %c0_5 = arith.constant 0 : index
    %5 = vector.load %arg4[%c0_4, %c0_5] : memref<384x256xbf16, #tpu.memory_space<vmem>>, vector<384x256xbf16>
    %cst = arith.constant dense<0.000000e+00> : vector<16x256xf32>
    %6 = tpu.matmul %4, %5, %cst {dimension_numbers = #tpu.dot_dimension_numbers<[1], [0], [0], [1], [0, 0, 1, 1], [], []>} : vector<16x384xbf16>, vector<384x256xbf16>, vector<16x256xf32> -> vector<16x256xf32>
    %7 = arith.addf %3, %6 : vector<16x256xf32>
    %c0_6 = arith.constant 0 : index
    %c0_7 = arith.constant 0 : index
    %8 = vector.load %arg10[%c0_6, %c0_7] : memref<16x256xf32, #tpu.memory_space<vmem>>, vector<16x256xf32>
    tpu.vector_store %arg10[%c0_6, %c0_7], %7 {strides = array<i32>} : memref<16x256xf32, #tpu.memory_space<vmem>>, vector<16x256xf32>,
    %c5_i32 = arith.constant 5 : i32
    %9 = arith.cmpi eq, %arg2, %c5_i32 : i32
    %10 = arith.extui %9 : i1 to i32
    %c0_i32_8 = arith.constant 0 : i32
    %11 = arith.cmpi ne, %10, %c0_i32_8 : i32
    scf.if %11 {
      %c0_9 = arith.constant 0 : index
      %c0_10 = arith.constant 0 : index
      %12 = vector.load %arg10[%c0_9, %c0_10] : memref<16x256xf32, #tpu.memory_space<vmem>>, vector<16x256xf32>
      %c0_11 = arith.constant 0 : index
      %c0_12 = arith.constant 0 : index
      %13 = vector.load %arg5[%c0_11, %c0_12] : memref<1x256xf32, #tpu.memory_space<vmem>>, vector<1x256xf32>
      %14 = vector.broadcast %13 : vector<1x256xf32> to vector<16x256xf32>
      %15 = arith.addf %12, %14 : vector<16x256xf32>
      %c0_13 = arith.constant 0 : index
      %c0_14 = arith.constant 0 : index
      %16 = vector.load %arg6[%c0_13, %c0_14] : memref<16x128xbf16, #tpu.memory_space<vmem>>, vector<16x128xbf16>
      %c0_15 = arith.constant 0 : index
      %c0_16 = arith.constant 0 : index
      %17 = vector.load %arg7[%c0_15, %c0_16] : memref<128x256xbf16, #tpu.memory_space<vmem>>, vector<128x256xbf16>
      %cst_17 = arith.constant dense<0.000000e+00> : vector<16x256xf32>
      %18 = tpu.matmul %16, %17, %cst_17 {dimension_numbers = #tpu.dot_dimension_numbers<[1], [0], [0], [1], [0, 0, 1, 1], [], []>} : vector<16x128xbf16>, vector<128x256xbf16>, vector<16x256xf32> -> vector<16x256xf32>
      %19 = arith.addf %15, %18 : vector<16x256xf32>
      %c0_18 = arith.constant 0 : index
      %c0_19 = arith.constant 0 : index
      %20 = vector.load %arg8[%c0_18, %c0_19] : memref<1x256xf32, #tpu.memory_space<vmem>>, vector<1x256xf32>
      %21 = vector.broadcast %20 : vector<1x256xf32> to vector<16x256xf32>
      %22 = arith.addf %19, %21 : vector<16x256xf32>
      %cst_20 = arith.constant 0.000000e+00 : f32
      %23 = vector.broadcast %cst_20 : f32 to vector<16x256xf32>
      %24 = arith.maximumf %22, %23 : vector<16x256xf32>
      %25 = arith.truncf %24 : vector<16x256xf32> to vector<16x256xbf16>
      %c0_21 = arith.constant 0 : index
      %c0_22 = arith.constant 0 : index
      %26 = vector.load %arg9[%c0_21, %c0_22] : memref<16x256xbf16, #tpu.memory_space<vmem>>, vector<16x256xbf16>
      tpu.vector_store %arg9[%c0_21, %c0_22], %25 {strides = array<i32>} : memref<16x256xbf16, #tpu.memory_space<vmem>>, vector<16x256xbf16>,
    } else {
    }
    return
  }
  func.func @transform_0(%arg0: i32, %arg1: i32, %arg2: i32) -> (i32, i32) {
    %c0_i32 = arith.constant 0 : i32
    return %arg0, %arg2 : i32, i32
  }
  func.func @transform_1(%arg0: i32, %arg1: i32, %arg2: i32) -> (i32, i32) {
    %c0_i32 = arith.constant 0 : i32
    return %arg2, %arg1 : i32, i32
  }
  func.func @transform_2(%arg0: i32, %arg1: i32, %arg2: i32) -> (i32, i32) {
    %c0_i32 = arith.constant 0 : i32
    %c0_i32_0 = arith.constant 0 : i32
    return %c0_i32, %arg1 : i32, i32
  }
  func.func @transform_3(%arg0: i32, %arg1: i32, %arg2: i32) -> (i32, i32) {
    %c0_i32 = arith.constant 0 : i32
    %c0_i32_0 = arith.constant 0 : i32
    return %arg0, %c0_i32 : i32, i32
  }
  func.func @transform_4(%arg0: i32, %arg1: i32, %arg2: i32) -> (i32, i32) {
    %c0_i32 = arith.constant 0 : i32
    %c0_i32_0 = arith.constant 0 : i32
    return %c0_i32, %arg1 : i32, i32
  }
  func.func @transform_5(%arg0: i32, %arg1: i32, %arg2: i32) -> (i32, i32) {
    %c0_i32 = arith.constant 0 : i32
    %c0_i32_0 = arith.constant 0 : i32
    return %c0_i32, %arg1 : i32, i32
  }
  func.func @transform_6(%arg0: i32, %arg1: i32, %arg2: i32) -> (i32, i32) {
    %c0_i32 = arith.constant 0 : i32
    return %arg0, %arg1 : i32, i32
  }
}

module attributes {stable_mosaic.version = 11 : i64} {
  func.func @kernel(%arg0: i32, %arg1: i32, %arg2: i32, %arg3: memref<16x384xbf16, #tpu.memory_space<vmem>>, %arg4: memref<384x256xbf16, #tpu.memory_space<vmem>>, %arg5: memref<1x256xf32, #tpu.memory_space<vmem>>, %arg6: memref<16x256xbf16, #tpu.memory_space<vmem>>, %arg7: memref<16x256xf32, #tpu.memory_space<vmem>>) attributes {dimension_semantics = [#tpu.dimension_semantics<parallel>, #tpu.dimension_semantics<parallel>, #tpu.dimension_semantics<arbitrary>], iteration_bounds = array<i64: 1, 1, 6>, scalar_prefetch = 0 : i64, scratch_operands = 1 : i64, tpu.core_type = #tpu.core_type<tc>, window_params = [{transform_indices = @transform_0, window_bounds = array<i64: 16, 384>}, {transform_indices = @transform_1, window_bounds = array<i64: 384, 256>}, {transform_indices = @transform_2, window_bounds = array<i64: 1, 256>}, {transform_indices = @transform_3, window_bounds = array<i64: 16, 256>}]} {
    %c0_i32 = arith.constant 0 : i32
    %0 = arith.cmpi eq, %arg2, %c0_i32 : i32
    %1 = arith.extui %0 : i1 to i32
    %c0_i32_0 = arith.constant 0 : i32
    %2 = arith.cmpi ne, %1, %c0_i32_0 : i32
    scf.if %2 {
      %cst_9 = arith.constant 0.000000e+00 : f32
      %12 = vector.broadcast %cst_9 : f32 to vector<16x256xf32>
      %c0_10 = arith.constant 0 : index
      %c0_11 = arith.constant 0 : index
      %13 = vector.load %arg7[%c0_10, %c0_11] : memref<16x256xf32, #tpu.memory_space<vmem>>, vector<16x256xf32>
      tpu.vector_store %arg7[%c0_10, %c0_11], %12 {strides = array<i32>} : memref<16x256xf32, #tpu.memory_space<vmem>>, vector<16x256xf32>,
    } else {
    }
    %c0 = arith.constant 0 : index
    %c0_1 = arith.constant 0 : index
    %3 = vector.load %arg7[%c0, %c0_1] : memref<16x256xf32, #tpu.memory_space<vmem>>, vector<16x256xf32>
    %c0_2 = arith.constant 0 : index
    %c0_3 = arith.constant 0 : index
    %4 = vector.load %arg3[%c0_2, %c0_3] : memref<16x384xbf16, #tpu.memory_space<vmem>>, vector<16x384xbf16>
    %c0_4 = arith.constant 0 : index
    %c0_5 = arith.constant 0 : index
    %5 = vector.load %arg4[%c0_4, %c0_5] : memref<384x256xbf16, #tpu.memory_space<vmem>>, vector<384x256xbf16>
    %cst = arith.constant dense<0.000000e+00> : vector<16x256xf32>
    %6 = tpu.matmul %4, %5, %cst {dimension_numbers = #tpu.dot_dimension_numbers<[1], [0], [0], [1], [0, 0, 1, 1], [], []>} : vector<16x384xbf16>, vector<384x256xbf16>, vector<16x256xf32> -> vector<16x256xf32>
    %7 = arith.addf %3, %6 : vector<16x256xf32>
    %c0_6 = arith.constant 0 : index
    %c0_7 = arith.constant 0 : index
    %8 = vector.load %arg7[%c0_6, %c0_7] : memref<16x256xf32, #tpu.memory_space<vmem>>, vector<16x256xf32>
    tpu.vector_store %arg7[%c0_6, %c0_7], %7 {strides = array<i32>} : memref<16x256xf32, #tpu.memory_space<vmem>>, vector<16x256xf32>,
    %c5_i32 = arith.constant 5 : i32
    %9 = arith.cmpi eq, %arg2, %c5_i32 : i32
    %10 = arith.extui %9 : i1 to i32
    %c0_i32_8 = arith.constant 0 : i32
    %11 = arith.cmpi ne, %10, %c0_i32_8 : i32
    scf.if %11 {
      %c0_9 = arith.constant 0 : index
      %c0_10 = arith.constant 0 : index
      %12 = vector.load %arg7[%c0_9, %c0_10] : memref<16x256xf32, #tpu.memory_space<vmem>>, vector<16x256xf32>
      %c0_11 = arith.constant 0 : index
      %c0_12 = arith.constant 0 : index
      %13 = vector.load %arg5[%c0_11, %c0_12] : memref<1x256xf32, #tpu.memory_space<vmem>>, vector<1x256xf32>
      %14 = vector.broadcast %13 : vector<1x256xf32> to vector<16x256xf32>
      %15 = arith.addf %12, %14 : vector<16x256xf32>
      %cst_13 = arith.constant 0.000000e+00 : f32
      %16 = vector.broadcast %cst_13 : f32 to vector<16x256xf32>
      %17 = arith.maximumf %15, %16 : vector<16x256xf32>
      %18 = arith.truncf %17 : vector<16x256xf32> to vector<16x256xbf16>
      %c0_14 = arith.constant 0 : index
      %c0_15 = arith.constant 0 : index
      %19 = vector.load %arg6[%c0_14, %c0_15] : memref<16x256xbf16, #tpu.memory_space<vmem>>, vector<16x256xbf16>
      tpu.vector_store %arg6[%c0_14, %c0_15], %18 {strides = array<i32>} : memref<16x256xbf16, #tpu.memory_space<vmem>>, vector<16x256xbf16>,
    } else {
    }
    return
  }
  func.func @transform_0(%arg0: i32, %arg1: i32, %arg2: i32) -> (i32, i32) {
    %c0_i32 = arith.constant 0 : i32
    return %arg0, %arg2 : i32, i32
  }
  func.func @transform_1(%arg0: i32, %arg1: i32, %arg2: i32) -> (i32, i32) {
    %c0_i32 = arith.constant 0 : i32
    return %arg2, %arg1 : i32, i32
  }
  func.func @transform_2(%arg0: i32, %arg1: i32, %arg2: i32) -> (i32, i32) {
    %c0_i32 = arith.constant 0 : i32
    %c0_i32_0 = arith.constant 0 : i32
    return %c0_i32, %arg1 : i32, i32
  }
  func.func @transform_3(%arg0: i32, %arg1: i32, %arg2: i32) -> (i32, i32) {
    %c0_i32 = arith.constant 0 : i32
    return %arg0, %arg1 : i32, i32
  }
}

module attributes {stable_mosaic.version = 11 : i64} {
  func.func @kernel(%arg0: i32, %arg1: i32, %arg2: i32, %arg3: memref<16x384xbf16, #tpu.memory_space<vmem>>, %arg4: memref<384x256xbf16, #tpu.memory_space<vmem>>, %arg5: memref<1x256xf32, #tpu.memory_space<vmem>>, %arg6: memref<16x256xbf16, #tpu.memory_space<vmem>>, %arg7: memref<16x256xbf16, #tpu.memory_space<vmem>>, %arg8: memref<16x256xf32, #tpu.memory_space<vmem>>) attributes {dimension_semantics = [#tpu.dimension_semantics<parallel>, #tpu.dimension_semantics<parallel>, #tpu.dimension_semantics<arbitrary>], iteration_bounds = array<i64: 1, 1, 6>, scalar_prefetch = 0 : i64, scratch_operands = 1 : i64, tpu.core_type = #tpu.core_type<tc>, window_params = [{transform_indices = @transform_0, window_bounds = array<i64: 16, 384>}, {transform_indices = @transform_1, window_bounds = array<i64: 384, 256>}, {transform_indices = @transform_2, window_bounds = array<i64: 1, 256>}, {transform_indices = @transform_3, window_bounds = array<i64: 16, 256>}, {transform_indices = @transform_4, window_bounds = array<i64: 16, 256>}]} {
    %c0_i32 = arith.constant 0 : i32
    %0 = arith.cmpi eq, %arg2, %c0_i32 : i32
    %1 = arith.extui %0 : i1 to i32
    %c0_i32_0 = arith.constant 0 : i32
    %2 = arith.cmpi ne, %1, %c0_i32_0 : i32
    scf.if %2 {
      %cst_9 = arith.constant 0.000000e+00 : f32
      %12 = vector.broadcast %cst_9 : f32 to vector<16x256xf32>
      %c0_10 = arith.constant 0 : index
      %c0_11 = arith.constant 0 : index
      %13 = vector.load %arg8[%c0_10, %c0_11] : memref<16x256xf32, #tpu.memory_space<vmem>>, vector<16x256xf32>
      tpu.vector_store %arg8[%c0_10, %c0_11], %12 {strides = array<i32>} : memref<16x256xf32, #tpu.memory_space<vmem>>, vector<16x256xf32>,
    } else {
    }
    %c0 = arith.constant 0 : index
    %c0_1 = arith.constant 0 : index
    %3 = vector.load %arg8[%c0, %c0_1] : memref<16x256xf32, #tpu.memory_space<vmem>>, vector<16x256xf32>
    %c0_2 = arith.constant 0 : index
    %c0_3 = arith.constant 0 : index
    %4 = vector.load %arg3[%c0_2, %c0_3] : memref<16x384xbf16, #tpu.memory_space<vmem>>, vector<16x384xbf16>
    %c0_4 = arith.constant 0 : index
    %c0_5 = arith.constant 0 : index
    %5 = vector.load %arg4[%c0_4, %c0_5] : memref<384x256xbf16, #tpu.memory_space<vmem>>, vector<384x256xbf16>
    %cst = arith.constant dense<0.000000e+00> : vector<16x256xf32>
    %6 = tpu.matmul %4, %5, %cst {dimension_numbers = #tpu.dot_dimension_numbers<[1], [0], [0], [1], [0, 0, 1, 1], [], []>} : vector<16x384xbf16>, vector<384x256xbf16>, vector<16x256xf32> -> vector<16x256xf32>
    %7 = arith.addf %3, %6 : vector<16x256xf32>
    %c0_6 = arith.constant 0 : index
    %c0_7 = arith.constant 0 : index
    %8 = vector.load %arg8[%c0_6, %c0_7] : memref<16x256xf32, #tpu.memory_space<vmem>>, vector<16x256xf32>
    tpu.vector_store %arg8[%c0_6, %c0_7], %7 {strides = array<i32>} : memref<16x256xf32, #tpu.memory_space<vmem>>, vector<16x256xf32>,
    %c5_i32 = arith.constant 5 : i32
    %9 = arith.cmpi eq, %arg2, %c5_i32 : i32
    %10 = arith.extui %9 : i1 to i32
    %c0_i32_8 = arith.constant 0 : i32
    %11 = arith.cmpi ne, %10, %c0_i32_8 : i32
    scf.if %11 {
      %c0_9 = arith.constant 0 : index
      %c0_10 = arith.constant 0 : index
      %12 = vector.load %arg8[%c0_9, %c0_10] : memref<16x256xf32, #tpu.memory_space<vmem>>, vector<16x256xf32>
      %c0_11 = arith.constant 0 : index
      %c0_12 = arith.constant 0 : index
      %13 = vector.load %arg5[%c0_11, %c0_12] : memref<1x256xf32, #tpu.memory_space<vmem>>, vector<1x256xf32>
      %14 = vector.broadcast %13 : vector<1x256xf32> to vector<16x256xf32>
      %15 = arith.addf %12, %14 : vector<16x256xf32>
      %c0_13 = arith.constant 0 : index
      %c0_14 = arith.constant 0 : index
      %16 = vector.load %arg6[%c0_13, %c0_14] : memref<16x256xbf16, #tpu.memory_space<vmem>>, vector<16x256xbf16>
      %17 = arith.extf %16 : vector<16x256xbf16> to vector<16x256xf32>
      %18 = arith.addf %15, %17 : vector<16x256xf32>
      %cst_15 = arith.constant 0.000000e+00 : f32
      %19 = vector.broadcast %cst_15 : f32 to vector<16x256xf32>
      %20 = arith.maximumf %18, %19 : vector<16x256xf32>
      %21 = arith.truncf %20 : vector<16x256xf32> to vector<16x256xbf16>
      %c0_16 = arith.constant 0 : index
      %c0_17 = arith.constant 0 : index
      %22 = vector.load %arg7[%c0_16, %c0_17] : memref<16x256xbf16, #tpu.memory_space<vmem>>, vector<16x256xbf16>
      tpu.vector_store %arg7[%c0_16, %c0_17], %21 {strides = array<i32>} : memref<16x256xbf16, #tpu.memory_space<vmem>>, vector<16x256xbf16>,
    } else {
    }
    return
  }
  func.func @transform_0(%arg0: i32, %arg1: i32, %arg2: i32) -> (i32, i32) {
    %c0_i32 = arith.constant 0 : i32
    return %arg0, %arg2 : i32, i32
  }
  func.func @transform_1(%arg0: i32, %arg1: i32, %arg2: i32) -> (i32, i32) {
    %c0_i32 = arith.constant 0 : i32
    return %arg2, %arg1 : i32, i32
  }
  func.func @transform_2(%arg0: i32, %arg1: i32, %arg2: i32) -> (i32, i32) {
    %c0_i32 = arith.constant 0 : i32
    %c0_i32_0 = arith.constant 0 : i32
    return %c0_i32, %arg1 : i32, i32
  }
  func.func @transform_3(%arg0: i32, %arg1: i32, %arg2: i32) -> (i32, i32) {
    %c0_i32 = arith.constant 0 : i32
    return %arg0, %arg1 : i32, i32
  }
  func.func @transform_4(%arg0: i32, %arg1: i32, %arg2: i32) -> (i32, i32) {
    %c0_i32 = arith.constant 0 : i32
    return %arg0, %arg1 : i32, i32
  }
}

module attributes {stable_mosaic.version = 11 : i64} {
  func.func @kernel(%arg0: i32, %arg1: i32, %arg2: i32, %arg3: memref<16x384xbf16, #tpu.memory_space<vmem>>, %arg4: memref<384x256xbf16, #tpu.memory_space<vmem>>, %arg5: memref<1x256xf32, #tpu.memory_space<vmem>>, %arg6: memref<16x256xbf16, #tpu.memory_space<vmem>>, %arg7: memref<16x256xf32, #tpu.memory_space<vmem>>) attributes {dimension_semantics = [#tpu.dimension_semantics<parallel>, #tpu.dimension_semantics<parallel>, #tpu.dimension_semantics<arbitrary>], iteration_bounds = array<i64: 1, 2, 6>, scalar_prefetch = 0 : i64, scratch_operands = 1 : i64, tpu.core_type = #tpu.core_type<tc>, window_params = [{transform_indices = @transform_0, window_bounds = array<i64: 16, 384>}, {transform_indices = @transform_1, window_bounds = array<i64: 384, 256>}, {transform_indices = @transform_2, window_bounds = array<i64: 1, 256>}, {transform_indices = @transform_3, window_bounds = array<i64: 16, 256>}]} {
    %c0_i32 = arith.constant 0 : i32
    %0 = arith.cmpi eq, %arg2, %c0_i32 : i32
    %1 = arith.extui %0 : i1 to i32
    %c0_i32_0 = arith.constant 0 : i32
    %2 = arith.cmpi ne, %1, %c0_i32_0 : i32
    scf.if %2 {
      %cst_9 = arith.constant 0.000000e+00 : f32
      %12 = vector.broadcast %cst_9 : f32 to vector<16x256xf32>
      %c0_10 = arith.constant 0 : index
      %c0_11 = arith.constant 0 : index
      %13 = vector.load %arg7[%c0_10, %c0_11] : memref<16x256xf32, #tpu.memory_space<vmem>>, vector<16x256xf32>
      tpu.vector_store %arg7[%c0_10, %c0_11], %12 {strides = array<i32>} : memref<16x256xf32, #tpu.memory_space<vmem>>, vector<16x256xf32>,
    } else {
    }
    %c0 = arith.constant 0 : index
    %c0_1 = arith.constant 0 : index
    %3 = vector.load %arg7[%c0, %c0_1] : memref<16x256xf32, #tpu.memory_space<vmem>>, vector<16x256xf32>
    %c0_2 = arith.constant 0 : index
    %c0_3 = arith.constant 0 : index
    %4 = vector.load %arg3[%c0_2, %c0_3] : memref<16x384xbf16, #tpu.memory_space<vmem>>, vector<16x384xbf16>
    %c0_4 = arith.constant 0 : index
    %c0_5 = arith.constant 0 : index
    %5 = vector.load %arg4[%c0_4, %c0_5] : memref<384x256xbf16, #tpu.memory_space<vmem>>, vector<384x256xbf16>
    %cst = arith.constant dense<0.000000e+00> : vector<16x256xf32>
    %6 = tpu.matmul %4, %5, %cst {dimension_numbers = #tpu.dot_dimension_numbers<[1], [0], [0], [1], [0, 0, 1, 1], [], []>} : vector<16x384xbf16>, vector<384x256xbf16>, vector<16x256xf32> -> vector<16x256xf32>
    %7 = arith.addf %3, %6 : vector<16x256xf32>
    %c0_6 = arith.constant 0 : index
    %c0_7 = arith.constant 0 : index
    %8 = vector.load %arg7[%c0_6, %c0_7] : memref<16x256xf32, #tpu.memory_space<vmem>>, vector<16x256xf32>
    tpu.vector_store %arg7[%c0_6, %c0_7], %7 {strides = array<i32>} : memref<16x256xf32, #tpu.memory_space<vmem>>, vector<16x256xf32>,
    %c5_i32 = arith.constant 5 : i32
    %9 = arith.cmpi eq, %arg2, %c5_i32 : i32
    %10 = arith.extui %9 : i1 to i32
    %c0_i32_8 = arith.constant 0 : i32
    %11 = arith.cmpi ne, %10, %c0_i32_8 : i32
    scf.if %11 {
      %c0_9 = arith.constant 0 : index
      %c0_10 = arith.constant 0 : index
      %12 = vector.load %arg7[%c0_9, %c0_10] : memref<16x256xf32, #tpu.memory_space<vmem>>, vector<16x256xf32>
      %c0_11 = arith.constant 0 : index
      %c0_12 = arith.constant 0 : index
      %13 = vector.load %arg5[%c0_11, %c0_12] : memref<1x256xf32, #tpu.memory_space<vmem>>, vector<1x256xf32>
      %14 = vector.broadcast %13 : vector<1x256xf32> to vector<16x256xf32>
      %15 = arith.addf %12, %14 : vector<16x256xf32>
      %cst_13 = arith.constant 0.000000e+00 : f32
      %16 = vector.broadcast %cst_13 : f32 to vector<16x256xf32>
      %17 = arith.maximumf %15, %16 : vector<16x256xf32>
      %18 = arith.truncf %17 : vector<16x256xf32> to vector<16x256xbf16>
      %c0_14 = arith.constant 0 : index
      %c0_15 = arith.constant 0 : index
      %19 = vector.load %arg6[%c0_14, %c0_15] : memref<16x256xbf16, #tpu.memory_space<vmem>>, vector<16x256xbf16>
      tpu.vector_store %arg6[%c0_14, %c0_15], %18 {strides = array<i32>} : memref<16x256xbf16, #tpu.memory_space<vmem>>, vector<16x256xbf16>,
    } else {
    }
    return
  }
  func.func @transform_0(%arg0: i32, %arg1: i32, %arg2: i32) -> (i32, i32) {
    %c0_i32 = arith.constant 0 : i32
    return %arg0, %arg2 : i32, i32
  }
  func.func @transform_1(%arg0: i32, %arg1: i32, %arg2: i32) -> (i32, i32) {
    %c0_i32 = arith.constant 0 : i32
    return %arg2, %arg1 : i32, i32
  }
  func.func @transform_2(%arg0: i32, %arg1: i32, %arg2: i32) -> (i32, i32) {
    %c0_i32 = arith.constant 0 : i32
    %c0_i32_0 = arith.constant 0 : i32
    return %c0_i32, %arg1 : i32, i32
  }
  func.func @transform_3(%arg0: i32, %arg1: i32, %arg2: i32) -> (i32, i32) {
    %c0_i32 = arith.constant 0 : i32
    return %arg0, %arg1 : i32, i32
  }
}

module attributes {stable_mosaic.version = 11 : i64} {
  func.func @kernel(%arg0: i32, %arg1: i32, %arg2: i32, %arg3: memref<16x512xbf16, #tpu.memory_space<vmem>>, %arg4: memref<512x256xbf16, #tpu.memory_space<vmem>>, %arg5: memref<1x256xf32, #tpu.memory_space<vmem>>, %arg6: memref<16x256xbf16, #tpu.memory_space<vmem>>, %arg7: memref<16x256xf32, #tpu.memory_space<vmem>>) attributes {dimension_semantics = [#tpu.dimension_semantics<parallel>, #tpu.dimension_semantics<parallel>, #tpu.dimension_semantics<arbitrary>], iteration_bounds = array<i64: 1, 2, 9>, scalar_prefetch = 0 : i64, scratch_operands = 1 : i64, tpu.core_type = #tpu.core_type<tc>, window_params = [{transform_indices = @transform_0, window_bounds = array<i64: 16, 512>}, {transform_indices = @transform_1, window_bounds = array<i64: 512, 256>}, {transform_indices = @transform_2, window_bounds = array<i64: 1, 256>}, {transform_indices = @transform_3, window_bounds = array<i64: 16, 256>}]} {
    %c0_i32 = arith.constant 0 : i32
    %0 = arith.cmpi eq, %arg2, %c0_i32 : i32
    %1 = arith.extui %0 : i1 to i32
    %c0_i32_0 = arith.constant 0 : i32
    %2 = arith.cmpi ne, %1, %c0_i32_0 : i32
    scf.if %2 {
      %cst_9 = arith.constant 0.000000e+00 : f32
      %12 = vector.broadcast %cst_9 : f32 to vector<16x256xf32>
      %c0_10 = arith.constant 0 : index
      %c0_11 = arith.constant 0 : index
      %13 = vector.load %arg7[%c0_10, %c0_11] : memref<16x256xf32, #tpu.memory_space<vmem>>, vector<16x256xf32>
      tpu.vector_store %arg7[%c0_10, %c0_11], %12 {strides = array<i32>} : memref<16x256xf32, #tpu.memory_space<vmem>>, vector<16x256xf32>,
    } else {
    }
    %c0 = arith.constant 0 : index
    %c0_1 = arith.constant 0 : index
    %3 = vector.load %arg7[%c0, %c0_1] : memref<16x256xf32, #tpu.memory_space<vmem>>, vector<16x256xf32>
    %c0_2 = arith.constant 0 : index
    %c0_3 = arith.constant 0 : index
    %4 = vector.load %arg3[%c0_2, %c0_3] : memref<16x512xbf16, #tpu.memory_space<vmem>>, vector<16x512xbf16>
    %c0_4 = arith.constant 0 : index
    %c0_5 = arith.constant 0 : index
    %5 = vector.load %arg4[%c0_4, %c0_5] : memref<512x256xbf16, #tpu.memory_space<vmem>>, vector<512x256xbf16>
    %cst = arith.constant dense<0.000000e+00> : vector<16x256xf32>
    %6 = tpu.matmul %4, %5, %cst {dimension_numbers = #tpu.dot_dimension_numbers<[1], [0], [0], [1], [0, 0, 1, 1], [], []>} : vector<16x512xbf16>, vector<512x256xbf16>, vector<16x256xf32> -> vector<16x256xf32>
    %7 = arith.addf %3, %6 : vector<16x256xf32>
    %c0_6 = arith.constant 0 : index
    %c0_7 = arith.constant 0 : index
    %8 = vector.load %arg7[%c0_6, %c0_7] : memref<16x256xf32, #tpu.memory_space<vmem>>, vector<16x256xf32>
    tpu.vector_store %arg7[%c0_6, %c0_7], %7 {strides = array<i32>} : memref<16x256xf32, #tpu.memory_space<vmem>>, vector<16x256xf32>,
    %c8_i32 = arith.constant 8 : i32
    %9 = arith.cmpi eq, %arg2, %c8_i32 : i32
    %10 = arith.extui %9 : i1 to i32
    %c0_i32_8 = arith.constant 0 : i32
    %11 = arith.cmpi ne, %10, %c0_i32_8 : i32
    scf.if %11 {
      %c0_9 = arith.constant 0 : index
      %c0_10 = arith.constant 0 : index
      %12 = vector.load %arg7[%c0_9, %c0_10] : memref<16x256xf32, #tpu.memory_space<vmem>>, vector<16x256xf32>
      %c0_11 = arith.constant 0 : index
      %c0_12 = arith.constant 0 : index
      %13 = vector.load %arg5[%c0_11, %c0_12] : memref<1x256xf32, #tpu.memory_space<vmem>>, vector<1x256xf32>
      %14 = vector.broadcast %13 : vector<1x256xf32> to vector<16x256xf32>
      %15 = arith.addf %12, %14 : vector<16x256xf32>
      %cst_13 = arith.constant 0.000000e+00 : f32
      %16 = vector.broadcast %cst_13 : f32 to vector<16x256xf32>
      %17 = arith.maximumf %15, %16 : vector<16x256xf32>
      %18 = arith.truncf %17 : vector<16x256xf32> to vector<16x256xbf16>
      %c0_14 = arith.constant 0 : index
      %c0_15 = arith.constant 0 : index
      %19 = vector.load %arg6[%c0_14, %c0_15] : memref<16x256xbf16, #tpu.memory_space<vmem>>, vector<16x256xbf16>
      tpu.vector_store %arg6[%c0_14, %c0_15], %18 {strides = array<i32>} : memref<16x256xbf16, #tpu.memory_space<vmem>>, vector<16x256xbf16>,
    } else {
    }
    return
  }
  func.func @transform_0(%arg0: i32, %arg1: i32, %arg2: i32) -> (i32, i32) {
    %c0_i32 = arith.constant 0 : i32
    return %arg0, %arg2 : i32, i32
  }
  func.func @transform_1(%arg0: i32, %arg1: i32, %arg2: i32) -> (i32, i32) {
    %c0_i32 = arith.constant 0 : i32
    return %arg2, %arg1 : i32, i32
  }
  func.func @transform_2(%arg0: i32, %arg1: i32, %arg2: i32) -> (i32, i32) {
    %c0_i32 = arith.constant 0 : i32
    %c0_i32_0 = arith.constant 0 : i32
    return %c0_i32, %arg1 : i32, i32
  }
  func.func @transform_3(%arg0: i32, %arg1: i32, %arg2: i32) -> (i32, i32) {
    %c0_i32 = arith.constant 0 : i32
    return %arg0, %arg1 : i32, i32
  }
}

module attributes {stable_mosaic.version = 11 : i64} {
  func.func @kernel(%arg0: i32, %arg1: i32, %arg2: i32, %arg3: memref<16x512xbf16, #tpu.memory_space<vmem>>, %arg4: memref<512x256xbf16, #tpu.memory_space<vmem>>, %arg5: memref<1x256xf32, #tpu.memory_space<vmem>>, %arg6: memref<16x256xbf16, #tpu.memory_space<vmem>>, %arg7: memref<256x256xbf16, #tpu.memory_space<vmem>>, %arg8: memref<1x256xf32, #tpu.memory_space<vmem>>, %arg9: memref<16x256xbf16, #tpu.memory_space<vmem>>, %arg10: memref<16x256xf32, #tpu.memory_space<vmem>>) attributes {dimension_semantics = [#tpu.dimension_semantics<parallel>, #tpu.dimension_semantics<parallel>, #tpu.dimension_semantics<arbitrary>], iteration_bounds = array<i64: 1, 2, 9>, scalar_prefetch = 0 : i64, scratch_operands = 1 : i64, tpu.core_type = #tpu.core_type<tc>, window_params = [{transform_indices = @transform_0, window_bounds = array<i64: 16, 512>}, {transform_indices = @transform_1, window_bounds = array<i64: 512, 256>}, {transform_indices = @transform_2, window_bounds = array<i64: 1, 256>}, {transform_indices = @transform_3, window_bounds = array<i64: 16, 256>}, {transform_indices = @transform_4, window_bounds = array<i64: 256, 256>}, {transform_indices = @transform_5, window_bounds = array<i64: 1, 256>}, {transform_indices = @transform_6, window_bounds = array<i64: 16, 256>}]} {
    %c0_i32 = arith.constant 0 : i32
    %0 = arith.cmpi eq, %arg2, %c0_i32 : i32
    %1 = arith.extui %0 : i1 to i32
    %c0_i32_0 = arith.constant 0 : i32
    %2 = arith.cmpi ne, %1, %c0_i32_0 : i32
    scf.if %2 {
      %cst_9 = arith.constant 0.000000e+00 : f32
      %12 = vector.broadcast %cst_9 : f32 to vector<16x256xf32>
      %c0_10 = arith.constant 0 : index
      %c0_11 = arith.constant 0 : index
      %13 = vector.load %arg10[%c0_10, %c0_11] : memref<16x256xf32, #tpu.memory_space<vmem>>, vector<16x256xf32>
      tpu.vector_store %arg10[%c0_10, %c0_11], %12 {strides = array<i32>} : memref<16x256xf32, #tpu.memory_space<vmem>>, vector<16x256xf32>,
    } else {
    }
    %c0 = arith.constant 0 : index
    %c0_1 = arith.constant 0 : index
    %3 = vector.load %arg10[%c0, %c0_1] : memref<16x256xf32, #tpu.memory_space<vmem>>, vector<16x256xf32>
    %c0_2 = arith.constant 0 : index
    %c0_3 = arith.constant 0 : index
    %4 = vector.load %arg3[%c0_2, %c0_3] : memref<16x512xbf16, #tpu.memory_space<vmem>>, vector<16x512xbf16>
    %c0_4 = arith.constant 0 : index
    %c0_5 = arith.constant 0 : index
    %5 = vector.load %arg4[%c0_4, %c0_5] : memref<512x256xbf16, #tpu.memory_space<vmem>>, vector<512x256xbf16>
    %cst = arith.constant dense<0.000000e+00> : vector<16x256xf32>
    %6 = tpu.matmul %4, %5, %cst {dimension_numbers = #tpu.dot_dimension_numbers<[1], [0], [0], [1], [0, 0, 1, 1], [], []>} : vector<16x512xbf16>, vector<512x256xbf16>, vector<16x256xf32> -> vector<16x256xf32>
    %7 = arith.addf %3, %6 : vector<16x256xf32>
    %c0_6 = arith.constant 0 : index
    %c0_7 = arith.constant 0 : index
    %8 = vector.load %arg10[%c0_6, %c0_7] : memref<16x256xf32, #tpu.memory_space<vmem>>, vector<16x256xf32>
    tpu.vector_store %arg10[%c0_6, %c0_7], %7 {strides = array<i32>} : memref<16x256xf32, #tpu.memory_space<vmem>>, vector<16x256xf32>,
    %c8_i32 = arith.constant 8 : i32
    %9 = arith.cmpi eq, %arg2, %c8_i32 : i32
    %10 = arith.extui %9 : i1 to i32
    %c0_i32_8 = arith.constant 0 : i32
    %11 = arith.cmpi ne, %10, %c0_i32_8 : i32
    scf.if %11 {
      %c0_9 = arith.constant 0 : index
      %c0_10 = arith.constant 0 : index
      %12 = vector.load %arg10[%c0_9, %c0_10] : memref<16x256xf32, #tpu.memory_space<vmem>>, vector<16x256xf32>
      %c0_11 = arith.constant 0 : index
      %c0_12 = arith.constant 0 : index
      %13 = vector.load %arg5[%c0_11, %c0_12] : memref<1x256xf32, #tpu.memory_space<vmem>>, vector<1x256xf32>
      %14 = vector.broadcast %13 : vector<1x256xf32> to vector<16x256xf32>
      %15 = arith.addf %12, %14 : vector<16x256xf32>
      %c0_13 = arith.constant 0 : index
      %c0_14 = arith.constant 0 : index
      %16 = vector.load %arg6[%c0_13, %c0_14] : memref<16x256xbf16, #tpu.memory_space<vmem>>, vector<16x256xbf16>
      %c0_15 = arith.constant 0 : index
      %c0_16 = arith.constant 0 : index
      %17 = vector.load %arg7[%c0_15, %c0_16] : memref<256x256xbf16, #tpu.memory_space<vmem>>, vector<256x256xbf16>
      %cst_17 = arith.constant dense<0.000000e+00> : vector<16x256xf32>
      %18 = tpu.matmul %16, %17, %cst_17 {dimension_numbers = #tpu.dot_dimension_numbers<[1], [0], [0], [1], [0, 0, 1, 1], [], []>} : vector<16x256xbf16>, vector<256x256xbf16>, vector<16x256xf32> -> vector<16x256xf32>
      %19 = arith.addf %15, %18 : vector<16x256xf32>
      %c0_18 = arith.constant 0 : index
      %c0_19 = arith.constant 0 : index
      %20 = vector.load %arg8[%c0_18, %c0_19] : memref<1x256xf32, #tpu.memory_space<vmem>>, vector<1x256xf32>
      %21 = vector.broadcast %20 : vector<1x256xf32> to vector<16x256xf32>
      %22 = arith.addf %19, %21 : vector<16x256xf32>
      %cst_20 = arith.constant 0.000000e+00 : f32
      %23 = vector.broadcast %cst_20 : f32 to vector<16x256xf32>
      %24 = arith.maximumf %22, %23 : vector<16x256xf32>
      %25 = arith.truncf %24 : vector<16x256xf32> to vector<16x256xbf16>
      %c0_21 = arith.constant 0 : index
      %c0_22 = arith.constant 0 : index
      %26 = vector.load %arg9[%c0_21, %c0_22] : memref<16x256xbf16, #tpu.memory_space<vmem>>, vector<16x256xbf16>
      tpu.vector_store %arg9[%c0_21, %c0_22], %25 {strides = array<i32>} : memref<16x256xbf16, #tpu.memory_space<vmem>>, vector<16x256xbf16>,
    } else {
    }
    return
  }
  func.func @transform_0(%arg0: i32, %arg1: i32, %arg2: i32) -> (i32, i32) {
    %c0_i32 = arith.constant 0 : i32
    return %arg0, %arg2 : i32, i32
  }
  func.func @transform_1(%arg0: i32, %arg1: i32, %arg2: i32) -> (i32, i32) {
    %c0_i32 = arith.constant 0 : i32
    return %arg2, %arg1 : i32, i32
  }
  func.func @transform_2(%arg0: i32, %arg1: i32, %arg2: i32) -> (i32, i32) {
    %c0_i32 = arith.constant 0 : i32
    %c0_i32_0 = arith.constant 0 : i32
    return %c0_i32, %arg1 : i32, i32
  }
  func.func @transform_3(%arg0: i32, %arg1: i32, %arg2: i32) -> (i32, i32) {
    %c0_i32 = arith.constant 0 : i32
    %c0_i32_0 = arith.constant 0 : i32
    return %arg0, %c0_i32 : i32, i32
  }
  func.func @transform_4(%arg0: i32, %arg1: i32, %arg2: i32) -> (i32, i32) {
    %c0_i32 = arith.constant 0 : i32
    %c0_i32_0 = arith.constant 0 : i32
    return %c0_i32, %arg1 : i32, i32
  }
  func.func @transform_5(%arg0: i32, %arg1: i32, %arg2: i32) -> (i32, i32) {
    %c0_i32 = arith.constant 0 : i32
    %c0_i32_0 = arith.constant 0 : i32
    return %c0_i32, %arg1 : i32, i32
  }
  func.func @transform_6(%arg0: i32, %arg1: i32, %arg2: i32) -> (i32, i32) {
    %c0_i32 = arith.constant 0 : i32
    return %arg0, %arg1 : i32, i32
  }
}

module attributes {stable_mosaic.version = 11 : i64} {
  func.func @kernel(%arg0: i32, %arg1: i32, %arg2: i32, %arg3: memref<16x512xbf16, #tpu.memory_space<vmem>>, %arg4: memref<512x256xbf16, #tpu.memory_space<vmem>>, %arg5: memref<1x256xf32, #tpu.memory_space<vmem>>, %arg6: memref<16x256xbf16, #tpu.memory_space<vmem>>, %arg7: memref<16x256xbf16, #tpu.memory_space<vmem>>, %arg8: memref<16x256xf32, #tpu.memory_space<vmem>>) attributes {dimension_semantics = [#tpu.dimension_semantics<parallel>, #tpu.dimension_semantics<parallel>, #tpu.dimension_semantics<arbitrary>], iteration_bounds = array<i64: 1, 2, 9>, scalar_prefetch = 0 : i64, scratch_operands = 1 : i64, tpu.core_type = #tpu.core_type<tc>, window_params = [{transform_indices = @transform_0, window_bounds = array<i64: 16, 512>}, {transform_indices = @transform_1, window_bounds = array<i64: 512, 256>}, {transform_indices = @transform_2, window_bounds = array<i64: 1, 256>}, {transform_indices = @transform_3, window_bounds = array<i64: 16, 256>}, {transform_indices = @transform_4, window_bounds = array<i64: 16, 256>}]} {
    %c0_i32 = arith.constant 0 : i32
    %0 = arith.cmpi eq, %arg2, %c0_i32 : i32
    %1 = arith.extui %0 : i1 to i32
    %c0_i32_0 = arith.constant 0 : i32
    %2 = arith.cmpi ne, %1, %c0_i32_0 : i32
    scf.if %2 {
      %cst_9 = arith.constant 0.000000e+00 : f32
      %12 = vector.broadcast %cst_9 : f32 to vector<16x256xf32>
      %c0_10 = arith.constant 0 : index
      %c0_11 = arith.constant 0 : index
      %13 = vector.load %arg8[%c0_10, %c0_11] : memref<16x256xf32, #tpu.memory_space<vmem>>, vector<16x256xf32>
      tpu.vector_store %arg8[%c0_10, %c0_11], %12 {strides = array<i32>} : memref<16x256xf32, #tpu.memory_space<vmem>>, vector<16x256xf32>,
    } else {
    }
    %c0 = arith.constant 0 : index
    %c0_1 = arith.constant 0 : index
    %3 = vector.load %arg8[%c0, %c0_1] : memref<16x256xf32, #tpu.memory_space<vmem>>, vector<16x256xf32>
    %c0_2 = arith.constant 0 : index
    %c0_3 = arith.constant 0 : index
    %4 = vector.load %arg3[%c0_2, %c0_3] : memref<16x512xbf16, #tpu.memory_space<vmem>>, vector<16x512xbf16>
    %c0_4 = arith.constant 0 : index
    %c0_5 = arith.constant 0 : index
    %5 = vector.load %arg4[%c0_4, %c0_5] : memref<512x256xbf16, #tpu.memory_space<vmem>>, vector<512x256xbf16>
    %cst = arith.constant dense<0.000000e+00> : vector<16x256xf32>
    %6 = tpu.matmul %4, %5, %cst {dimension_numbers = #tpu.dot_dimension_numbers<[1], [0], [0], [1], [0, 0, 1, 1], [], []>} : vector<16x512xbf16>, vector<512x256xbf16>, vector<16x256xf32> -> vector<16x256xf32>
    %7 = arith.addf %3, %6 : vector<16x256xf32>
    %c0_6 = arith.constant 0 : index
    %c0_7 = arith.constant 0 : index
    %8 = vector.load %arg8[%c0_6, %c0_7] : memref<16x256xf32, #tpu.memory_space<vmem>>, vector<16x256xf32>
    tpu.vector_store %arg8[%c0_6, %c0_7], %7 {strides = array<i32>} : memref<16x256xf32, #tpu.memory_space<vmem>>, vector<16x256xf32>,
    %c8_i32 = arith.constant 8 : i32
    %9 = arith.cmpi eq, %arg2, %c8_i32 : i32
    %10 = arith.extui %9 : i1 to i32
    %c0_i32_8 = arith.constant 0 : i32
    %11 = arith.cmpi ne, %10, %c0_i32_8 : i32
    scf.if %11 {
      %c0_9 = arith.constant 0 : index
      %c0_10 = arith.constant 0 : index
      %12 = vector.load %arg8[%c0_9, %c0_10] : memref<16x256xf32, #tpu.memory_space<vmem>>, vector<16x256xf32>
      %c0_11 = arith.constant 0 : index
      %c0_12 = arith.constant 0 : index
      %13 = vector.load %arg5[%c0_11, %c0_12] : memref<1x256xf32, #tpu.memory_space<vmem>>, vector<1x256xf32>
      %14 = vector.broadcast %13 : vector<1x256xf32> to vector<16x256xf32>
      %15 = arith.addf %12, %14 : vector<16x256xf32>
      %c0_13 = arith.constant 0 : index
      %c0_14 = arith.constant 0 : index
      %16 = vector.load %arg6[%c0_13, %c0_14] : memref<16x256xbf16, #tpu.memory_space<vmem>>, vector<16x256xbf16>
      %17 = arith.extf %16 : vector<16x256xbf16> to vector<16x256xf32>
      %18 = arith.addf %15, %17 : vector<16x256xf32>
      %cst_15 = arith.constant 0.000000e+00 : f32
      %19 = vector.broadcast %cst_15 : f32 to vector<16x256xf32>
      %20 = arith.maximumf %18, %19 : vector<16x256xf32>
      %21 = arith.truncf %20 : vector<16x256xf32> to vector<16x256xbf16>
      %c0_16 = arith.constant 0 : index
      %c0_17 = arith.constant 0 : index
      %22 = vector.load %arg7[%c0_16, %c0_17] : memref<16x256xbf16, #tpu.memory_space<vmem>>, vector<16x256xbf16>
      tpu.vector_store %arg7[%c0_16, %c0_17], %21 {strides = array<i32>} : memref<16x256xbf16, #tpu.memory_space<vmem>>, vector<16x256xbf16>,
    } else {
    }
    return
  }
  func.func @transform_0(%arg0: i32, %arg1: i32, %arg2: i32) -> (i32, i32) {
    %c0_i32 = arith.constant 0 : i32
    return %arg0, %arg2 : i32, i32
  }
  func.func @transform_1(%arg0: i32, %arg1: i32, %arg2: i32) -> (i32, i32) {
    %c0_i32 = arith.constant 0 : i32
    return %arg2, %arg1 : i32, i32
  }
  func.func @transform_2(%arg0: i32, %arg1: i32, %arg2: i32) -> (i32, i32) {
    %c0_i32 = arith.constant 0 : i32
    %c0_i32_0 = arith.constant 0 : i32
    return %c0_i32, %arg1 : i32, i32
  }
  func.func @transform_3(%arg0: i32, %arg1: i32, %arg2: i32) -> (i32, i32) {
    %c0_i32 = arith.constant 0 : i32
    return %arg0, %arg1 : i32, i32
  }
  func.func @transform_4(%arg0: i32, %arg1: i32, %arg2: i32) -> (i32, i32) {
    %c0_i32 = arith.constant 0 : i32
    return %arg0, %arg1 : i32, i32
  }
}

module attributes {stable_mosaic.version = 11 : i64} {
  func.func @_avgpool_kernel(%arg0: i32, %arg1: memref<2x1x128xbf16, #tpu.memory_space<vmem>>, %arg2: memref<2x128xf32, #tpu.memory_space<vmem>>) attributes {dimension_semantics = [#tpu.dimension_semantics<parallel>], iteration_bounds = array<i64: 4>, scalar_prefetch = 0 : i64, scratch_operands = 0 : i64, tpu.core_type = #tpu.core_type<tc>, window_params = [{transform_indices = @transform_0, window_bounds = array<i64: 2, 1, 128>}, {transform_indices = @transform_1, window_bounds = array<i64: 2, 128>}]} {
    %c0 = arith.constant 0 : index
    %c0_0 = arith.constant 0 : index
    %c0_1 = arith.constant 0 : index
    %0 = vector.load %arg1[%c0, %c0_0, %c0_1] : memref<2x1x128xbf16, #tpu.memory_space<vmem>>, vector<2x1x128xbf16>
    %1 = arith.extf %0 : vector<2x1x128xbf16> to vector<2x1x128xf32>
    %cst = arith.constant dense<0.000000e+00> : vector<2x128xf32>
    %2 = vector.multi_reduction <add>, %1, %cst [1] : vector<2x1x128xf32> to vector<2x128xf32>
    %cst_2 = arith.constant 1.000000e+00 : f32
    %3 = vector.broadcast %cst_2 : f32 to vector<2x128xf32>
    %4 = arith.mulf %2, %3 : vector<2x128xf32>
    %c0_3 = arith.constant 0 : index
    %c0_4 = arith.constant 0 : index
    %5 = vector.load %arg2[%c0_3, %c0_4] : memref<2x128xf32, #tpu.memory_space<vmem>>, vector<2x128xf32>
    tpu.vector_store %arg2[%c0_3, %c0_4], %4 {strides = array<i32>} : memref<2x128xf32, #tpu.memory_space<vmem>>, vector<2x128xf32>,
    return
  }
  func.func @transform_0(%arg0: i32) -> (i32, i32, i32) {
    %c0_i32 = arith.constant 0 : i32
    %c0_i32_0 = arith.constant 0 : i32
    %c0_i32_1 = arith.constant 0 : i32
    return %c0_i32, %c0_i32_0, %arg0 : i32, i32, i32
  }
  func.func @transform_1(%arg0: i32) -> (i32, i32) {
    %c0_i32 = arith.constant 0 : i32
    %c0_i32_0 = arith.constant 0 : i32
    return %c0_i32, %arg0 : i32, i32
  }
}

</mosaic_0001>

<bundles_post_ra>
// kernel: multi_task_net_forward.18
= control target key start
LH: loop header
LB: loop body
LE: loop exit
PB: predicated region body
PF: predicated region fallthrough
CT: control target
= control target key end

     0   :  { %s1632_s12 = smov 0   ;;  %s1634_s13 = smov 0   ;;  %s1804_s0 = inlined_call_operand.vmem [shape: bf16[512,147], index: 0, kind: input, shape index: {}]   ;;  %s1805_s1 = inlined_call_operand.vmem [shape: bf16[147,128], index: 1, kind: input, shape index: {}]   ;;  %s1806_s2 = inlined_call_operand.vmem [shape: f32[1,128], index: 2, kind: input, shape index: {}]   ;;  %s1807_s3 = inlined_call_operand.vmem [shape: bf16[512,128], index: 3, kind: output, shape index: {}]  }
   0x1   :  { %s1636_s14 = smov 0  }
   0x2 LB: > { %s32_s15 = sadd.s32 1, %s1604_s13  ;;  %p1255_p0 = scmp.ge.s32.totalorder %s1608_s14, 1  ;;  %s1608_s14 = sphi %s1636_s14, %s13_s14   ;;  %s1604_s13 = sphi %s1634_s13, %s1809_s13   ;;  %s1600_s12 = sphi %s1632_s12, %s1808_s12  }
   0x3   : > { %p34_p1 = scmp.ge.s32.totalorder %s32_s15, 2  ;;  %p191_p2 = scmp.lt.s32.totalorder %s1608_s14, 3 }
   0x5   : > { %s1811_s15 = smov (%p34_p1, %s32_s15), 0  ;;  %p192_p3 = pnand %p1255_p0, %p191_p2 }
   0x6   : > { %s1256_s22 = sshll.u32 (!%p192_p3), %s1600_s12, 5 }
   0x7   : > { %195 = sbr.rel (%p192_p3) target bundleno = 313 (0x139), region = 32  ;;  %p236_p4 = scmp.lt.s32.totalorder (!%p192_p3), %s1256_s22, 63 }
   0xc   : > { %v1528_v0 = vld [vmem:[%s1805_s1 + $0x38] sm:$0xff]   ;;  %v1610_v1 = vmov 0   ;;  %v1529_v2 = vld [vmem:[%s1805_s1 + $0x30] sm:$0xff]   ;;  %v1530_v3 = vld [vmem:[%s1805_s1 + $0x28] sm:$0xff]   ;;  %s1813_s22 = smov (!%p236_p4, %s1256_s22), 63  ;;  %vm588_vm0 = vcmask 154624  }
   0xd   : > { %644 = vmatprep.subr.bf16.mxu0 %v1610_v1  ;;  %1482 = vmatprep.subr.bf16.mxu1 %v1610_v1  ;;  %v1531_v4 = vld [vmem:[%s1805_s1 + $0x20] sm:$0xff]   ;;  %s1354_s25 = sshll.u32 %s1813_s22, 3  ;;  %v1532_v5 = vld [vmem:[%s1805_s1 + $0x18] sm:$0xff]   ;;  %v1533_v8 = vld [vmem:[%s1805_s1 + $0x10] sm:$0xff]   ;;  %vm637_vm1 = vcmask 1040384   ;;  %vm638_vm2 = vcmask 1041408  }
   0xe   : > { %645 = vmatpush1.bf16.msra.mxu0 %v1528_v0  ;;  %1492 = vmatpush1.bf16.msra.mxu1 %v1528_v0  ;;  %s1668_s28 = scalar_lea.vmem %s1804_s0, %s1354_s25  ;;  %v1534_v9 = vld [vmem:[%s1805_s1 + $0x8] sm:$0xff]   ;;  %v1611_v10 = vmov 65535   ;;  %v1535_v12 = vld [vmem:[%s1805_s1] sm:$0xff]   ;;  %s1260_s19 = sshll.u32 %s1813_s22, 2 }
   0xf   : > { %646 = vmatprep.subr.bf16.mxu0 %v1610_v1  ;;  %1483 = vmatprep.subr.bf16.mxu1 %v1610_v1  ;;  %v1540_v6 = vld [vmem:[%s1668_s28 + $0x4] ss:$8 sps:$4 sm:$0xff]   ;;  %v639_v11 = vsel %vm637_vm1, 4294967295, %v1611_v10  ;;  %v1536_v13 = vld [vmem:[%s1805_s1 + $0x48] ss:$0 sps:$4 sm:$0x33]   ;;  %s1749_s23 = scalar_lea.vmem %s1807_s3, %s1260_s19 }
  0x10   : > { %v1543_v7 = vld [vmem:[%s1668_s28 + $0x84] ss:$8 sps:$4 sm:$0xff]   ;;  %1303 = vmatprep.mubr.msk.bf16.mxu0 %vm588_vm0, %v1540_v6  ;;  %v640_v14 = vsel %vm638_vm2, %v639_v11, 0  ;;  %v1538_v17 = vld [vmem:[%s1668_s28] ss:$8 sps:$4 sm:$0xff]  }
  0x11   : > { %1311 = vmatprep.mubr.msk.bf16.mxu1 %vm588_vm0, %v1543_v7  ;;  %v642_v15 = vand.u32 %v1536_v13, %v640_v14  ;;  %v1537_v16 = vld [vmem:[%s1805_s1 + $0x40] sm:$0xff]   ;;  %v1544_v19 = vld [vmem:[%s1668_s28 + $0x14] ss:$8 sps:$4 sm:$0xff]   ;;  %v1548_v21 = vld [vmem:[%s1668_s28 + $0x10] ss:$8 sps:$4 sm:$0xff]  }
  0x12   : > { %647 = vmatpush1.bf16.msra.mxu0 %v1529_v2  ;;  %1493 = vmatpush1.bf16.msra.mxu1 %v1529_v2  ;;  %v1541_v18 = vld [vmem:[%s1668_s28 + $0x80] ss:$8 sps:$4 sm:$0xff]   ;;  %v1546_v20 = vld [vmem:[%s1668_s28 + $0x94] ss:$8 sps:$4 sm:$0xff]   ;;  %v1549_v22 = vld [vmem:[%s1668_s28 + $0x90] ss:$8 sps:$4 sm:$0xff]  }
  0x13   : > { %648 = vmatprep.subr.bf16.mxu0 %v1610_v1  ;;  %1484 = vmatprep.subr.bf16.mxu1 %v1610_v1  ;;  %v1550_v23 = vld [vmem:[%s1668_s28 + $0x24] ss:$8 sps:$4 sm:$0xff]   ;;  %v1554_v25 = vld [vmem:[%s1668_s28 + $0x20] ss:$8 sps:$4 sm:$0xff]   ;;  %v1556_v27 = vld [vmem:[%s1668_s28 + $0x34] ss:$8 sps:$4 sm:$0xff]  }
  0x14   : > { %v1552_v24 = vld [vmem:[%s1668_s28 + $0xa4] ss:$8 sps:$4 sm:$0xff]   ;;  %v1555_v26 = vld [vmem:[%s1668_s28 + $0xa0] ss:$8 sps:$4 sm:$0xff]   ;;  %v1558_v28 = vld [vmem:[%s1668_s28 + $0xb4] ss:$8 sps:$4 sm:$0xff]  }
  0x15   : > { %v1560_v29 = vld [vmem:[%s1668_s28 + $0x30] ss:$8 sps:$4 sm:$0xff]   ;;  %v1562_v31 = vld [vmem:[%s1668_s28 + $0x44] ss:$8 sps:$4 sm:$0xff]   ;;  %v1566_v33 = vld [vmem:[%s1668_s28 + $0x40] ss:$8 sps:$4 sm:$0xff]  }
  0x16   : > { %649 = vmatpush1.bf16.msra.mxu0 %v1530_v3  ;;  %1494 = vmatpush1.bf16.msra.mxu1 %v1530_v3  ;;  %v1561_v30 = vld [vmem:[%s1668_s28 + $0xb0] ss:$8 sps:$4 sm:$0xff]   ;;  %v1564_v32 = vld [vmem:[%s1668_s28 + $0xc4] ss:$8 sps:$4 sm:$0xff]   ;;  %v1567_v34 = vld [vmem:[%s1668_s28 + $0xc0] ss:$8 sps:$4 sm:$0xff]  }
  0x17   : > { %650 = vmatprep.subr.bf16.mxu0 %v1610_v1  ;;  %1485 = vmatprep.subr.bf16.mxu1 %v1610_v1  ;;  %v1568_v35 = vld [vmem:[%s1668_s28 + $0x54] ss:$8 sps:$4 sm:$0xff]   ;;  %v1572_v37 = vld [vmem:[%s1668_s28 + $0x50] ss:$8 sps:$4 sm:$0xff]   ;;  %v1574_v39 = vld [vmem:[%s1668_s28 + $0x64] ss:$8 sps:$4 sm:$0xff]  }
  0x18   : > { %v1570_v36 = vld [vmem:[%s1668_s28 + $0xd4] ss:$8 sps:$4 sm:$0xff]   ;;  %v1573_v38 = vld [vmem:[%s1668_s28 + $0xd0] ss:$8 sps:$4 sm:$0xff]   ;;  %v1576_v40 = vld [vmem:[%s1668_s28 + $0xe4] ss:$8 sps:$4 sm:$0xff]  }
  0x19   : > { %v1578_v41 = vld [vmem:[%s1668_s28 + $0x60] ss:$8 sps:$4 sm:$0xff]   ;;  %v1580_v43 = vld [vmem:[%s1668_s28 + $0x74] ss:$8 sps:$4 sm:$0xff]   ;;  %v1584_v45 = vld [vmem:[%s1668_s28 + $0x70] ss:$8 sps:$4 sm:$0xff]  }
  0x1a   : > { %651 = vmatpush1.bf16.msra.mxu0 %v1531_v4  ;;  %1495 = vmatpush1.bf16.msra.mxu1 %v1531_v4  ;;  %v1579_v42 = vld [vmem:[%s1668_s28 + $0xe0] ss:$8 sps:$4 sm:$0xff]   ;;  %v1582_v44 = vld [vmem:[%s1668_s28 + $0xf4] ss:$8 sps:$4 sm:$0xff]   ;;  %v1585_v46 = vld [vmem:[%s1668_s28 + $0xf0] ss:$8 sps:$4 sm:$0xff]  }
  0x1b   : > { %652 = vmatprep.subr.bf16.mxu0 %v1610_v1  ;;  %1486 = vmatprep.subr.bf16.mxu1 %v1610_v1  ;;  %v1739_v48 = vld [vmem:[%s1806_s2] ss:$0 sm:$0xff] }
  0x1e   : > { %653 = vmatpush1.bf16.msra.mxu0 %v1532_v5  ;;  %1496 = vmatpush1.bf16.msra.mxu1 %v1532_v5 }
  0x1f   : > { %654 = vmatprep.subr.bf16.mxu0 %v1610_v1  ;;  %1487 = vmatprep.subr.bf16.mxu1 %v1610_v1 }
  0x22   : > { %655 = vmatpush1.bf16.msra.mxu0 %v1533_v8  ;;  %1497 = vmatpush1.bf16.msra.mxu1 %v1533_v8 }
  0x23   : > { %656 = vmatprep.subr.bf16.mxu0 %v1610_v1  ;;  %1488 = vmatprep.subr.bf16.mxu1 %v1610_v1 }
  0x26   : > { %657 = vmatpush1.bf16.msra.mxu0 %v1534_v9  ;;  %1498 = vmatpush1.bf16.msra.mxu1 %v1534_v9 }
  0x27   : > { %658 = vmatprep.subr.bf16.mxu0 %v1610_v1  ;;  %1489 = vmatprep.subr.bf16.mxu1 %v1610_v1 }
  0x2a   : > { %659 = vmatpush1.bf16.msra.mxu0 %v1535_v12  ;;  %1499 = vmatpush1.bf16.msra.mxu1 %v1535_v12 }
  0x2b   : > { %672 = vmatprep.subr.bf16.mxu0 %v1610_v1  ;;  %1490 = vmatprep.subr.bf16.mxu1 %v1610_v1 }
  0x2e   : > { %673 = vmatpush2.bf16.msra.mxu0 %v642_v15  ;;  %1500 = vmatpush2.bf16.msra.mxu1 %v642_v15 }
  0x2f   : > { %674 = vmatprep.subr.bf16.mxu0 %v1610_v1  ;;  %1491 = vmatprep.subr.bf16.mxu1 %v1610_v1 }
  0x32   : > { %675 = vmatpush2.bf16.msra.mxu0 %v1537_v16  ;;  %1501 = vmatpush2.bf16.msra.mxu1 %v1537_v16 }
  0x35   : > { %677 = vmatmul.mubr.bf16.vlgmr.msra.gmra.mxu0 %v1538_v17  ;;  %741 = vmatmul.mubr.bf16.vlgmr.msra.gmra.mxu1 %v1541_v18 }
  0x36   : > { %1304 = vmatprep.mubr.msk.bf16.mxu0 %vm588_vm0, %v1544_v19  ;;  %1312 = vmatprep.mubr.msk.bf16.mxu1 %vm588_vm0, %v1546_v20 }
  0x3d   : > { %685 = vmatmul.mubr.bf16.gmra.mxu0 %v1548_v21  ;;  %749 = vmatmul.mubr.bf16.gmra.mxu1 %v1549_v22 }
  0x3e   : > { %1305 = vmatprep.mubr.msk.bf16.mxu0 %vm588_vm0, %v1550_v23  ;;  %1313 = vmatprep.mubr.msk.bf16.mxu1 %vm588_vm0, %v1552_v24 }
  0x45   : > { %693 = vmatmul.mubr.bf16.gmra.mxu0 %v1554_v25  ;;  %757 = vmatmul.mubr.bf16.gmra.mxu1 %v1555_v26 }
  0x46   : > { %1306 = vmatprep.mubr.msk.bf16.mxu0 %vm588_vm0, %v1556_v27  ;;  %1314 = vmatprep.mubr.msk.bf16.mxu1 %vm588_vm0, %v1558_v28 }
  0x4d   : > { %701 = vmatmul.mubr.bf16.gmra.mxu0 %v1560_v29  ;;  %765 = vmatmul.mubr.bf16.gmra.mxu1 %v1561_v30 }
  0x4e   : > { %1307 = vmatprep.mubr.msk.bf16.mxu0 %vm588_vm0, %v1562_v31  ;;  %1315 = vmatprep.mubr.msk.bf16.mxu1 %vm588_vm0, %v1564_v32 }
  0x55   : > { %709 = vmatmul.mubr.bf16.gmra.mxu0 %v1566_v33  ;;  %773 = vmatmul.mubr.bf16.gmra.mxu1 %v1567_v34 }
  0x56   : > { %1308 = vmatprep.mubr.msk.bf16.mxu0 %vm588_vm0, %v1568_v35  ;;  %1316 = vmatprep.mubr.msk.bf16.mxu1 %vm588_vm0, %v1570_v36 }
  0x5d   : > { %717 = vmatmul.mubr.bf16.gmra.mxu0 %v1572_v37  ;;  %781 = vmatmul.mubr.bf16.gmra.mxu1 %v1573_v38 }
  0x5e   : > { %1309 = vmatprep.mubr.msk.bf16.mxu0 %vm588_vm0, %v1574_v39  ;;  %1317 = vmatprep.mubr.msk.bf16.mxu1 %vm588_vm0, %v1576_v40 }
  0x65   : > { %725 = vmatmul.mubr.bf16.gmra.mxu0 %v1578_v41  ;;  %789 = vmatmul.mubr.bf16.gmra.mxu1 %v1579_v42 }
  0x66   : > { %1310 = vmatprep.mubr.msk.bf16.mxu0 %vm588_vm0, %v1580_v43  ;;  %1318 = vmatprep.mubr.msk.bf16.mxu1 %vm588_vm0, %v1582_v44 }
  0x6d   : > { %733 = vmatmul.mubr.bf16.gmra.mxu0 %v1584_v45  ;;  %797 = vmatmul.mubr.bf16.gmra.mxu1 %v1585_v46 }
  0xf5   : > { %v678_v47 = vpop.f32.mrf.mxu0  ;;  %v742_v49 = vpop.f32.mrf.mxu1 }
  0xf6   : > { %v911_v52 = vadd.f32 %v1739_v48, %v678_v47  ;;  %v927_v53 = vadd.f32 %v1739_v48, %v742_v49 }
  0xf7   : > { %v680_v50 = vpop.f32.mrf.mxu0  ;;  %v744_v51 = vpop.f32.mrf.mxu1 }
  0xf8   : > { %v943_v60 = vmax.f32 %v911_v52, 0.0  ;;  %v959_v61 = vmax.f32 %v927_v53, 0.0 }
  0xf9   : > { %v681_v54 = vpop.f32.mrf.mxu0  ;;  %v745_v55 = vpop.f32.mrf.mxu1 }
  0xfa   : > { %v912_v56 = vadd.f32 %v1739_v48, %v681_v54  ;;  %v928_v57 = vadd.f32 %v1739_v48, %v745_v55 }
  0xfb   : > { %v683_v58 = vpop.f32.mrf.mxu0  ;;  %v747_v59 = vpop.f32.mrf.mxu1 }
  0xfc   : > { %v944_v62 = vmax.f32 %v912_v56, 0.0  ;;  %v960_v63 = vmax.f32 %v928_v57, 0.0 }
  0xfd   : > { %v686_v0 = vpop.f32.mrf.mxu0  ;;  %v750_v1 = vpop.f32.mrf.mxu1 }
  0xfe   : > { %v1390_v2 = vpack.c.bf16 %v944_v62, %v943_v60  ;;  %v1430_v3 = vpack.c.bf16 %v960_v63, %v959_v61  ;;  %v913_v6 = vadd.f32 %v1739_v48, %v686_v0  ;;  %v929_v7 = vadd.f32 %v1739_v48, %v750_v1 }
  0xff   : > { %v688_v4 = vpop.f32.mrf.mxu0  ;;  %v752_v5 = vpop.f32.mrf.mxu1 }
 0x100   : > { %1391 = vst [vmem:[%s1749_s23] sm:$0xff] %v1390_v2   ;;  %1474 = vst [vmem:[%s1749_s23 + $0x40] sm:$0xff] %v1430_v3   ;;  %v945_v14 = vmax.f32 %v913_v6, 0.0  ;;  %v961_v15 = vmax.f32 %v929_v7, 0.0 }
 0x101   : > { %v689_v8 = vpop.f32.mrf.mxu0  ;;  %v753_v9 = vpop.f32.mrf.mxu1 }
 0x102   : > { %v914_v10 = vadd.f32 %v1739_v48, %v689_v8  ;;  %v930_v11 = vadd.f32 %v1739_v48, %v753_v9 }
 0x103   : > { %v691_v12 = vpop.f32.mrf.mxu0  ;;  %v755_v13 = vpop.f32.mrf.mxu1 }
 0x104   : > { %v946_v16 = vmax.f32 %v914_v10, 0.0  ;;  %v962_v17 = vmax.f32 %v930_v11, 0.0 }
 0x105   : > { %v694_v18 = vpop.f32.mrf.mxu0  ;;  %v758_v19 = vpop.f32.mrf.mxu1 }
 0x106   : > { %v1395_v20 = vpack.c.bf16 %v946_v16, %v945_v14  ;;  %v1435_v21 = vpack.c.bf16 %v962_v17, %v961_v15  ;;  %v915_v24 = vadd.f32 %v1739_v48, %v694_v18  ;;  %v931_v25 = vadd.f32 %v1739_v48, %v758_v19 }
 0x107   : > { %v696_v22 = vpop.f32.mrf.mxu0  ;;  %v760_v23 = vpop.f32.mrf.mxu1 }
 0x108   : > { %1467 = vst [vmem:[%s1749_s23 + $0x8] sm:$0xff] %v1395_v20   ;;  %1475 = vst [vmem:[%s1749_s23 + $0x48] sm:$0xff] %v1435_v21   ;;  %v947_v32 = vmax.f32 %v915_v24, 0.0  ;;  %v963_v33 = vmax.f32 %v931_v25, 0.0 }
 0x109   : > { %v697_v26 = vpop.f32.mrf.mxu0  ;;  %v761_v27 = vpop.f32.mrf.mxu1 }
 0x10a   : > { %v916_v28 = vadd.f32 %v1739_v48, %v697_v26  ;;  %v932_v29 = vadd.f32 %v1739_v48, %v761_v27 }
 0x10b   : > { %v699_v30 = vpop.f32.mrf.mxu0  ;;  %v763_v31 = vpop.f32.mrf.mxu1 }
 0x10c   : > { %v948_v34 = vmax.f32 %v916_v28, 0.0  ;;  %v964_v35 = vmax.f32 %v932_v29, 0.0 }
 0x10d   : > { %v702_v36 = vpop.f32.mrf.mxu0  ;;  %v766_v37 = vpop.f32.mrf.mxu1 }
 0x10e   : > { %v1400_v38 = vpack.c.bf16 %v948_v34, %v947_v32  ;;  %v1440_v39 = vpack.c.bf16 %v964_v35, %v963_v33  ;;  %v917_v42 = vadd.f32 %v1739_v48, %v702_v36  ;;  %v933_v43 = vadd.f32 %v1739_v48, %v766_v37 }
 0x10f   : > { %v704_v40 = vpop.f32.mrf.mxu0  ;;  %v768_v41 = vpop.f32.mrf.mxu1 }
 0x110   : > { %1468 = vst [vmem:[%s1749_s23 + $0x10] sm:$0xff] %v1400_v38   ;;  %1476 = vst [vmem:[%s1749_s23 + $0x50] sm:$0xff] %v1440_v39   ;;  %v949_v51 = vmax.f32 %v917_v42, 0.0  ;;  %v965_v52 = vmax.f32 %v933_v43, 0.0 }
 0x111   : > { %v705_v44 = vpop.f32.mrf.mxu0  ;;  %v769_v45 = vpop.f32.mrf.mxu1 }
 0x112   : > { %v918_v46 = vadd.f32 %v1739_v48, %v705_v44  ;;  %v934_v47 = vadd.f32 %v1739_v48, %v769_v45 }
 0x113   : > { %v707_v49 = vpop.f32.mrf.mxu0  ;;  %v771_v50 = vpop.f32.mrf.mxu1 }
 0x114   : > { %v950_v53 = vmax.f32 %v918_v46, 0.0  ;;  %v966_v54 = vmax.f32 %v934_v47, 0.0 }
 0x115   : > { %v710_v55 = vpop.f32.mrf.mxu0  ;;  %v774_v56 = vpop.f32.mrf.mxu1 }
 0x116   : > { %v1405_v57 = vpack.c.bf16 %v950_v53, %v949_v51  ;;  %v1445_v58 = vpack.c.bf16 %v966_v54, %v965_v52  ;;  %v919_v61 = vadd.f32 %v1739_v48, %v710_v55  ;;  %v935_v62 = vadd.f32 %v1739_v48, %v774_v56 }
 0x117   : > { %v712_v59 = vpop.f32.mrf.mxu0  ;;  %v776_v60 = vpop.f32.mrf.mxu1 }
 0x118   : > { %1469 = vst [vmem:[%s1749_s23 + $0x18] sm:$0xff] %v1405_v57   ;;  %1477 = vst [vmem:[%s1749_s23 + $0x58] sm:$0xff] %v1445_v58   ;;  %v951_v5 = vmax.f32 %v919_v61, 0.0  ;;  %v967_v6 = vmax.f32 %v935_v62, 0.0 }
 0x119   : > { %v713_v63 = vpop.f32.mrf.mxu0  ;;  %v777_v0 = vpop.f32.mrf.mxu1 }
 0x11a   : > { %v920_v1 = vadd.f32 %v1739_v48, %v713_v63  ;;  %v936_v2 = vadd.f32 %v1739_v48, %v777_v0 }
 0x11b   : > { %v715_v3 = vpop.f32.mrf.mxu0  ;;  %v779_v4 = vpop.f32.mrf.mxu1 }
 0x11c   : > { %v952_v7 = vmax.f32 %v920_v1, 0.0  ;;  %v968_v8 = vmax.f32 %v936_v2, 0.0 }
 0x11d   : > { %v718_v9 = vpop.f32.mrf.mxu0  ;;  %v782_v10 = vpop.f32.mrf.mxu1 }
 0x11e   : > { %v1410_v11 = vpack.c.bf16 %v952_v7, %v951_v5  ;;  %v1450_v12 = vpack.c.bf16 %v968_v8, %v967_v6  ;;  %v921_v15 = vadd.f32 %v1739_v48, %v718_v9  ;;  %v937_v16 = vadd.f32 %v1739_v48, %v782_v10 }
 0x11f   : > { %v720_v13 = vpop.f32.mrf.mxu0  ;;  %v784_v14 = vpop.f32.mrf.mxu1 }
 0x120   : > { %1470 = vst [vmem:[%s1749_s23 + $0x20] sm:$0xff] %v1410_v11   ;;  %1478 = vst [vmem:[%s1749_s23 + $0x60] sm:$0xff] %v1450_v12   ;;  %v953_v23 = vmax.f32 %v921_v15, 0.0  ;;  %v969_v24 = vmax.f32 %v937_v16, 0.0 }
 0x121   : > { %v721_v17 = vpop.f32.mrf.mxu0  ;;  %v785_v18 = vpop.f32.mrf.mxu1 }
 0x122   : > { %v922_v19 = vadd.f32 %v1739_v48, %v721_v17  ;;  %v938_v20 = vadd.f32 %v1739_v48, %v785_v18 }
 0x123   : > { %v723_v21 = vpop.f32.mrf.mxu0  ;;  %v787_v22 = vpop.f32.mrf.mxu1 }
 0x124   : > { %v954_v25 = vmax.f32 %v922_v19, 0.0  ;;  %v970_v26 = vmax.f32 %v938_v20, 0.0 }
 0x125   : > { %v726_v27 = vpop.f32.mrf.mxu0  ;;  %v790_v28 = vpop.f32.mrf.mxu1 }
 0x126   : > { %v1415_v29 = vpack.c.bf16 %v954_v25, %v953_v23  ;;  %v1455_v30 = vpack.c.bf16 %v970_v26, %v969_v24  ;;  %v923_v33 = vadd.f32 %v1739_v48, %v726_v27  ;;  %v939_v34 = vadd.f32 %v1739_v48, %v790_v28 }
 0x127   : > { %v728_v31 = vpop.f32.mrf.mxu0  ;;  %v792_v32 = vpop.f32.mrf.mxu1 }
 0x128   : > { %1471 = vst [vmem:[%s1749_s23 + $0x28] sm:$0xff] %v1415_v29   ;;  %1479 = vst [vmem:[%s1749_s23 + $0x68] sm:$0xff] %v1455_v30   ;;  %v955_v41 = vmax.f32 %v923_v33, 0.0  ;;  %v971_v42 = vmax.f32 %v939_v34, 0.0 }
 0x129   : > { %v729_v35 = vpop.f32.mrf.mxu0  ;;  %v793_v36 = vpop.f32.mrf.mxu1 }
 0x12a   : > { %v924_v37 = vadd.f32 %v1739_v48, %v729_v35  ;;  %v940_v38 = vadd.f32 %v1739_v48, %v793_v36 }
 0x12b   : > { %v731_v39 = vpop.f32.mrf.mxu0  ;;  %v795_v40 = vpop.f32.mrf.mxu1 }
 0x12c   : > { %v956_v43 = vmax.f32 %v924_v37, 0.0  ;;  %v972_v44 = vmax.f32 %v940_v38, 0.0 }
 0x12d   : > { %v734_v45 = vpop.f32.mrf.mxu0  ;;  %v798_v46 = vpop.f32.mrf.mxu1 }
 0x12e   : > { %v1420_v47 = vpack.c.bf16 %v956_v43, %v955_v41  ;;  %v1460_v49 = vpack.c.bf16 %v972_v44, %v971_v42  ;;  %v925_v52 = vadd.f32 %v1739_v48, %v734_v45  ;;  %v941_v53 = vadd.f32 %v1739_v48, %v798_v46 }
 0x12f   : > { %v736_v50 = vpop.f32.mrf.mxu0  ;;  %v800_v51 = vpop.f32.mrf.mxu1 }
 0x130   : > { %1472 = vst [vmem:[%s1749_s23 + $0x30] sm:$0xff] %v1420_v47   ;;  %1480 = vst [vmem:[%s1749_s23 + $0x70] sm:$0xff] %v1460_v49   ;;  %v957_v60 = vmax.f32 %v925_v52, 0.0  ;;  %v973_v61 = vmax.f32 %v941_v53, 0.0 }
 0x131   : > { %v737_v54 = vpop.f32.mrf.mxu0  ;;  %v801_v55 = vpop.f32.mrf.mxu1 }
 0x132   : > { %v926_v56 = vadd.f32 %v1739_v48, %v737_v54  ;;  %v942_v57 = vadd.f32 %v1739_v48, %v801_v55 }
 0x133   : > { %v739_v58 = vpop.f32.mrf.mxu0  ;;  %v803_v59 = vpop.f32.mrf.mxu1 }
 0x134   : > { %v958_v62 = vmax.f32 %v926_v56, 0.0  ;;  %v974_v63 = vmax.f32 %v942_v57, 0.0 }
 0x136   : > { %v1425_v0 = vpack.c.bf16 %v958_v62, %v957_v60  ;;  %v1465_v1 = vpack.c.bf16 %v974_v63, %v973_v61 }
 0x138   : > { %1473 = vst [vmem:[%s1749_s23 + $0x38] sm:$0xff] %v1425_v0   ;;  %1481 = vst [vmem:[%s1749_s23 + $0x78] sm:$0xff] %v1465_v1  }
 0x139 PF: > { %s13_s14 = sadd.s32 1, %s1608_s14   ;;  %s1808_s12 = smov %s1604_s13 }
 0x13a   : > { %p10_p5 = scmp.ge.s32.totalorder %s13_s14, 4   ;;  %s1809_s13 = smov %s1811_s15 }
 0x13c   :  { %12 = sbr.rel (!%p10_p5) target bundleno = 2 (0x2), region = 76 }

// kernel: multi_task_net_forward.19
= control target key start
LH: loop header
LB: loop body
LE: loop exit
PB: predicated region body
PF: predicated region fallthrough
CT: control target
= control target key end

     0   :  { %s1660_s12 = smov 0   ;;  %s1662_s13 = smov 0   ;;  %s1874_s0 = inlined_call_operand.vmem [shape: bf16[128,1152], index: 0, kind: input, shape index: {}]   ;;  %s1875_s1 = inlined_call_operand.vmem [shape: bf16[1152,128], index: 1, kind: input, shape index: {}]   ;;  %s1876_s2 = inlined_call_operand.vmem [shape: f32[1,128], index: 2, kind: input, shape index: {}]   ;;  %s1877_s3 = inlined_call_operand.vmem [shape: bf16[128,128], index: 3, kind: output, shape index: {}]  }
   0x1   :  { %s1664_s14 = smov 0   ;;  %s1666_s15 = smov 0  }
   0x2   :  { %s1668_s16 = smov 0  }
   0x3 LB: > { %s25_s17 = sadd.s32 1, %s1633_s15  ;;  %p48_p1 = scmp.ne.s32.totalorder %s1625_s13, %s1621_s12  ;;  %s1637_s16 = sphi %s1668_s16, %s13_s16   ;;  %s1633_s15 = sphi %s1666_s15, %s1881_s15   ;;  %s1629_s14 = sphi %s1664_s14, %s1880_s14   ;;  %s1625_s13 = sphi %s1662_s13, %s1879_s13   ;;  %s1621_s12 = sphi %s1660_s12, %s1878_s12  }
   0x4   : > { %p26_p0 = scmp.ge.s32.totalorder %s25_s17, 3  ;;  %p49_p2 = scmp.eq.s32.totalorder %s1637_s16, 0 }
   0x5   : > { %s41_s19 = sadd.s32 1, %s1625_s13  ;;  %p1217_p5 = scmp.ge.s32.totalorder %s1637_s16, 3 }
   0x6   : > { %s1883_s17 = smov (%p26_p0, %s25_s17), 0  ;;  %p50_p3 = por %p49_p2, %p48_p1 }
   0x7   : > { %s37_s18 = ssub.s32 %s1633_s15, %s1883_s17  ;;  %162 = sbr.rel (%p1217_p5) target bundleno = 35 (0x23), region = 20 }
   0x8   : > { %p39_p4 = scmp.eq.s32.totalorder %s37_s18, 0 }
   0xa   : > { %s1695_s20 = scalar_select %p39_p4, %s1625_s13, %s41_s19  }
   0xc   : > { %165 = sbr.rel (!%p50_p3) target bundleno = 35 (0x23), region = 24  ;;  %s167_s21 = sand.u32 (%p50_p3), 1, %s1625_s13  }
   0xd   : > { %s1324_s22 = smul.u32 (%p50_p3), 12, %s1633_s15 }
   0xe   : > { %s1500_s23 = smul.u32 (%p50_p3), 192, %s167_s21 }
   0xf   : > { %s1703_s26 = scalar_lea.vmem (%p50_p3), %s1874_s0, %s1324_s22 }
  0x10   : > { %v190_v0 = vld [vmem:[%s1703_s26] sm:$0xff] (%p50_p3)  ;;  %v194_v2 = vld [vmem:[%s1703_s26 + $0x48] sm:$0xff] (%p50_p3)  ;;  %s1708_s27 = scalar_lea.vmem (%p50_p3), [#allocation3], %s1500_s23  ;;  %v198_v4 = vld [vmem:[%s1703_s26 + $0x90] sm:$0xff] (%p50_p3) }
  0x11   : > { %v192_v1 = vld [vmem:[%s1703_s26 + $0x24] sm:$0xff]  ;;  %191 = vst [vmem:[%s1708_s27] sm:$0xff] %v190_v0  ;;  %195 = vst [vmem:[%s1708_s27 + $0x18] sm:$0xff] %v194_v2  ;;  %v196_v3 = vld [vmem:[%s1703_s26 + $0x6c] sm:$0xff] }
  0x12   : > { %193 = vst [vmem:[%s1708_s27 + $0xc] sm:$0xff] %v192_v1  ;;  %v200_v5 = vld [vmem:[%s1703_s26 + $0xb4] sm:$0xff]  ;;  %197 = vst [vmem:[%s1708_s27 + $0x24] sm:$0xff] %v196_v3  ;;  %v204_v7 = vld [vmem:[%s1703_s26 + $0xfc] sm:$0xff] }
  0x13   : > { %199 = vst [vmem:[%s1708_s27 + $0x30] sm:$0xff] %v198_v4  ;;  %201 = vst [vmem:[%s1708_s27 + $0x3c] sm:$0xff] %v200_v5  ;;  %v202_v6 = vld [vmem:[%s1703_s26 + $0xd8] sm:$0xff]  ;;  %v206_v8 = vld [vmem:[%s1703_s26 + $0x120] sm:$0xff] }
  0x14   : > { %203 = vst [vmem:[%s1708_s27 + $0x48] sm:$0xff] %v202_v6  ;;  %205 = vst [vmem:[%s1708_s27 + $0x54] sm:$0xff] %v204_v7  ;;  %v208_v9 = vld [vmem:[%s1703_s26 + $0x144] sm:$0xff]  ;;  %v212_v11 = vld [vmem:[%s1703_s26 + $0x18c] sm:$0xff] }
  0x15   : > { %207 = vst [vmem:[%s1708_s27 + $0x60] sm:$0xff] %v206_v8  ;;  %v210_v10 = vld [vmem:[%s1703_s26 + $0x168] sm:$0xff]  ;;  %209 = vst [vmem:[%s1708_s27 + $0x6c] sm:$0xff] %v208_v9  ;;  %v214_v12 = vld [vmem:[%s1703_s26 + $0x1b0] sm:$0xff] }
  0x16   : > { %211 = vst [vmem:[%s1708_s27 + $0x78] sm:$0xff] %v210_v10  ;;  %213 = vst [vmem:[%s1708_s27 + $0x84] sm:$0xff] %v212_v11  ;;  %v216_v13 = vld [vmem:[%s1703_s26 + $0x1d4] sm:$0xff]  ;;  %v220_v15 = vld [vmem:[%s1703_s26 + $0x21c] sm:$0xff] }
  0x17   : > { %v218_v14 = vld [vmem:[%s1703_s26 + $0x1f8] sm:$0xff]  ;;  %215 = vst [vmem:[%s1708_s27 + $0x90] sm:$0xff] %v214_v12  ;;  %217 = vst [vmem:[%s1708_s27 + $0x9c] sm:$0xff] %v216_v13  ;;  %v1219_v16 = vld [vmem:[%s1703_s26 + $0x8] sm:$0xf] }
  0x18   : > { %219 = vst [vmem:[%s1708_s27 + $0xa8] sm:$0xff] %v218_v14  ;;  %v1221_v17 = vld [vmem:[%s1703_s26 + $0x2c] sm:$0xf]  ;;  %221 = vst [vmem:[%s1708_s27 + $0xb4] sm:$0xff] %v220_v15  ;;  %v1223_v18 = vld [vmem:[%s1703_s26 + $0x50] sm:$0xf] }
  0x19   : > { %1220 = vst [vmem:[%s1708_s27 + $0x8] sm:$0xf] %v1219_v16  ;;  %1222 = vst [vmem:[%s1708_s27 + $0x14] sm:$0xf] %v1221_v17  ;;  %v1225_v19 = vld [vmem:[%s1703_s26 + $0x74] sm:$0xf] }
  0x1a   : > { %v1227_v20 = vld [vmem:[%s1703_s26 + $0x98] sm:$0xf]  ;;  %1224 = vst [vmem:[%s1708_s27 + $0x20] sm:$0xf] %v1223_v18  ;;  %1226 = vst [vmem:[%s1708_s27 + $0x2c] sm:$0xf] %v1225_v19 }
  0x1b   : > { %1228 = vst [vmem:[%s1708_s27 + $0x38] sm:$0xf] %v1227_v20  ;;  %v1229_v21 = vld [vmem:[%s1703_s26 + $0xbc] sm:$0xf]  ;;  %v1231_v22 = vld [vmem:[%s1703_s26 + $0xe0] sm:$0xf] }
  0x1c   : > { %v1233_v23 = vld [vmem:[%s1703_s26 + $0x104] sm:$0xf]  ;;  %1230 = vst [vmem:[%s1708_s27 + $0x44] sm:$0xf] %v1229_v21  ;;  %1232 = vst [vmem:[%s1708_s27 + $0x50] sm:$0xf] %v1231_v22 }
  0x1d   : > { %1234 = vst [vmem:[%s1708_s27 + $0x5c] sm:$0xf] %v1233_v23  ;;  %v1235_v24 = vld [vmem:[%s1703_s26 + $0x128] sm:$0xf]  ;;  %v1237_v25 = vld [vmem:[%s1703_s26 + $0x14c] sm:$0xf] }
  0x1e   : > { %v1239_v26 = vld [vmem:[%s1703_s26 + $0x170] sm:$0xf]  ;;  %1236 = vst [vmem:[%s1708_s27 + $0x68] sm:$0xf] %v1235_v24  ;;  %1238 = vst [vmem:[%s1708_s27 + $0x74] sm:$0xf] %v1237_v25 }
  0x1f   : > { %1240 = vst [vmem:[%s1708_s27 + $0x80] sm:$0xf] %v1239_v26  ;;  %v1241_v27 = vld [vmem:[%s1703_s26 + $0x194] sm:$0xf]  ;;  %v1243_v28 = vld [vmem:[%s1703_s26 + $0x1b8] sm:$0xf] }
  0x20   : > { %v1245_v29 = vld [vmem:[%s1703_s26 + $0x1dc] sm:$0xf]  ;;  %1242 = vst [vmem:[%s1708_s27 + $0x8c] sm:$0xf] %v1241_v27  ;;  %1244 = vst [vmem:[%s1708_s27 + $0x98] sm:$0xf] %v1243_v28 }
  0x21   : > { %1246 = vst [vmem:[%s1708_s27 + $0xa4] sm:$0xf] %v1245_v29  ;;  %v1247_v30 = vld [vmem:[%s1703_s26 + $0x200] sm:$0xf]  ;;  %v1249_v31 = vld [vmem:[%s1703_s26 + $0x224] sm:$0xf] }
  0x22   : > { %1248 = vst [vmem:[%s1708_s27 + $0xb0] sm:$0xf] %v1247_v30  ;;  %1250 = vst [vmem:[%s1708_s27 + $0xbc] sm:$0xf] %v1249_v31 }
  0x23 PF: > { %p1251_p6 = scmp.ge.s32.totalorder %s1637_s16, 1  ;;  %p278_p7 = scmp.lt.s32.totalorder %s1637_s16, 4 }
  0x25   : > { %p279_p8 = pnand %p1251_p6, %p278_p7 }
  0x26   : > { %s285_s28 = sand.u32 (!%p279_p8), 1, %s1621_s12   ;;  %s324_s29 = smul.u32 (!%p279_p8), 48, %s1629_s14 }
  0x27   : > { %282 = sbr.rel (%p279_p8) target bundleno = 369 (0x171), region = 54  ;;  %p1253_p10 = scmp.ne.s32.totalorder (!%p279_p8), %s1629_s14, 0 }
  0x28   : > { %s1501_s30 = smul.u32 (!%p279_p8), 192, %s285_s28  ;;  %p325_p9 = scmp.lt.s32.totalorder (!%p279_p8), %s324_s29, 143 }
  0x2a   : > { %s1780_s8 = scalar_lea.vmem (!%p279_p8), [#allocation3], %s1501_s30 }
  0x2c   : > { %s1885_s29 = smov (!%p325_p9, %s324_s29), 143  ;;  %349 = sbr.rel (%p1253_p10) target bundleno = 58 (0x3a), region = 62 }
  0x2d   : > { %s1252_s4 = sshll.u32 %s1885_s29, 2 }
  0x2e   : > { %s1778_s7 = scalar_lea.vmem %s1875_s1, %s1252_s4 }
  0x31   : > { %v1639_v32 = vmov 0.0  }
  0x32   : > { %350 = vst [vmem:[#allocation2 + $0x30] sm:$0xff] %v1639_v32  ;;  %351 = vst [vmem:[#allocation2] sm:$0xff] %v1639_v32 }
  0x33   : > { %352 = vst [vmem:[#allocation2 + $0x58] sm:$0xff] %v1639_v32  ;;  %353 = vst [vmem:[#allocation2 + $0x18] sm:$0xff] %v1639_v32 }
  0x34   : > { %354 = vst [vmem:[#allocation2 + $0x50] sm:$0xff] %v1639_v32  ;;  %355 = vst [vmem:[#allocation2 + $0x68] sm:$0xff] %v1639_v32 }
  0x35   : > { %356 = vst [vmem:[#allocation2 + $0x8] sm:$0xff] %v1639_v32  ;;  %357 = vst [vmem:[#allocation2 + $0x48] sm:$0xff] %v1639_v32 }
  0x36   : > { %358 = vst [vmem:[#allocation2 + $0x40] sm:$0xff] %v1639_v32  ;;  %359 = vst [vmem:[#allocation2 + $0x20] sm:$0xff] %v1639_v32 }
  0x37   : > { %360 = vst [vmem:[#allocation2 + $0x10] sm:$0xff] %v1639_v32  ;;  %361 = vst [vmem:[#allocation2 + $0x38] sm:$0xff] %v1639_v32 }
  0x38   : > { %362 = vst [vmem:[#allocation2 + $0x60] sm:$0xff] %v1639_v32  ;;  %363 = vst [vmem:[#allocation2 + $0x70] sm:$0xff] %v1639_v32 }
  0x39   : > { %364 = vst [vmem:[#allocation2 + $0x78] sm:$0xff] %v1639_v32  ;;  %365 = vst [vmem:[#allocation2 + $0x28] sm:$0xff] %v1639_v32 }
  0x3a PF: > { %v1543_v33 = vld [vmem:[%s1778_s7 + $0x78] sm:$0xff]   ;;  %v1546_v36 = vld [vmem:[%s1778_s7 + $0x70] sm:$0xff]   ;;  %v1549_v39 = vld [vmem:[%s1778_s7 + $0x68] sm:$0xff]   ;;  %p1302_p11 = scmp.ne.s32.totalorder %s1629_s14, 2 }
  0x3b   : > { %v1544_v34 = vld [vmem:[%s1778_s7 + $0x38] sm:$0xff]   ;;  %1388 = vmatprep.subr.bf16.mxu0 %v1543_v33  ;;  %v1547_v37 = vld [vmem:[%s1778_s7 + $0x30] sm:$0xff]   ;;  %v1550_v40 = vld [vmem:[%s1778_s7 + $0x28] sm:$0xff]  }
  0x3c   : > { %v1545_v35 = vld [vmem:[%s1778_s7 + $0xb8] sm:$0xff]   ;;  %1389 = vmatpush3.bf16.msra.mxu0 %v1544_v34  ;;  %v1548_v38 = vld [vmem:[%s1778_s7 + $0xb0] sm:$0xff]   ;;  %v1551_v41 = vld [vmem:[%s1778_s7 + $0xa8] sm:$0xff]  }
  0x3d   : > { %1468 = vmatprep.subr.bf16.mxu1 %v1545_v35  ;;  %1390 = vmatprep.subr.bf16.mxu0 %v1546_v36  ;;  %v1552_v42 = vld [vmem:[%s1778_s7 + $0x60] sm:$0xff]   ;;  %v1555_v45 = vld [vmem:[%s1778_s7 + $0x58] sm:$0xff]   ;;  %v1558_v48 = vld [vmem:[%s1778_s7 + $0x50] sm:$0xff]  }
  0x3e   : > { %1469 = vmatpush3.bf16.msra.mxu1 %v1545_v35  ;;  %v1553_v43 = vld [vmem:[%s1778_s7 + $0x20] sm:$0xff]   ;;  %v1557_v46 = vld [vmem:[%s1778_s7 + $0x98] sm:$0xff]   ;;  %v1560_v49 = vld [vmem:[%s1778_s7 + $0x90] sm:$0xff]  }
  0x3f   : > { %1470 = vmatprep.subr.bf16.mxu1 %v1548_v38  ;;  %v1554_v44 = vld [vmem:[%s1778_s7 + $0xa0] sm:$0xff]   ;;  %v1556_v47 = vld [vmem:[%s1778_s7 + $0x18] sm:$0xff]   ;;  %v1559_v50 = vld [vmem:[%s1778_s7 + $0x10] sm:$0xff]  }
  0x40   : > { %1391 = vmatpush3.bf16.msra.mxu0 %v1547_v37  ;;  %v1561_v51 = vld [vmem:[%s1778_s7 + $0x48] sm:$0xff]   ;;  %v1564_v54 = vld [vmem:[%s1778_s7 + $0x40] sm:$0xff]   ;;  %v1579_v1 = vld [vmem:[%s1780_s8 + $0x50] ss:$12 sps:$4 sm:$0xff]  }
  0x41   : > { %1392 = vmatprep.subr.bf16.mxu0 %v1549_v39  ;;  %v1562_v52 = vld [vmem:[%s1778_s7 + $0x8] sm:$0xff]   ;;  %v1566_v55 = vld [vmem:[%s1778_s7 + $0x80] sm:$0xff]   ;;  %v1577_v3 = vld [vmem:[%s1780_s8 + $0x30] ss:$12 sps:$4 sm:$0xff]  }
  0x42   : > { %1471 = vmatpush3.bf16.msra.mxu1 %v1548_v38  ;;  %v1563_v53 = vld [vmem:[%s1778_s7 + $0x88] sm:$0xff]   ;;  %v1569_v56 = vld [vmem:[%s1780_s8 + $0x4] ss:$12 sps:$4 sm:$0xff]   ;;  %v1575_v0 = vld [vmem:[%s1780_s8 + $0x34] ss:$12 sps:$4 sm:$0xff]  }
  0x43   : > { %1472 = vmatprep.subr.bf16.mxu1 %v1551_v41  ;;  %v1570_v57 = vld [vmem:[%s1780_s8 + $0x8] ss:$12 sps:$4 sm:$0xff]   ;;  %v1565_v58 = vld [vmem:[%s1778_s7] sm:$0xff]   ;;  %766 = vmatprep.mubr.bf16.mxu0 %v1569_v56  ;;  %v1580_v4 = vld [vmem:[%s1780_s8 + $0x4c] ss:$12 sps:$4 sm:$0xff]  }
  0x44   : > { %1393 = vmatpush3.bf16.msra.mxu0 %v1550_v40  ;;  %1484 = vmatprep.mubr.bf16.mxu1 %v1570_v57  ;;  %v1567_v59 = vld [vmem:[%s1780_s8] ss:$12 sps:$4 sm:$0xff]   ;;  %v1572_v60 = vld [vmem:[%s1780_s8 + $0x1c] ss:$12 sps:$4 sm:$0xff]   ;;  %v1578_v62 = vld [vmem:[%s1780_s8 + $0x38] ss:$12 sps:$4 sm:$0xff]  }
  0x45   : > { %1394 = vmatprep.subr.bf16.mxu0 %v1552_v42  ;;  %v1571_v61 = vld [vmem:[%s1780_s8 + $0x20] ss:$12 sps:$4 sm:$0xff]   ;;  %v1574_v63 = vld [vmem:[%s1780_s8 + $0x18] ss:$12 sps:$4 sm:$0xff]   ;;  %v1586_v2 = vld [vmem:[%s1780_s8 + $0x68] ss:$12 sps:$4 sm:$0xff]  }
  0x46   : > { %1473 = vmatpush3.bf16.msra.mxu1 %v1551_v41  ;;  %v1587_v5 = vld [vmem:[%s1780_s8 + $0x80] ss:$12 sps:$4 sm:$0xff]   ;;  %v1594_v6 = vld [vmem:[%s1780_s8 + $0x98] ss:$12 sps:$4 sm:$0xff]   ;;  %v1582_v7 = vld [vmem:[%s1780_s8 + $0x48] ss:$12 sps:$4 sm:$0xff]  }
  0x47   : > { %1474 = vmatprep.subr.bf16.mxu1 %v1554_v44  ;;  %v1583_v8 = vld [vmem:[%s1780_s8 + $0x64] ss:$12 sps:$4 sm:$0xff]   ;;  %v1585_v10 = vld [vmem:[%s1780_s8 + $0x60] ss:$12 sps:$4 sm:$0xff]   ;;  %v1588_v11 = vld [vmem:[%s1780_s8 + $0x7c] ss:$12 sps:$4 sm:$0xff]  }
  0x48   : > { %1395 = vmatpush3.bf16.msra.mxu0 %v1553_v43  ;;  %v1595_v9 = vld [vmem:[%s1780_s8 + $0xb0] ss:$12 sps:$4 sm:$0xff]   ;;  %v1590_v12 = vld [vmem:[%s1780_s8 + $0x78] ss:$12 sps:$4 sm:$0xff]   ;;  %v1591_v13 = vld [vmem:[%s1780_s8 + $0x94] ss:$12 sps:$4 sm:$0xff]  }
  0x49   : > { %1396 = vmatprep.subr.bf16.mxu0 %v1555_v45  ;;  %v1593_v14 = vld [vmem:[%s1780_s8 + $0x90] ss:$12 sps:$4 sm:$0xff]   ;;  %v1596_v15 = vld [vmem:[%s1780_s8 + $0xac] ss:$12 sps:$4 sm:$0xff]   ;;  %v1598_v16 = vld [vmem:[%s1780_s8 + $0xa8] ss:$12 sps:$4 sm:$0xff]  }
  0x4a   : > { %1475 = vmatpush3.bf16.msra.mxu1 %v1554_v44  ;;  %v366_v22 = vld [vmem:[#allocation2 + $0x30] sm:$0xff]  ;;  %v367_v30 = vld [vmem:[#allocation2] sm:$0xff]  ;;  %v368_v37 = vld [vmem:[#allocation2 + $0x58] sm:$0xff] }
  0x4b   : > { %1476 = vmatprep.subr.bf16.mxu1 %v1557_v46  ;;  %v369_v44 = vld [vmem:[#allocation2 + $0x18] sm:$0xff] }
  0x4c   : > { %1397 = vmatpush3.bf16.msra.mxu0 %v1556_v47 }
  0x4d   : > { %1398 = vmatprep.subr.bf16.mxu0 %v1558_v48 }
  0x4e   : > { %1477 = vmatpush3.bf16.msra.mxu1 %v1557_v46 }
  0x4f   : > { %1478 = vmatprep.subr.bf16.mxu1 %v1560_v49 }
  0x50   : > { %1399 = vmatpush3.bf16.msra.mxu0 %v1559_v50 }
  0x51   : > { %1400 = vmatprep.subr.bf16.mxu0 %v1561_v51 }
  0x52   : > { %1479 = vmatpush3.bf16.msra.mxu1 %v1560_v49 }
  0x53   : > { %1480 = vmatprep.subr.bf16.mxu1 %v1563_v53 }
  0x54   : > { %1401 = vmatpush3.bf16.msra.mxu0 %v1562_v52  ;;  %v370_v52 = vld [vmem:[#allocation2 + $0x50] sm:$0xff] }
  0x55   : > { %1402 = vmatprep.subr.bf16.mxu0 %v1564_v54 }
  0x56   : > { %1481 = vmatpush3.bf16.msra.mxu1 %v1563_v53 }
  0x57   : > { %1482 = vmatprep.subr.bf16.mxu1 %v1566_v55 }
  0x58   : > { %1403 = vmatpush3.bf16.msra.mxu0 %v1565_v58 }
  0x5a   : > { %1483 = vmatpush3.bf16.msra.mxu1 %v1566_v55 }
  0x5b   : > { %767 = vmatmul.mubr.bf16.vlgmr.msra.gmra.mxu0 %v1567_v59  ;;  %v371_v59 = vld [vmem:[#allocation2 + $0x68] sm:$0xff] }
  0x5c   : > { %774 = vmatprep.mubr.bf16.mxu0 %v1572_v60 }
  0x5d   : > { %1485 = vmatmul.mubr.bf16.vlgmr.msra.gmra.mxu1 %v1571_v61 }
  0x5e   : > { %1488 = vmatprep.mubr.bf16.mxu1 %v1578_v62 }
  0x63   : > { %775 = vmatmul.mubr.bf16.gmra.mxu0 %v1574_v63 }
  0x64   : > { %782 = vmatprep.mubr.bf16.mxu0 %v1575_v0 }
  0x65   : > { %1489 = vmatmul.mubr.bf16.gmra.mxu1 %v1579_v1  ;;  %v372_v1 = vld [vmem:[#allocation2 + $0x8] sm:$0xff] }
  0x66   : > { %1492 = vmatprep.mubr.bf16.mxu1 %v1586_v2 }
  0x6b   : > { %783 = vmatmul.mubr.bf16.gmra.mxu0 %v1577_v3 }
  0x6c   : > { %790 = vmatprep.mubr.bf16.mxu0 %v1580_v4 }
  0x6d   : > { %1493 = vmatmul.mubr.bf16.gmra.mxu1 %v1587_v5 }
  0x6e   : > { %1496 = vmatprep.mubr.bf16.mxu1 %v1594_v6 }
  0x73   : > { %791 = vmatmul.mubr.bf16.gmra.mxu0 %v1582_v7 }
  0x74   : > { %798 = vmatprep.mubr.bf16.mxu0 %v1583_v8  ;;  %v373_v8 = vld [vmem:[#allocation2 + $0x48] sm:$0xff] }
  0x75   : > { %1497 = vmatmul.mubr.bf16.gmra.mxu1 %v1595_v9 }
  0x7b   : > { %799 = vmatmul.mubr.bf16.gmra.mxu0 %v1585_v10 }
  0x7c   : > { %806 = vmatprep.mubr.bf16.mxu0 %v1588_v11 }
  0x83   : > { %807 = vmatmul.mubr.bf16.gmra.mxu0 %v1590_v12 }
  0x84   : > { %814 = vmatprep.mubr.bf16.mxu0 %v1591_v13 }
  0x8b   : > { %815 = vmatmul.mubr.bf16.gmra.mxu0 %v1593_v14 }
  0x8c   : > { %822 = vmatprep.mubr.bf16.mxu0 %v1596_v15 }
  0x93   : > { %823 = vmatmul.mubr.bf16.gmra.mxu0 %v1598_v16  ;;  %v374_v16 = vld [vmem:[#allocation2 + $0x40] sm:$0xff] }
 0x11b   : > { %v1404_v17 = vpop.f32.mrf.mxu0 }
 0x11d   : > { %v1405_v18 = vpop.f32.mrf.mxu0  ;;  %v1486_v19 = vpop.f32.mrf.mxu1 }
 0x11e   : > { %v1406_v20 = vadd.f32 %v1405_v18, %v1404_v17 }
 0x11f   : > { %v1407_v21 = vpop.f32.mrf.mxu0  ;;  %v865_v23 = vpop.f32.mrf.mxu1 }
 0x120   : > { %v866_v24 = vadd.f32 %v1406_v20, %v865_v23  ;;  %v375_v23 = vld [vmem:[#allocation2 + $0x20] sm:$0xff] }
 0x121   : > { %v1408_v25 = vpop.f32.mrf.mxu0  ;;  %v1487_v26 = vpop.f32.mrf.mxu1 }
 0x122   : > { %v928_v27 = vadd.f32 %v866_v24, %v366_v22  ;;  %v1409_v28 = vadd.f32 %v1408_v25, %v1407_v21 }
 0x123   : > { %v1410_v29 = vpop.f32.mrf.mxu0  ;;  %v868_v31 = vpop.f32.mrf.mxu1 }
 0x124   : > { %944 = vst [vmem:[#allocation2 + $0x30] sm:$0xff] %v928_v27  ;;  %v869_v32 = vadd.f32 %v1409_v28, %v868_v31 }
 0x125   : > { %v1411_v33 = vpop.f32.mrf.mxu0  ;;  %v1490_v34 = vpop.f32.mrf.mxu1 }
 0x126   : > { %v929_v35 = vadd.f32 %v869_v32, %v367_v30  ;;  %v1412_v36 = vadd.f32 %v1411_v33, %v1410_v29  ;;  %v376_v29 = vld [vmem:[#allocation2 + $0x10] sm:$0xff] }
 0x127   : > { %v1413_v38 = vpop.f32.mrf.mxu0  ;;  %v881_v41 = vpop.f32.mrf.mxu1 }
 0x128   : > { %945 = vst [vmem:[#allocation2] sm:$0xff] %v929_v35  ;;  %v874_v39 = vadd.f32 %v1486_v19, %v1412_v36  ;;  %v377_v36 = vld [vmem:[#allocation2 + $0x38] sm:$0xff] }
 0x129   : > { %v1414_v40 = vpop.f32.mrf.mxu0  ;;  %v1491_v48 = vpop.f32.mrf.mxu1 }
 0x12a   : > { %v930_v42 = vadd.f32 %v874_v39, %v368_v37  ;;  %v1415_v43 = vadd.f32 %v1414_v40, %v1413_v38 }
 0x12b   : > { %v1416_v45 = vpop.f32.mrf.mxu0  ;;  %v884_v55 = vpop.f32.mrf.mxu1 }
 0x12c   : > { %946 = vst [vmem:[#allocation2 + $0x58] sm:$0xff] %v930_v42  ;;  %v877_v46 = vadd.f32 %v1487_v26, %v1415_v43 }
 0x12d   : > { %v1417_v47 = vpop.f32.mrf.mxu0  ;;  %v1494_v62 = vpop.f32.mrf.mxu1 }
 0x12e   : > { %v931_v49 = vadd.f32 %v877_v46, %v369_v44  ;;  %v1418_v50 = vadd.f32 %v1417_v47, %v1416_v45  ;;  %v378_v44 = vld [vmem:[#allocation2 + $0x60] sm:$0xff] }
 0x12f   : > { %v1419_v51 = vpop.f32.mrf.mxu0  ;;  %v897_v5 = vpop.f32.mrf.mxu1 }
 0x130   : > { %947 = vst [vmem:[#allocation2 + $0x18] sm:$0xff] %v931_v49  ;;  %v882_v53 = vadd.f32 %v1418_v50, %v881_v41 }
 0x131   : > { %v1420_v54 = vpop.f32.mrf.mxu0  ;;  %v1495_v12 = vpop.f32.mrf.mxu1 }
 0x132   : > { %v932_v56 = vadd.f32 %v882_v53, %v370_v52  ;;  %v1421_v57 = vadd.f32 %v1420_v54, %v1419_v51  ;;  %v379_v51 = vld [vmem:[#allocation2 + $0x70] sm:$0xff] }
 0x133   : > { %v1422_v58 = vpop.f32.mrf.mxu0  ;;  %v900_v19 = vpop.f32.mrf.mxu1 }
 0x134   : > { %948 = vst [vmem:[#allocation2 + $0x50] sm:$0xff] %v932_v56  ;;  %v885_v60 = vadd.f32 %v1421_v57, %v884_v55  ;;  %v380_v56 = vld [vmem:[#allocation2 + $0x78] sm:$0xff] }
 0x135   : > { %v1423_v61 = vpop.f32.mrf.mxu0  ;;  %v1498_v26 = vpop.f32.mrf.mxu1 }
 0x136   : > { %v933_v63 = vadd.f32 %v885_v60, %v371_v59  ;;  %v1424_v0 = vadd.f32 %v1423_v61, %v1422_v58 }
 0x137   : > { %v1425_v2 = vpop.f32.mrf.mxu0  ;;  %v913_v33 = vpop.f32.mrf.mxu1 }
 0x138   : > { %949 = vst [vmem:[#allocation2 + $0x68] sm:$0xff] %v933_v63  ;;  %v890_v3 = vadd.f32 %v1490_v34, %v1424_v0 }
 0x139   : > { %v1426_v4 = vpop.f32.mrf.mxu0  ;;  %v1499_v40 = vpop.f32.mrf.mxu1 }
 0x13a   : > { %v934_v6 = vadd.f32 %v890_v3, %v372_v1  ;;  %v1427_v7 = vadd.f32 %v1426_v4, %v1425_v2 }
 0x13b   : > { %v1428_v9 = vpop.f32.mrf.mxu0  ;;  %v916_v47 = vpop.f32.mrf.mxu1 }
 0x13c   : > { %950 = vst [vmem:[#allocation2 + $0x8] sm:$0xff] %v934_v6  ;;  %v893_v10 = vadd.f32 %v1491_v48, %v1427_v7 }
 0x13d   : > { %v1429_v11 = vpop.f32.mrf.mxu0 }
 0x13e   : > { %v935_v13 = vadd.f32 %v893_v10, %v373_v8  ;;  %v1430_v14 = vadd.f32 %v1429_v11, %v1428_v9 }
 0x13f   : > { %v1431_v15 = vpop.f32.mrf.mxu0 }
 0x140   : > { %951 = vst [vmem:[#allocation2 + $0x48] sm:$0xff] %v935_v13  ;;  %v898_v17 = vadd.f32 %v1430_v14, %v897_v5 }
 0x141   : > { %v1432_v18 = vpop.f32.mrf.mxu0 }
 0x142   : > { %v936_v20 = vadd.f32 %v898_v17, %v374_v16  ;;  %v1433_v21 = vadd.f32 %v1432_v18, %v1431_v15 }
 0x143   : > { %v1434_v22 = vpop.f32.mrf.mxu0 }
 0x144   : > { %952 = vst [vmem:[#allocation2 + $0x40] sm:$0xff] %v936_v20  ;;  %v901_v24 = vadd.f32 %v1433_v21, %v900_v19 }
 0x145   : > { %v1435_v25 = vpop.f32.mrf.mxu0 }
 0x146   : > { %v937_v27 = vadd.f32 %v901_v24, %v375_v23  ;;  %v1436_v28 = vadd.f32 %v1435_v25, %v1434_v22 }
 0x147   : > { %v1437_v30 = vpop.f32.mrf.mxu0 }
 0x148   : > { %953 = vst [vmem:[#allocation2 + $0x20] sm:$0xff] %v937_v27  ;;  %v906_v31 = vadd.f32 %v1494_v62, %v1436_v28  ;;  %v381_v62 = vld [vmem:[#allocation2 + $0x28] sm:$0xff] }
 0x149   : > { %v1438_v32 = vpop.f32.mrf.mxu0 }
 0x14a   : > { %v938_v34 = vadd.f32 %v906_v31, %v376_v29  ;;  %v1439_v35 = vadd.f32 %v1438_v32, %v1437_v30 }
 0x14b   : > { %v1440_v37 = vpop.f32.mrf.mxu0 }
 0x14c   : > { %954 = vst [vmem:[#allocation2 + $0x10] sm:$0xff] %v938_v34  ;;  %v909_v38 = vadd.f32 %v1495_v12, %v1439_v35 }
 0x14d   : > { %v1441_v39 = vpop.f32.mrf.mxu0 }
 0x14e   : > { %v939_v41 = vadd.f32 %v909_v38, %v377_v36  ;;  %v1442_v42 = vadd.f32 %v1441_v39, %v1440_v37 }
 0x14f   : > { %v1443_v43 = vpop.f32.mrf.mxu0 }
 0x150   : > { %955 = vst [vmem:[#allocation2 + $0x38] sm:$0xff] %v939_v41  ;;  %v914_v45 = vadd.f32 %v1442_v42, %v913_v33 }
 0x151   : > { %v1444_v46 = vpop.f32.mrf.mxu0 }
 0x152   : > { %v940_v48 = vadd.f32 %v914_v45, %v378_v44  ;;  %v1445_v49 = vadd.f32 %v1444_v46, %v1443_v43 }
 0x153   : > { %v1446_v50 = vpop.f32.mrf.mxu0 }
 0x154   : > { %956 = vst [vmem:[#allocation2 + $0x60] sm:$0xff] %v940_v48  ;;  %v917_v52 = vadd.f32 %v1445_v49, %v916_v47 }
 0x155   : > { %v1447_v53 = vpop.f32.mrf.mxu0 }
 0x156   : > { %v941_v54 = vadd.f32 %v917_v52, %v379_v51  ;;  %v1448_v55 = vadd.f32 %v1447_v53, %v1446_v50 }
 0x157   : > { %v1449_v57 = vpop.f32.mrf.mxu0 }
 0x158   : > { %957 = vst [vmem:[#allocation2 + $0x70] sm:$0xff] %v941_v54  ;;  %v922_v58 = vadd.f32 %v1498_v26, %v1448_v55 }
 0x159   : > { %v1450_v59 = vpop.f32.mrf.mxu0 }
 0x15a   : > { %v942_v60 = vadd.f32 %v922_v58, %v380_v56  ;;  %v1451_v61 = vadd.f32 %v1450_v59, %v1449_v57 }
 0x15c   : > { %958 = vst [vmem:[#allocation2 + $0x78] sm:$0xff] %v942_v60  ;;  %v925_v63 = vadd.f32 %v1499_v40, %v1451_v61  ;;  %963 = sbr.rel (%p1302_p11) target bundleno = 369 (0x171), region = 66 }
 0x15e   : > { %v943_v0 = vadd.f32 %v925_v63, %v381_v62 }
 0x160   : > { %959 = vst [vmem:[#allocation2 + $0x28] sm:$0xff] %v943_v0 }
 0x161   : > { %v964_v1 = vld [vmem:[#allocation2 + $0x30] sm:$0xff]  ;;  %v965_v2 = vld [vmem:[#allocation2] sm:$0xff]  ;;  %v966_v6 = vld [vmem:[#allocation2 + $0x58] sm:$0xff] }
 0x162   : > { %v1303_v3 = vld [vmem:[%s1876_s2] ss:$0 sm:$0xff]  ;;  %v967_v7 = vld [vmem:[#allocation2 + $0x18] sm:$0xff]  ;;  %v968_v8 = vld [vmem:[#allocation2 + $0x50] sm:$0xff] }
 0x163   : > { %v987_v4 = vadd.f32 %v1303_v3, %v964_v1  ;;  %v988_v5 = vadd.f32 %v1303_v3, %v965_v2  ;;  %v989_v9 = vadd.f32 %v1303_v3, %v966_v6  ;;  %v990_v10 = vadd.f32 %v1303_v3, %v967_v7  ;;  %v969_v11 = vld [vmem:[#allocation2 + $0x68] sm:$0xff]  ;;  %v972_v19 = vld [vmem:[#allocation2 + $0x40] sm:$0xff]  ;;  %v974_v21 = vld [vmem:[#allocation2 + $0x10] sm:$0xff] }
 0x164   : > { %v991_v12 = vadd.f32 %v1303_v3, %v968_v8  ;;  %v970_v13 = vld [vmem:[#allocation2 + $0x8] sm:$0xff]  ;;  %v992_v17 = vadd.f32 %v1303_v3, %v969_v11  ;;  %v973_v20 = vld [vmem:[#allocation2 + $0x20] sm:$0xff]  ;;  %v975_v26 = vld [vmem:[#allocation2 + $0x38] sm:$0xff]  ;;  %v995_v31 = vadd.f32 %v1303_v3, %v972_v19  ;;  %v997_v36 = vadd.f32 %v1303_v3, %v974_v21 }
 0x165   : > { %v971_v14 = vld [vmem:[#allocation2 + $0x48] sm:$0xff]  ;;  %v1003_v15 = vmax.f32 %v987_v4, 0.0  ;;  %v1004_v16 = vmax.f32 %v988_v5, 0.0  ;;  %v993_v18 = vadd.f32 %v1303_v3, %v970_v13  ;;  %v1005_v22 = vmax.f32 %v989_v9, 0.0  ;;  %v976_v27 = vld [vmem:[#allocation2 + $0x60] sm:$0xff]  ;;  %v977_v32 = vld [vmem:[#allocation2 + $0x70] sm:$0xff] }
 0x166   : > { %v1006_v23 = vmax.f32 %v990_v10, 0.0  ;;  %v1007_v24 = vmax.f32 %v991_v12, 0.0  ;;  %v994_v25 = vadd.f32 %v1303_v3, %v971_v14  ;;  %v1008_v29 = vmax.f32 %v992_v17, 0.0  ;;  %v978_v37 = vld [vmem:[#allocation2 + $0x78] sm:$0xff] }
 0x167   : > { %v1344_v28 = vpack.c.bf16 %v1004_v16, %v1003_v15  ;;  %v1009_v30 = vmax.f32 %v993_v18, 0.0  ;;  %v996_v35 = vadd.f32 %v1303_v3, %v973_v20  ;;  %v979_v38 = vld [vmem:[#allocation2 + $0x28] sm:$0xff]  ;;  %v1011_v40 = vmax.f32 %v995_v31, 0.0 }
 0x168   : > { %v1349_v33 = vpack.c.bf16 %v1006_v23, %v1005_v22  ;;  %v1010_v34 = vmax.f32 %v994_v25, 0.0  ;;  %v1354_v39 = vpack.c.bf16 %v1008_v29, %v1007_v24  ;;  %v998_v41 = vadd.f32 %v1303_v3, %v975_v26 }
 0x169   : > { %1345 = vst [vmem:[%s1877_s3] sm:$0xff] %v1344_v28   ;;  %v999_v42 = vadd.f32 %v1303_v3, %v976_v27  ;;  %v1012_v44 = vmax.f32 %v996_v35, 0.0  ;;  %v1013_v45 = vmax.f32 %v997_v36, 0.0  ;;  %v1000_v46 = vadd.f32 %v1303_v3, %v977_v32 }
 0x16a   : > { %1381 = vst [vmem:[%s1877_s3 + $0x8] sm:$0xff] %v1349_v33   ;;  %v1359_v43 = vpack.c.bf16 %v1010_v34, %v1009_v30  ;;  %1382 = vst [vmem:[%s1877_s3 + $0x10] sm:$0xff] %v1354_v39   ;;  %v1014_v47 = vmax.f32 %v998_v41, 0.0  ;;  %v1001_v49 = vadd.f32 %v1303_v3, %v978_v37  ;;  %v1002_v50 = vadd.f32 %v1303_v3, %v979_v38 }
 0x16b   : > { %v1015_v48 = vmax.f32 %v999_v42, 0.0  ;;  %v1364_v51 = vpack.c.bf16 %v1012_v44, %v1011_v40  ;;  %v1016_v52 = vmax.f32 %v1000_v46, 0.0 }
 0x16c   : > { %1383 = vst [vmem:[%s1877_s3 + $0x18] sm:$0xff] %v1359_v43   ;;  %v1369_v53 = vpack.c.bf16 %v1014_v47, %v1013_v45  ;;  %v1017_v54 = vmax.f32 %v1001_v49, 0.0  ;;  %v1018_v55 = vmax.f32 %v1002_v50, 0.0 }
 0x16d   : > { %1384 = vst [vmem:[%s1877_s3 + $0x20] sm:$0xff] %v1364_v51   ;;  %v1374_v56 = vpack.c.bf16 %v1016_v52, %v1015_v48 }
 0x16e   : > { %1385 = vst [vmem:[%s1877_s3 + $0x28] sm:$0xff] %v1369_v53   ;;  %v1379_v57 = vpack.c.bf16 %v1018_v55, %v1017_v54 }
 0x16f   : > { %1386 = vst [vmem:[%s1877_s3 + $0x30] sm:$0xff] %v1374_v56  }
 0x170   : > { %1387 = vst [vmem:[%s1877_s3 + $0x38] sm:$0xff] %v1379_v57  }
 0x171 PF: > { %s13_s16 = sadd.s32 1, %s1637_s16   ;;  %s1878_s12 = smov %s1625_s13 }
 0x172   : > { %p10_p12 = scmp.ge.s32.totalorder %s13_s16, 5   ;;  %s1879_s13 = smov %s1695_s20 }
 0x173   : > { %s1880_s14 = smov %s1633_s15  ;;  %s1881_s15 = smov %s1883_s17 }
 0x174   :  { %12 = sbr.rel (!%p10_p12) target bundleno = 3 (0x3), region = 113 }

// kernel: multi_task_net_forward.20
= control target key start
LH: loop header
LB: loop body
LE: loop exit
PB: predicated region body
PF: predicated region fallthrough
CT: control target
= control target key end

     0   :  { %s1831_s15 = smov 0   ;;  %s1833_s16 = smov 0   ;;  %s2087_s0 = inlined_call_operand.vmem [shape: bf16[128,1152], index: 0, kind: input, shape index: {}]   ;;  %s2088_s1 = inlined_call_operand.vmem [shape: bf16[1152,128], index: 1, kind: input, shape index: {}]   ;;  %s2089_s2 = inlined_call_operand.vmem [shape: f32[1,128], index: 2, kind: input, shape index: {}]   ;;  %s2090_s3 = inlined_call_operand.vmem [shape: bf16[128,128], index: 3, kind: input, shape index: {}]   ;;  %s2091_s4 = inlined_call_operand.vmem [shape: bf16[128,128], index: 4, kind: output, shape index: {}]  }
   0x1   :  { %s1835_s17 = smov 0   ;;  %s1837_s18 = smov 0  }
   0x2   :  { %s1839_s19 = smov 0  }
   0x3 LB: > { %s26_s20 = sadd.s32 1, %s1799_s18  ;;  %p49_p1 = scmp.ne.s32.totalorder %s1791_s16, %s1787_s15  ;;  %s1803_s19 = sphi %s1839_s19, %s14_s19   ;;  %s1799_s18 = sphi %s1837_s18, %s2095_s18   ;;  %s1795_s17 = sphi %s1835_s17, %s2094_s17   ;;  %s1791_s16 = sphi %s1833_s16, %s2093_s16   ;;  %s1787_s15 = sphi %s1831_s15, %s2092_s15  }
   0x4   : > { %p27_p0 = scmp.ge.s32.totalorder %s26_s20, 3  ;;  %p50_p2 = scmp.eq.s32.totalorder %s1803_s19, 0 }
   0x5   : > { %s42_s22 = sadd.s32 1, %s1791_s16  ;;  %p1344_p5 = scmp.ge.s32.totalorder %s1803_s19, 3 }
   0x6   : > { %s2097_s20 = smov (%p27_p0, %s26_s20), 0  ;;  %p51_p3 = por %p50_p2, %p49_p1 }
   0x7   : > { %s38_s21 = ssub.s32 %s1799_s18, %s2097_s20  ;;  %203 = sbr.rel (%p1344_p5) target bundleno = 35 (0x23), region = 24 }
   0x8   : > { %p40_p4 = scmp.eq.s32.totalorder %s38_s21, 0 }
   0xa   : > { %s1866_s23 = scalar_select %p40_p4, %s1791_s16, %s42_s22  }
   0xc   : > { %206 = sbr.rel (!%p51_p3) target bundleno = 35 (0x23), region = 28  ;;  %s208_s24 = sand.u32 (%p51_p3), 1, %s1791_s16  }
   0xd   : > { %s1451_s25 = smul.u32 (%p51_p3), 12, %s1799_s18 }
   0xe   : > { %s1666_s26 = smul.u32 (%p51_p3), 192, %s208_s24 }
   0xf   : > { %s1874_s29 = scalar_lea.vmem (%p51_p3), %s2087_s0, %s1451_s25 }
  0x10   : > { %v231_v0 = vld [vmem:[%s1874_s29] sm:$0xff] (%p51_p3)  ;;  %v235_v2 = vld [vmem:[%s1874_s29 + $0x48] sm:$0xff] (%p51_p3)  ;;  %s1879_s30 = scalar_lea.vmem (%p51_p3), [#allocation3], %s1666_s26  ;;  %v239_v4 = vld [vmem:[%s1874_s29 + $0x90] sm:$0xff] (%p51_p3) }
  0x11   : > { %v233_v1 = vld [vmem:[%s1874_s29 + $0x24] sm:$0xff]  ;;  %232 = vst [vmem:[%s1879_s30] sm:$0xff] %v231_v0  ;;  %236 = vst [vmem:[%s1879_s30 + $0x18] sm:$0xff] %v235_v2  ;;  %v237_v3 = vld [vmem:[%s1874_s29 + $0x6c] sm:$0xff] }
  0x12   : > { %234 = vst [vmem:[%s1879_s30 + $0xc] sm:$0xff] %v233_v1  ;;  %v241_v5 = vld [vmem:[%s1874_s29 + $0xb4] sm:$0xff]  ;;  %238 = vst [vmem:[%s1879_s30 + $0x24] sm:$0xff] %v237_v3  ;;  %v245_v7 = vld [vmem:[%s1874_s29 + $0xfc] sm:$0xff] }
  0x13   : > { %240 = vst [vmem:[%s1879_s30 + $0x30] sm:$0xff] %v239_v4  ;;  %242 = vst [vmem:[%s1879_s30 + $0x3c] sm:$0xff] %v241_v5  ;;  %v243_v6 = vld [vmem:[%s1874_s29 + $0xd8] sm:$0xff]  ;;  %v247_v8 = vld [vmem:[%s1874_s29 + $0x120] sm:$0xff] }
  0x14   : > { %244 = vst [vmem:[%s1879_s30 + $0x48] sm:$0xff] %v243_v6  ;;  %246 = vst [vmem:[%s1879_s30 + $0x54] sm:$0xff] %v245_v7  ;;  %v249_v9 = vld [vmem:[%s1874_s29 + $0x144] sm:$0xff]  ;;  %v253_v11 = vld [vmem:[%s1874_s29 + $0x18c] sm:$0xff] }
  0x15   : > { %248 = vst [vmem:[%s1879_s30 + $0x60] sm:$0xff] %v247_v8  ;;  %v251_v10 = vld [vmem:[%s1874_s29 + $0x168] sm:$0xff]  ;;  %250 = vst [vmem:[%s1879_s30 + $0x6c] sm:$0xff] %v249_v9  ;;  %v255_v12 = vld [vmem:[%s1874_s29 + $0x1b0] sm:$0xff] }
  0x16   : > { %252 = vst [vmem:[%s1879_s30 + $0x78] sm:$0xff] %v251_v10  ;;  %254 = vst [vmem:[%s1879_s30 + $0x84] sm:$0xff] %v253_v11  ;;  %v257_v13 = vld [vmem:[%s1874_s29 + $0x1d4] sm:$0xff]  ;;  %v261_v15 = vld [vmem:[%s1874_s29 + $0x21c] sm:$0xff] }
  0x17   : > { %v259_v14 = vld [vmem:[%s1874_s29 + $0x1f8] sm:$0xff]  ;;  %256 = vst [vmem:[%s1879_s30 + $0x90] sm:$0xff] %v255_v12  ;;  %258 = vst [vmem:[%s1879_s30 + $0x9c] sm:$0xff] %v257_v13  ;;  %v1346_v16 = vld [vmem:[%s1874_s29 + $0x8] sm:$0xf] }
  0x18   : > { %260 = vst [vmem:[%s1879_s30 + $0xa8] sm:$0xff] %v259_v14  ;;  %v1348_v17 = vld [vmem:[%s1874_s29 + $0x2c] sm:$0xf]  ;;  %262 = vst [vmem:[%s1879_s30 + $0xb4] sm:$0xff] %v261_v15  ;;  %v1350_v18 = vld [vmem:[%s1874_s29 + $0x50] sm:$0xf] }
  0x19   : > { %1347 = vst [vmem:[%s1879_s30 + $0x8] sm:$0xf] %v1346_v16  ;;  %1349 = vst [vmem:[%s1879_s30 + $0x14] sm:$0xf] %v1348_v17  ;;  %v1352_v19 = vld [vmem:[%s1874_s29 + $0x74] sm:$0xf] }
  0x1a   : > { %v1354_v20 = vld [vmem:[%s1874_s29 + $0x98] sm:$0xf]  ;;  %1351 = vst [vmem:[%s1879_s30 + $0x20] sm:$0xf] %v1350_v18  ;;  %1353 = vst [vmem:[%s1879_s30 + $0x2c] sm:$0xf] %v1352_v19 }
  0x1b   : > { %1355 = vst [vmem:[%s1879_s30 + $0x38] sm:$0xf] %v1354_v20  ;;  %v1356_v21 = vld [vmem:[%s1874_s29 + $0xbc] sm:$0xf]  ;;  %v1358_v22 = vld [vmem:[%s1874_s29 + $0xe0] sm:$0xf] }
  0x1c   : > { %v1360_v23 = vld [vmem:[%s1874_s29 + $0x104] sm:$0xf]  ;;  %1357 = vst [vmem:[%s1879_s30 + $0x44] sm:$0xf] %v1356_v21  ;;  %1359 = vst [vmem:[%s1879_s30 + $0x50] sm:$0xf] %v1358_v22 }
  0x1d   : > { %1361 = vst [vmem:[%s1879_s30 + $0x5c] sm:$0xf] %v1360_v23  ;;  %v1362_v24 = vld [vmem:[%s1874_s29 + $0x128] sm:$0xf]  ;;  %v1364_v25 = vld [vmem:[%s1874_s29 + $0x14c] sm:$0xf] }
  0x1e   : > { %v1366_v26 = vld [vmem:[%s1874_s29 + $0x170] sm:$0xf]  ;;  %1363 = vst [vmem:[%s1879_s30 + $0x68] sm:$0xf] %v1362_v24  ;;  %1365 = vst [vmem:[%s1879_s30 + $0x74] sm:$0xf] %v1364_v25 }
  0x1f   : > { %1367 = vst [vmem:[%s1879_s30 + $0x80] sm:$0xf] %v1366_v26  ;;  %v1368_v27 = vld [vmem:[%s1874_s29 + $0x194] sm:$0xf]  ;;  %v1370_v28 = vld [vmem:[%s1874_s29 + $0x1b8] sm:$0xf] }
  0x20   : > { %v1372_v29 = vld [vmem:[%s1874_s29 + $0x1dc] sm:$0xf]  ;;  %1369 = vst [vmem:[%s1879_s30 + $0x8c] sm:$0xf] %v1368_v27  ;;  %1371 = vst [vmem:[%s1879_s30 + $0x98] sm:$0xf] %v1370_v28 }
  0x21   : > { %1373 = vst [vmem:[%s1879_s30 + $0xa4] sm:$0xf] %v1372_v29  ;;  %v1374_v30 = vld [vmem:[%s1874_s29 + $0x200] sm:$0xf]  ;;  %v1376_v31 = vld [vmem:[%s1874_s29 + $0x224] sm:$0xf] }
  0x22   : > { %1375 = vst [vmem:[%s1879_s30 + $0xb0] sm:$0xf] %v1374_v30  ;;  %1377 = vst [vmem:[%s1879_s30 + $0xbc] sm:$0xf] %v1376_v31 }
  0x23 PF: > { %p1378_p6 = scmp.ge.s32.totalorder %s1803_s19, 1  ;;  %p319_p7 = scmp.lt.s32.totalorder %s1803_s19, 4 }
  0x25   : > { %p320_p8 = pnand %p1378_p6, %p319_p7 }
  0x26   : > { %s326_s5 = sand.u32 (!%p320_p8), 1, %s1787_s15   ;;  %s375_s6 = smul.u32 (!%p320_p8), 48, %s1795_s17 }
  0x27   : > { %323 = sbr.rel (%p320_p8) target bundleno = 379 (0x17b), region = 58  ;;  %p1380_p10 = scmp.ne.s32.totalorder (!%p320_p8), %s1795_s17, 0 }
  0x28   : > { %s1667_s7 = smul.u32 (!%p320_p8), 192, %s326_s5  ;;  %p376_p9 = scmp.lt.s32.totalorder (!%p320_p8), %s375_s6, 143 }
  0x2a   : > { %s1951_s12 = scalar_lea.vmem (!%p320_p8), [#allocation3], %s1667_s7 }
  0x2c   : > { %s2099_s6 = smov (!%p376_p9, %s375_s6), 143  ;;  %409 = sbr.rel (%p1380_p10) target bundleno = 58 (0x3a), region = 66 }
  0x2d   : > { %s1379_s8 = sshll.u32 %s2099_s6, 2 }
  0x2e   : > { %s1949_s11 = scalar_lea.vmem %s2088_s1, %s1379_s8 }
  0x31   : > { %v1805_v32 = vmov 0.0  }
  0x32   : > { %410 = vst [vmem:[#allocation2 + $0x30] sm:$0xff] %v1805_v32  ;;  %411 = vst [vmem:[#allocation2] sm:$0xff] %v1805_v32 }
  0x33   : > { %412 = vst [vmem:[#allocation2 + $0x58] sm:$0xff] %v1805_v32  ;;  %413 = vst [vmem:[#allocation2 + $0x18] sm:$0xff] %v1805_v32 }
  0x34   : > { %414 = vst [vmem:[#allocation2 + $0x50] sm:$0xff] %v1805_v32  ;;  %415 = vst [vmem:[#allocation2 + $0x68] sm:$0xff] %v1805_v32 }
  0x35   : > { %416 = vst [vmem:[#allocation2 + $0x8] sm:$0xff] %v1805_v32  ;;  %417 = vst [vmem:[#allocation2 + $0x48] sm:$0xff] %v1805_v32 }
  0x36   : > { %418 = vst [vmem:[#allocation2 + $0x40] sm:$0xff] %v1805_v32  ;;  %419 = vst [vmem:[#allocation2 + $0x20] sm:$0xff] %v1805_v32 }
  0x37   : > { %420 = vst [vmem:[#allocation2 + $0x10] sm:$0xff] %v1805_v32  ;;  %421 = vst [vmem:[#allocation2 + $0x38] sm:$0xff] %v1805_v32 }
  0x38   : > { %422 = vst [vmem:[#allocation2 + $0x60] sm:$0xff] %v1805_v32  ;;  %423 = vst [vmem:[#allocation2 + $0x70] sm:$0xff] %v1805_v32 }
  0x39   : > { %424 = vst [vmem:[#allocation2 + $0x78] sm:$0xff] %v1805_v32  ;;  %425 = vst [vmem:[#allocation2 + $0x28] sm:$0xff] %v1805_v32 }
  0x3a PF: > { %v1709_v33 = vld [vmem:[%s1949_s11 + $0x78] sm:$0xff]   ;;  %v1712_v36 = vld [vmem:[%s1949_s11 + $0x70] sm:$0xff]   ;;  %v1715_v39 = vld [vmem:[%s1949_s11 + $0x68] sm:$0xff]   ;;  %p1429_p11 = scmp.ne.s32.totalorder %s1795_s17, 2 }
  0x3b   : > { %v1710_v34 = vld [vmem:[%s1949_s11 + $0x38] sm:$0xff]   ;;  %1554 = vmatprep.subr.bf16.mxu0 %v1709_v33  ;;  %v1713_v37 = vld [vmem:[%s1949_s11 + $0x30] sm:$0xff]   ;;  %v1716_v40 = vld [vmem:[%s1949_s11 + $0x28] sm:$0xff]  }
  0x3c   : > { %v1711_v35 = vld [vmem:[%s1949_s11 + $0xb8] sm:$0xff]   ;;  %1555 = vmatpush3.bf16.msra.mxu0 %v1710_v34  ;;  %v1714_v38 = vld [vmem:[%s1949_s11 + $0xb0] sm:$0xff]   ;;  %v1717_v41 = vld [vmem:[%s1949_s11 + $0xa8] sm:$0xff]  }
  0x3d   : > { %1634 = vmatprep.subr.bf16.mxu1 %v1711_v35  ;;  %1556 = vmatprep.subr.bf16.mxu0 %v1712_v36  ;;  %v1718_v42 = vld [vmem:[%s1949_s11 + $0x60] sm:$0xff]   ;;  %v1721_v45 = vld [vmem:[%s1949_s11 + $0x58] sm:$0xff]   ;;  %v1724_v48 = vld [vmem:[%s1949_s11 + $0x50] sm:$0xff]  }
  0x3e   : > { %1635 = vmatpush3.bf16.msra.mxu1 %v1711_v35  ;;  %v1719_v43 = vld [vmem:[%s1949_s11 + $0x20] sm:$0xff]   ;;  %v1723_v46 = vld [vmem:[%s1949_s11 + $0x98] sm:$0xff]   ;;  %v1726_v49 = vld [vmem:[%s1949_s11 + $0x90] sm:$0xff]  }
  0x3f   : > { %1636 = vmatprep.subr.bf16.mxu1 %v1714_v38  ;;  %v1720_v44 = vld [vmem:[%s1949_s11 + $0xa0] sm:$0xff]   ;;  %v1722_v47 = vld [vmem:[%s1949_s11 + $0x18] sm:$0xff]   ;;  %v1725_v50 = vld [vmem:[%s1949_s11 + $0x10] sm:$0xff]  }
  0x40   : > { %1557 = vmatpush3.bf16.msra.mxu0 %v1713_v37  ;;  %v1727_v51 = vld [vmem:[%s1949_s11 + $0x48] sm:$0xff]   ;;  %v1730_v54 = vld [vmem:[%s1949_s11 + $0x40] sm:$0xff]   ;;  %v1745_v1 = vld [vmem:[%s1951_s12 + $0x50] ss:$12 sps:$4 sm:$0xff]  }
  0x41   : > { %1558 = vmatprep.subr.bf16.mxu0 %v1715_v39  ;;  %v1728_v52 = vld [vmem:[%s1949_s11 + $0x8] sm:$0xff]   ;;  %v1732_v55 = vld [vmem:[%s1949_s11 + $0x80] sm:$0xff]   ;;  %v1743_v3 = vld [vmem:[%s1951_s12 + $0x30] ss:$12 sps:$4 sm:$0xff]  }
  0x42   : > { %1637 = vmatpush3.bf16.msra.mxu1 %v1714_v38  ;;  %v1729_v53 = vld [vmem:[%s1949_s11 + $0x88] sm:$0xff]   ;;  %v1735_v56 = vld [vmem:[%s1951_s12 + $0x4] ss:$12 sps:$4 sm:$0xff]   ;;  %v1741_v0 = vld [vmem:[%s1951_s12 + $0x34] ss:$12 sps:$4 sm:$0xff]  }
  0x43   : > { %1638 = vmatprep.subr.bf16.mxu1 %v1717_v41  ;;  %v1736_v57 = vld [vmem:[%s1951_s12 + $0x8] ss:$12 sps:$4 sm:$0xff]   ;;  %v1731_v58 = vld [vmem:[%s1949_s11] sm:$0xff]   ;;  %826 = vmatprep.mubr.bf16.mxu0 %v1735_v56  ;;  %v1746_v4 = vld [vmem:[%s1951_s12 + $0x4c] ss:$12 sps:$4 sm:$0xff]  }
  0x44   : > { %1559 = vmatpush3.bf16.msra.mxu0 %v1716_v40  ;;  %1650 = vmatprep.mubr.bf16.mxu1 %v1736_v57  ;;  %v1733_v59 = vld [vmem:[%s1951_s12] ss:$12 sps:$4 sm:$0xff]   ;;  %v1738_v60 = vld [vmem:[%s1951_s12 + $0x1c] ss:$12 sps:$4 sm:$0xff]   ;;  %v1744_v62 = vld [vmem:[%s1951_s12 + $0x38] ss:$12 sps:$4 sm:$0xff]  }
  0x45   : > { %1560 = vmatprep.subr.bf16.mxu0 %v1718_v42  ;;  %v1737_v61 = vld [vmem:[%s1951_s12 + $0x20] ss:$12 sps:$4 sm:$0xff]   ;;  %v1740_v63 = vld [vmem:[%s1951_s12 + $0x18] ss:$12 sps:$4 sm:$0xff]   ;;  %v1752_v2 = vld [vmem:[%s1951_s12 + $0x68] ss:$12 sps:$4 sm:$0xff]  }
  0x46   : > { %1639 = vmatpush3.bf16.msra.mxu1 %v1717_v41  ;;  %v1753_v5 = vld [vmem:[%s1951_s12 + $0x80] ss:$12 sps:$4 sm:$0xff]   ;;  %v1760_v6 = vld [vmem:[%s1951_s12 + $0x98] ss:$12 sps:$4 sm:$0xff]   ;;  %v1748_v7 = vld [vmem:[%s1951_s12 + $0x48] ss:$12 sps:$4 sm:$0xff]  }
  0x47   : > { %1640 = vmatprep.subr.bf16.mxu1 %v1720_v44  ;;  %v1749_v8 = vld [vmem:[%s1951_s12 + $0x64] ss:$12 sps:$4 sm:$0xff]   ;;  %v1751_v10 = vld [vmem:[%s1951_s12 + $0x60] ss:$12 sps:$4 sm:$0xff]   ;;  %v1754_v11 = vld [vmem:[%s1951_s12 + $0x7c] ss:$12 sps:$4 sm:$0xff]  }
  0x48   : > { %1561 = vmatpush3.bf16.msra.mxu0 %v1719_v43  ;;  %v1761_v9 = vld [vmem:[%s1951_s12 + $0xb0] ss:$12 sps:$4 sm:$0xff]   ;;  %v1756_v12 = vld [vmem:[%s1951_s12 + $0x78] ss:$12 sps:$4 sm:$0xff]   ;;  %v1757_v13 = vld [vmem:[%s1951_s12 + $0x94] ss:$12 sps:$4 sm:$0xff]  }
  0x49   : > { %1562 = vmatprep.subr.bf16.mxu0 %v1721_v45  ;;  %v1759_v14 = vld [vmem:[%s1951_s12 + $0x90] ss:$12 sps:$4 sm:$0xff]   ;;  %v1762_v15 = vld [vmem:[%s1951_s12 + $0xac] ss:$12 sps:$4 sm:$0xff]   ;;  %v1764_v16 = vld [vmem:[%s1951_s12 + $0xa8] ss:$12 sps:$4 sm:$0xff]  }
  0x4a   : > { %1641 = vmatpush3.bf16.msra.mxu1 %v1720_v44  ;;  %v426_v22 = vld [vmem:[#allocation2 + $0x30] sm:$0xff]  ;;  %v427_v30 = vld [vmem:[#allocation2] sm:$0xff]  ;;  %v428_v37 = vld [vmem:[#allocation2 + $0x58] sm:$0xff] }
  0x4b   : > { %1642 = vmatprep.subr.bf16.mxu1 %v1723_v46  ;;  %v429_v44 = vld [vmem:[#allocation2 + $0x18] sm:$0xff] }
  0x4c   : > { %1563 = vmatpush3.bf16.msra.mxu0 %v1722_v47 }
  0x4d   : > { %1564 = vmatprep.subr.bf16.mxu0 %v1724_v48 }
  0x4e   : > { %1643 = vmatpush3.bf16.msra.mxu1 %v1723_v46 }
  0x4f   : > { %1644 = vmatprep.subr.bf16.mxu1 %v1726_v49 }
  0x50   : > { %1565 = vmatpush3.bf16.msra.mxu0 %v1725_v50 }
  0x51   : > { %1566 = vmatprep.subr.bf16.mxu0 %v1727_v51 }
  0x52   : > { %1645 = vmatpush3.bf16.msra.mxu1 %v1726_v49 }
  0x53   : > { %1646 = vmatprep.subr.bf16.mxu1 %v1729_v53 }
  0x54   : > { %1567 = vmatpush3.bf16.msra.mxu0 %v1728_v52  ;;  %v430_v52 = vld [vmem:[#allocation2 + $0x50] sm:$0xff] }
  0x55   : > { %1568 = vmatprep.subr.bf16.mxu0 %v1730_v54 }
  0x56   : > { %1647 = vmatpush3.bf16.msra.mxu1 %v1729_v53 }
  0x57   : > { %1648 = vmatprep.subr.bf16.mxu1 %v1732_v55 }
  0x58   : > { %1569 = vmatpush3.bf16.msra.mxu0 %v1731_v58 }
  0x5a   : > { %1649 = vmatpush3.bf16.msra.mxu1 %v1732_v55 }
  0x5b   : > { %827 = vmatmul.mubr.bf16.vlgmr.msra.gmra.mxu0 %v1733_v59  ;;  %v431_v59 = vld [vmem:[#allocation2 + $0x68] sm:$0xff] }
  0x5c   : > { %834 = vmatprep.mubr.bf16.mxu0 %v1738_v60 }
  0x5d   : > { %1651 = vmatmul.mubr.bf16.vlgmr.msra.gmra.mxu1 %v1737_v61 }
  0x5e   : > { %1654 = vmatprep.mubr.bf16.mxu1 %v1744_v62 }
  0x63   : > { %835 = vmatmul.mubr.bf16.gmra.mxu0 %v1740_v63 }
  0x64   : > { %842 = vmatprep.mubr.bf16.mxu0 %v1741_v0 }
  0x65   : > { %1655 = vmatmul.mubr.bf16.gmra.mxu1 %v1745_v1  ;;  %v432_v1 = vld [vmem:[#allocation2 + $0x8] sm:$0xff] }
  0x66   : > { %1658 = vmatprep.mubr.bf16.mxu1 %v1752_v2 }
  0x6b   : > { %843 = vmatmul.mubr.bf16.gmra.mxu0 %v1743_v3 }
  0x6c   : > { %850 = vmatprep.mubr.bf16.mxu0 %v1746_v4 }
  0x6d   : > { %1659 = vmatmul.mubr.bf16.gmra.mxu1 %v1753_v5 }
  0x6e   : > { %1662 = vmatprep.mubr.bf16.mxu1 %v1760_v6 }
  0x73   : > { %851 = vmatmul.mubr.bf16.gmra.mxu0 %v1748_v7 }
  0x74   : > { %858 = vmatprep.mubr.bf16.mxu0 %v1749_v8  ;;  %v433_v8 = vld [vmem:[#allocation2 + $0x48] sm:$0xff] }
  0x75   : > { %1663 = vmatmul.mubr.bf16.gmra.mxu1 %v1761_v9 }
  0x7b   : > { %859 = vmatmul.mubr.bf16.gmra.mxu0 %v1751_v10 }
  0x7c   : > { %866 = vmatprep.mubr.bf16.mxu0 %v1754_v11 }
  0x83   : > { %867 = vmatmul.mubr.bf16.gmra.mxu0 %v1756_v12 }
  0x84   : > { %874 = vmatprep.mubr.bf16.mxu0 %v1757_v13 }
  0x8b   : > { %875 = vmatmul.mubr.bf16.gmra.mxu0 %v1759_v14 }
  0x8c   : > { %882 = vmatprep.mubr.bf16.mxu0 %v1762_v15 }
  0x93   : > { %883 = vmatmul.mubr.bf16.gmra.mxu0 %v1764_v16  ;;  %v434_v16 = vld [vmem:[#allocation2 + $0x40] sm:$0xff] }
 0x11b   : > { %v1570_v17 = vpop.f32.mrf.mxu0 }
 0x11d   : > { %v1571_v18 = vpop.f32.mrf.mxu0  ;;  %v1652_v19 = vpop.f32.mrf.mxu1 }
 0x11e   : > { %v1572_v20 = vadd.f32 %v1571_v18, %v1570_v17 }
 0x11f   : > { %v1573_v21 = vpop.f32.mrf.mxu0  ;;  %v925_v23 = vpop.f32.mrf.mxu1 }
 0x120   : > { %v926_v24 = vadd.f32 %v1572_v20, %v925_v23  ;;  %v435_v23 = vld [vmem:[#allocation2 + $0x20] sm:$0xff] }
 0x121   : > { %v1574_v25 = vpop.f32.mrf.mxu0  ;;  %v1653_v26 = vpop.f32.mrf.mxu1 }
 0x122   : > { %v988_v27 = vadd.f32 %v926_v24, %v426_v22  ;;  %v1575_v28 = vadd.f32 %v1574_v25, %v1573_v21 }
 0x123   : > { %v1576_v29 = vpop.f32.mrf.mxu0  ;;  %v928_v31 = vpop.f32.mrf.mxu1 }
 0x124   : > { %1004 = vst [vmem:[#allocation2 + $0x30] sm:$0xff] %v988_v27  ;;  %v929_v32 = vadd.f32 %v1575_v28, %v928_v31 }
 0x125   : > { %v1577_v33 = vpop.f32.mrf.mxu0  ;;  %v1656_v34 = vpop.f32.mrf.mxu1 }
 0x126   : > { %v989_v35 = vadd.f32 %v929_v32, %v427_v30  ;;  %v1578_v36 = vadd.f32 %v1577_v33, %v1576_v29  ;;  %v436_v29 = vld [vmem:[#allocation2 + $0x10] sm:$0xff] }
 0x127   : > { %v1579_v38 = vpop.f32.mrf.mxu0  ;;  %v941_v41 = vpop.f32.mrf.mxu1 }
 0x128   : > { %1005 = vst [vmem:[#allocation2] sm:$0xff] %v989_v35  ;;  %v934_v39 = vadd.f32 %v1652_v19, %v1578_v36  ;;  %v437_v36 = vld [vmem:[#allocation2 + $0x38] sm:$0xff] }
 0x129   : > { %v1580_v40 = vpop.f32.mrf.mxu0  ;;  %v1657_v48 = vpop.f32.mrf.mxu1 }
 0x12a   : > { %v990_v42 = vadd.f32 %v934_v39, %v428_v37  ;;  %v1581_v43 = vadd.f32 %v1580_v40, %v1579_v38 }
 0x12b   : > { %v1582_v45 = vpop.f32.mrf.mxu0  ;;  %v944_v55 = vpop.f32.mrf.mxu1 }
 0x12c   : > { %1006 = vst [vmem:[#allocation2 + $0x58] sm:$0xff] %v990_v42  ;;  %v937_v46 = vadd.f32 %v1653_v26, %v1581_v43 }
 0x12d   : > { %v1583_v47 = vpop.f32.mrf.mxu0  ;;  %v1660_v62 = vpop.f32.mrf.mxu1 }
 0x12e   : > { %v991_v49 = vadd.f32 %v937_v46, %v429_v44  ;;  %v1584_v50 = vadd.f32 %v1583_v47, %v1582_v45  ;;  %v438_v44 = vld [vmem:[#allocation2 + $0x60] sm:$0xff] }
 0x12f   : > { %v1585_v51 = vpop.f32.mrf.mxu0  ;;  %v957_v5 = vpop.f32.mrf.mxu1 }
 0x130   : > { %1007 = vst [vmem:[#allocation2 + $0x18] sm:$0xff] %v991_v49  ;;  %v942_v53 = vadd.f32 %v1584_v50, %v941_v41 }
 0x131   : > { %v1586_v54 = vpop.f32.mrf.mxu0  ;;  %v1661_v12 = vpop.f32.mrf.mxu1 }
 0x132   : > { %v992_v56 = vadd.f32 %v942_v53, %v430_v52  ;;  %v1587_v57 = vadd.f32 %v1586_v54, %v1585_v51  ;;  %v439_v51 = vld [vmem:[#allocation2 + $0x70] sm:$0xff] }
 0x133   : > { %v1588_v58 = vpop.f32.mrf.mxu0  ;;  %v960_v19 = vpop.f32.mrf.mxu1 }
 0x134   : > { %1008 = vst [vmem:[#allocation2 + $0x50] sm:$0xff] %v992_v56  ;;  %v945_v60 = vadd.f32 %v1587_v57, %v944_v55  ;;  %v440_v56 = vld [vmem:[#allocation2 + $0x78] sm:$0xff] }
 0x135   : > { %v1589_v61 = vpop.f32.mrf.mxu0  ;;  %v1664_v26 = vpop.f32.mrf.mxu1 }
 0x136   : > { %v993_v63 = vadd.f32 %v945_v60, %v431_v59  ;;  %v1590_v0 = vadd.f32 %v1589_v61, %v1588_v58 }
 0x137   : > { %v1591_v2 = vpop.f32.mrf.mxu0  ;;  %v973_v33 = vpop.f32.mrf.mxu1 }
 0x138   : > { %1009 = vst [vmem:[#allocation2 + $0x68] sm:$0xff] %v993_v63  ;;  %v950_v3 = vadd.f32 %v1656_v34, %v1590_v0 }
 0x139   : > { %v1592_v4 = vpop.f32.mrf.mxu0  ;;  %v1665_v40 = vpop.f32.mrf.mxu1 }
 0x13a   : > { %v994_v6 = vadd.f32 %v950_v3, %v432_v1  ;;  %v1593_v7 = vadd.f32 %v1592_v4, %v1591_v2 }
 0x13b   : > { %v1594_v9 = vpop.f32.mrf.mxu0  ;;  %v976_v47 = vpop.f32.mrf.mxu1 }
 0x13c   : > { %1010 = vst [vmem:[#allocation2 + $0x8] sm:$0xff] %v994_v6  ;;  %v953_v10 = vadd.f32 %v1657_v48, %v1593_v7 }
 0x13d   : > { %v1595_v11 = vpop.f32.mrf.mxu0 }
 0x13e   : > { %v995_v13 = vadd.f32 %v953_v10, %v433_v8  ;;  %v1596_v14 = vadd.f32 %v1595_v11, %v1594_v9 }
 0x13f   : > { %v1597_v15 = vpop.f32.mrf.mxu0 }
 0x140   : > { %1011 = vst [vmem:[#allocation2 + $0x48] sm:$0xff] %v995_v13  ;;  %v958_v17 = vadd.f32 %v1596_v14, %v957_v5 }
 0x141   : > { %v1598_v18 = vpop.f32.mrf.mxu0 }
 0x142   : > { %v996_v20 = vadd.f32 %v958_v17, %v434_v16  ;;  %v1599_v21 = vadd.f32 %v1598_v18, %v1597_v15 }
 0x143   : > { %v1600_v22 = vpop.f32.mrf.mxu0 }
 0x144   : > { %1012 = vst [vmem:[#allocation2 + $0x40] sm:$0xff] %v996_v20  ;;  %v961_v24 = vadd.f32 %v1599_v21, %v960_v19 }
 0x145   : > { %v1601_v25 = vpop.f32.mrf.mxu0 }
 0x146   : > { %v997_v27 = vadd.f32 %v961_v24, %v435_v23  ;;  %v1602_v28 = vadd.f32 %v1601_v25, %v1600_v22 }
 0x147   : > { %v1603_v30 = vpop.f32.mrf.mxu0 }
 0x148   : > { %1013 = vst [vmem:[#allocation2 + $0x20] sm:$0xff] %v997_v27  ;;  %v966_v31 = vadd.f32 %v1660_v62, %v1602_v28  ;;  %v441_v62 = vld [vmem:[#allocation2 + $0x28] sm:$0xff] }
 0x149   : > { %v1604_v32 = vpop.f32.mrf.mxu0 }
 0x14a   : > { %v998_v34 = vadd.f32 %v966_v31, %v436_v29  ;;  %v1605_v35 = vadd.f32 %v1604_v32, %v1603_v30 }
 0x14b   : > { %v1606_v37 = vpop.f32.mrf.mxu0 }
 0x14c   : > { %1014 = vst [vmem:[#allocation2 + $0x10] sm:$0xff] %v998_v34  ;;  %v969_v38 = vadd.f32 %v1661_v12, %v1605_v35 }
 0x14d   : > { %v1607_v39 = vpop.f32.mrf.mxu0 }
 0x14e   : > { %v999_v41 = vadd.f32 %v969_v38, %v437_v36  ;;  %v1608_v42 = vadd.f32 %v1607_v39, %v1606_v37 }
 0x14f   : > { %v1609_v43 = vpop.f32.mrf.mxu0 }
 0x150   : > { %1015 = vst [vmem:[#allocation2 + $0x38] sm:$0xff] %v999_v41  ;;  %v974_v45 = vadd.f32 %v1608_v42, %v973_v33 }
 0x151   : > { %v1610_v46 = vpop.f32.mrf.mxu0 }
 0x152   : > { %v1000_v48 = vadd.f32 %v974_v45, %v438_v44  ;;  %v1611_v49 = vadd.f32 %v1610_v46, %v1609_v43 }
 0x153   : > { %v1612_v50 = vpop.f32.mrf.mxu0 }
 0x154   : > { %1016 = vst [vmem:[#allocation2 + $0x60] sm:$0xff] %v1000_v48  ;;  %v977_v52 = vadd.f32 %v1611_v49, %v976_v47 }
 0x155   : > { %v1613_v53 = vpop.f32.mrf.mxu0 }
 0x156   : > { %v1001_v54 = vadd.f32 %v977_v52, %v439_v51  ;;  %v1614_v55 = vadd.f32 %v1613_v53, %v1612_v50 }
 0x157   : > { %v1615_v57 = vpop.f32.mrf.mxu0 }
 0x158   : > { %1017 = vst [vmem:[#allocation2 + $0x70] sm:$0xff] %v1001_v54  ;;  %v982_v58 = vadd.f32 %v1664_v26, %v1614_v55 }
 0x159   : > { %v1616_v59 = vpop.f32.mrf.mxu0 }
 0x15a   : > { %v1002_v60 = vadd.f32 %v982_v58, %v440_v56  ;;  %v1617_v61 = vadd.f32 %v1616_v59, %v1615_v57 }
 0x15c   : > { %1018 = vst [vmem:[#allocation2 + $0x78] sm:$0xff] %v1002_v60  ;;  %v985_v63 = vadd.f32 %v1665_v40, %v1617_v61  ;;  %1023 = sbr.rel (%p1429_p11) target bundleno = 379 (0x17b), region = 70 }
 0x15e   : > { %v1003_v0 = vadd.f32 %v985_v63, %v441_v62 }
 0x160   : > { %1019 = vst [vmem:[#allocation2 + $0x28] sm:$0xff] %v1003_v0 }
 0x161   : > { %v1024_v1 = vld [vmem:[#allocation2 + $0x30] sm:$0xff]  ;;  %v1025_v2 = vld [vmem:[#allocation2] sm:$0xff]  ;;  %v1026_v7 = vld [vmem:[#allocation2 + $0x58] sm:$0xff] }
 0x162   : > { %v2006_v3 = vld [vmem:[%s2089_s2] ss:$0 sm:$0xff]  ;;  %v1027_v8 = vld [vmem:[#allocation2 + $0x18] sm:$0xff]  ;;  %v1540_v13 = vld [vmem:[%s2090_s3 + $0x8] sm:$0xff]  }
 0x163   : > { %v1047_v4 = vadd.f32 %v2006_v3, %v1024_v1  ;;  %v1048_v5 = vadd.f32 %v2006_v3, %v1025_v2  ;;  %v1469_v6 = vld [vmem:[%s2090_s3] sm:$0xff]   ;;  %v1049_v11 = vadd.f32 %v2006_v3, %v1026_v7  ;;  %v1050_v12 = vadd.f32 %v2006_v3, %v1027_v8  ;;  %v1028_v14 = vld [vmem:[#allocation2 + $0x50] sm:$0xff]  ;;  %v1029_v15 = vld [vmem:[#allocation2 + $0x68] sm:$0xff] }
 0x164   : > { %v1470_v9 = vunpack.c.l.bf16 %v1469_v6  ;;  %v1471_v10 = vunpack.c.h.bf16 %v1469_v6  ;;  %v1474_v16 = vunpack.c.l.bf16 %v1540_v13  ;;  %v1475_v17 = vunpack.c.h.bf16 %v1540_v13  ;;  %v1541_v20 = vld [vmem:[%s2090_s3 + $0x10] sm:$0xff]   ;;  %v1030_v21 = vld [vmem:[#allocation2 + $0x8] sm:$0xff]  ;;  %v1542_v27 = vld [vmem:[%s2090_s3 + $0x18] sm:$0xff]  }
 0x165   : > { %v1051_v18 = vadd.f32 %v2006_v3, %v1028_v14  ;;  %v1052_v19 = vadd.f32 %v2006_v3, %v1029_v15  ;;  %v1031_v22 = vld [vmem:[#allocation2 + $0x48] sm:$0xff]  ;;  %v1478_v25 = vunpack.c.l.bf16 %v1541_v20  ;;  %v1479_v26 = vunpack.c.h.bf16 %v1541_v20  ;;  %v1032_v32 = vld [vmem:[#allocation2 + $0x40] sm:$0xff]  ;;  %v1034_v43 = vld [vmem:[#allocation2 + $0x10] sm:$0xff] }
 0x166   : > { %v1095_v23 = vadd.f32 %v1470_v9, %v1047_v4  ;;  %v1096_v24 = vadd.f32 %v1471_v10, %v1048_v5  ;;  %v1097_v28 = vadd.f32 %v1474_v16, %v1049_v11  ;;  %v1098_v29 = vadd.f32 %v1475_v17, %v1050_v12  ;;  %v1033_v37 = vld [vmem:[#allocation2 + $0x20] sm:$0xff]  ;;  %v1035_v48 = vld [vmem:[#allocation2 + $0x38] sm:$0xff]  ;;  %v1544_v49 = vld [vmem:[%s2090_s3 + $0x28] sm:$0xff]  }
 0x167   : > { %v1053_v30 = vadd.f32 %v2006_v3, %v1030_v21  ;;  %v1054_v31 = vadd.f32 %v2006_v3, %v1031_v22  ;;  %v1099_v35 = vadd.f32 %v1478_v25, %v1051_v18  ;;  %v1100_v36 = vadd.f32 %v1479_v26, %v1052_v19  ;;  %v1543_v42 = vld [vmem:[%s2090_s3 + $0x20] sm:$0xff]   ;;  %v1037_v59 = vld [vmem:[#allocation2 + $0x70] sm:$0xff]  ;;  %v1038_v6 = vld [vmem:[#allocation2 + $0x78] sm:$0xff] }
 0x168   : > { %v1111_v33 = vmax.f32 %v1095_v23, 0.0  ;;  %v1112_v34 = vmax.f32 %v1096_v24, 0.0  ;;  %v1113_v38 = vmax.f32 %v1097_v28, 0.0  ;;  %v1114_v39 = vmax.f32 %v1098_v29, 0.0  ;;  %v1036_v54 = vld [vmem:[#allocation2 + $0x60] sm:$0xff]  ;;  %v1545_v60 = vld [vmem:[%s2090_s3 + $0x30] sm:$0xff]  }
 0x169   : > { %v1482_v40 = vunpack.c.l.bf16 %v1542_v27  ;;  %v1483_v41 = vunpack.c.h.bf16 %v1542_v27  ;;  %v1115_v45 = vmax.f32 %v1099_v35, 0.0  ;;  %v1116_v46 = vmax.f32 %v1100_v36, 0.0  ;;  %v1039_v7 = vld [vmem:[#allocation2 + $0x28] sm:$0xff]  ;;  %v1546_v12 = vld [vmem:[%s2090_s3 + $0x38] sm:$0xff]  }
 0x16a   : > { %v1503_v44 = vpack.c.bf16 %v1112_v34, %v1111_v33  ;;  %v1055_v47 = vadd.f32 %v2006_v3, %v1032_v32  ;;  %v1508_v50 = vpack.c.bf16 %v1114_v39, %v1113_v38  ;;  %v1056_v53 = vadd.f32 %v2006_v3, %v1033_v37 }
 0x16b   : > { %v1101_v51 = vadd.f32 %v1482_v40, %v1053_v30  ;;  %v1102_v52 = vadd.f32 %v1483_v41, %v1054_v31  ;;  %v1513_v55 = vpack.c.bf16 %v1116_v46, %v1115_v45  ;;  %v1486_v56 = vunpack.c.l.bf16 %v1543_v42 }
 0x16c   : > { %1504 = vst [vmem:[%s2091_s4] sm:$0xff] %v1503_v44   ;;  %v1487_v57 = vunpack.c.h.bf16 %v1543_v42  ;;  %v1057_v58 = vadd.f32 %v2006_v3, %v1034_v43  ;;  %1547 = vst [vmem:[%s2091_s4 + $0x8] sm:$0xff] %v1508_v50   ;;  %v1058_v63 = vadd.f32 %v2006_v3, %v1035_v48  ;;  %v1490_v0 = vunpack.c.l.bf16 %v1544_v49 }
 0x16d   : > { %v1117_v61 = vmax.f32 %v1101_v51, 0.0  ;;  %v1118_v62 = vmax.f32 %v1102_v52, 0.0  ;;  %1548 = vst [vmem:[%s2091_s4 + $0x10] sm:$0xff] %v1513_v55   ;;  %v1103_v1 = vadd.f32 %v1486_v56, %v1055_v47  ;;  %v1491_v4 = vunpack.c.h.bf16 %v1544_v49 }
 0x16e   : > { %v1104_v2 = vadd.f32 %v1487_v57, %v1056_v53  ;;  %v1059_v5 = vadd.f32 %v2006_v3, %v1036_v54  ;;  %v1105_v9 = vadd.f32 %v1490_v0, %v1057_v58  ;;  %v1060_v10 = vadd.f32 %v2006_v3, %v1037_v59 }
 0x16f   : > { %v1518_v8 = vpack.c.bf16 %v1118_v62, %v1117_v61  ;;  %v1494_v11 = vunpack.c.l.bf16 %v1545_v60  ;;  %v1119_v13 = vmax.f32 %v1103_v1, 0.0  ;;  %v1106_v15 = vadd.f32 %v1491_v4, %v1058_v63 }
 0x170   : > { %v1120_v14 = vmax.f32 %v1104_v2, 0.0  ;;  %v1495_v16 = vunpack.c.h.bf16 %v1545_v60  ;;  %v1121_v17 = vmax.f32 %v1105_v9, 0.0  ;;  %v1061_v19 = vadd.f32 %v2006_v3, %v1038_v6 }
 0x171   : > { %1549 = vst [vmem:[%s2091_s4 + $0x18] sm:$0xff] %v1518_v8   ;;  %v1107_v18 = vadd.f32 %v1494_v11, %v1059_v5  ;;  %v1062_v20 = vadd.f32 %v2006_v3, %v1039_v7  ;;  %v1122_v22 = vmax.f32 %v1106_v15, 0.0  ;;  %v1498_v24 = vunpack.c.l.bf16 %v1546_v12 }
 0x172   : > { %v1523_v21 = vpack.c.bf16 %v1120_v14, %v1119_v13  ;;  %v1108_v23 = vadd.f32 %v1495_v16, %v1060_v10  ;;  %v1499_v26 = vunpack.c.h.bf16 %v1546_v12 }
 0x173   : > { %v1123_v25 = vmax.f32 %v1107_v18, 0.0  ;;  %v1528_v27 = vpack.c.bf16 %v1122_v22, %v1121_v17  ;;  %v1109_v29 = vadd.f32 %v1498_v24, %v1061_v19 }
 0x174   : > { %1550 = vst [vmem:[%s2091_s4 + $0x20] sm:$0xff] %v1523_v21   ;;  %v1124_v28 = vmax.f32 %v1108_v23, 0.0  ;;  %v1110_v30 = vadd.f32 %v1499_v26, %v1062_v20 }
 0x175   : > { %1551 = vst [vmem:[%s2091_s4 + $0x28] sm:$0xff] %v1528_v27   ;;  %v1125_v3 = vmax.f32 %v1109_v29, 0.0 }
 0x176   : > { %v1533_v31 = vpack.c.bf16 %v1124_v28, %v1123_v25  ;;  %v1126_v32 = vmax.f32 %v1110_v30, 0.0 }
 0x178   : > { %1552 = vst [vmem:[%s2091_s4 + $0x30] sm:$0xff] %v1533_v31   ;;  %v1538_v33 = vpack.c.bf16 %v1126_v32, %v1125_v3 }
 0x17a   : > { %1553 = vst [vmem:[%s2091_s4 + $0x38] sm:$0xff] %v1538_v33  }
 0x17b PF: > { %s14_s19 = sadd.s32 1, %s1803_s19   ;;  %s2092_s15 = smov %s1791_s16 }
 0x17c   : > { %p11_p12 = scmp.ge.s32.totalorder %s14_s19, 5   ;;  %s2093_s16 = smov %s1866_s23 }
 0x17d   : > { %s2094_s17 = smov %s1799_s18  ;;  %s2095_s18 = smov %s2097_s20 }
 0x17e   :  { %13 = sbr.rel (!%p11_p12) target bundleno = 3 (0x3), region = 120 }

// kernel: multi_task_net_forward.23
= control target key start
LH: loop header
LB: loop body
LE: loop exit
PB: predicated region body
PF: predicated region fallthrough
CT: control target
= control target key end

     0   :  { %s1072_s12 = smov 0   ;;  %s1074_s13 = smov 0   ;;  %s1182_s0 = inlined_call_operand.vmem [shape: bf16[32,1152], index: 0, kind: input, shape index: {}]   ;;  %s1183_s1 = inlined_call_operand.vmem [shape: bf16[1152,128], index: 1, kind: input, shape index: {}]   ;;  %s1184_s2 = inlined_call_operand.vmem [shape: f32[1,128], index: 2, kind: input, shape index: {}]   ;;  %s1185_s3 = inlined_call_operand.vmem [shape: bf16[32,128], index: 3, kind: output, shape index: {}]  }
   0x1   :  { %s1076_s14 = smov 0   ;;  %s1078_s15 = smov 0  }
   0x2   :  { %s1080_s16 = smov 0  }
   0x3 LB: > { %s25_s17 = sadd.s32 1, %s1045_s15  ;;  %p48_p1 = scmp.ne.s32.totalorder %s1037_s13, %s1033_s12  ;;  %s1049_s16 = sphi %s1080_s16, %s13_s16   ;;  %s1045_s15 = sphi %s1078_s15, %s1189_s15   ;;  %s1041_s14 = sphi %s1076_s14, %s1188_s14   ;;  %s1037_s13 = sphi %s1074_s13, %s1187_s13   ;;  %s1033_s12 = sphi %s1072_s12, %s1186_s12  }
   0x4   : > { %p26_p0 = scmp.ge.s32.totalorder %s25_s17, 3  ;;  %p49_p2 = scmp.eq.s32.totalorder %s1049_s16, 0 }
   0x5   : > { %s41_s19 = sadd.s32 1, %s1037_s13  ;;  %p809_p5 = scmp.ge.s32.totalorder %s1049_s16, 3 }
   0x6   : > { %s1191_s17 = smov (%p26_p0, %s25_s17), 0  ;;  %p50_p3 = por %p49_p2, %p48_p1 }
   0x7   : > { %s37_s18 = ssub.s32 %s1045_s15, %s1191_s17  ;;  %162 = sbr.rel (%p809_p5) target bundleno = 21 (0x15), region = 20 }
   0x8   : > { %p39_p4 = scmp.eq.s32.totalorder %s37_s18, 0 }
   0xa   : > { %s1107_s20 = scalar_select %p39_p4, %s1037_s13, %s41_s19  }
   0xc   : > { %165 = sbr.rel (!%p50_p3) target bundleno = 21 (0x15), region = 24  ;;  %s167_s21 = sand.u32 (%p50_p3), 1, %s1037_s13  }
   0xd   : > { %s862_s22 = smul.u32 (%p50_p3), 12, %s1045_s15 }
   0xe   : > { %s936_s23 = smul.u32 (%p50_p3), 48, %s167_s21 }
   0xf   : > { %s175_s26 = scalar_lea.vmem (%p50_p3), %s1182_s0, %s862_s22 }
  0x10   : > { %v190_v0 = vld [vmem:[%s175_s26] sm:$0xff] (%p50_p3)  ;;  %v194_v2 = vld [vmem:[%s175_s26 + $0x48] sm:$0xff] (%p50_p3)  ;;  %s169_s27 = scalar_lea.vmem (%p50_p3), [#allocation3], %s936_s23  ;;  %v815_v6 = vld [vmem:[%s175_s26 + $0x50] sm:$0xf] (%p50_p3) }
  0x11   : > { %v192_v1 = vld [vmem:[%s175_s26 + $0x24] sm:$0xff]  ;;  %191 = vst [vmem:[%s169_s27] sm:$0xff] %v190_v0  ;;  %195 = vst [vmem:[%s169_s27 + $0x18] sm:$0xff] %v194_v2  ;;  %v196_v3 = vld [vmem:[%s175_s26 + $0x6c] sm:$0xff] }
  0x12   : > { %193 = vst [vmem:[%s169_s27 + $0xc] sm:$0xff] %v192_v1  ;;  %v811_v4 = vld [vmem:[%s175_s26 + $0x8] sm:$0xf]  ;;  %v813_v5 = vld [vmem:[%s175_s26 + $0x2c] sm:$0xf]  ;;  %197 = vst [vmem:[%s169_s27 + $0x24] sm:$0xff] %v196_v3 }
  0x13   : > { %812 = vst [vmem:[%s169_s27 + $0x8] sm:$0xf] %v811_v4  ;;  %814 = vst [vmem:[%s169_s27 + $0x14] sm:$0xf] %v813_v5  ;;  %v817_v7 = vld [vmem:[%s175_s26 + $0x74] sm:$0xf] }
  0x14   : > { %816 = vst [vmem:[%s169_s27 + $0x20] sm:$0xf] %v815_v6  ;;  %818 = vst [vmem:[%s169_s27 + $0x2c] sm:$0xf] %v817_v7 }
  0x15 PF: > { %p819_p6 = scmp.ge.s32.totalorder %s1049_s16, 1  ;;  %p230_p7 = scmp.lt.s32.totalorder %s1049_s16, 4 }
  0x17   : > { %p231_p8 = pnand %p819_p6, %p230_p7 }
  0x18   : > { %s237_s28 = sand.u32 (!%p231_p8), 1, %s1033_s12   ;;  %s276_s29 = smul.u32 (!%p231_p8), 48, %s1041_s14 }
  0x19   : > { %234 = sbr.rel (%p231_p8) target bundleno = 299 (0x12b), region = 54  ;;  %p821_p10 = scmp.ne.s32.totalorder (!%p231_p8), %s1041_s14, 0 }
  0x1a   : > { %s937_s30 = smul.u32 (!%p231_p8), 48, %s237_s28  ;;  %p277_p9 = scmp.lt.s32.totalorder (!%p231_p8), %s276_s29, 143 }
  0x1c   : > { %s1124_s8 = scalar_lea.vmem (!%p231_p8), [#allocation3], %s937_s30 }
  0x1e   : > { %s1193_s29 = smov (!%p277_p9, %s276_s29), 143  ;;  %301 = sbr.rel (%p821_p10) target bundleno = 38 (0x26), region = 62 }
  0x1f   : > { %s820_s4 = sshll.u32 %s1193_s29, 2 }
  0x20   : > { %s1122_s7 = scalar_lea.vmem %s1183_s1, %s820_s4 }
  0x23   : > { %v1051_v8 = vmov 0.0  }
  0x24   : > { %302 = vst [vmem:[#allocation2 + $0x10] sm:$0xff] %v1051_v8  ;;  %303 = vst [vmem:[#allocation2] sm:$0xff] %v1051_v8 }
  0x25   : > { %304 = vst [vmem:[#allocation2 + $0x18] sm:$0xff] %v1051_v8  ;;  %305 = vst [vmem:[#allocation2 + $0x8] sm:$0xff] %v1051_v8 }
  0x26 PF: > { %v979_v9 = vld [vmem:[%s1122_s7 + $0x78] sm:$0xff]   ;;  %v982_v12 = vld [vmem:[%s1122_s7 + $0x70] sm:$0xff]   ;;  %v985_v15 = vld [vmem:[%s1122_s7 + $0x68] sm:$0xff]   ;;  %p852_p11 = scmp.ne.s32.totalorder %s1041_s14, 2 }
  0x27   : > { %v980_v10 = vld [vmem:[%s1122_s7 + $0x38] sm:$0xff]   ;;  %878 = vmatprep.subr.bf16.mxu0 %v979_v9  ;;  %v983_v13 = vld [vmem:[%s1122_s7 + $0x30] sm:$0xff]   ;;  %v986_v16 = vld [vmem:[%s1122_s7 + $0x28] sm:$0xff]  }
  0x28   : > { %v981_v11 = vld [vmem:[%s1122_s7 + $0xb8] sm:$0xff]   ;;  %879 = vmatpush3.bf16.msra.mxu0 %v980_v10  ;;  %v984_v14 = vld [vmem:[%s1122_s7 + $0xb0] sm:$0xff]   ;;  %v987_v17 = vld [vmem:[%s1122_s7 + $0xa8] sm:$0xff]  }
  0x29   : > { %916 = vmatprep.subr.bf16.mxu1 %v981_v11  ;;  %880 = vmatprep.subr.bf16.mxu0 %v982_v12  ;;  %v988_v18 = vld [vmem:[%s1122_s7 + $0x60] sm:$0xff]   ;;  %v991_v21 = vld [vmem:[%s1122_s7 + $0x58] sm:$0xff]   ;;  %v994_v24 = vld [vmem:[%s1122_s7 + $0x50] sm:$0xff]  }
  0x2a   : > { %917 = vmatpush3.bf16.msra.mxu1 %v981_v11  ;;  %v989_v19 = vld [vmem:[%s1122_s7 + $0x20] sm:$0xff]   ;;  %v993_v22 = vld [vmem:[%s1122_s7 + $0x98] sm:$0xff]   ;;  %v996_v25 = vld [vmem:[%s1122_s7 + $0x90] sm:$0xff]  }
  0x2b   : > { %918 = vmatprep.subr.bf16.mxu1 %v984_v14  ;;  %v990_v20 = vld [vmem:[%s1122_s7 + $0xa0] sm:$0xff]   ;;  %v992_v23 = vld [vmem:[%s1122_s7 + $0x18] sm:$0xff]   ;;  %v995_v26 = vld [vmem:[%s1122_s7 + $0x10] sm:$0xff]  }
  0x2c   : > { %881 = vmatpush3.bf16.msra.mxu0 %v983_v13  ;;  %v997_v27 = vld [vmem:[%s1122_s7 + $0x48] sm:$0xff]   ;;  %v1000_v30 = vld [vmem:[%s1122_s7 + $0x40] sm:$0xff]   ;;  %v306_v44 = vld [vmem:[#allocation2 + $0x10] sm:$0xff] }
  0x2d   : > { %882 = vmatprep.subr.bf16.mxu0 %v985_v15  ;;  %v998_v28 = vld [vmem:[%s1122_s7 + $0x8] sm:$0xff]   ;;  %v1002_v31 = vld [vmem:[%s1122_s7 + $0x80] sm:$0xff]   ;;  %v308_v58 = vld [vmem:[#allocation2 + $0x18] sm:$0xff] }
  0x2e   : > { %919 = vmatpush3.bf16.msra.mxu1 %v984_v14  ;;  %v999_v29 = vld [vmem:[%s1122_s7 + $0x88] sm:$0xff]   ;;  %v1005_v32 = vld [vmem:[%s1124_s8 + $0x4] ss:$12 sps:$4 sm:$0xff]  }
  0x2f   : > { %920 = vmatprep.subr.bf16.mxu1 %v987_v17  ;;  %v1006_v33 = vld [vmem:[%s1124_s8 + $0x8] ss:$12 sps:$4 sm:$0xff]   ;;  %574 = vmatprep.mubr.bf16.mxu0 %v1005_v32  ;;  %v1003_v35 = vld [vmem:[%s1124_s8] ss:$12 sps:$4 sm:$0xff]   ;;  %v1010_v38 = vld [vmem:[%s1124_s8 + $0x18] ss:$12 sps:$4 sm:$0xff]  }
  0x30   : > { %883 = vmatpush3.bf16.msra.mxu0 %v986_v16  ;;  %v1001_v34 = vld [vmem:[%s1122_s7] sm:$0xff]   ;;  %932 = vmatprep.mubr.bf16.mxu1 %v1006_v33  ;;  %v1008_v36 = vld [vmem:[%s1124_s8 + $0x1c] ss:$12 sps:$4 sm:$0xff]  }
  0x31   : > { %884 = vmatprep.subr.bf16.mxu0 %v988_v18  ;;  %v1007_v37 = vld [vmem:[%s1124_s8 + $0x20] ss:$12 sps:$4 sm:$0xff]  }
  0x32   : > { %921 = vmatpush3.bf16.msra.mxu1 %v987_v17  ;;  %v307_v52 = vld [vmem:[#allocation2] sm:$0xff]  ;;  %v309_v0 = vld [vmem:[#allocation2 + $0x8] sm:$0xff] }
  0x33   : > { %922 = vmatprep.subr.bf16.mxu1 %v990_v20 }
  0x34   : > { %885 = vmatpush3.bf16.msra.mxu0 %v989_v19 }
  0x35   : > { %886 = vmatprep.subr.bf16.mxu0 %v991_v21 }
  0x36   : > { %923 = vmatpush3.bf16.msra.mxu1 %v990_v20 }
  0x37   : > { %924 = vmatprep.subr.bf16.mxu1 %v993_v22 }
  0x38   : > { %887 = vmatpush3.bf16.msra.mxu0 %v992_v23 }
  0x39   : > { %888 = vmatprep.subr.bf16.mxu0 %v994_v24 }
  0x3a   : > { %925 = vmatpush3.bf16.msra.mxu1 %v993_v22 }
  0x3b   : > { %926 = vmatprep.subr.bf16.mxu1 %v996_v25 }
  0x3c   : > { %889 = vmatpush3.bf16.msra.mxu0 %v995_v26 }
  0x3d   : > { %890 = vmatprep.subr.bf16.mxu0 %v997_v27 }
  0x3e   : > { %927 = vmatpush3.bf16.msra.mxu1 %v996_v25 }
  0x3f   : > { %928 = vmatprep.subr.bf16.mxu1 %v999_v29 }
  0x40   : > { %891 = vmatpush3.bf16.msra.mxu0 %v998_v28 }
  0x41   : > { %892 = vmatprep.subr.bf16.mxu0 %v1000_v30 }
  0x42   : > { %929 = vmatpush3.bf16.msra.mxu1 %v999_v29 }
  0x43   : > { %930 = vmatprep.subr.bf16.mxu1 %v1002_v31 }
  0x44   : > { %893 = vmatpush3.bf16.msra.mxu0 %v1001_v34 }
  0x46   : > { %931 = vmatpush3.bf16.msra.mxu1 %v1002_v31 }
  0x47   : > { %575 = vmatmul.mubr.bf16.vlgmr.msra.gmra.mxu0 %v1003_v35 }
  0x48   : > { %582 = vmatprep.mubr.bf16.mxu0 %v1008_v36 }
  0x49   : > { %933 = vmatmul.mubr.bf16.vlgmr.msra.gmra.mxu1 %v1007_v37 }
  0x4f   : > { %583 = vmatmul.mubr.bf16.gmra.mxu0 %v1010_v38 }
 0x107   : > { %v894_v39 = vpop.f32.mrf.mxu0 }
 0x109   : > { %v895_v40 = vpop.f32.mrf.mxu0  ;;  %v934_v41 = vpop.f32.mrf.mxu1 }
 0x10a   : > { %v896_v42 = vadd.f32 %v895_v40, %v894_v39 }
 0x10b   : > { %v897_v43 = vpop.f32.mrf.mxu0  ;;  %v625_v45 = vpop.f32.mrf.mxu1 }
 0x10c   : > { %v626_v46 = vadd.f32 %v896_v42, %v625_v45 }
 0x10d   : > { %v898_v47 = vpop.f32.mrf.mxu0  ;;  %v935_v48 = vpop.f32.mrf.mxu1 }
 0x10e   : > { %v640_v49 = vadd.f32 %v626_v46, %v306_v44  ;;  %v899_v50 = vadd.f32 %v898_v47, %v897_v43 }
 0x10f   : > { %v900_v51 = vpop.f32.mrf.mxu0  ;;  %v628_v53 = vpop.f32.mrf.mxu1 }
 0x110   : > { %644 = vst [vmem:[#allocation2 + $0x10] sm:$0xff] %v640_v49  ;;  %v629_v54 = vadd.f32 %v899_v50, %v628_v53 }
 0x111   : > { %v901_v55 = vpop.f32.mrf.mxu0 }
 0x112   : > { %v641_v56 = vadd.f32 %v629_v54, %v307_v52  ;;  %v902_v57 = vadd.f32 %v901_v55, %v900_v51 }
 0x113   : > { %v903_v59 = vpop.f32.mrf.mxu0 }
 0x114   : > { %645 = vst [vmem:[#allocation2] sm:$0xff] %v641_v56  ;;  %v634_v60 = vadd.f32 %v934_v41, %v902_v57 }
 0x115   : > { %v904_v61 = vpop.f32.mrf.mxu0 }
 0x116   : > { %v642_v62 = vadd.f32 %v634_v60, %v308_v58  ;;  %v905_v63 = vadd.f32 %v904_v61, %v903_v59 }
 0x118   : > { %646 = vst [vmem:[#allocation2 + $0x18] sm:$0xff] %v642_v62  ;;  %v637_v1 = vadd.f32 %v935_v48, %v905_v63  ;;  %651 = sbr.rel (%p852_p11) target bundleno = 299 (0x12b), region = 66 }
 0x11a   : > { %v643_v2 = vadd.f32 %v637_v1, %v309_v0 }
 0x11c   : > { %647 = vst [vmem:[#allocation2 + $0x8] sm:$0xff] %v643_v2 }
 0x11d   : > { %v652_v3 = vld [vmem:[#allocation2 + $0x10] sm:$0xff]  ;;  %v653_v4 = vld [vmem:[#allocation2] sm:$0xff] }
 0x11e   : > { %v853_v5 = vld [vmem:[%s1184_s2] ss:$0 sm:$0xff] }
 0x11f   : > { %v663_v6 = vadd.f32 %v853_v5, %v652_v3  ;;  %v664_v7 = vadd.f32 %v853_v5, %v653_v4  ;;  %v654_v8 = vld [vmem:[#allocation2 + $0x18] sm:$0xff] }
 0x120   : > { %v665_v10 = vadd.f32 %v853_v5, %v654_v8 }
 0x121   : > { %v667_v12 = vmax.f32 %v663_v6, 0.0  ;;  %v668_v13 = vmax.f32 %v664_v7, 0.0 }
 0x122   : > { %v669_v14 = vmax.f32 %v665_v10, 0.0 }
 0x123   : > { %v655_v9 = vld [vmem:[#allocation2 + $0x8] sm:$0xff]  ;;  %v870_v16 = vpack.c.bf16 %v668_v13, %v667_v12 }
 0x124   : > { %v666_v11 = vadd.f32 %v853_v5, %v655_v9 }
 0x125   : > { %871 = vst [vmem:[%s1185_s3] sm:$0xff] %v870_v16  }
 0x126   : > { %v670_v15 = vmax.f32 %v666_v11, 0.0 }
 0x128   : > { %v875_v17 = vpack.c.bf16 %v670_v15, %v669_v14 }
 0x12a   : > { %877 = vst [vmem:[%s1185_s3 + $0x8] sm:$0xff] %v875_v17  }
 0x12b PF: > { %s13_s16 = sadd.s32 1, %s1049_s16   ;;  %s1186_s12 = smov %s1037_s13 }
 0x12c   : > { %p10_p12 = scmp.ge.s32.totalorder %s13_s16, 5   ;;  %s1187_s13 = smov %s1107_s20 }
 0x12d   : > { %s1188_s14 = smov %s1045_s15  ;;  %s1189_s15 = smov %s1191_s17 }
 0x12e   :  { %12 = sbr.rel (!%p10_p12) target bundleno = 3 (0x3), region = 113 }

// kernel: multi_task_net_forward.26
= control target key start
LH: loop header
LB: loop body
LE: loop exit
PB: predicated region body
PF: predicated region fallthrough
CT: control target
= control target key end

     0   :  { %s1177_s15 = smov 0   ;;  %s1179_s16 = smov 0   ;;  %s1293_s0 = inlined_call_operand.vmem [shape: bf16[32,1152], index: 0, kind: input, shape index: {}]   ;;  %s1294_s1 = inlined_call_operand.vmem [shape: bf16[1152,128], index: 1, kind: input, shape index: {}]   ;;  %s1295_s2 = inlined_call_operand.vmem [shape: f32[1,128], index: 2, kind: input, shape index: {}]   ;;  %s1296_s3 = inlined_call_operand.vmem [shape: bf16[32,128], index: 3, kind: input, shape index: {}]   ;;  %s1297_s4 = inlined_call_operand.vmem [shape: bf16[32,128], index: 4, kind: output, shape index: {}]  }
   0x1   :  { %s1181_s17 = smov 0   ;;  %s1183_s18 = smov 0  }
   0x2   :  { %s1185_s19 = smov 0  }
   0x3 LB: > { %s26_s20 = sadd.s32 1, %s1145_s18  ;;  %p49_p1 = scmp.ne.s32.totalorder %s1137_s16, %s1133_s15  ;;  %s1149_s19 = sphi %s1185_s19, %s14_s19   ;;  %s1145_s18 = sphi %s1183_s18, %s1301_s18   ;;  %s1141_s17 = sphi %s1181_s17, %s1300_s17   ;;  %s1137_s16 = sphi %s1179_s16, %s1299_s16   ;;  %s1133_s15 = sphi %s1177_s15, %s1298_s15  }
   0x4   : > { %p27_p0 = scmp.ge.s32.totalorder %s26_s20, 3  ;;  %p50_p2 = scmp.eq.s32.totalorder %s1149_s19, 0 }
   0x5   : > { %s42_s22 = sadd.s32 1, %s1137_s16  ;;  %p900_p5 = scmp.ge.s32.totalorder %s1149_s19, 3 }
   0x6   : > { %s1303_s20 = smov (%p27_p0, %s26_s20), 0  ;;  %p51_p3 = por %p50_p2, %p49_p1 }
   0x7   : > { %s38_s21 = ssub.s32 %s1145_s18, %s1303_s20  ;;  %203 = sbr.rel (%p900_p5) target bundleno = 21 (0x15), region = 24 }
   0x8   : > { %p40_p4 = scmp.eq.s32.totalorder %s38_s21, 0 }
   0xa   : > { %s1212_s23 = scalar_select %p40_p4, %s1137_s16, %s42_s22  }
   0xc   : > { %206 = sbr.rel (!%p51_p3) target bundleno = 21 (0x15), region = 28  ;;  %s208_s24 = sand.u32 (%p51_p3), 1, %s1137_s16  }
   0xd   : > { %s953_s25 = smul.u32 (%p51_p3), 12, %s1145_s18 }
   0xe   : > { %s1036_s26 = smul.u32 (%p51_p3), 48, %s208_s24 }
   0xf   : > { %s216_s29 = scalar_lea.vmem (%p51_p3), %s1293_s0, %s953_s25 }
  0x10   : > { %v231_v0 = vld [vmem:[%s216_s29] sm:$0xff] (%p51_p3)  ;;  %v235_v2 = vld [vmem:[%s216_s29 + $0x48] sm:$0xff] (%p51_p3)  ;;  %s210_s30 = scalar_lea.vmem (%p51_p3), [#allocation3], %s1036_s26  ;;  %v906_v6 = vld [vmem:[%s216_s29 + $0x50] sm:$0xf] (%p51_p3) }
  0x11   : > { %v233_v1 = vld [vmem:[%s216_s29 + $0x24] sm:$0xff]  ;;  %232 = vst [vmem:[%s210_s30] sm:$0xff] %v231_v0  ;;  %236 = vst [vmem:[%s210_s30 + $0x18] sm:$0xff] %v235_v2  ;;  %v237_v3 = vld [vmem:[%s216_s29 + $0x6c] sm:$0xff] }
  0x12   : > { %234 = vst [vmem:[%s210_s30 + $0xc] sm:$0xff] %v233_v1  ;;  %v902_v4 = vld [vmem:[%s216_s29 + $0x8] sm:$0xf]  ;;  %v904_v5 = vld [vmem:[%s216_s29 + $0x2c] sm:$0xf]  ;;  %238 = vst [vmem:[%s210_s30 + $0x24] sm:$0xff] %v237_v3 }
  0x13   : > { %903 = vst [vmem:[%s210_s30 + $0x8] sm:$0xf] %v902_v4  ;;  %905 = vst [vmem:[%s210_s30 + $0x14] sm:$0xf] %v904_v5  ;;  %v908_v7 = vld [vmem:[%s216_s29 + $0x74] sm:$0xf] }
  0x14   : > { %907 = vst [vmem:[%s210_s30 + $0x20] sm:$0xf] %v906_v6  ;;  %909 = vst [vmem:[%s210_s30 + $0x2c] sm:$0xf] %v908_v7 }
  0x15 PF: > { %p910_p6 = scmp.ge.s32.totalorder %s1149_s19, 1  ;;  %p271_p7 = scmp.lt.s32.totalorder %s1149_s19, 4 }
  0x17   : > { %p272_p8 = pnand %p910_p6, %p271_p7 }
  0x18   : > { %s278_s5 = sand.u32 (!%p272_p8), 1, %s1133_s15   ;;  %s327_s6 = smul.u32 (!%p272_p8), 48, %s1141_s17 }
  0x19   : > { %275 = sbr.rel (%p272_p8) target bundleno = 301 (0x12d), region = 58  ;;  %p912_p10 = scmp.ne.s32.totalorder (!%p272_p8), %s1141_s17, 0 }
  0x1a   : > { %s1037_s7 = smul.u32 (!%p272_p8), 48, %s278_s5  ;;  %p328_p9 = scmp.lt.s32.totalorder (!%p272_p8), %s327_s6, 143 }
  0x1c   : > { %s1229_s12 = scalar_lea.vmem (!%p272_p8), [#allocation3], %s1037_s7 }
  0x1e   : > { %s1305_s6 = smov (!%p328_p9, %s327_s6), 143  ;;  %361 = sbr.rel (%p912_p10) target bundleno = 38 (0x26), region = 66 }
  0x1f   : > { %s911_s8 = sshll.u32 %s1305_s6, 2 }
  0x20   : > { %s1227_s11 = scalar_lea.vmem %s1294_s1, %s911_s8 }
  0x23   : > { %v1151_v8 = vmov 0.0  }
  0x24   : > { %362 = vst [vmem:[#allocation2 + $0x10] sm:$0xff] %v1151_v8  ;;  %363 = vst [vmem:[#allocation2] sm:$0xff] %v1151_v8 }
  0x25   : > { %364 = vst [vmem:[#allocation2 + $0x18] sm:$0xff] %v1151_v8  ;;  %365 = vst [vmem:[#allocation2 + $0x8] sm:$0xff] %v1151_v8 }
  0x26 PF: > { %v1079_v9 = vld [vmem:[%s1227_s11 + $0x78] sm:$0xff]   ;;  %v1082_v12 = vld [vmem:[%s1227_s11 + $0x70] sm:$0xff]   ;;  %v1085_v15 = vld [vmem:[%s1227_s11 + $0x68] sm:$0xff]   ;;  %p943_p11 = scmp.ne.s32.totalorder %s1141_s17, 2 }
  0x27   : > { %v1080_v10 = vld [vmem:[%s1227_s11 + $0x38] sm:$0xff]   ;;  %978 = vmatprep.subr.bf16.mxu0 %v1079_v9  ;;  %v1083_v13 = vld [vmem:[%s1227_s11 + $0x30] sm:$0xff]   ;;  %v1086_v16 = vld [vmem:[%s1227_s11 + $0x28] sm:$0xff]  }
  0x28   : > { %v1081_v11 = vld [vmem:[%s1227_s11 + $0xb8] sm:$0xff]   ;;  %979 = vmatpush3.bf16.msra.mxu0 %v1080_v10  ;;  %v1084_v14 = vld [vmem:[%s1227_s11 + $0xb0] sm:$0xff]   ;;  %v1087_v17 = vld [vmem:[%s1227_s11 + $0xa8] sm:$0xff]  }
  0x29   : > { %1016 = vmatprep.subr.bf16.mxu1 %v1081_v11  ;;  %980 = vmatprep.subr.bf16.mxu0 %v1082_v12  ;;  %v1088_v18 = vld [vmem:[%s1227_s11 + $0x60] sm:$0xff]   ;;  %v1091_v21 = vld [vmem:[%s1227_s11 + $0x58] sm:$0xff]   ;;  %v1094_v24 = vld [vmem:[%s1227_s11 + $0x50] sm:$0xff]  }
  0x2a   : > { %1017 = vmatpush3.bf16.msra.mxu1 %v1081_v11  ;;  %v1089_v19 = vld [vmem:[%s1227_s11 + $0x20] sm:$0xff]   ;;  %v1093_v22 = vld [vmem:[%s1227_s11 + $0x98] sm:$0xff]   ;;  %v1096_v25 = vld [vmem:[%s1227_s11 + $0x90] sm:$0xff]  }
  0x2b   : > { %1018 = vmatprep.subr.bf16.mxu1 %v1084_v14  ;;  %v1090_v20 = vld [vmem:[%s1227_s11 + $0xa0] sm:$0xff]   ;;  %v1092_v23 = vld [vmem:[%s1227_s11 + $0x18] sm:$0xff]   ;;  %v1095_v26 = vld [vmem:[%s1227_s11 + $0x10] sm:$0xff]  }
  0x2c   : > { %981 = vmatpush3.bf16.msra.mxu0 %v1083_v13  ;;  %v1097_v27 = vld [vmem:[%s1227_s11 + $0x48] sm:$0xff]   ;;  %v1100_v30 = vld [vmem:[%s1227_s11 + $0x40] sm:$0xff]   ;;  %v366_v44 = vld [vmem:[#allocation2 + $0x10] sm:$0xff] }
  0x2d   : > { %982 = vmatprep.subr.bf16.mxu0 %v1085_v15  ;;  %v1098_v28 = vld [vmem:[%s1227_s11 + $0x8] sm:$0xff]   ;;  %v1102_v31 = vld [vmem:[%s1227_s11 + $0x80] sm:$0xff]   ;;  %v368_v58 = vld [vmem:[#allocation2 + $0x18] sm:$0xff] }
  0x2e   : > { %1019 = vmatpush3.bf16.msra.mxu1 %v1084_v14  ;;  %v1099_v29 = vld [vmem:[%s1227_s11 + $0x88] sm:$0xff]   ;;  %v1105_v32 = vld [vmem:[%s1229_s12 + $0x4] ss:$12 sps:$4 sm:$0xff]  }
  0x2f   : > { %1020 = vmatprep.subr.bf16.mxu1 %v1087_v17  ;;  %v1106_v33 = vld [vmem:[%s1229_s12 + $0x8] ss:$12 sps:$4 sm:$0xff]   ;;  %634 = vmatprep.mubr.bf16.mxu0 %v1105_v32  ;;  %v1103_v35 = vld [vmem:[%s1229_s12] ss:$12 sps:$4 sm:$0xff]   ;;  %v1110_v38 = vld [vmem:[%s1229_s12 + $0x18] ss:$12 sps:$4 sm:$0xff]  }
  0x30   : > { %983 = vmatpush3.bf16.msra.mxu0 %v1086_v16  ;;  %v1101_v34 = vld [vmem:[%s1227_s11] sm:$0xff]   ;;  %1032 = vmatprep.mubr.bf16.mxu1 %v1106_v33  ;;  %v1108_v36 = vld [vmem:[%s1229_s12 + $0x1c] ss:$12 sps:$4 sm:$0xff]  }
  0x31   : > { %984 = vmatprep.subr.bf16.mxu0 %v1088_v18  ;;  %v1107_v37 = vld [vmem:[%s1229_s12 + $0x20] ss:$12 sps:$4 sm:$0xff]  }
  0x32   : > { %1021 = vmatpush3.bf16.msra.mxu1 %v1087_v17  ;;  %v367_v52 = vld [vmem:[#allocation2] sm:$0xff]  ;;  %v369_v0 = vld [vmem:[#allocation2 + $0x8] sm:$0xff] }
  0x33   : > { %1022 = vmatprep.subr.bf16.mxu1 %v1090_v20 }
  0x34   : > { %985 = vmatpush3.bf16.msra.mxu0 %v1089_v19 }
  0x35   : > { %986 = vmatprep.subr.bf16.mxu0 %v1091_v21 }
  0x36   : > { %1023 = vmatpush3.bf16.msra.mxu1 %v1090_v20 }
  0x37   : > { %1024 = vmatprep.subr.bf16.mxu1 %v1093_v22 }
  0x38   : > { %987 = vmatpush3.bf16.msra.mxu0 %v1092_v23 }
  0x39   : > { %988 = vmatprep.subr.bf16.mxu0 %v1094_v24 }
  0x3a   : > { %1025 = vmatpush3.bf16.msra.mxu1 %v1093_v22 }
  0x3b   : > { %1026 = vmatprep.subr.bf16.mxu1 %v1096_v25 }
  0x3c   : > { %989 = vmatpush3.bf16.msra.mxu0 %v1095_v26 }
  0x3d   : > { %990 = vmatprep.subr.bf16.mxu0 %v1097_v27 }
  0x3e   : > { %1027 = vmatpush3.bf16.msra.mxu1 %v1096_v25 }
  0x3f   : > { %1028 = vmatprep.subr.bf16.mxu1 %v1099_v29 }
  0x40   : > { %991 = vmatpush3.bf16.msra.mxu0 %v1098_v28 }
  0x41   : > { %992 = vmatprep.subr.bf16.mxu0 %v1100_v30 }
  0x42   : > { %1029 = vmatpush3.bf16.msra.mxu1 %v1099_v29 }
  0x43   : > { %1030 = vmatprep.subr.bf16.mxu1 %v1102_v31 }
  0x44   : > { %993 = vmatpush3.bf16.msra.mxu0 %v1101_v34 }
  0x46   : > { %1031 = vmatpush3.bf16.msra.mxu1 %v1102_v31 }
  0x47   : > { %635 = vmatmul.mubr.bf16.vlgmr.msra.gmra.mxu0 %v1103_v35 }
  0x48   : > { %642 = vmatprep.mubr.bf16.mxu0 %v1108_v36 }
  0x49   : > { %1033 = vmatmul.mubr.bf16.vlgmr.msra.gmra.mxu1 %v1107_v37 }
  0x4f   : > { %643 = vmatmul.mubr.bf16.gmra.mxu0 %v1110_v38 }
 0x107   : > { %v994_v39 = vpop.f32.mrf.mxu0 }
 0x109   : > { %v995_v40 = vpop.f32.mrf.mxu0  ;;  %v1034_v41 = vpop.f32.mrf.mxu1 }
 0x10a   : > { %v996_v42 = vadd.f32 %v995_v40, %v994_v39 }
 0x10b   : > { %v997_v43 = vpop.f32.mrf.mxu0  ;;  %v685_v45 = vpop.f32.mrf.mxu1 }
 0x10c   : > { %v686_v46 = vadd.f32 %v996_v42, %v685_v45 }
 0x10d   : > { %v998_v47 = vpop.f32.mrf.mxu0  ;;  %v1035_v48 = vpop.f32.mrf.mxu1 }
 0x10e   : > { %v700_v49 = vadd.f32 %v686_v46, %v366_v44  ;;  %v999_v50 = vadd.f32 %v998_v47, %v997_v43 }
 0x10f   : > { %v1000_v51 = vpop.f32.mrf.mxu0  ;;  %v688_v53 = vpop.f32.mrf.mxu1 }
 0x110   : > { %704 = vst [vmem:[#allocation2 + $0x10] sm:$0xff] %v700_v49  ;;  %v689_v54 = vadd.f32 %v999_v50, %v688_v53 }
 0x111   : > { %v1001_v55 = vpop.f32.mrf.mxu0 }
 0x112   : > { %v701_v56 = vadd.f32 %v689_v54, %v367_v52  ;;  %v1002_v57 = vadd.f32 %v1001_v55, %v1000_v51 }
 0x113   : > { %v1003_v59 = vpop.f32.mrf.mxu0 }
 0x114   : > { %705 = vst [vmem:[#allocation2] sm:$0xff] %v701_v56  ;;  %v694_v60 = vadd.f32 %v1034_v41, %v1002_v57 }
 0x115   : > { %v1004_v61 = vpop.f32.mrf.mxu0 }
 0x116   : > { %v702_v62 = vadd.f32 %v694_v60, %v368_v58  ;;  %v1005_v63 = vadd.f32 %v1004_v61, %v1003_v59 }
 0x118   : > { %706 = vst [vmem:[#allocation2 + $0x18] sm:$0xff] %v702_v62  ;;  %v697_v1 = vadd.f32 %v1035_v48, %v1005_v63  ;;  %711 = sbr.rel (%p943_p11) target bundleno = 301 (0x12d), region = 70 }
 0x11a   : > { %v703_v2 = vadd.f32 %v697_v1, %v369_v0 }
 0x11c   : > { %707 = vst [vmem:[#allocation2 + $0x8] sm:$0xff] %v703_v2 }
 0x11d   : > { %v712_v3 = vld [vmem:[#allocation2 + $0x10] sm:$0xff]  ;;  %v713_v4 = vld [vmem:[#allocation2] sm:$0xff]  ;;  %v976_v15 = vld [vmem:[%s1296_s3 + $0x8] sm:$0xff]  }
 0x11e   : > { %v944_v5 = vld [vmem:[%s1295_s2] ss:$0 sm:$0xff]  ;;  %v964_v16 = vunpack.c.l.bf16 %v976_v15  ;;  %v965_v17 = vunpack.c.h.bf16 %v976_v15 }
 0x11f   : > { %v723_v6 = vadd.f32 %v944_v5, %v712_v3  ;;  %v724_v7 = vadd.f32 %v944_v5, %v713_v4  ;;  %v959_v8 = vld [vmem:[%s1296_s3] sm:$0xff]   ;;  %v714_v9 = vld [vmem:[#allocation2 + $0x18] sm:$0xff] }
 0x120   : > { %v960_v11 = vunpack.c.l.bf16 %v959_v8  ;;  %v961_v12 = vunpack.c.h.bf16 %v959_v8  ;;  %v725_v13 = vadd.f32 %v944_v5, %v714_v9 }
 0x122   : > { %v735_v18 = vadd.f32 %v960_v11, %v723_v6  ;;  %v736_v19 = vadd.f32 %v961_v12, %v724_v7  ;;  %v737_v20 = vadd.f32 %v964_v16, %v725_v13 }
 0x123   : > { %v715_v10 = vld [vmem:[#allocation2 + $0x8] sm:$0xff] }
 0x124   : > { %v726_v14 = vadd.f32 %v944_v5, %v715_v10  ;;  %v739_v22 = vmax.f32 %v735_v18, 0.0  ;;  %v740_v23 = vmax.f32 %v736_v19, 0.0  ;;  %v741_v24 = vmax.f32 %v737_v20, 0.0 }
 0x126   : > { %v738_v21 = vadd.f32 %v965_v17, %v726_v14  ;;  %v969_v26 = vpack.c.bf16 %v740_v23, %v739_v22 }
 0x128   : > { %v742_v25 = vmax.f32 %v738_v21, 0.0  ;;  %970 = vst [vmem:[%s1297_s4] sm:$0xff] %v969_v26  }
 0x12a   : > { %v974_v27 = vpack.c.bf16 %v742_v25, %v741_v24 }
 0x12c   : > { %977 = vst [vmem:[%s1297_s4 + $0x8] sm:$0xff] %v974_v27  }
 0x12d PF: > { %s14_s19 = sadd.s32 1, %s1149_s19   ;;  %s1298_s15 = smov %s1137_s16 }
 0x12e   : > { %p11_p12 = scmp.ge.s32.totalorder %s14_s19, 5   ;;  %s1299_s16 = smov %s1212_s23 }
 0x12f   : > { %s1300_s17 = smov %s1145_s18  ;;  %s1301_s18 = smov %s1303_s20 }
 0x130   :  { %13 = sbr.rel (!%p11_p12) target bundleno = 3 (0x3), region = 120 }

// kernel: multi_task_net_forward.24
= control target key start
LH: loop header
LB: loop body
LE: loop exit
PB: predicated region body
PF: predicated region fallthrough
CT: control target
= control target key end

     0   :  { %s1461_s21 = smov 0   ;;  %s1463_s22 = smov 0   ;;  %s1604_s0 = inlined_call_operand.vmem [shape: bf16[32,1152], index: 0, kind: input, shape index: {}]   ;;  %s1605_s1 = inlined_call_operand.vmem [shape: bf16[1152,128], index: 1, kind: input, shape index: {}]   ;;  %s1606_s2 = inlined_call_operand.vmem [shape: f32[1,128], index: 2, kind: input, shape index: {}]   ;;  %s1607_s3 = inlined_call_operand.vmem [shape: bf16[32,128], index: 3, kind: input, shape index: {}]   ;;  %s1608_s4 = inlined_call_operand.vmem [shape: bf16[128,128], index: 4, kind: input, shape index: {}]   ;;  %s1609_s5 = inlined_call_operand.vmem [shape: f32[1,128], index: 5, kind: input, shape index: {}]   ;;  %s1610_s6 = inlined_call_operand.vmem [shape: bf16[32,128], index: 6, kind: output, shape index: {}]  }
   0x1   :  { %s1465_s23 = smov 0   ;;  %s1467_s24 = smov 0  }
   0x2   :  { %s1469_s25 = smov 0  }
   0x3 LB: > { %s28_s26 = sadd.s32 1, %s1419_s24  ;;  %p51_p1 = scmp.ne.s32.totalorder %s1411_s22, %s1407_s21  ;;  %s1423_s25 = sphi %s1469_s25, %s16_s25   ;;  %s1419_s24 = sphi %s1467_s24, %s1614_s24   ;;  %s1415_s23 = sphi %s1465_s23, %s1613_s23   ;;  %s1411_s22 = sphi %s1463_s22, %s1612_s22   ;;  %s1407_s21 = sphi %s1461_s21, %s1611_s21  }
   0x4   : > { %p29_p0 = scmp.ge.s32.totalorder %s28_s26, 3  ;;  %p52_p2 = scmp.eq.s32.totalorder %s1423_s25, 0 }
   0x5   : > { %s44_s28 = sadd.s32 1, %s1411_s22  ;;  %p1132_p5 = scmp.ge.s32.totalorder %s1423_s25, 3 }
   0x6   : > { %s1616_s26 = smov (%p29_p0, %s28_s26), 0  ;;  %p53_p3 = por %p52_p2, %p51_p1 }
   0x7   : > { %s40_s27 = ssub.s32 %s1419_s24, %s1616_s26  ;;  %265 = sbr.rel (%p1132_p5) target bundleno = 21 (0x15), region = 32 }
   0x8   : > { %p42_p4 = scmp.eq.s32.totalorder %s40_s27, 0 }
   0xa   : > { %s1496_s29 = scalar_select %p42_p4, %s1411_s22, %s44_s28  }
   0xc   : > { %268 = sbr.rel (!%p53_p3) target bundleno = 21 (0x15), region = 36  ;;  %s270_s30 = sand.u32 (%p53_p3), 1, %s1411_s22  }
   0xd   : > { %s1196_s7 = smul.u32 (%p53_p3), 12, %s1419_s24 }
   0xe   : > { %s1300_s8 = smul.u32 (%p53_p3), 48, %s270_s30 }
   0xf   : > { %s278_s11 = scalar_lea.vmem (%p53_p3), %s1604_s0, %s1196_s7 }
  0x10   : > { %v293_v0 = vld [vmem:[%s278_s11] sm:$0xff] (%p53_p3)  ;;  %v297_v2 = vld [vmem:[%s278_s11 + $0x48] sm:$0xff] (%p53_p3)  ;;  %s272_s12 = scalar_lea.vmem (%p53_p3), [#allocation3], %s1300_s8  ;;  %v1138_v6 = vld [vmem:[%s278_s11 + $0x50] sm:$0xf] (%p53_p3) }
  0x11   : > { %v295_v1 = vld [vmem:[%s278_s11 + $0x24] sm:$0xff]  ;;  %294 = vst [vmem:[%s272_s12] sm:$0xff] %v293_v0  ;;  %298 = vst [vmem:[%s272_s12 + $0x18] sm:$0xff] %v297_v2  ;;  %v299_v3 = vld [vmem:[%s278_s11 + $0x6c] sm:$0xff] }
  0x12   : > { %296 = vst [vmem:[%s272_s12 + $0xc] sm:$0xff] %v295_v1  ;;  %v1134_v4 = vld [vmem:[%s278_s11 + $0x8] sm:$0xf]  ;;  %v1136_v5 = vld [vmem:[%s278_s11 + $0x2c] sm:$0xf]  ;;  %300 = vst [vmem:[%s272_s12 + $0x24] sm:$0xff] %v299_v3 }
  0x13   : > { %1135 = vst [vmem:[%s272_s12 + $0x8] sm:$0xf] %v1134_v4  ;;  %1137 = vst [vmem:[%s272_s12 + $0x14] sm:$0xf] %v1136_v5  ;;  %v1140_v7 = vld [vmem:[%s278_s11 + $0x74] sm:$0xf] }
  0x14   : > { %1139 = vst [vmem:[%s272_s12 + $0x20] sm:$0xf] %v1138_v6  ;;  %1141 = vst [vmem:[%s272_s12 + $0x2c] sm:$0xf] %v1140_v7 }
  0x15 PF: > { %p1142_p6 = scmp.ge.s32.totalorder %s1423_s25, 1  ;;  %p333_p7 = scmp.lt.s32.totalorder %s1423_s25, 4 }
  0x17   : > { %p334_p8 = pnand %p1142_p6, %p333_p7 }
  0x18   : > { %s340_s13 = sand.u32 (!%p334_p8), 1, %s1407_s21   ;;  %s397_s14 = smul.u32 (!%p334_p8), 48, %s1415_s23 }
  0x19   : > { %337 = sbr.rel (%p334_p8) target bundleno = 526 (0x20e), region = 66  ;;  %p1144_p10 = scmp.ne.s32.totalorder (!%p334_p8), %s1415_s23, 0 }
  0x1a   : > { %s1301_s15 = smul.u32 (!%p334_p8), 48, %s340_s13  ;;  %p398_p9 = scmp.lt.s32.totalorder (!%p334_p8), %s397_s14, 143 }
  0x1c   : > { %s1513_s20 = scalar_lea.vmem (!%p334_p8), [#allocation3], %s1301_s15 }
  0x1e   : > { %s1618_s14 = smov (!%p398_p9, %s397_s14), 143  ;;  %435 = sbr.rel (%p1144_p10) target bundleno = 38 (0x26), region = 74 }
  0x1f   : > { %s1143_s16 = sshll.u32 %s1618_s14, 2 }
  0x20   : > { %s1511_s19 = scalar_lea.vmem %s1605_s1, %s1143_s16 }
  0x23   : > { %v1425_v8 = vmov 0.0  }
  0x24   : > { %436 = vst [vmem:[#allocation2 + $0x10] sm:$0xff] %v1425_v8  ;;  %437 = vst [vmem:[#allocation2] sm:$0xff] %v1425_v8 }
  0x25   : > { %438 = vst [vmem:[#allocation2 + $0x18] sm:$0xff] %v1425_v8  ;;  %439 = vst [vmem:[#allocation2 + $0x8] sm:$0xff] %v1425_v8 }
  0x26 PF: > { %v1343_v9 = vld [vmem:[%s1511_s19 + $0x78] sm:$0xff]   ;;  %v1346_v12 = vld [vmem:[%s1511_s19 + $0x70] sm:$0xff]   ;;  %v1349_v15 = vld [vmem:[%s1511_s19 + $0x68] sm:$0xff]   ;;  %p1175_p11 = scmp.ne.s32.totalorder %s1415_s23, 2 }
  0x27   : > { %v1344_v10 = vld [vmem:[%s1511_s19 + $0x38] sm:$0xff]   ;;  %1212 = vmatprep.subr.bf16.mxu0 %v1343_v9  ;;  %v1347_v13 = vld [vmem:[%s1511_s19 + $0x30] sm:$0xff]   ;;  %v1350_v16 = vld [vmem:[%s1511_s19 + $0x28] sm:$0xff]  }
  0x28   : > { %v1345_v11 = vld [vmem:[%s1511_s19 + $0xb8] sm:$0xff]   ;;  %1213 = vmatpush3.bf16.msra.mxu0 %v1344_v10  ;;  %v1348_v14 = vld [vmem:[%s1511_s19 + $0xb0] sm:$0xff]   ;;  %v1351_v17 = vld [vmem:[%s1511_s19 + $0xa8] sm:$0xff]  }
  0x29   : > { %1260 = vmatprep.subr.bf16.mxu1 %v1345_v11  ;;  %1214 = vmatprep.subr.bf16.mxu0 %v1346_v12  ;;  %v1352_v18 = vld [vmem:[%s1511_s19 + $0x60] sm:$0xff]   ;;  %v1355_v21 = vld [vmem:[%s1511_s19 + $0x58] sm:$0xff]   ;;  %v1358_v24 = vld [vmem:[%s1511_s19 + $0x50] sm:$0xff]  }
  0x2a   : > { %1261 = vmatpush3.bf16.msra.mxu1 %v1345_v11  ;;  %v1353_v19 = vld [vmem:[%s1511_s19 + $0x20] sm:$0xff]   ;;  %v1357_v22 = vld [vmem:[%s1511_s19 + $0x98] sm:$0xff]   ;;  %v1360_v25 = vld [vmem:[%s1511_s19 + $0x90] sm:$0xff]  }
  0x2b   : > { %1262 = vmatprep.subr.bf16.mxu1 %v1348_v14  ;;  %v1354_v20 = vld [vmem:[%s1511_s19 + $0xa0] sm:$0xff]   ;;  %v1356_v23 = vld [vmem:[%s1511_s19 + $0x18] sm:$0xff]   ;;  %v1359_v26 = vld [vmem:[%s1511_s19 + $0x10] sm:$0xff]  }
  0x2c   : > { %1215 = vmatpush3.bf16.msra.mxu0 %v1347_v13  ;;  %v1361_v27 = vld [vmem:[%s1511_s19 + $0x48] sm:$0xff]   ;;  %v1364_v30 = vld [vmem:[%s1511_s19 + $0x40] sm:$0xff]   ;;  %v440_v44 = vld [vmem:[#allocation2 + $0x10] sm:$0xff] }
  0x2d   : > { %1216 = vmatprep.subr.bf16.mxu0 %v1349_v15  ;;  %v1362_v28 = vld [vmem:[%s1511_s19 + $0x8] sm:$0xff]   ;;  %v1366_v31 = vld [vmem:[%s1511_s19 + $0x80] sm:$0xff]   ;;  %v442_v58 = vld [vmem:[#allocation2 + $0x18] sm:$0xff] }
  0x2e   : > { %1263 = vmatpush3.bf16.msra.mxu1 %v1348_v14  ;;  %v1363_v29 = vld [vmem:[%s1511_s19 + $0x88] sm:$0xff]   ;;  %v1369_v32 = vld [vmem:[%s1513_s20 + $0x4] ss:$12 sps:$4 sm:$0xff]  }
  0x2f   : > { %1264 = vmatprep.subr.bf16.mxu1 %v1351_v17  ;;  %v1370_v33 = vld [vmem:[%s1513_s20 + $0x8] ss:$12 sps:$4 sm:$0xff]   ;;  %708 = vmatprep.mubr.bf16.mxu0 %v1369_v32  ;;  %v1367_v35 = vld [vmem:[%s1513_s20] ss:$12 sps:$4 sm:$0xff]   ;;  %v1374_v38 = vld [vmem:[%s1513_s20 + $0x18] ss:$12 sps:$4 sm:$0xff]  }
  0x30   : > { %1217 = vmatpush3.bf16.msra.mxu0 %v1350_v16  ;;  %v1365_v34 = vld [vmem:[%s1511_s19] sm:$0xff]   ;;  %1276 = vmatprep.mubr.bf16.mxu1 %v1370_v33  ;;  %v1372_v36 = vld [vmem:[%s1513_s20 + $0x1c] ss:$12 sps:$4 sm:$0xff]  }
  0x31   : > { %1218 = vmatprep.subr.bf16.mxu0 %v1352_v18  ;;  %v1371_v37 = vld [vmem:[%s1513_s20 + $0x20] ss:$12 sps:$4 sm:$0xff]  }
  0x32   : > { %1265 = vmatpush3.bf16.msra.mxu1 %v1351_v17  ;;  %v441_v52 = vld [vmem:[#allocation2] sm:$0xff]  ;;  %v443_v0 = vld [vmem:[#allocation2 + $0x8] sm:$0xff] }
  0x33   : > { %1266 = vmatprep.subr.bf16.mxu1 %v1354_v20 }
  0x34   : > { %1219 = vmatpush3.bf16.msra.mxu0 %v1353_v19 }
  0x35   : > { %1220 = vmatprep.subr.bf16.mxu0 %v1355_v21 }
  0x36   : > { %1267 = vmatpush3.bf16.msra.mxu1 %v1354_v20 }
  0x37   : > { %1268 = vmatprep.subr.bf16.mxu1 %v1357_v22 }
  0x38   : > { %1221 = vmatpush3.bf16.msra.mxu0 %v1356_v23 }
  0x39   : > { %1222 = vmatprep.subr.bf16.mxu0 %v1358_v24 }
  0x3a   : > { %1269 = vmatpush3.bf16.msra.mxu1 %v1357_v22 }
  0x3b   : > { %1270 = vmatprep.subr.bf16.mxu1 %v1360_v25 }
  0x3c   : > { %1223 = vmatpush3.bf16.msra.mxu0 %v1359_v26 }
  0x3d   : > { %1224 = vmatprep.subr.bf16.mxu0 %v1361_v27 }
  0x3e   : > { %1271 = vmatpush3.bf16.msra.mxu1 %v1360_v25 }
  0x3f   : > { %1272 = vmatprep.subr.bf16.mxu1 %v1363_v29 }
  0x40   : > { %1225 = vmatpush3.bf16.msra.mxu0 %v1362_v28 }
  0x41   : > { %1226 = vmatprep.subr.bf16.mxu0 %v1364_v30 }
  0x42   : > { %1273 = vmatpush3.bf16.msra.mxu1 %v1363_v29 }
  0x43   : > { %1274 = vmatprep.subr.bf16.mxu1 %v1366_v31 }
  0x44   : > { %1227 = vmatpush3.bf16.msra.mxu0 %v1365_v34 }
  0x46   : > { %1275 = vmatpush3.bf16.msra.mxu1 %v1366_v31 }
  0x47   : > { %709 = vmatmul.mubr.bf16.vlgmr.msra.gmra.mxu0 %v1367_v35 }
  0x48   : > { %716 = vmatprep.mubr.bf16.mxu0 %v1372_v36 }
  0x49   : > { %1277 = vmatmul.mubr.bf16.vlgmr.msra.gmra.mxu1 %v1371_v37 }
  0x4f   : > { %717 = vmatmul.mubr.bf16.gmra.mxu0 %v1374_v38 }
 0x107   : > { %v1228_v39 = vpop.f32.mrf.mxu0 }
 0x109   : > { %v1229_v40 = vpop.f32.mrf.mxu0  ;;  %v1278_v41 = vpop.f32.mrf.mxu1 }
 0x10a   : > { %v1230_v42 = vadd.f32 %v1229_v40, %v1228_v39 }
 0x10b   : > { %v1231_v43 = vpop.f32.mrf.mxu0  ;;  %v759_v45 = vpop.f32.mrf.mxu1 }
 0x10c   : > { %v760_v46 = vadd.f32 %v1230_v42, %v759_v45 }
 0x10d   : > { %v1232_v47 = vpop.f32.mrf.mxu0  ;;  %v1279_v48 = vpop.f32.mrf.mxu1 }
 0x10e   : > { %v774_v49 = vadd.f32 %v760_v46, %v440_v44  ;;  %v1233_v50 = vadd.f32 %v1232_v47, %v1231_v43 }
 0x10f   : > { %v1234_v51 = vpop.f32.mrf.mxu0  ;;  %v762_v53 = vpop.f32.mrf.mxu1 }
 0x110   : > { %778 = vst [vmem:[#allocation2 + $0x10] sm:$0xff] %v774_v49  ;;  %v763_v54 = vadd.f32 %v1233_v50, %v762_v53 }
 0x111   : > { %v1235_v55 = vpop.f32.mrf.mxu0 }
 0x112   : > { %v775_v56 = vadd.f32 %v763_v54, %v441_v52  ;;  %v1236_v57 = vadd.f32 %v1235_v55, %v1234_v51 }
 0x113   : > { %v1237_v59 = vpop.f32.mrf.mxu0 }
 0x114   : > { %779 = vst [vmem:[#allocation2] sm:$0xff] %v775_v56  ;;  %v768_v60 = vadd.f32 %v1278_v41, %v1236_v57 }
 0x115   : > { %v1238_v61 = vpop.f32.mrf.mxu0 }
 0x116   : > { %v776_v62 = vadd.f32 %v768_v60, %v442_v58  ;;  %v1239_v63 = vadd.f32 %v1238_v61, %v1237_v59 }
 0x118   : > { %780 = vst [vmem:[#allocation2 + $0x18] sm:$0xff] %v776_v62  ;;  %v771_v1 = vadd.f32 %v1279_v48, %v1239_v63  ;;  %785 = sbr.rel (%p1175_p11) target bundleno = 526 (0x20e), region = 78 }
 0x11a   : > { %v777_v2 = vadd.f32 %v771_v1, %v443_v0 }
 0x11c   : > { %781 = vst [vmem:[#allocation2 + $0x8] sm:$0xff] %v777_v2 }
 0x11d   : > { %v1375_v3 = vld [vmem:[%s1608_s4 + $0x38] sm:$0xff]   ;;  %v1376_v4 = vld [vmem:[%s1608_s4 + $0x30] sm:$0xff]   ;;  %v1377_v5 = vld [vmem:[%s1608_s4 + $0x28] sm:$0xff]  }
 0x11e   : > { %1280 = vmatprep.subr.bf16.mxu0 %v1375_v3  ;;  %v1378_v6 = vld [vmem:[%s1608_s4 + $0x20] sm:$0xff]   ;;  %v1379_v8 = vld [vmem:[%s1608_s4 + $0x18] sm:$0xff]   ;;  %v1380_v9 = vld [vmem:[%s1608_s4 + $0x10] sm:$0xff]  }
 0x11f   : > { %1281 = vmatpush3.bf16.msra.mxu0 %v1375_v3  ;;  %v1383_v7 = vld [vmem:[%s1607_s3] sm:$0xff]   ;;  %v1381_v10 = vld [vmem:[%s1608_s4 + $0x8] sm:$0xff]   ;;  %v788_v13 = vld [vmem:[#allocation2 + $0x18] sm:$0xff] }
 0x120   : > { %1282 = vmatprep.subr.bf16.mxu0 %v1376_v4  ;;  %1296 = vmatprep.mubr.bf16.mxu0 %v1383_v7  ;;  %v1382_v11 = vld [vmem:[%s1608_s4] sm:$0xff]   ;;  %v1384_v12 = vld [vmem:[%s1607_s3 + $0x8] sm:$0xff]   ;;  %v786_v15 = vld [vmem:[#allocation2 + $0x10] sm:$0xff] }
 0x121   : > { %v1176_v14 = vld [vmem:[%s1606_s2] ss:$0 sm:$0xff] }
 0x122   : > { %v799_v16 = vadd.f32 %v1176_v14, %v788_v13  ;;  %v797_v18 = vadd.f32 %v1176_v14, %v786_v15  ;;  %v787_v20 = vld [vmem:[#allocation2] sm:$0xff] }
 0x123   : > { %1283 = vmatpush3.bf16.msra.mxu0 %v1376_v4  ;;  %v789_v17 = vld [vmem:[#allocation2 + $0x8] sm:$0xff]  ;;  %v1187_v23 = vld [vmem:[%s1609_s5] ss:$0 sm:$0xff]  ;;  %v798_v26 = vadd.f32 %v1176_v14, %v787_v20 }
 0x124   : > { %1284 = vmatprep.subr.bf16.mxu0 %v1377_v5  ;;  %v800_v22 = vadd.f32 %v1176_v14, %v789_v17 }
 0x127   : > { %1285 = vmatpush3.bf16.msra.mxu0 %v1377_v5 }
 0x128   : > { %1286 = vmatprep.subr.bf16.mxu0 %v1378_v6 }
 0x12b   : > { %1287 = vmatpush3.bf16.msra.mxu0 %v1378_v6 }
 0x12c   : > { %1288 = vmatprep.subr.bf16.mxu0 %v1379_v8 }
 0x12f   : > { %1289 = vmatpush3.bf16.msra.mxu0 %v1379_v8 }
 0x130   : > { %1290 = vmatprep.subr.bf16.mxu0 %v1380_v9 }
 0x133   : > { %1291 = vmatpush3.bf16.msra.mxu0 %v1380_v9 }
 0x134   : > { %1292 = vmatprep.subr.bf16.mxu0 %v1381_v10 }
 0x137   : > { %1293 = vmatpush3.bf16.msra.mxu0 %v1381_v10 }
 0x138   : > { %1294 = vmatprep.subr.bf16.mxu0 %v1382_v11 }
 0x13b   : > { %1295 = vmatpush3.bf16.msra.mxu0 %v1382_v11 }
 0x13e   : > { %1297 = vmatmul.mubr.bf16.vlgmr.msra.gmra.mxu0 %v1384_v12 }
 0x1fe   : > { %v1298_v19 = vpop.f32.mrf.mxu0 }
 0x1ff   : > { %v932_v21 = vadd.f32 %v1298_v19, %v799_v16 }
 0x200   : > { %v915_v24 = vpop.f32.mrf.mxu0 }
 0x201   : > { %v930_v25 = vadd.f32 %v915_v24, %v797_v18  ;;  %v943_v28 = vadd.f32 %v1187_v23, %v932_v21 }
 0x202   : > { %v1299_v27 = vpop.f32.mrf.mxu0 }
 0x203   : > { %v933_v29 = vadd.f32 %v1299_v27, %v800_v22  ;;  %v941_v31 = vadd.f32 %v1187_v23, %v930_v25  ;;  %v947_v34 = vmax.f32 %v943_v28, 0.0 }
 0x204   : > { %v918_v30 = vpop.f32.mrf.mxu0 }
 0x205   : > { %v944_v32 = vadd.f32 %v1187_v23, %v933_v29  ;;  %v931_v33 = vadd.f32 %v918_v30, %v798_v26  ;;  %v945_v37 = vmax.f32 %v941_v31, 0.0 }
 0x207   : > { %v948_v35 = vmax.f32 %v944_v32, 0.0  ;;  %v942_v36 = vadd.f32 %v1187_v23, %v931_v33 }
 0x209   : > { %v1209_v38 = vpack.c.bf16 %v948_v35, %v947_v34  ;;  %v946_v39 = vmax.f32 %v942_v36, 0.0 }
 0x20b   : > { %1211 = vst [vmem:[%s1610_s6 + $0x8] sm:$0xff] %v1209_v38   ;;  %v1204_v40 = vpack.c.bf16 %v946_v39, %v945_v37 }
 0x20d   : > { %1205 = vst [vmem:[%s1610_s6] sm:$0xff] %v1204_v40  }
 0x20e PF: > { %s16_s25 = sadd.s32 1, %s1423_s25   ;;  %s1611_s21 = smov %s1411_s22 }
 0x20f   : > { %p13_p12 = scmp.ge.s32.totalorder %s16_s25, 5   ;;  %s1612_s22 = smov %s1496_s29 }
 0x210   : > { %s1613_s23 = smov %s1419_s24  ;;  %s1614_s24 = smov %s1616_s26 }
 0x211   :  { %15 = sbr.rel (!%p13_p12) target bundleno = 3 (0x3), region = 134 }

// kernel: multi_task_net_forward.27
= control target key start
LH: loop header
LB: loop body
LE: loop exit
PB: predicated region body
PF: predicated region fallthrough
CT: control target
= control target key end

     0   :  { %s1148_s12 = smov 0   ;;  %s1150_s13 = smov 0   ;;  %s1279_s0 = inlined_call_operand.vmem [shape: bf16[16,1152], index: 0, kind: input, shape index: {}]   ;;  %s1280_s1 = inlined_call_operand.vmem [shape: bf16[1152,256], index: 1, kind: input, shape index: {}]   ;;  %s1281_s2 = inlined_call_operand.vmem [shape: f32[1,256], index: 2, kind: input, shape index: {}]   ;;  %s1282_s3 = inlined_call_operand.vmem [shape: bf16[16,256], index: 3, kind: output, shape index: {}]  }
   0x1   :  { %s1152_s14 = smov 0   ;;  %s1154_s15 = smov 0  }
   0x2   :  { %s1156_s16 = smov 0  }
   0x3 LB: > { %s25_s17 = sadd.s32 1, %s1120_s15  ;;  %p48_p1 = scmp.ne.s32.totalorder %s1112_s13, %s1108_s12  ;;  %s1124_s16 = sphi %s1156_s16, %s13_s16   ;;  %s1120_s15 = sphi %s1154_s15, %s1286_s15   ;;  %s1116_s14 = sphi %s1152_s14, %s1285_s14   ;;  %s1112_s13 = sphi %s1150_s13, %s1284_s13   ;;  %s1108_s12 = sphi %s1148_s12, %s1283_s12  }
   0x4   : > { %p26_p0 = scmp.ge.s32.totalorder %s25_s17, 3  ;;  %p49_p2 = scmp.eq.s32.totalorder %s1124_s16, 0 }
   0x5   : > { %s41_s19 = sadd.s32 1, %s1112_s13  ;;  %p894_p5 = scmp.ge.s32.totalorder %s1124_s16, 3 }
   0x6   : > { %s1288_s17 = smov (%p26_p0, %s25_s17), 0  ;;  %p50_p3 = por %p49_p2, %p48_p1 }
   0x7   : > { %s37_s18 = ssub.s32 %s1120_s15, %s1288_s17  ;;  %164 = sbr.rel (%p894_p5) target bundleno = 19 (0x13), region = 20 }
   0x8   : > { %p39_p4 = scmp.eq.s32.totalorder %s37_s18, 0 }
   0xa   : > { %s1183_s20 = scalar_select %p39_p4, %s1112_s13, %s41_s19  }
   0xc   : > { %167 = sbr.rel (!%p50_p3) target bundleno = 19 (0x13), region = 24  ;;  %s169_s21 = sand.u32 (%p50_p3), 1, %s1112_s13  }
   0xd   : > { %s962_s22 = smul.u32 (%p50_p3), 12, %s1120_s15 }
   0xe   : > { %s966_s23 = smul.u32 (%p50_p3), 24, %s169_s21 }
   0xf   : > { %s177_s26 = scalar_lea.vmem (%p50_p3), %s1279_s0, %s962_s22 }
  0x10   : > { %v192_v0 = vld [vmem:[%s177_s26] sm:$0xff] (%p50_p3)  ;;  %v896_v2 = vld [vmem:[%s177_s26 + $0x8] sm:$0xf] (%p50_p3)  ;;  %s171_s27 = scalar_lea.vmem (%p50_p3), [#allocation3], %s966_s23  ;;  %v898_v3 = vld [vmem:[%s177_s26 + $0x2c] sm:$0xf] (%p50_p3) }
  0x11   : > { %v194_v1 = vld [vmem:[%s177_s26 + $0x24] sm:$0xff]  ;;  %193 = vst [vmem:[%s171_s27] sm:$0xff] %v192_v0  ;;  %897 = vst [vmem:[%s171_s27 + $0x8] sm:$0xf] %v896_v2 }
  0x12   : > { %195 = vst [vmem:[%s171_s27 + $0xc] sm:$0xff] %v194_v1  ;;  %899 = vst [vmem:[%s171_s27 + $0x14] sm:$0xf] %v898_v3 }
  0x13 PF: > { %p900_p6 = scmp.ge.s32.totalorder %s1124_s16, 1  ;;  %p227_p7 = scmp.lt.s32.totalorder %s1124_s16, 4 }
  0x15   : > { %p228_p8 = pnand %p900_p6, %p227_p7 }
  0x16   : > { %s234_s28 = sand.u32 (!%p228_p8), 1, %s1108_s12   ;;  %s278_s29 = smul.u32 (!%p228_p8), 48, %s1116_s14 }
  0x17   : > { %231 = sbr.rel (%p228_p8) target bundleno = 320 (0x140), region = 54  ;;  %p903_p10 = scmp.ne.s32.totalorder (!%p228_p8), %s1116_s14, 0 }
  0x18   : > { %s967_s30 = smul.u32 (!%p228_p8), 24, %s234_s28  ;;  %p280_p9 = scmp.lt.s32.totalorder (!%p228_p8), %s278_s29, 143 }
  0x1a   : > { %s1200_s8 = scalar_lea.vmem (!%p228_p8), [#allocation3], %s967_s30 }
  0x1c   : > { %s1290_s29 = smov (!%p280_p9, %s278_s29), 143  ;;  %311 = sbr.rel (%p903_p10) target bundleno = 36 (0x24), region = 62 }
  0x1d   : > { %s963_s4 = sshll.u32 %s1290_s29, 3 }
  0x1e   : > { %s1198_s7 = scalar_lea.vmem %s1280_s1, %s963_s4 }
  0x21   : > { %v1126_v4 = vmov 0.0  }
  0x22   : > { %312 = vst [vmem:[#allocation2 + $0x10] sm:$0xff] %v1126_v4  ;;  %313 = vst [vmem:[#allocation2] sm:$0xff] %v1126_v4 }
  0x23   : > { %314 = vst [vmem:[#allocation2 + $0x18] sm:$0xff] %v1126_v4  ;;  %315 = vst [vmem:[#allocation2 + $0x8] sm:$0xff] %v1126_v4 }
  0x24 PF: > { %v1010_v5 = vld [vmem:[%s1198_s7 + $0x74] ss:$8 sps:$4 sm:$0xff]   ;;  %v1012_v6 = vld [vmem:[%s1198_s7 + $0x70] ss:$8 sps:$4 sm:$0xff]   ;;  %v1127_v7 = vmov 0   ;;  %p955_p11 = scmp.ne.s32.totalorder %s1116_s14, 2 }
  0x25   : > { %703 = vmatprep.mubr.bf16.mxu1 %v1127_v7  ;;  %628 = vmatprep.subr.bf16.mxu0 %v1010_v5  ;;  %v1013_v8 = vld [vmem:[%s1198_s7 + $0x64] ss:$8 sps:$4 sm:$0xff]   ;;  %v1015_v9 = vld [vmem:[%s1198_s7 + $0x60] ss:$8 sps:$4 sm:$0xff]   ;;  %v1016_v10 = vld [vmem:[%s1198_s7 + $0x54] ss:$8 sps:$4 sm:$0xff]  }
  0x26   : > { %629 = vmatpush1.bf16.msra.mxu0 %v1012_v6  ;;  %v1018_v11 = vld [vmem:[%s1198_s7 + $0x50] ss:$8 sps:$4 sm:$0xff]   ;;  %v1019_v12 = vld [vmem:[%s1198_s7 + $0x44] ss:$8 sps:$4 sm:$0xff]   ;;  %v1031_v13 = vld [vmem:[%s1198_s7 + $0x174] ss:$8 sps:$4 sm:$0xff]  }
  0x27   : > { %630 = vmatprep.subr.bf16.mxu0 %v1013_v8  ;;  %v1033_v14 = vld [vmem:[%s1198_s7 + $0x170] ss:$8 sps:$4 sm:$0xff]   ;;  %v1021_v15 = vld [vmem:[%s1198_s7 + $0x40] ss:$8 sps:$4 sm:$0xff]   ;;  %v1022_v16 = vld [vmem:[%s1198_s7 + $0x34] ss:$8 sps:$4 sm:$0xff]   ;;  %671 = vmatprep.subr.bf16.mxu1 %v1031_v13 }
  0x28   : > { %v1037_v17 = vld [vmem:[%s1198_s7 + $0x164] ss:$8 sps:$4 sm:$0xff]   ;;  %672 = vmatpush1.bf16.msra.mxu1 %v1033_v14  ;;  %v1039_v18 = vld [vmem:[%s1198_s7 + $0x160] ss:$8 sps:$4 sm:$0xff]   ;;  %v1024_v19 = vld [vmem:[%s1198_s7 + $0x30] ss:$8 sps:$4 sm:$0xff]  }
  0x29   : > { %673 = vmatprep.subr.bf16.mxu1 %v1037_v17  ;;  %v1043_v20 = vld [vmem:[%s1198_s7 + $0x154] ss:$8 sps:$4 sm:$0xff]   ;;  %v1025_v21 = vld [vmem:[%s1198_s7 + $0x24] ss:$8 sps:$4 sm:$0xff]   ;;  %v1045_v22 = vld [vmem:[%s1198_s7 + $0x150] ss:$8 sps:$4 sm:$0xff]  }
  0x2a   : > { %631 = vmatpush1.bf16.msra.mxu0 %v1015_v9  ;;  %v1049_v23 = vld [vmem:[%s1198_s7 + $0x144] ss:$8 sps:$4 sm:$0xff]   ;;  %v1027_v24 = vld [vmem:[%s1198_s7 + $0x20] ss:$8 sps:$4 sm:$0xff]   ;;  %v1028_v25 = vld [vmem:[%s1198_s7 + $0x14] ss:$8 sps:$4 sm:$0xff]  }
  0x2b   : > { %632 = vmatprep.subr.bf16.mxu0 %v1016_v10  ;;  %v1051_v26 = vld [vmem:[%s1198_s7 + $0x140] ss:$8 sps:$4 sm:$0xff]   ;;  %v1055_v27 = vld [vmem:[%s1198_s7 + $0x134] ss:$8 sps:$4 sm:$0xff]   ;;  %v1030_v28 = vld [vmem:[%s1198_s7 + $0x10] ss:$8 sps:$4 sm:$0xff]  }
  0x2c   : > { %674 = vmatpush1.bf16.msra.mxu1 %v1039_v18  ;;  %v1034_v29 = vld [vmem:[%s1198_s7 + $0x4] ss:$8 sps:$4 sm:$0xff]   ;;  %v1057_v30 = vld [vmem:[%s1198_s7 + $0x130] ss:$8 sps:$4 sm:$0xff]   ;;  %v1036_v32 = vld [vmem:[%s1198_s7] ss:$8 sps:$4 sm:$0xff]  }
  0x2d   : > { %675 = vmatprep.subr.bf16.mxu1 %v1043_v20  ;;  %v1061_v31 = vld [vmem:[%s1198_s7 + $0x124] ss:$8 sps:$4 sm:$0xff]   ;;  %v1040_v33 = vld [vmem:[%s1198_s7 + $0xf4] ss:$8 sps:$4 sm:$0xff]   ;;  %v1063_v34 = vld [vmem:[%s1198_s7 + $0x120] ss:$8 sps:$4 sm:$0xff]  }
  0x2e   : > { %633 = vmatpush1.bf16.msra.mxu0 %v1018_v11  ;;  %v1067_v35 = vld [vmem:[%s1198_s7 + $0x114] ss:$8 sps:$4 sm:$0xff]   ;;  %v1042_v36 = vld [vmem:[%s1198_s7 + $0xf0] ss:$8 sps:$4 sm:$0xff]   ;;  %v1046_v37 = vld [vmem:[%s1198_s7 + $0xe4] ss:$8 sps:$4 sm:$0xff]  }
  0x2f   : > { %634 = vmatprep.subr.bf16.mxu0 %v1019_v12  ;;  %v1069_v38 = vld [vmem:[%s1198_s7 + $0x110] ss:$8 sps:$4 sm:$0xff]   ;;  %v1073_v39 = vld [vmem:[%s1198_s7 + $0x104] ss:$8 sps:$4 sm:$0xff]   ;;  %v1048_v41 = vld [vmem:[%s1198_s7 + $0xe0] ss:$8 sps:$4 sm:$0xff]  }
  0x30   : > { %676 = vmatpush1.bf16.msra.mxu1 %v1045_v22  ;;  %v1085_v40 = vld [vmem:[%s1200_s8 + $0x4] ss:$12 sps:$4 sm:$0xff]   ;;  %v1079_v46 = vld [vmem:[%s1200_s8 + $0x8] ss:$12 sps:$4 sm:$0xff]   ;;  %v1083_v56 = vld [vmem:[%s1200_s8] ss:$12 sps:$4 sm:$0xff]  }
  0x31   : > { %677 = vmatprep.subr.bf16.mxu1 %v1049_v23  ;;  %v1052_v42 = vld [vmem:[%s1198_s7 + $0xd4] ss:$8 sps:$4 sm:$0xff]   ;;  %660 = vmatprep.mubr.bf16.mxu0 %v1085_v40  ;;  %v1075_v43 = vld [vmem:[%s1198_s7 + $0x100] ss:$8 sps:$4 sm:$0xff]   ;;  %v1054_v44 = vld [vmem:[%s1198_s7 + $0xd0] ss:$8 sps:$4 sm:$0xff]  }
  0x32   : > { %635 = vmatpush1.bf16.msra.mxu0 %v1021_v15  ;;  %v1058_v45 = vld [vmem:[%s1198_s7 + $0xc4] ss:$8 sps:$4 sm:$0xff]   ;;  %v1060_v47 = vld [vmem:[%s1198_s7 + $0xc0] ss:$8 sps:$4 sm:$0xff]   ;;  %v1064_v48 = vld [vmem:[%s1198_s7 + $0xb4] ss:$8 sps:$4 sm:$0xff]  }
  0x33   : > { %636 = vmatprep.subr.bf16.mxu0 %v1022_v16  ;;  %v1066_v49 = vld [vmem:[%s1198_s7 + $0xb0] ss:$8 sps:$4 sm:$0xff]   ;;  %v1070_v50 = vld [vmem:[%s1198_s7 + $0xa4] ss:$8 sps:$4 sm:$0xff]   ;;  %v1072_v51 = vld [vmem:[%s1198_s7 + $0xa0] ss:$8 sps:$4 sm:$0xff]  }
  0x34   : > { %678 = vmatpush1.bf16.msra.mxu1 %v1051_v26  ;;  %v1076_v52 = vld [vmem:[%s1198_s7 + $0x94] ss:$8 sps:$4 sm:$0xff]   ;;  %v1078_v53 = vld [vmem:[%s1198_s7 + $0x90] ss:$8 sps:$4 sm:$0xff]   ;;  %v1080_v54 = vld [vmem:[%s1198_s7 + $0x84] ss:$8 sps:$4 sm:$0xff]  }
  0x35   : > { %679 = vmatprep.subr.bf16.mxu1 %v1055_v27  ;;  %v1082_v55 = vld [vmem:[%s1198_s7 + $0x80] ss:$8 sps:$4 sm:$0xff]   ;;  %v316_v59 = vld [vmem:[#allocation2 + $0x10] sm:$0xff]  ;;  %v318_v3 = vld [vmem:[#allocation2 + $0x18] sm:$0xff] }
  0x36   : > { %637 = vmatpush1.bf16.msra.mxu0 %v1024_v19  ;;  %v317_v63 = vld [vmem:[#allocation2] sm:$0xff]  ;;  %v319_v8 = vld [vmem:[#allocation2 + $0x8] sm:$0xff] }
  0x37   : > { %638 = vmatprep.subr.bf16.mxu0 %v1025_v21 }
  0x38   : > { %680 = vmatpush1.bf16.msra.mxu1 %v1057_v30 }
  0x39   : > { %681 = vmatprep.subr.bf16.mxu1 %v1061_v31 }
  0x3a   : > { %639 = vmatpush1.bf16.msra.mxu0 %v1027_v24 }
  0x3b   : > { %640 = vmatprep.subr.bf16.mxu0 %v1028_v25 }
  0x3c   : > { %682 = vmatpush1.bf16.msra.mxu1 %v1063_v34 }
  0x3d   : > { %683 = vmatprep.subr.bf16.mxu1 %v1067_v35 }
  0x3e   : > { %641 = vmatpush1.bf16.msra.mxu0 %v1030_v28 }
  0x3f   : > { %642 = vmatprep.subr.bf16.mxu0 %v1034_v29 }
  0x40   : > { %684 = vmatpush1.bf16.msra.mxu1 %v1069_v38 }
  0x41   : > { %685 = vmatprep.subr.bf16.mxu1 %v1073_v39 }
  0x42   : > { %643 = vmatpush1.bf16.msra.mxu0 %v1036_v32 }
  0x43   : > { %644 = vmatprep.subr.bf16.mxu0 %v1040_v33 }
  0x44   : > { %686 = vmatpush1.bf16.msra.mxu1 %v1075_v43 }
  0x46   : > { %645 = vmatpush2.bf16.msra.mxu0 %v1042_v36 }
  0x47   : > { %646 = vmatprep.subr.bf16.mxu0 %v1046_v37  ;;  %704 = vmatmul.mubr.bf16.vlgmr.msra.gmra.mxu1 %v1079_v46 }
  0x4a   : > { %647 = vmatpush2.bf16.msra.mxu0 %v1048_v41 }
  0x4b   : > { %648 = vmatprep.subr.bf16.mxu0 %v1052_v42 }
  0x4e   : > { %649 = vmatpush2.bf16.msra.mxu0 %v1054_v44 }
  0x4f   : > { %650 = vmatprep.subr.bf16.mxu0 %v1058_v45 }
  0x52   : > { %651 = vmatpush2.bf16.msra.mxu0 %v1060_v47 }
  0x53   : > { %652 = vmatprep.subr.bf16.mxu0 %v1064_v48 }
  0x56   : > { %653 = vmatpush2.bf16.msra.mxu0 %v1066_v49 }
  0x57   : > { %654 = vmatprep.subr.bf16.mxu0 %v1070_v50 }
  0x5a   : > { %655 = vmatpush2.bf16.msra.mxu0 %v1072_v51 }
  0x5b   : > { %656 = vmatprep.subr.bf16.mxu0 %v1076_v52 }
  0x5e   : > { %657 = vmatpush2.bf16.msra.mxu0 %v1078_v53 }
  0x5f   : > { %658 = vmatprep.subr.bf16.mxu0 %v1080_v54 }
  0x62   : > { %659 = vmatpush2.bf16.msra.mxu0 %v1082_v55 }
  0x65   : > { %661 = vmatmul.mubr.bf16.vlgmr.msra.gmra.mxu0 %v1083_v56 }
 0x107   : > { %v705_v57 = vpop.f32.mrf.mxu1 }
 0x109   : > { %v707_v58 = vpop.f32.mrf.mxu1 }
 0x10b   : > { %v709_v62 = vpop.f32.mrf.mxu1 }
 0x10d   : > { %v711_v7 = vpop.f32.mrf.mxu1 }
 0x125   : > { %v662_v60 = vpop.f32.mrf.mxu0 }
 0x126   : > { %v706_v61 = vadd.f32 %v705_v57, %v662_v60 }
 0x127   : > { %v664_v0 = vpop.f32.mrf.mxu0 }
 0x128   : > { %v714_v1 = vadd.f32 %v706_v61, %v316_v59  ;;  %v708_v2 = vadd.f32 %v707_v58, %v664_v0 }
 0x129   : > { %v666_v4 = vpop.f32.mrf.mxu0 }
 0x12a   : > { %718 = vst [vmem:[#allocation2 + $0x10] sm:$0xff] %v714_v1  ;;  %v715_v5 = vadd.f32 %v708_v2, %v317_v63  ;;  %v710_v6 = vadd.f32 %v709_v62, %v666_v4 }
 0x12b   : > { %v668_v9 = vpop.f32.mrf.mxu0 }
 0x12c   : > { %719 = vst [vmem:[#allocation2] sm:$0xff] %v715_v5  ;;  %v716_v10 = vadd.f32 %v710_v6, %v318_v3  ;;  %v712_v11 = vadd.f32 %v711_v7, %v668_v9  ;;  %725 = sbr.rel (%p955_p11) target bundleno = 320 (0x140), region = 66 }
 0x12e   : > { %720 = vst [vmem:[#allocation2 + $0x18] sm:$0xff] %v716_v10  ;;  %v717_v12 = vadd.f32 %v712_v11, %v319_v8 }
 0x130   : > { %721 = vst [vmem:[#allocation2 + $0x8] sm:$0xff] %v717_v12 }
 0x131   : > { %v732_v13 = vlaneseq  ;;  %v730_v15 = vld [vmem:[%s1281_s2] sm:$0x3]  ;;  %v726_v16 = vld [vmem:[#allocation2 + $0x10] sm:$0xff] }
 0x133   : > { %v733_v14 = vshrl.u32 %v732_v13, 7  ;;  %v727_v19 = vld [vmem:[#allocation2] sm:$0xff] }
 0x135   : > { %v734_v17 = vsub.s32 0, %v733_v14  ;;  %v738_v18 = vsub.s32 1, %v733_v14  ;;  %v728_v20 = vld [vmem:[#allocation2 + $0x18] sm:$0xff] }
 0x137   : > { %v729_v21 = vld [vmem:[#allocation2 + $0x8] sm:$0xff]  ;;  %v735_v22 = vrot.slane %v730_v15, %v734_v17  ;;  %v739_v23 = vrot.slane %v730_v15, %v738_v18 }
 0x139   : > { %v742_v24 = vadd.f32 %v735_v22, %v726_v16  ;;  %v743_v25 = vadd.f32 %v739_v23, %v727_v19  ;;  %v744_v26 = vadd.f32 %v735_v22, %v728_v20  ;;  %v745_v27 = vadd.f32 %v739_v23, %v729_v21 }
 0x13b   : > { %v746_v28 = vmax.f32 %v742_v24, 0.0  ;;  %v747_v29 = vmax.f32 %v743_v25, 0.0  ;;  %v748_v30 = vmax.f32 %v744_v26, 0.0  ;;  %v749_v31 = vmax.f32 %v745_v27, 0.0 }
 0x13d   : > { %v964_v32 = vpack.c.bf16 %v747_v29, %v746_v28  ;;  %v965_v33 = vpack.c.bf16 %v749_v31, %v748_v30 }
 0x13f   : > { %762 = vst [vmem:[%s1282_s3] sm:$0xff] %v964_v32  ;;  %763 = vst [vmem:[%s1282_s3 + $0x8] sm:$0xff] %v965_v33 }
 0x140 PF: > { %s13_s16 = sadd.s32 1, %s1124_s16   ;;  %s1283_s12 = smov %s1112_s13 }
 0x141   : > { %p10_p12 = scmp.ge.s32.totalorder %s13_s16, 5   ;;  %s1284_s13 = smov %s1183_s20 }
 0x142   : > { %s1285_s14 = smov %s1120_s15  ;;  %s1286_s15 = smov %s1288_s17 }
 0x143   :  { %12 = sbr.rel (!%p10_p12) target bundleno = 3 (0x3), region = 113 }

// kernel: multi_task_net_forward.28
= control target key start
LH: loop header
LB: loop body
LE: loop exit
PB: predicated region body
PF: predicated region fallthrough
CT: control target
= control target key end

     0   :  { %s1563_s21 = smov 0   ;;  %s1565_s22 = smov 0   ;;  %s1748_s0 = inlined_call_operand.vmem [shape: bf16[16,2304], index: 0, kind: input, shape index: {}]   ;;  %s1749_s1 = inlined_call_operand.vmem [shape: bf16[2304,256], index: 1, kind: input, shape index: {}]   ;;  %s1750_s2 = inlined_call_operand.vmem [shape: f32[1,256], index: 2, kind: input, shape index: {}]   ;;  %s1751_s3 = inlined_call_operand.vmem [shape: bf16[16,128], index: 3, kind: input, shape index: {}]   ;;  %s1752_s4 = inlined_call_operand.vmem [shape: bf16[128,256], index: 4, kind: input, shape index: {}]   ;;  %s1753_s5 = inlined_call_operand.vmem [shape: f32[1,256], index: 5, kind: input, shape index: {}]   ;;  %s1754_s6 = inlined_call_operand.vmem [shape: bf16[16,256], index: 6, kind: output, shape index: {}]  }
   0x1   :  { %s1567_s23 = smov 0   ;;  %s1569_s24 = smov 0  }
   0x2   :  { %s1571_s25 = smov 0  }
   0x3 LB: > { %s28_s26 = sadd.s32 1, %s1519_s24  ;;  %p51_p1 = scmp.ne.s32.totalorder %s1511_s22, %s1507_s21  ;;  %s1523_s25 = sphi %s1571_s25, %s16_s25   ;;  %s1519_s24 = sphi %s1569_s24, %s1758_s24   ;;  %s1515_s23 = sphi %s1567_s23, %s1757_s23   ;;  %s1511_s22 = sphi %s1565_s22, %s1756_s22   ;;  %s1507_s21 = sphi %s1563_s21, %s1755_s21  }
   0x4   : > { %p29_p0 = scmp.ge.s32.totalorder %s28_s26, 6  ;;  %p52_p2 = scmp.eq.s32.totalorder %s1523_s25, 0 }
   0x5   : > { %s44_s28 = sadd.s32 1, %s1511_s22  ;;  %p1250_p5 = scmp.ge.s32.totalorder %s1523_s25, 6 }
   0x6   : > { %s1760_s26 = smov (%p29_p0, %s28_s26), 0  ;;  %p53_p3 = por %p52_p2, %p51_p1 }
   0x7   : > { %s40_s27 = ssub.s32 %s1519_s24, %s1760_s26  ;;  %271 = sbr.rel (%p1250_p5) target bundleno = 19 (0x13), region = 32 }
   0x8   : > { %p42_p4 = scmp.eq.s32.totalorder %s40_s27, 0 }
   0xa   : > { %s1598_s29 = scalar_select %p42_p4, %s1511_s22, %s44_s28  }
   0xc   : > { %274 = sbr.rel (!%p53_p3) target bundleno = 19 (0x13), region = 36  ;;  %s276_s30 = sand.u32 (%p53_p3), 1, %s1511_s22  }
   0xd   : > { %s1335_s7 = smul.u32 (%p53_p3), 12, %s1519_s24 }
   0xe   : > { %s1339_s8 = smul.u32 (%p53_p3), 24, %s276_s30 }
   0xf   : > { %s284_s11 = scalar_lea.vmem (%p53_p3), %s1748_s0, %s1335_s7 }
  0x10   : > { %v299_v0 = vld [vmem:[%s284_s11] sm:$0xff] (%p53_p3)  ;;  %v301_v1 = vld [vmem:[%s284_s11 + $0x48] sm:$0xff] (%p53_p3)  ;;  %s278_s12 = scalar_lea.vmem (%p53_p3), [#allocation3], %s1339_s8  ;;  %v1254_v3 = vld [vmem:[%s284_s11 + $0x50] sm:$0xf] (%p53_p3) }
  0x11   : > { %v1252_v2 = vld [vmem:[%s284_s11 + $0x8] sm:$0xf]  ;;  %300 = vst [vmem:[%s278_s12] sm:$0xff] %v299_v0  ;;  %302 = vst [vmem:[%s278_s12 + $0xc] sm:$0xff] %v301_v1 }
  0x12   : > { %1253 = vst [vmem:[%s278_s12 + $0x8] sm:$0xf] %v1252_v2  ;;  %1255 = vst [vmem:[%s278_s12 + $0x14] sm:$0xf] %v1254_v3 }
  0x13 PF: > { %p1256_p6 = scmp.ge.s32.totalorder %s1523_s25, 1  ;;  %p334_p7 = scmp.lt.s32.totalorder %s1523_s25, 7 }
  0x15   : > { %p335_p8 = pnand %p1256_p6, %p334_p7 }
  0x16   : > { %s341_s13 = sand.u32 (!%p335_p8), 1, %s1507_s21   ;;  %s405_s14 = smul.u32 (!%p335_p8), 48, %s1515_s23 }
  0x17   : > { %338 = sbr.rel (%p335_p8) target bundleno = 546 (0x222), region = 66  ;;  %p1259_p10 = scmp.ne.s32.totalorder (!%p335_p8), %s1515_s23, 0 }
  0x18   : > { %s1340_s15 = smul.u32 (!%p335_p8), 24, %s341_s13  ;;  %p407_p9 = scmp.lt.s32.totalorder (!%p335_p8), %s405_s14, 287 }
  0x1a   : > { %s1615_s20 = scalar_lea.vmem (!%p335_p8), [#allocation3], %s1340_s15 }
  0x1c   : > { %s1762_s14 = smov (!%p407_p9, %s405_s14), 287  ;;  %455 = sbr.rel (%p1259_p10) target bundleno = 36 (0x24), region = 74 }
  0x1d   : > { %s1336_s16 = sshll.u32 %s1762_s14, 3 }
  0x1e   : > { %s1613_s19 = scalar_lea.vmem %s1749_s1, %s1336_s16 }
  0x21   : > { %v1525_v4 = vmov 0.0  }
  0x22   : > { %456 = vst [vmem:[#allocation2 + $0x10] sm:$0xff] %v1525_v4  ;;  %457 = vst [vmem:[#allocation2] sm:$0xff] %v1525_v4 }
  0x23   : > { %458 = vst [vmem:[#allocation2 + $0x18] sm:$0xff] %v1525_v4  ;;  %459 = vst [vmem:[#allocation2 + $0x8] sm:$0xff] %v1525_v4 }
  0x24 PF: > { %v1384_v5 = vld [vmem:[%s1613_s19 + $0x74] ss:$8 sps:$4 sm:$0xff]   ;;  %v1386_v6 = vld [vmem:[%s1613_s19 + $0x70] ss:$8 sps:$4 sm:$0xff]   ;;  %v1526_v7 = vmov 0   ;;  %p1311_p11 = scmp.ne.s32.totalorder %s1515_s23, 5 }
  0x25   : > { %847 = vmatprep.mubr.bf16.mxu1 %v1526_v7  ;;  %772 = vmatprep.subr.bf16.mxu0 %v1384_v5  ;;  %v1387_v8 = vld [vmem:[%s1613_s19 + $0x64] ss:$8 sps:$4 sm:$0xff]   ;;  %v1389_v9 = vld [vmem:[%s1613_s19 + $0x60] ss:$8 sps:$4 sm:$0xff]   ;;  %v1390_v10 = vld [vmem:[%s1613_s19 + $0x54] ss:$8 sps:$4 sm:$0xff]  }
  0x26   : > { %773 = vmatpush1.bf16.msra.mxu0 %v1386_v6  ;;  %v1392_v11 = vld [vmem:[%s1613_s19 + $0x50] ss:$8 sps:$4 sm:$0xff]   ;;  %v1393_v12 = vld [vmem:[%s1613_s19 + $0x44] ss:$8 sps:$4 sm:$0xff]   ;;  %v1405_v13 = vld [vmem:[%s1613_s19 + $0x174] ss:$8 sps:$4 sm:$0xff]  }
  0x27   : > { %774 = vmatprep.subr.bf16.mxu0 %v1387_v8  ;;  %v1407_v14 = vld [vmem:[%s1613_s19 + $0x170] ss:$8 sps:$4 sm:$0xff]   ;;  %v1395_v15 = vld [vmem:[%s1613_s19 + $0x40] ss:$8 sps:$4 sm:$0xff]   ;;  %v1396_v16 = vld [vmem:[%s1613_s19 + $0x34] ss:$8 sps:$4 sm:$0xff]   ;;  %815 = vmatprep.subr.bf16.mxu1 %v1405_v13 }
  0x28   : > { %v1411_v17 = vld [vmem:[%s1613_s19 + $0x164] ss:$8 sps:$4 sm:$0xff]   ;;  %816 = vmatpush1.bf16.msra.mxu1 %v1407_v14  ;;  %v1413_v18 = vld [vmem:[%s1613_s19 + $0x160] ss:$8 sps:$4 sm:$0xff]   ;;  %v1398_v19 = vld [vmem:[%s1613_s19 + $0x30] ss:$8 sps:$4 sm:$0xff]  }
  0x29   : > { %817 = vmatprep.subr.bf16.mxu1 %v1411_v17  ;;  %v1417_v20 = vld [vmem:[%s1613_s19 + $0x154] ss:$8 sps:$4 sm:$0xff]   ;;  %v1399_v21 = vld [vmem:[%s1613_s19 + $0x24] ss:$8 sps:$4 sm:$0xff]   ;;  %v1419_v22 = vld [vmem:[%s1613_s19 + $0x150] ss:$8 sps:$4 sm:$0xff]  }
  0x2a   : > { %775 = vmatpush1.bf16.msra.mxu0 %v1389_v9  ;;  %v1423_v23 = vld [vmem:[%s1613_s19 + $0x144] ss:$8 sps:$4 sm:$0xff]   ;;  %v1401_v24 = vld [vmem:[%s1613_s19 + $0x20] ss:$8 sps:$4 sm:$0xff]   ;;  %v1402_v25 = vld [vmem:[%s1613_s19 + $0x14] ss:$8 sps:$4 sm:$0xff]  }
  0x2b   : > { %776 = vmatprep.subr.bf16.mxu0 %v1390_v10  ;;  %v1425_v26 = vld [vmem:[%s1613_s19 + $0x140] ss:$8 sps:$4 sm:$0xff]   ;;  %v1429_v27 = vld [vmem:[%s1613_s19 + $0x134] ss:$8 sps:$4 sm:$0xff]   ;;  %v1404_v28 = vld [vmem:[%s1613_s19 + $0x10] ss:$8 sps:$4 sm:$0xff]  }
  0x2c   : > { %818 = vmatpush1.bf16.msra.mxu1 %v1413_v18  ;;  %v1408_v29 = vld [vmem:[%s1613_s19 + $0x4] ss:$8 sps:$4 sm:$0xff]   ;;  %v1431_v30 = vld [vmem:[%s1613_s19 + $0x130] ss:$8 sps:$4 sm:$0xff]   ;;  %v1410_v32 = vld [vmem:[%s1613_s19] ss:$8 sps:$4 sm:$0xff]  }
  0x2d   : > { %819 = vmatprep.subr.bf16.mxu1 %v1417_v20  ;;  %v1435_v31 = vld [vmem:[%s1613_s19 + $0x124] ss:$8 sps:$4 sm:$0xff]   ;;  %v1414_v33 = vld [vmem:[%s1613_s19 + $0xf4] ss:$8 sps:$4 sm:$0xff]   ;;  %v1437_v34 = vld [vmem:[%s1613_s19 + $0x120] ss:$8 sps:$4 sm:$0xff]  }
  0x2e   : > { %777 = vmatpush1.bf16.msra.mxu0 %v1392_v11  ;;  %v1441_v35 = vld [vmem:[%s1613_s19 + $0x114] ss:$8 sps:$4 sm:$0xff]   ;;  %v1416_v36 = vld [vmem:[%s1613_s19 + $0xf0] ss:$8 sps:$4 sm:$0xff]   ;;  %v1420_v37 = vld [vmem:[%s1613_s19 + $0xe4] ss:$8 sps:$4 sm:$0xff]  }
  0x2f   : > { %778 = vmatprep.subr.bf16.mxu0 %v1393_v12  ;;  %v1443_v38 = vld [vmem:[%s1613_s19 + $0x110] ss:$8 sps:$4 sm:$0xff]   ;;  %v1447_v39 = vld [vmem:[%s1613_s19 + $0x104] ss:$8 sps:$4 sm:$0xff]   ;;  %v1422_v41 = vld [vmem:[%s1613_s19 + $0xe0] ss:$8 sps:$4 sm:$0xff]  }
  0x30   : > { %820 = vmatpush1.bf16.msra.mxu1 %v1419_v22  ;;  %v1459_v40 = vld [vmem:[%s1615_s20 + $0x4] ss:$12 sps:$4 sm:$0xff]   ;;  %v1453_v46 = vld [vmem:[%s1615_s20 + $0x8] ss:$12 sps:$4 sm:$0xff]   ;;  %v1457_v56 = vld [vmem:[%s1615_s20] ss:$12 sps:$4 sm:$0xff]  }
  0x31   : > { %821 = vmatprep.subr.bf16.mxu1 %v1423_v23  ;;  %v1426_v42 = vld [vmem:[%s1613_s19 + $0xd4] ss:$8 sps:$4 sm:$0xff]   ;;  %804 = vmatprep.mubr.bf16.mxu0 %v1459_v40  ;;  %v1449_v43 = vld [vmem:[%s1613_s19 + $0x100] ss:$8 sps:$4 sm:$0xff]   ;;  %v1428_v44 = vld [vmem:[%s1613_s19 + $0xd0] ss:$8 sps:$4 sm:$0xff]  }
  0x32   : > { %779 = vmatpush1.bf16.msra.mxu0 %v1395_v15  ;;  %v1432_v45 = vld [vmem:[%s1613_s19 + $0xc4] ss:$8 sps:$4 sm:$0xff]   ;;  %v1434_v47 = vld [vmem:[%s1613_s19 + $0xc0] ss:$8 sps:$4 sm:$0xff]   ;;  %v1438_v48 = vld [vmem:[%s1613_s19 + $0xb4] ss:$8 sps:$4 sm:$0xff]  }
  0x33   : > { %780 = vmatprep.subr.bf16.mxu0 %v1396_v16  ;;  %v1440_v49 = vld [vmem:[%s1613_s19 + $0xb0] ss:$8 sps:$4 sm:$0xff]   ;;  %v1444_v50 = vld [vmem:[%s1613_s19 + $0xa4] ss:$8 sps:$4 sm:$0xff]   ;;  %v1446_v51 = vld [vmem:[%s1613_s19 + $0xa0] ss:$8 sps:$4 sm:$0xff]  }
  0x34   : > { %822 = vmatpush1.bf16.msra.mxu1 %v1425_v26  ;;  %v1450_v52 = vld [vmem:[%s1613_s19 + $0x94] ss:$8 sps:$4 sm:$0xff]   ;;  %v1452_v53 = vld [vmem:[%s1613_s19 + $0x90] ss:$8 sps:$4 sm:$0xff]   ;;  %v1454_v54 = vld [vmem:[%s1613_s19 + $0x84] ss:$8 sps:$4 sm:$0xff]  }
  0x35   : > { %823 = vmatprep.subr.bf16.mxu1 %v1429_v27  ;;  %v1456_v55 = vld [vmem:[%s1613_s19 + $0x80] ss:$8 sps:$4 sm:$0xff]   ;;  %v460_v59 = vld [vmem:[#allocation2 + $0x10] sm:$0xff]  ;;  %v462_v3 = vld [vmem:[#allocation2 + $0x18] sm:$0xff] }
  0x36   : > { %781 = vmatpush1.bf16.msra.mxu0 %v1398_v19  ;;  %v461_v63 = vld [vmem:[#allocation2] sm:$0xff]  ;;  %v463_v8 = vld [vmem:[#allocation2 + $0x8] sm:$0xff] }
  0x37   : > { %782 = vmatprep.subr.bf16.mxu0 %v1399_v21 }
  0x38   : > { %824 = vmatpush1.bf16.msra.mxu1 %v1431_v30 }
  0x39   : > { %825 = vmatprep.subr.bf16.mxu1 %v1435_v31 }
  0x3a   : > { %783 = vmatpush1.bf16.msra.mxu0 %v1401_v24 }
  0x3b   : > { %784 = vmatprep.subr.bf16.mxu0 %v1402_v25 }
  0x3c   : > { %826 = vmatpush1.bf16.msra.mxu1 %v1437_v34 }
  0x3d   : > { %827 = vmatprep.subr.bf16.mxu1 %v1441_v35 }
  0x3e   : > { %785 = vmatpush1.bf16.msra.mxu0 %v1404_v28 }
  0x3f   : > { %786 = vmatprep.subr.bf16.mxu0 %v1408_v29 }
  0x40   : > { %828 = vmatpush1.bf16.msra.mxu1 %v1443_v38 }
  0x41   : > { %829 = vmatprep.subr.bf16.mxu1 %v1447_v39 }
  0x42   : > { %787 = vmatpush1.bf16.msra.mxu0 %v1410_v32 }
  0x43   : > { %788 = vmatprep.subr.bf16.mxu0 %v1414_v33 }
  0x44   : > { %830 = vmatpush1.bf16.msra.mxu1 %v1449_v43 }
  0x46   : > { %789 = vmatpush2.bf16.msra.mxu0 %v1416_v36 }
  0x47   : > { %790 = vmatprep.subr.bf16.mxu0 %v1420_v37  ;;  %848 = vmatmul.mubr.bf16.vlgmr.msra.gmra.mxu1 %v1453_v46 }
  0x4a   : > { %791 = vmatpush2.bf16.msra.mxu0 %v1422_v41 }
  0x4b   : > { %792 = vmatprep.subr.bf16.mxu0 %v1426_v42 }
  0x4e   : > { %793 = vmatpush2.bf16.msra.mxu0 %v1428_v44 }
  0x4f   : > { %794 = vmatprep.subr.bf16.mxu0 %v1432_v45 }
  0x52   : > { %795 = vmatpush2.bf16.msra.mxu0 %v1434_v47 }
  0x53   : > { %796 = vmatprep.subr.bf16.mxu0 %v1438_v48 }
  0x56   : > { %797 = vmatpush2.bf16.msra.mxu0 %v1440_v49 }
  0x57   : > { %798 = vmatprep.subr.bf16.mxu0 %v1444_v50 }
  0x5a   : > { %799 = vmatpush2.bf16.msra.mxu0 %v1446_v51 }
  0x5b   : > { %800 = vmatprep.subr.bf16.mxu0 %v1450_v52 }
  0x5e   : > { %801 = vmatpush2.bf16.msra.mxu0 %v1452_v53 }
  0x5f   : > { %802 = vmatprep.subr.bf16.mxu0 %v1454_v54 }
  0x62   : > { %803 = vmatpush2.bf16.msra.mxu0 %v1456_v55 }
  0x65   : > { %805 = vmatmul.mubr.bf16.vlgmr.msra.gmra.mxu0 %v1457_v56 }
 0x107   : > { %v849_v57 = vpop.f32.mrf.mxu1 }
 0x109   : > { %v851_v58 = vpop.f32.mrf.mxu1 }
 0x10b   : > { %v853_v62 = vpop.f32.mrf.mxu1 }
 0x10d   : > { %v855_v7 = vpop.f32.mrf.mxu1 }
 0x125   : > { %v806_v60 = vpop.f32.mrf.mxu0 }
 0x126   : > { %v850_v61 = vadd.f32 %v849_v57, %v806_v60 }
 0x127   : > { %v808_v0 = vpop.f32.mrf.mxu0 }
 0x128   : > { %v858_v1 = vadd.f32 %v850_v61, %v460_v59  ;;  %v852_v2 = vadd.f32 %v851_v58, %v808_v0 }
 0x129   : > { %v810_v4 = vpop.f32.mrf.mxu0 }
 0x12a   : > { %862 = vst [vmem:[#allocation2 + $0x10] sm:$0xff] %v858_v1  ;;  %v859_v5 = vadd.f32 %v852_v2, %v461_v63  ;;  %v854_v6 = vadd.f32 %v853_v62, %v810_v4 }
 0x12b   : > { %v812_v9 = vpop.f32.mrf.mxu0 }
 0x12c   : > { %863 = vst [vmem:[#allocation2] sm:$0xff] %v859_v5  ;;  %v860_v10 = vadd.f32 %v854_v6, %v462_v3  ;;  %v856_v11 = vadd.f32 %v855_v7, %v812_v9  ;;  %869 = sbr.rel (%p1311_p11) target bundleno = 546 (0x222), region = 78 }
 0x12e   : > { %864 = vst [vmem:[#allocation2 + $0x18] sm:$0xff] %v860_v10  ;;  %v861_v12 = vadd.f32 %v856_v11, %v463_v8 }
 0x130   : > { %865 = vst [vmem:[#allocation2 + $0x8] sm:$0xff] %v861_v12 }
 0x131   : > { %v1460_v13 = vld [vmem:[%s1752_s4 + $0x74] ss:$8 sps:$4 sm:$0xff]   ;;  %v1462_v14 = vld [vmem:[%s1752_s4 + $0x70] ss:$8 sps:$4 sm:$0xff]   ;;  %v1527_v15 = vmov 0   ;;  %v1484_v30 = vld [vmem:[%s1751_s3] sm:$0xff]   ;;  %v876_v31 = vlaneseq }
 0x132   : > { %1026 = vmatprep.mubr.bf16.mxu0 %v1527_v15  ;;  %994 = vmatprep.subr.bf16.mxu0 %v1460_v13  ;;  %v1463_v16 = vld [vmem:[%s1752_s4 + $0x64] ss:$8 sps:$4 sm:$0xff]   ;;  %v1465_v17 = vld [vmem:[%s1752_s4 + $0x60] ss:$8 sps:$4 sm:$0xff]   ;;  %v1466_v18 = vld [vmem:[%s1752_s4 + $0x54] ss:$8 sps:$4 sm:$0xff]  }
 0x133   : > { %995 = vmatpush1.bf16.msra.mxu0 %v1462_v14  ;;  %v1468_v19 = vld [vmem:[%s1752_s4 + $0x50] ss:$8 sps:$4 sm:$0xff]   ;;  %v1469_v20 = vld [vmem:[%s1752_s4 + $0x44] ss:$8 sps:$4 sm:$0xff]   ;;  %v1471_v21 = vld [vmem:[%s1752_s4 + $0x40] ss:$8 sps:$4 sm:$0xff]  }
 0x134   : > { %996 = vmatprep.subr.bf16.mxu0 %v1463_v16  ;;  %v1472_v22 = vld [vmem:[%s1752_s4 + $0x34] ss:$8 sps:$4 sm:$0xff]   ;;  %v1474_v23 = vld [vmem:[%s1752_s4 + $0x30] ss:$8 sps:$4 sm:$0xff]   ;;  %v1475_v24 = vld [vmem:[%s1752_s4 + $0x24] ss:$8 sps:$4 sm:$0xff]  }
 0x135   : > { %v1477_v25 = vld [vmem:[%s1752_s4 + $0x20] ss:$8 sps:$4 sm:$0xff]   ;;  %v1478_v26 = vld [vmem:[%s1752_s4 + $0x14] ss:$8 sps:$4 sm:$0xff]   ;;  %v1480_v27 = vld [vmem:[%s1752_s4 + $0x10] ss:$8 sps:$4 sm:$0xff]  }
 0x136   : > { %v1481_v28 = vld [vmem:[%s1752_s4 + $0x4] ss:$8 sps:$4 sm:$0xff]   ;;  %v1483_v29 = vld [vmem:[%s1752_s4] ss:$8 sps:$4 sm:$0xff]   ;;  %v877_v32 = vshrl.u32 %v876_v31, 7  ;;  %v870_v37 = vld [vmem:[#allocation2 + $0x10] sm:$0xff] }
 0x137   : > { %997 = vmatpush1.bf16.msra.mxu0 %v1465_v17  ;;  %v874_v34 = vld [vmem:[%s1750_s2] sm:$0x3]  ;;  %v872_v42 = vld [vmem:[#allocation2 + $0x18] sm:$0xff]  ;;  %v873_v46 = vld [vmem:[#allocation2 + $0x8] sm:$0xff] }
 0x138   : > { %998 = vmatprep.subr.bf16.mxu0 %v1466_v18  ;;  %v878_v33 = vsub.s32 0, %v877_v32  ;;  %v882_v35 = vsub.s32 1, %v877_v32  ;;  %v1041_v39 = vld [vmem:[%s1753_s5] sm:$0x3] }
 0x139   : > { %v871_v40 = vld [vmem:[#allocation2] sm:$0xff] }
 0x13a   : > { %v879_v36 = vrot.slane %v874_v34, %v878_v33  ;;  %v883_v38 = vrot.slane %v874_v34, %v882_v35  ;;  %v1046_v43 = vrot.slane %v1041_v39, %v878_v33  ;;  %v1050_v48 = vrot.slane %v1041_v39, %v882_v35 }
 0x13b   : > { %999 = vmatpush1.bf16.msra.mxu0 %v1468_v19 }
 0x13c   : > { %1000 = vmatprep.subr.bf16.mxu0 %v1469_v20  ;;  %v886_v41 = vadd.f32 %v879_v36, %v870_v37  ;;  %v887_v44 = vadd.f32 %v883_v38, %v871_v40  ;;  %v888_v49 = vadd.f32 %v879_v36, %v872_v42  ;;  %v889_v53 = vadd.f32 %v883_v38, %v873_v46 }
 0x13f   : > { %1001 = vmatpush1.bf16.msra.mxu0 %v1471_v21 }
 0x140   : > { %1002 = vmatprep.subr.bf16.mxu0 %v1472_v22 }
 0x143   : > { %1003 = vmatpush1.bf16.msra.mxu0 %v1474_v23 }
 0x144   : > { %1004 = vmatprep.subr.bf16.mxu0 %v1475_v24 }
 0x147   : > { %1005 = vmatpush1.bf16.msra.mxu0 %v1477_v25 }
 0x148   : > { %1006 = vmatprep.subr.bf16.mxu0 %v1478_v26 }
 0x14b   : > { %1007 = vmatpush1.bf16.msra.mxu0 %v1480_v27 }
 0x14c   : > { %1008 = vmatprep.subr.bf16.mxu0 %v1481_v28 }
 0x14f   : > { %1009 = vmatpush1.bf16.msra.mxu0 %v1483_v29 }
 0x152   : > { %1027 = vmatmul.mubr.bf16.vlgmr.msra.gmra.mxu0 %v1484_v30 }
 0x212   : > { %v1028_v45 = vpop.f32.mrf.mxu0 }
 0x213   : > { %v1037_v47 = vadd.f32 %v1028_v45, %v886_v41 }
 0x214   : > { %v1030_v50 = vpop.f32.mrf.mxu0 }
 0x215   : > { %v1053_v51 = vadd.f32 %v1046_v43, %v1037_v47  ;;  %v1038_v52 = vadd.f32 %v1030_v50, %v887_v44 }
 0x216   : > { %v1032_v54 = vpop.f32.mrf.mxu0 }
 0x217   : > { %v1054_v55 = vadd.f32 %v1050_v48, %v1038_v52  ;;  %v1039_v56 = vadd.f32 %v1032_v54, %v888_v49  ;;  %v1057_v58 = vmax.f32 %v1053_v51, 0.0 }
 0x218   : > { %v1034_v57 = vpop.f32.mrf.mxu0 }
 0x219   : > { %v1058_v59 = vmax.f32 %v1054_v55, 0.0  ;;  %v1055_v60 = vadd.f32 %v1046_v43, %v1039_v56  ;;  %v1040_v61 = vadd.f32 %v1034_v57, %v889_v53 }
 0x21b   : > { %v1337_v62 = vpack.c.bf16 %v1058_v59, %v1057_v58  ;;  %v1056_v63 = vadd.f32 %v1050_v48, %v1040_v61  ;;  %v1059_v0 = vmax.f32 %v1055_v60, 0.0 }
 0x21d   : > { %1073 = vst [vmem:[%s1754_s6] sm:$0xff] %v1337_v62  ;;  %v1060_v1 = vmax.f32 %v1056_v63, 0.0 }
 0x21f   : > { %v1338_v2 = vpack.c.bf16 %v1060_v1, %v1059_v0 }
 0x221   : > { %1074 = vst [vmem:[%s1754_s6 + $0x8] sm:$0xff] %v1338_v2 }
 0x222 PF: > { %s16_s25 = sadd.s32 1, %s1523_s25   ;;  %s1755_s21 = smov %s1511_s22 }
 0x223   : > { %p13_p12 = scmp.ge.s32.totalorder %s16_s25, 8   ;;  %s1756_s22 = smov %s1598_s29 }
 0x224   : > { %s1757_s23 = smov %s1519_s24  ;;  %s1758_s24 = smov %s1760_s26 }
 0x225   :  { %15 = sbr.rel (!%p13_p12) target bundleno = 3 (0x3), region = 134 }

// kernel: multi_task_net_forward.29
= control target key start
LH: loop header
LB: loop body
LE: loop exit
PB: predicated region body
PF: predicated region fallthrough
CT: control target
= control target key end

     0   :  { %s1148_s12 = smov 0   ;;  %s1150_s13 = smov 0   ;;  %s1279_s0 = inlined_call_operand.vmem [shape: bf16[16,2304], index: 0, kind: input, shape index: {}]   ;;  %s1280_s1 = inlined_call_operand.vmem [shape: bf16[2304,256], index: 1, kind: input, shape index: {}]   ;;  %s1281_s2 = inlined_call_operand.vmem [shape: f32[1,256], index: 2, kind: input, shape index: {}]   ;;  %s1282_s3 = inlined_call_operand.vmem [shape: bf16[16,256], index: 3, kind: output, shape index: {}]  }
   0x1   :  { %s1152_s14 = smov 0   ;;  %s1154_s15 = smov 0  }
   0x2   :  { %s1156_s16 = smov 0  }
   0x3 LB: > { %s25_s17 = sadd.s32 1, %s1120_s15  ;;  %p48_p1 = scmp.ne.s32.totalorder %s1112_s13, %s1108_s12  ;;  %s1124_s16 = sphi %s1156_s16, %s13_s16   ;;  %s1120_s15 = sphi %s1154_s15, %s1286_s15   ;;  %s1116_s14 = sphi %s1152_s14, %s1285_s14   ;;  %s1112_s13 = sphi %s1150_s13, %s1284_s13   ;;  %s1108_s12 = sphi %s1148_s12, %s1283_s12  }
   0x4   : > { %p26_p0 = scmp.ge.s32.totalorder %s25_s17, 6  ;;  %p49_p2 = scmp.eq.s32.totalorder %s1124_s16, 0 }
   0x5   : > { %s41_s19 = sadd.s32 1, %s1112_s13  ;;  %p894_p5 = scmp.ge.s32.totalorder %s1124_s16, 6 }
   0x6   : > { %s1288_s17 = smov (%p26_p0, %s25_s17), 0  ;;  %p50_p3 = por %p49_p2, %p48_p1 }
   0x7   : > { %s37_s18 = ssub.s32 %s1120_s15, %s1288_s17  ;;  %164 = sbr.rel (%p894_p5) target bundleno = 19 (0x13), region = 20 }
   0x8   : > { %p39_p4 = scmp.eq.s32.totalorder %s37_s18, 0 }
   0xa   : > { %s1183_s20 = scalar_select %p39_p4, %s1112_s13, %s41_s19  }
   0xc   : > { %167 = sbr.rel (!%p50_p3) target bundleno = 19 (0x13), region = 24  ;;  %s169_s21 = sand.u32 (%p50_p3), 1, %s1112_s13  }
   0xd   : > { %s962_s22 = smul.u32 (%p50_p3), 12, %s1120_s15 }
   0xe   : > { %s966_s23 = smul.u32 (%p50_p3), 24, %s169_s21 }
   0xf   : > { %s177_s26 = scalar_lea.vmem (%p50_p3), %s1279_s0, %s962_s22 }
  0x10   : > { %v192_v0 = vld [vmem:[%s177_s26] sm:$0xff] (%p50_p3)  ;;  %v194_v1 = vld [vmem:[%s177_s26 + $0x48] sm:$0xff] (%p50_p3)  ;;  %s171_s27 = scalar_lea.vmem (%p50_p3), [#allocation3], %s966_s23  ;;  %v898_v3 = vld [vmem:[%s177_s26 + $0x50] sm:$0xf] (%p50_p3) }
  0x11   : > { %v896_v2 = vld [vmem:[%s177_s26 + $0x8] sm:$0xf]  ;;  %193 = vst [vmem:[%s171_s27] sm:$0xff] %v192_v0  ;;  %195 = vst [vmem:[%s171_s27 + $0xc] sm:$0xff] %v194_v1 }
  0x12   : > { %897 = vst [vmem:[%s171_s27 + $0x8] sm:$0xf] %v896_v2  ;;  %899 = vst [vmem:[%s171_s27 + $0x14] sm:$0xf] %v898_v3 }
  0x13 PF: > { %p900_p6 = scmp.ge.s32.totalorder %s1124_s16, 1  ;;  %p227_p7 = scmp.lt.s32.totalorder %s1124_s16, 7 }
  0x15   : > { %p228_p8 = pnand %p900_p6, %p227_p7 }
  0x16   : > { %s234_s28 = sand.u32 (!%p228_p8), 1, %s1108_s12   ;;  %s278_s29 = smul.u32 (!%p228_p8), 48, %s1116_s14 }
  0x17   : > { %231 = sbr.rel (%p228_p8) target bundleno = 320 (0x140), region = 54  ;;  %p903_p10 = scmp.ne.s32.totalorder (!%p228_p8), %s1116_s14, 0 }
  0x18   : > { %s967_s30 = smul.u32 (!%p228_p8), 24, %s234_s28  ;;  %p280_p9 = scmp.lt.s32.totalorder (!%p228_p8), %s278_s29, 287 }
  0x1a   : > { %s1200_s8 = scalar_lea.vmem (!%p228_p8), [#allocation3], %s967_s30 }
  0x1c   : > { %s1290_s29 = smov (!%p280_p9, %s278_s29), 287  ;;  %311 = sbr.rel (%p903_p10) target bundleno = 36 (0x24), region = 62 }
  0x1d   : > { %s963_s4 = sshll.u32 %s1290_s29, 3 }
  0x1e   : > { %s1198_s7 = scalar_lea.vmem %s1280_s1, %s963_s4 }
  0x21   : > { %v1126_v4 = vmov 0.0  }
  0x22   : > { %312 = vst [vmem:[#allocation2 + $0x10] sm:$0xff] %v1126_v4  ;;  %313 = vst [vmem:[#allocation2] sm:$0xff] %v1126_v4 }
  0x23   : > { %314 = vst [vmem:[#allocation2 + $0x18] sm:$0xff] %v1126_v4  ;;  %315 = vst [vmem:[#allocation2 + $0x8] sm:$0xff] %v1126_v4 }
  0x24 PF: > { %v1010_v5 = vld [vmem:[%s1198_s7 + $0x74] ss:$8 sps:$4 sm:$0xff]   ;;  %v1012_v6 = vld [vmem:[%s1198_s7 + $0x70] ss:$8 sps:$4 sm:$0xff]   ;;  %v1127_v7 = vmov 0   ;;  %p955_p11 = scmp.ne.s32.totalorder %s1116_s14, 5 }
  0x25   : > { %703 = vmatprep.mubr.bf16.mxu1 %v1127_v7  ;;  %628 = vmatprep.subr.bf16.mxu0 %v1010_v5  ;;  %v1013_v8 = vld [vmem:[%s1198_s7 + $0x64] ss:$8 sps:$4 sm:$0xff]   ;;  %v1015_v9 = vld [vmem:[%s1198_s7 + $0x60] ss:$8 sps:$4 sm:$0xff]   ;;  %v1016_v10 = vld [vmem:[%s1198_s7 + $0x54] ss:$8 sps:$4 sm:$0xff]  }
  0x26   : > { %629 = vmatpush1.bf16.msra.mxu0 %v1012_v6  ;;  %v1018_v11 = vld [vmem:[%s1198_s7 + $0x50] ss:$8 sps:$4 sm:$0xff]   ;;  %v1019_v12 = vld [vmem:[%s1198_s7 + $0x44] ss:$8 sps:$4 sm:$0xff]   ;;  %v1031_v13 = vld [vmem:[%s1198_s7 + $0x174] ss:$8 sps:$4 sm:$0xff]  }
  0x27   : > { %630 = vmatprep.subr.bf16.mxu0 %v1013_v8  ;;  %v1033_v14 = vld [vmem:[%s1198_s7 + $0x170] ss:$8 sps:$4 sm:$0xff]   ;;  %v1021_v15 = vld [vmem:[%s1198_s7 + $0x40] ss:$8 sps:$4 sm:$0xff]   ;;  %v1022_v16 = vld [vmem:[%s1198_s7 + $0x34] ss:$8 sps:$4 sm:$0xff]   ;;  %671 = vmatprep.subr.bf16.mxu1 %v1031_v13 }
  0x28   : > { %v1037_v17 = vld [vmem:[%s1198_s7 + $0x164] ss:$8 sps:$4 sm:$0xff]   ;;  %672 = vmatpush1.bf16.msra.mxu1 %v1033_v14  ;;  %v1039_v18 = vld [vmem:[%s1198_s7 + $0x160] ss:$8 sps:$4 sm:$0xff]   ;;  %v1024_v19 = vld [vmem:[%s1198_s7 + $0x30] ss:$8 sps:$4 sm:$0xff]  }
  0x29   : > { %673 = vmatprep.subr.bf16.mxu1 %v1037_v17  ;;  %v1043_v20 = vld [vmem:[%s1198_s7 + $0x154] ss:$8 sps:$4 sm:$0xff]   ;;  %v1025_v21 = vld [vmem:[%s1198_s7 + $0x24] ss:$8 sps:$4 sm:$0xff]   ;;  %v1045_v22 = vld [vmem:[%s1198_s7 + $0x150] ss:$8 sps:$4 sm:$0xff]  }
  0x2a   : > { %631 = vmatpush1.bf16.msra.mxu0 %v1015_v9  ;;  %v1049_v23 = vld [vmem:[%s1198_s7 + $0x144] ss:$8 sps:$4 sm:$0xff]   ;;  %v1027_v24 = vld [vmem:[%s1198_s7 + $0x20] ss:$8 sps:$4 sm:$0xff]   ;;  %v1028_v25 = vld [vmem:[%s1198_s7 + $0x14] ss:$8 sps:$4 sm:$0xff]  }
  0x2b   : > { %632 = vmatprep.subr.bf16.mxu0 %v1016_v10  ;;  %v1051_v26 = vld [vmem:[%s1198_s7 + $0x140] ss:$8 sps:$4 sm:$0xff]   ;;  %v1055_v27 = vld [vmem:[%s1198_s7 + $0x134] ss:$8 sps:$4 sm:$0xff]   ;;  %v1030_v28 = vld [vmem:[%s1198_s7 + $0x10] ss:$8 sps:$4 sm:$0xff]  }
  0x2c   : > { %674 = vmatpush1.bf16.msra.mxu1 %v1039_v18  ;;  %v1034_v29 = vld [vmem:[%s1198_s7 + $0x4] ss:$8 sps:$4 sm:$0xff]   ;;  %v1057_v30 = vld [vmem:[%s1198_s7 + $0x130] ss:$8 sps:$4 sm:$0xff]   ;;  %v1036_v32 = vld [vmem:[%s1198_s7] ss:$8 sps:$4 sm:$0xff]  }
  0x2d   : > { %675 = vmatprep.subr.bf16.mxu1 %v1043_v20  ;;  %v1061_v31 = vld [vmem:[%s1198_s7 + $0x124] ss:$8 sps:$4 sm:$0xff]   ;;  %v1040_v33 = vld [vmem:[%s1198_s7 + $0xf4] ss:$8 sps:$4 sm:$0xff]   ;;  %v1063_v34 = vld [vmem:[%s1198_s7 + $0x120] ss:$8 sps:$4 sm:$0xff]  }
  0x2e   : > { %633 = vmatpush1.bf16.msra.mxu0 %v1018_v11  ;;  %v1067_v35 = vld [vmem:[%s1198_s7 + $0x114] ss:$8 sps:$4 sm:$0xff]   ;;  %v1042_v36 = vld [vmem:[%s1198_s7 + $0xf0] ss:$8 sps:$4 sm:$0xff]   ;;  %v1046_v37 = vld [vmem:[%s1198_s7 + $0xe4] ss:$8 sps:$4 sm:$0xff]  }
  0x2f   : > { %634 = vmatprep.subr.bf16.mxu0 %v1019_v12  ;;  %v1069_v38 = vld [vmem:[%s1198_s7 + $0x110] ss:$8 sps:$4 sm:$0xff]   ;;  %v1073_v39 = vld [vmem:[%s1198_s7 + $0x104] ss:$8 sps:$4 sm:$0xff]   ;;  %v1048_v41 = vld [vmem:[%s1198_s7 + $0xe0] ss:$8 sps:$4 sm:$0xff]  }
  0x30   : > { %676 = vmatpush1.bf16.msra.mxu1 %v1045_v22  ;;  %v1085_v40 = vld [vmem:[%s1200_s8 + $0x4] ss:$12 sps:$4 sm:$0xff]   ;;  %v1079_v46 = vld [vmem:[%s1200_s8 + $0x8] ss:$12 sps:$4 sm:$0xff]   ;;  %v1083_v56 = vld [vmem:[%s1200_s8] ss:$12 sps:$4 sm:$0xff]  }
  0x31   : > { %677 = vmatprep.subr.bf16.mxu1 %v1049_v23  ;;  %v1052_v42 = vld [vmem:[%s1198_s7 + $0xd4] ss:$8 sps:$4 sm:$0xff]   ;;  %660 = vmatprep.mubr.bf16.mxu0 %v1085_v40  ;;  %v1075_v43 = vld [vmem:[%s1198_s7 + $0x100] ss:$8 sps:$4 sm:$0xff]   ;;  %v1054_v44 = vld [vmem:[%s1198_s7 + $0xd0] ss:$8 sps:$4 sm:$0xff]  }
  0x32   : > { %635 = vmatpush1.bf16.msra.mxu0 %v1021_v15  ;;  %v1058_v45 = vld [vmem:[%s1198_s7 + $0xc4] ss:$8 sps:$4 sm:$0xff]   ;;  %v1060_v47 = vld [vmem:[%s1198_s7 + $0xc0] ss:$8 sps:$4 sm:$0xff]   ;;  %v1064_v48 = vld [vmem:[%s1198_s7 + $0xb4] ss:$8 sps:$4 sm:$0xff]  }
  0x33   : > { %636 = vmatprep.subr.bf16.mxu0 %v1022_v16  ;;  %v1066_v49 = vld [vmem:[%s1198_s7 + $0xb0] ss:$8 sps:$4 sm:$0xff]   ;;  %v1070_v50 = vld [vmem:[%s1198_s7 + $0xa4] ss:$8 sps:$4 sm:$0xff]   ;;  %v1072_v51 = vld [vmem:[%s1198_s7 + $0xa0] ss:$8 sps:$4 sm:$0xff]  }
  0x34   : > { %678 = vmatpush1.bf16.msra.mxu1 %v1051_v26  ;;  %v1076_v52 = vld [vmem:[%s1198_s7 + $0x94] ss:$8 sps:$4 sm:$0xff]   ;;  %v1078_v53 = vld [vmem:[%s1198_s7 + $0x90] ss:$8 sps:$4 sm:$0xff]   ;;  %v1080_v54 = vld [vmem:[%s1198_s7 + $0x84] ss:$8 sps:$4 sm:$0xff]  }
  0x35   : > { %679 = vmatprep.subr.bf16.mxu1 %v1055_v27  ;;  %v1082_v55 = vld [vmem:[%s1198_s7 + $0x80] ss:$8 sps:$4 sm:$0xff]   ;;  %v316_v59 = vld [vmem:[#allocation2 + $0x10] sm:$0xff]  ;;  %v318_v3 = vld [vmem:[#allocation2 + $0x18] sm:$0xff] }
  0x36   : > { %637 = vmatpush1.bf16.msra.mxu0 %v1024_v19  ;;  %v317_v63 = vld [vmem:[#allocation2] sm:$0xff]  ;;  %v319_v8 = vld [vmem:[#allocation2 + $0x8] sm:$0xff] }
  0x37   : > { %638 = vmatprep.subr.bf16.mxu0 %v1025_v21 }
  0x38   : > { %680 = vmatpush1.bf16.msra.mxu1 %v1057_v30 }
  0x39   : > { %681 = vmatprep.subr.bf16.mxu1 %v1061_v31 }
  0x3a   : > { %639 = vmatpush1.bf16.msra.mxu0 %v1027_v24 }
  0x3b   : > { %640 = vmatprep.subr.bf16.mxu0 %v1028_v25 }
  0x3c   : > { %682 = vmatpush1.bf16.msra.mxu1 %v1063_v34 }
  0x3d   : > { %683 = vmatprep.subr.bf16.mxu1 %v1067_v35 }
  0x3e   : > { %641 = vmatpush1.bf16.msra.mxu0 %v1030_v28 }
  0x3f   : > { %642 = vmatprep.subr.bf16.mxu0 %v1034_v29 }
  0x40   : > { %684 = vmatpush1.bf16.msra.mxu1 %v1069_v38 }
  0x41   : > { %685 = vmatprep.subr.bf16.mxu1 %v1073_v39 }
  0x42   : > { %643 = vmatpush1.bf16.msra.mxu0 %v1036_v32 }
  0x43   : > { %644 = vmatprep.subr.bf16.mxu0 %v1040_v33 }
  0x44   : > { %686 = vmatpush1.bf16.msra.mxu1 %v1075_v43 }
  0x46   : > { %645 = vmatpush2.bf16.msra.mxu0 %v1042_v36 }
  0x47   : > { %646 = vmatprep.subr.bf16.mxu0 %v1046_v37  ;;  %704 = vmatmul.mubr.bf16.vlgmr.msra.gmra.mxu1 %v1079_v46 }
  0x4a   : > { %647 = vmatpush2.bf16.msra.mxu0 %v1048_v41 }
  0x4b   : > { %648 = vmatprep.subr.bf16.mxu0 %v1052_v42 }
  0x4e   : > { %649 = vmatpush2.bf16.msra.mxu0 %v1054_v44 }
  0x4f   : > { %650 = vmatprep.subr.bf16.mxu0 %v1058_v45 }
  0x52   : > { %651 = vmatpush2.bf16.msra.mxu0 %v1060_v47 }
  0x53   : > { %652 = vmatprep.subr.bf16.mxu0 %v1064_v48 }
  0x56   : > { %653 = vmatpush2.bf16.msra.mxu0 %v1066_v49 }
  0x57   : > { %654 = vmatprep.subr.bf16.mxu0 %v1070_v50 }
  0x5a   : > { %655 = vmatpush2.bf16.msra.mxu0 %v1072_v51 }
  0x5b   : > { %656 = vmatprep.subr.bf16.mxu0 %v1076_v52 }
  0x5e   : > { %657 = vmatpush2.bf16.msra.mxu0 %v1078_v53 }
  0x5f   : > { %658 = vmatprep.subr.bf16.mxu0 %v1080_v54 }
  0x62   : > { %659 = vmatpush2.bf16.msra.mxu0 %v1082_v55 }
  0x65   : > { %661 = vmatmul.mubr.bf16.vlgmr.msra.gmra.mxu0 %v1083_v56 }
 0x107   : > { %v705_v57 = vpop.f32.mrf.mxu1 }
 0x109   : > { %v707_v58 = vpop.f32.mrf.mxu1 }
 0x10b   : > { %v709_v62 = vpop.f32.mrf.mxu1 }
 0x10d   : > { %v711_v7 = vpop.f32.mrf.mxu1 }
 0x125   : > { %v662_v60 = vpop.f32.mrf.mxu0 }
 0x126   : > { %v706_v61 = vadd.f32 %v705_v57, %v662_v60 }
 0x127   : > { %v664_v0 = vpop.f32.mrf.mxu0 }
 0x128   : > { %v714_v1 = vadd.f32 %v706_v61, %v316_v59  ;;  %v708_v2 = vadd.f32 %v707_v58, %v664_v0 }
 0x129   : > { %v666_v4 = vpop.f32.mrf.mxu0 }
 0x12a   : > { %718 = vst [vmem:[#allocation2 + $0x10] sm:$0xff] %v714_v1  ;;  %v715_v5 = vadd.f32 %v708_v2, %v317_v63  ;;  %v710_v6 = vadd.f32 %v709_v62, %v666_v4 }
 0x12b   : > { %v668_v9 = vpop.f32.mrf.mxu0 }
 0x12c   : > { %719 = vst [vmem:[#allocation2] sm:$0xff] %v715_v5  ;;  %v716_v10 = vadd.f32 %v710_v6, %v318_v3  ;;  %v712_v11 = vadd.f32 %v711_v7, %v668_v9  ;;  %725 = sbr.rel (%p955_p11) target bundleno = 320 (0x140), region = 66 }
 0x12e   : > { %720 = vst [vmem:[#allocation2 + $0x18] sm:$0xff] %v716_v10  ;;  %v717_v12 = vadd.f32 %v712_v11, %v319_v8 }
 0x130   : > { %721 = vst [vmem:[#allocation2 + $0x8] sm:$0xff] %v717_v12 }
 0x131   : > { %v732_v13 = vlaneseq  ;;  %v730_v15 = vld [vmem:[%s1281_s2] sm:$0x3]  ;;  %v726_v16 = vld [vmem:[#allocation2 + $0x10] sm:$0xff] }
 0x133   : > { %v733_v14 = vshrl.u32 %v732_v13, 7  ;;  %v727_v19 = vld [vmem:[#allocation2] sm:$0xff] }
 0x135   : > { %v734_v17 = vsub.s32 0, %v733_v14  ;;  %v738_v18 = vsub.s32 1, %v733_v14  ;;  %v728_v20 = vld [vmem:[#allocation2 + $0x18] sm:$0xff] }
 0x137   : > { %v729_v21 = vld [vmem:[#allocation2 + $0x8] sm:$0xff]  ;;  %v735_v22 = vrot.slane %v730_v15, %v734_v17  ;;  %v739_v23 = vrot.slane %v730_v15, %v738_v18 }
 0x139   : > { %v742_v24 = vadd.f32 %v735_v22, %v726_v16  ;;  %v743_v25 = vadd.f32 %v739_v23, %v727_v19  ;;  %v744_v26 = vadd.f32 %v735_v22, %v728_v20  ;;  %v745_v27 = vadd.f32 %v739_v23, %v729_v21 }
 0x13b   : > { %v746_v28 = vmax.f32 %v742_v24, 0.0  ;;  %v747_v29 = vmax.f32 %v743_v25, 0.0  ;;  %v748_v30 = vmax.f32 %v744_v26, 0.0  ;;  %v749_v31 = vmax.f32 %v745_v27, 0.0 }
 0x13d   : > { %v964_v32 = vpack.c.bf16 %v747_v29, %v746_v28  ;;  %v965_v33 = vpack.c.bf16 %v749_v31, %v748_v30 }
 0x13f   : > { %762 = vst [vmem:[%s1282_s3] sm:$0xff] %v964_v32  ;;  %763 = vst [vmem:[%s1282_s3 + $0x8] sm:$0xff] %v965_v33 }
 0x140 PF: > { %s13_s16 = sadd.s32 1, %s1124_s16   ;;  %s1283_s12 = smov %s1112_s13 }
 0x141   : > { %p10_p12 = scmp.ge.s32.totalorder %s13_s16, 8   ;;  %s1284_s13 = smov %s1183_s20 }
 0x142   : > { %s1285_s14 = smov %s1120_s15  ;;  %s1286_s15 = smov %s1288_s17 }
 0x143   :  { %12 = sbr.rel (!%p10_p12) target bundleno = 3 (0x3), region = 113 }

// kernel: multi_task_net_forward.30
= control target key start
LH: loop header
LB: loop body
LE: loop exit
PB: predicated region body
PF: predicated region fallthrough
CT: control target
= control target key end

     0   :  { %s1253_s15 = smov 0   ;;  %s1255_s16 = smov 0   ;;  %s1390_s0 = inlined_call_operand.vmem [shape: bf16[16,2304], index: 0, kind: input, shape index: {}]   ;;  %s1391_s1 = inlined_call_operand.vmem [shape: bf16[2304,256], index: 1, kind: input, shape index: {}]   ;;  %s1392_s2 = inlined_call_operand.vmem [shape: f32[1,256], index: 2, kind: input, shape index: {}]   ;;  %s1393_s3 = inlined_call_operand.vmem [shape: bf16[16,256], index: 3, kind: input, shape index: {}]   ;;  %s1394_s4 = inlined_call_operand.vmem [shape: bf16[16,256], index: 4, kind: output, shape index: {}]  }
   0x1   :  { %s1257_s17 = smov 0   ;;  %s1259_s18 = smov 0  }
   0x2   :  { %s1261_s19 = smov 0  }
   0x3 LB: > { %s26_s20 = sadd.s32 1, %s1220_s18  ;;  %p49_p1 = scmp.ne.s32.totalorder %s1212_s16, %s1208_s15  ;;  %s1224_s19 = sphi %s1261_s19, %s14_s19   ;;  %s1220_s18 = sphi %s1259_s18, %s1398_s18   ;;  %s1216_s17 = sphi %s1257_s17, %s1397_s17   ;;  %s1212_s16 = sphi %s1255_s16, %s1396_s16   ;;  %s1208_s15 = sphi %s1253_s15, %s1395_s15  }
   0x4   : > { %p27_p0 = scmp.ge.s32.totalorder %s26_s20, 6  ;;  %p50_p2 = scmp.eq.s32.totalorder %s1224_s19, 0 }
   0x5   : > { %s42_s22 = sadd.s32 1, %s1212_s16  ;;  %p994_p5 = scmp.ge.s32.totalorder %s1224_s19, 6 }
   0x6   : > { %s1400_s20 = smov (%p27_p0, %s26_s20), 0  ;;  %p51_p3 = por %p50_p2, %p49_p1 }
   0x7   : > { %s38_s21 = ssub.s32 %s1220_s18, %s1400_s20  ;;  %208 = sbr.rel (%p994_p5) target bundleno = 19 (0x13), region = 24 }
   0x8   : > { %p40_p4 = scmp.eq.s32.totalorder %s38_s21, 0 }
   0xa   : > { %s1288_s23 = scalar_select %p40_p4, %s1212_s16, %s42_s22  }
   0xc   : > { %211 = sbr.rel (!%p51_p3) target bundleno = 19 (0x13), region = 28  ;;  %s213_s24 = sand.u32 (%p51_p3), 1, %s1212_s16  }
   0xd   : > { %s1062_s25 = smul.u32 (%p51_p3), 12, %s1220_s18 }
   0xe   : > { %s1066_s26 = smul.u32 (%p51_p3), 24, %s213_s24 }
   0xf   : > { %s221_s29 = scalar_lea.vmem (%p51_p3), %s1390_s0, %s1062_s25 }
  0x10   : > { %v236_v0 = vld [vmem:[%s221_s29] sm:$0xff] (%p51_p3)  ;;  %v238_v1 = vld [vmem:[%s221_s29 + $0x48] sm:$0xff] (%p51_p3)  ;;  %s215_s30 = scalar_lea.vmem (%p51_p3), [#allocation3], %s1066_s26  ;;  %v998_v3 = vld [vmem:[%s221_s29 + $0x50] sm:$0xf] (%p51_p3) }
  0x11   : > { %v996_v2 = vld [vmem:[%s221_s29 + $0x8] sm:$0xf]  ;;  %237 = vst [vmem:[%s215_s30] sm:$0xff] %v236_v0  ;;  %239 = vst [vmem:[%s215_s30 + $0xc] sm:$0xff] %v238_v1 }
  0x12   : > { %997 = vst [vmem:[%s215_s30 + $0x8] sm:$0xf] %v996_v2  ;;  %999 = vst [vmem:[%s215_s30 + $0x14] sm:$0xf] %v998_v3 }
  0x13 PF: > { %p1000_p6 = scmp.ge.s32.totalorder %s1224_s19, 1  ;;  %p271_p7 = scmp.lt.s32.totalorder %s1224_s19, 7 }
  0x15   : > { %p272_p8 = pnand %p1000_p6, %p271_p7 }
  0x16   : > { %s278_s5 = sand.u32 (!%p272_p8), 1, %s1208_s15   ;;  %s334_s6 = smul.u32 (!%p272_p8), 48, %s1216_s17 }
  0x17   : > { %275 = sbr.rel (%p272_p8) target bundleno = 322 (0x142), region = 58  ;;  %p1003_p10 = scmp.ne.s32.totalorder (!%p272_p8), %s1216_s17, 0 }
  0x18   : > { %s1067_s7 = smul.u32 (!%p272_p8), 24, %s278_s5  ;;  %p336_p9 = scmp.lt.s32.totalorder (!%p272_p8), %s334_s6, 287 }
  0x1a   : > { %s1305_s12 = scalar_lea.vmem (!%p272_p8), [#allocation3], %s1067_s7 }
  0x1c   : > { %s1402_s6 = smov (!%p336_p9, %s334_s6), 287  ;;  %379 = sbr.rel (%p1003_p10) target bundleno = 36 (0x24), region = 66 }
  0x1d   : > { %s1063_s8 = sshll.u32 %s1402_s6, 3 }
  0x1e   : > { %s1303_s11 = scalar_lea.vmem %s1391_s1, %s1063_s8 }
  0x21   : > { %v1226_v4 = vmov 0.0  }
  0x22   : > { %380 = vst [vmem:[#allocation2 + $0x10] sm:$0xff] %v1226_v4  ;;  %381 = vst [vmem:[#allocation2] sm:$0xff] %v1226_v4 }
  0x23   : > { %382 = vst [vmem:[#allocation2 + $0x18] sm:$0xff] %v1226_v4  ;;  %383 = vst [vmem:[#allocation2 + $0x8] sm:$0xff] %v1226_v4 }
  0x24 PF: > { %v1110_v5 = vld [vmem:[%s1303_s11 + $0x74] ss:$8 sps:$4 sm:$0xff]   ;;  %v1112_v6 = vld [vmem:[%s1303_s11 + $0x70] ss:$8 sps:$4 sm:$0xff]   ;;  %v1227_v7 = vmov 0   ;;  %p1055_p11 = scmp.ne.s32.totalorder %s1216_s17, 5 }
  0x25   : > { %771 = vmatprep.mubr.bf16.mxu1 %v1227_v7  ;;  %696 = vmatprep.subr.bf16.mxu0 %v1110_v5  ;;  %v1113_v8 = vld [vmem:[%s1303_s11 + $0x64] ss:$8 sps:$4 sm:$0xff]   ;;  %v1115_v9 = vld [vmem:[%s1303_s11 + $0x60] ss:$8 sps:$4 sm:$0xff]   ;;  %v1116_v10 = vld [vmem:[%s1303_s11 + $0x54] ss:$8 sps:$4 sm:$0xff]  }
  0x26   : > { %697 = vmatpush1.bf16.msra.mxu0 %v1112_v6  ;;  %v1118_v11 = vld [vmem:[%s1303_s11 + $0x50] ss:$8 sps:$4 sm:$0xff]   ;;  %v1119_v12 = vld [vmem:[%s1303_s11 + $0x44] ss:$8 sps:$4 sm:$0xff]   ;;  %v1131_v13 = vld [vmem:[%s1303_s11 + $0x174] ss:$8 sps:$4 sm:$0xff]  }
  0x27   : > { %698 = vmatprep.subr.bf16.mxu0 %v1113_v8  ;;  %v1133_v14 = vld [vmem:[%s1303_s11 + $0x170] ss:$8 sps:$4 sm:$0xff]   ;;  %v1121_v15 = vld [vmem:[%s1303_s11 + $0x40] ss:$8 sps:$4 sm:$0xff]   ;;  %v1122_v16 = vld [vmem:[%s1303_s11 + $0x34] ss:$8 sps:$4 sm:$0xff]   ;;  %739 = vmatprep.subr.bf16.mxu1 %v1131_v13 }
  0x28   : > { %v1137_v17 = vld [vmem:[%s1303_s11 + $0x164] ss:$8 sps:$4 sm:$0xff]   ;;  %740 = vmatpush1.bf16.msra.mxu1 %v1133_v14  ;;  %v1139_v18 = vld [vmem:[%s1303_s11 + $0x160] ss:$8 sps:$4 sm:$0xff]   ;;  %v1124_v19 = vld [vmem:[%s1303_s11 + $0x30] ss:$8 sps:$4 sm:$0xff]  }
  0x29   : > { %741 = vmatprep.subr.bf16.mxu1 %v1137_v17  ;;  %v1143_v20 = vld [vmem:[%s1303_s11 + $0x154] ss:$8 sps:$4 sm:$0xff]   ;;  %v1125_v21 = vld [vmem:[%s1303_s11 + $0x24] ss:$8 sps:$4 sm:$0xff]   ;;  %v1145_v22 = vld [vmem:[%s1303_s11 + $0x150] ss:$8 sps:$4 sm:$0xff]  }
  0x2a   : > { %699 = vmatpush1.bf16.msra.mxu0 %v1115_v9  ;;  %v1149_v23 = vld [vmem:[%s1303_s11 + $0x144] ss:$8 sps:$4 sm:$0xff]   ;;  %v1127_v24 = vld [vmem:[%s1303_s11 + $0x20] ss:$8 sps:$4 sm:$0xff]   ;;  %v1128_v25 = vld [vmem:[%s1303_s11 + $0x14] ss:$8 sps:$4 sm:$0xff]  }
  0x2b   : > { %700 = vmatprep.subr.bf16.mxu0 %v1116_v10  ;;  %v1151_v26 = vld [vmem:[%s1303_s11 + $0x140] ss:$8 sps:$4 sm:$0xff]   ;;  %v1155_v27 = vld [vmem:[%s1303_s11 + $0x134] ss:$8 sps:$4 sm:$0xff]   ;;  %v1130_v28 = vld [vmem:[%s1303_s11 + $0x10] ss:$8 sps:$4 sm:$0xff]  }
  0x2c   : > { %742 = vmatpush1.bf16.msra.mxu1 %v1139_v18  ;;  %v1134_v29 = vld [vmem:[%s1303_s11 + $0x4] ss:$8 sps:$4 sm:$0xff]   ;;  %v1157_v30 = vld [vmem:[%s1303_s11 + $0x130] ss:$8 sps:$4 sm:$0xff]   ;;  %v1136_v32 = vld [vmem:[%s1303_s11] ss:$8 sps:$4 sm:$0xff]  }
  0x2d   : > { %743 = vmatprep.subr.bf16.mxu1 %v1143_v20  ;;  %v1161_v31 = vld [vmem:[%s1303_s11 + $0x124] ss:$8 sps:$4 sm:$0xff]   ;;  %v1140_v33 = vld [vmem:[%s1303_s11 + $0xf4] ss:$8 sps:$4 sm:$0xff]   ;;  %v1163_v34 = vld [vmem:[%s1303_s11 + $0x120] ss:$8 sps:$4 sm:$0xff]  }
  0x2e   : > { %701 = vmatpush1.bf16.msra.mxu0 %v1118_v11  ;;  %v1167_v35 = vld [vmem:[%s1303_s11 + $0x114] ss:$8 sps:$4 sm:$0xff]   ;;  %v1142_v36 = vld [vmem:[%s1303_s11 + $0xf0] ss:$8 sps:$4 sm:$0xff]   ;;  %v1146_v37 = vld [vmem:[%s1303_s11 + $0xe4] ss:$8 sps:$4 sm:$0xff]  }
  0x2f   : > { %702 = vmatprep.subr.bf16.mxu0 %v1119_v12  ;;  %v1169_v38 = vld [vmem:[%s1303_s11 + $0x110] ss:$8 sps:$4 sm:$0xff]   ;;  %v1173_v39 = vld [vmem:[%s1303_s11 + $0x104] ss:$8 sps:$4 sm:$0xff]   ;;  %v1148_v41 = vld [vmem:[%s1303_s11 + $0xe0] ss:$8 sps:$4 sm:$0xff]  }
  0x30   : > { %744 = vmatpush1.bf16.msra.mxu1 %v1145_v22  ;;  %v1185_v40 = vld [vmem:[%s1305_s12 + $0x4] ss:$12 sps:$4 sm:$0xff]   ;;  %v1179_v46 = vld [vmem:[%s1305_s12 + $0x8] ss:$12 sps:$4 sm:$0xff]   ;;  %v1183_v56 = vld [vmem:[%s1305_s12] ss:$12 sps:$4 sm:$0xff]  }
  0x31   : > { %745 = vmatprep.subr.bf16.mxu1 %v1149_v23  ;;  %v1152_v42 = vld [vmem:[%s1303_s11 + $0xd4] ss:$8 sps:$4 sm:$0xff]   ;;  %728 = vmatprep.mubr.bf16.mxu0 %v1185_v40  ;;  %v1175_v43 = vld [vmem:[%s1303_s11 + $0x100] ss:$8 sps:$4 sm:$0xff]   ;;  %v1154_v44 = vld [vmem:[%s1303_s11 + $0xd0] ss:$8 sps:$4 sm:$0xff]  }
  0x32   : > { %703 = vmatpush1.bf16.msra.mxu0 %v1121_v15  ;;  %v1158_v45 = vld [vmem:[%s1303_s11 + $0xc4] ss:$8 sps:$4 sm:$0xff]   ;;  %v1160_v47 = vld [vmem:[%s1303_s11 + $0xc0] ss:$8 sps:$4 sm:$0xff]   ;;  %v1164_v48 = vld [vmem:[%s1303_s11 + $0xb4] ss:$8 sps:$4 sm:$0xff]  }
  0x33   : > { %704 = vmatprep.subr.bf16.mxu0 %v1122_v16  ;;  %v1166_v49 = vld [vmem:[%s1303_s11 + $0xb0] ss:$8 sps:$4 sm:$0xff]   ;;  %v1170_v50 = vld [vmem:[%s1303_s11 + $0xa4] ss:$8 sps:$4 sm:$0xff]   ;;  %v1172_v51 = vld [vmem:[%s1303_s11 + $0xa0] ss:$8 sps:$4 sm:$0xff]  }
  0x34   : > { %746 = vmatpush1.bf16.msra.mxu1 %v1151_v26  ;;  %v1176_v52 = vld [vmem:[%s1303_s11 + $0x94] ss:$8 sps:$4 sm:$0xff]   ;;  %v1178_v53 = vld [vmem:[%s1303_s11 + $0x90] ss:$8 sps:$4 sm:$0xff]   ;;  %v1180_v54 = vld [vmem:[%s1303_s11 + $0x84] ss:$8 sps:$4 sm:$0xff]  }
  0x35   : > { %747 = vmatprep.subr.bf16.mxu1 %v1155_v27  ;;  %v1182_v55 = vld [vmem:[%s1303_s11 + $0x80] ss:$8 sps:$4 sm:$0xff]   ;;  %v384_v59 = vld [vmem:[#allocation2 + $0x10] sm:$0xff]  ;;  %v386_v3 = vld [vmem:[#allocation2 + $0x18] sm:$0xff] }
  0x36   : > { %705 = vmatpush1.bf16.msra.mxu0 %v1124_v19  ;;  %v385_v63 = vld [vmem:[#allocation2] sm:$0xff]  ;;  %v387_v8 = vld [vmem:[#allocation2 + $0x8] sm:$0xff] }
  0x37   : > { %706 = vmatprep.subr.bf16.mxu0 %v1125_v21 }
  0x38   : > { %748 = vmatpush1.bf16.msra.mxu1 %v1157_v30 }
  0x39   : > { %749 = vmatprep.subr.bf16.mxu1 %v1161_v31 }
  0x3a   : > { %707 = vmatpush1.bf16.msra.mxu0 %v1127_v24 }
  0x3b   : > { %708 = vmatprep.subr.bf16.mxu0 %v1128_v25 }
  0x3c   : > { %750 = vmatpush1.bf16.msra.mxu1 %v1163_v34 }
  0x3d   : > { %751 = vmatprep.subr.bf16.mxu1 %v1167_v35 }
  0x3e   : > { %709 = vmatpush1.bf16.msra.mxu0 %v1130_v28 }
  0x3f   : > { %710 = vmatprep.subr.bf16.mxu0 %v1134_v29 }
  0x40   : > { %752 = vmatpush1.bf16.msra.mxu1 %v1169_v38 }
  0x41   : > { %753 = vmatprep.subr.bf16.mxu1 %v1173_v39 }
  0x42   : > { %711 = vmatpush1.bf16.msra.mxu0 %v1136_v32 }
  0x43   : > { %712 = vmatprep.subr.bf16.mxu0 %v1140_v33 }
  0x44   : > { %754 = vmatpush1.bf16.msra.mxu1 %v1175_v43 }
  0x46   : > { %713 = vmatpush2.bf16.msra.mxu0 %v1142_v36 }
  0x47   : > { %714 = vmatprep.subr.bf16.mxu0 %v1146_v37  ;;  %772 = vmatmul.mubr.bf16.vlgmr.msra.gmra.mxu1 %v1179_v46 }
  0x4a   : > { %715 = vmatpush2.bf16.msra.mxu0 %v1148_v41 }
  0x4b   : > { %716 = vmatprep.subr.bf16.mxu0 %v1152_v42 }
  0x4e   : > { %717 = vmatpush2.bf16.msra.mxu0 %v1154_v44 }
  0x4f   : > { %718 = vmatprep.subr.bf16.mxu0 %v1158_v45 }
  0x52   : > { %719 = vmatpush2.bf16.msra.mxu0 %v1160_v47 }
  0x53   : > { %720 = vmatprep.subr.bf16.mxu0 %v1164_v48 }
  0x56   : > { %721 = vmatpush2.bf16.msra.mxu0 %v1166_v49 }
  0x57   : > { %722 = vmatprep.subr.bf16.mxu0 %v1170_v50 }
  0x5a   : > { %723 = vmatpush2.bf16.msra.mxu0 %v1172_v51 }
  0x5b   : > { %724 = vmatprep.subr.bf16.mxu0 %v1176_v52 }
  0x5e   : > { %725 = vmatpush2.bf16.msra.mxu0 %v1178_v53 }
  0x5f   : > { %726 = vmatprep.subr.bf16.mxu0 %v1180_v54 }
  0x62   : > { %727 = vmatpush2.bf16.msra.mxu0 %v1182_v55 }
  0x65   : > { %729 = vmatmul.mubr.bf16.vlgmr.msra.gmra.mxu0 %v1183_v56 }
 0x107   : > { %v773_v57 = vpop.f32.mrf.mxu1 }
 0x109   : > { %v775_v58 = vpop.f32.mrf.mxu1 }
 0x10b   : > { %v777_v62 = vpop.f32.mrf.mxu1 }
 0x10d   : > { %v779_v7 = vpop.f32.mrf.mxu1 }
 0x125   : > { %v730_v60 = vpop.f32.mrf.mxu0 }
 0x126   : > { %v774_v61 = vadd.f32 %v773_v57, %v730_v60 }
 0x127   : > { %v732_v0 = vpop.f32.mrf.mxu0 }
 0x128   : > { %v782_v1 = vadd.f32 %v774_v61, %v384_v59  ;;  %v776_v2 = vadd.f32 %v775_v58, %v732_v0 }
 0x129   : > { %v734_v4 = vpop.f32.mrf.mxu0 }
 0x12a   : > { %786 = vst [vmem:[#allocation2 + $0x10] sm:$0xff] %v782_v1  ;;  %v783_v5 = vadd.f32 %v776_v2, %v385_v63  ;;  %v778_v6 = vadd.f32 %v777_v62, %v734_v4 }
 0x12b   : > { %v736_v9 = vpop.f32.mrf.mxu0 }
 0x12c   : > { %787 = vst [vmem:[#allocation2] sm:$0xff] %v783_v5  ;;  %v784_v10 = vadd.f32 %v778_v6, %v386_v3  ;;  %v780_v11 = vadd.f32 %v779_v7, %v736_v9  ;;  %793 = sbr.rel (%p1055_p11) target bundleno = 322 (0x142), region = 70 }
 0x12e   : > { %788 = vst [vmem:[#allocation2 + $0x18] sm:$0xff] %v784_v10  ;;  %v785_v12 = vadd.f32 %v780_v11, %v387_v8 }
 0x130   : > { %789 = vst [vmem:[#allocation2 + $0x8] sm:$0xff] %v785_v12 }
 0x131   : > { %v800_v13 = vlaneseq  ;;  %v814_v15 = vld [vmem:[%s1393_s3] sm:$0xff]  ;;  %v815_v17 = vld [vmem:[%s1393_s3 + $0x8] sm:$0xff]  ;;  %v794_v18 = vld [vmem:[#allocation2 + $0x10] sm:$0xff] }
 0x132   : > { %v798_v16 = vld [vmem:[%s1392_s2] sm:$0x3]  ;;  %v816_v22 = vunpack.c.l.bf16 %v814_v15  ;;  %v817_v23 = vunpack.c.h.bf16 %v814_v15  ;;  %v818_v28 = vunpack.c.l.bf16 %v815_v17  ;;  %v819_v29 = vunpack.c.h.bf16 %v815_v17 }
 0x133   : > { %v801_v14 = vshrl.u32 %v800_v13, 7  ;;  %v795_v21 = vld [vmem:[#allocation2] sm:$0xff] }
 0x135   : > { %v802_v19 = vsub.s32 0, %v801_v14  ;;  %v806_v20 = vsub.s32 1, %v801_v14  ;;  %v796_v24 = vld [vmem:[#allocation2 + $0x18] sm:$0xff] }
 0x137   : > { %v797_v25 = vld [vmem:[#allocation2 + $0x8] sm:$0xff]  ;;  %v803_v26 = vrot.slane %v798_v16, %v802_v19  ;;  %v807_v27 = vrot.slane %v798_v16, %v806_v20 }
 0x139   : > { %v810_v30 = vadd.f32 %v803_v26, %v794_v18  ;;  %v811_v31 = vadd.f32 %v807_v27, %v795_v21  ;;  %v812_v32 = vadd.f32 %v803_v26, %v796_v24  ;;  %v813_v33 = vadd.f32 %v807_v27, %v797_v25 }
 0x13b   : > { %v820_v34 = vadd.f32 %v816_v22, %v810_v30  ;;  %v821_v35 = vadd.f32 %v817_v23, %v811_v31  ;;  %v822_v36 = vadd.f32 %v818_v28, %v812_v32  ;;  %v823_v37 = vadd.f32 %v819_v29, %v813_v33 }
 0x13d   : > { %v824_v38 = vmax.f32 %v820_v34, 0.0  ;;  %v825_v39 = vmax.f32 %v821_v35, 0.0  ;;  %v826_v40 = vmax.f32 %v822_v36, 0.0  ;;  %v827_v41 = vmax.f32 %v823_v37, 0.0 }
 0x13f   : > { %v1064_v42 = vpack.c.bf16 %v825_v39, %v824_v38  ;;  %v1065_v43 = vpack.c.bf16 %v827_v41, %v826_v40 }
 0x141   : > { %840 = vst [vmem:[%s1394_s4] sm:$0xff] %v1064_v42  ;;  %841 = vst [vmem:[%s1394_s4 + $0x8] sm:$0xff] %v1065_v43 }
 0x142 PF: > { %s14_s19 = sadd.s32 1, %s1224_s19   ;;  %s1395_s15 = smov %s1212_s16 }
 0x143   : > { %p11_p12 = scmp.ge.s32.totalorder %s14_s19, 8   ;;  %s1396_s16 = smov %s1288_s23 }
 0x144   : > { %s1397_s17 = smov %s1220_s18  ;;  %s1398_s18 = smov %s1400_s20 }
 0x145   :  { %13 = sbr.rel (!%p11_p12) target bundleno = 3 (0x3), region = 120 }

// kernel: multi_task_net_forward.31
= control target key start
LH: loop header
LB: loop body
LE: loop exit
PB: predicated region body
PF: predicated region fallthrough
CT: control target
= control target key end

     0   :  { %s1812_s0 = inlined_call_operand.vmem [shape: bf16[16,2304], index: 0, kind: input, shape index: {}]   ;;  %s1813_s1 = inlined_call_operand.vmem [shape: bf16[2304,512], index: 1, kind: input, shape index: {}]   ;;  %s1814_s2 = inlined_call_operand.vmem [shape: f32[1,512], index: 2, kind: input, shape index: {}]   ;;  %s1815_s3 = inlined_call_operand.vmem [shape: bf16[16,512], index: 3, kind: output, shape index: {}]  }
   0x1   :  { %1817 = sst [smem:[#allocation7_spill]] %s1812_s0 }
   0x2   :  { %1818 = sst [smem:[#allocation8_spill]] %s1813_s1 }
   0x3   :  { %s1479_s12 = smov 0   ;;  %s1481_s13 = smov 0  }
   0x4   :  { %s1483_s14 = smov 0   ;;  %s1485_s15 = smov 0  }
   0x5   :  { %s1487_s16 = smov 0   ;;  %s1489_s17 = smov 0  }
   0x6   :  { %s1491_s18 = smov 0   ;;  %s1493_s19 = smov 0  }
   0x7   :  { %s1495_s20 = smov 0   ;;  %s1497_s21 = smov 0  }
   0x8   :  { %s1499_s22 = smov 0  }
   0x9 LB: > { %s1119_s23 = sadd.s32 4294967295, %s1455_s22   ;;  %s25_s24 = sadd.s32 1, %s1447_s20  ;;  %s1455_s22 = sphi %s1499_s22, %s13_s22   ;;  %s1451_s21 = sphi %s1497_s21, %s1835_s21   ;;  %s1447_s20 = sphi %s1495_s20, %s1834_s20   ;;  %s1443_s19 = sphi %s1493_s19, %s1833_s19   ;;  %s1439_s18 = sphi %s1491_s18, %s1832_s18   ;;  %s1435_s17 = sphi %s1489_s17, %s1831_s17   ;;  %s1431_s16 = sphi %s1487_s16, %s1830_s16   ;;  %s1427_s15 = sphi %s1485_s15, %s1829_s15   ;;  %s1423_s14 = sphi %s1483_s14, %s1828_s14   ;;  %s1419_s13 = sphi %s1481_s13, %s1827_s13   ;;  %s1415_s12 = sphi %s1479_s12, %s1826_s12  }
   0xa   : > { %p26_p0 = scmp.ge.s32.totalorder %s25_s24, 6  ;;  %s28_s25 = sadd.s32 1, %s1451_s21 }
   0xb   : > { %s41_s26 = sadd.s32 1, %s1435_s17  ;;  %p48_p1 = scmp.ne.s32.totalorder %s1435_s17, %s1431_s16 }
   0xc   : > { %s1837_s24 = smov (%p26_p0, %s25_s24), 0  ;;  %s1839_s25 = smov (!%p26_p0, %s28_s25), %s1451_s21 }
   0xd   : > { %s37_s27 = ssub.s32 %s1447_s20, %s1837_s24  ;;  %p49_p2 = scmp.eq.s32.totalorder %s1455_s22, 0 }
   0xe   : > { %p30_p3 = scmp.ge.s32.totalorder %s1839_s25, 2  ;;  %p39_p4 = scmp.eq.s32.totalorder %s37_s27, 0 }
   0xf   : > { %p1546_p5 = por %p49_p2, %p48_p1  ;;  %s69_s29 = sadd.s32 1, %s1427_s15 }
  0x10   : > { %s1841_s25 = smov (%p30_p3, %s1839_s25), 0  ;;  %p76_p6 = scmp.ne.s32.totalorder %s1427_s15, %s1423_s14 }
  0x11   : > { %1820 = sst [smem:[#allocation6_spill]] %s1841_s25  ;;  %s65_s4 = ssub.s32 %s1451_s21, %s1841_s25 }
  0x12   : > { %s1554_s30 = scalar_select %p39_p4, %s1435_s17, %s41_s26  }
  0x13   : > { %s66_s5 = sor.u32 %s65_s4, %s37_s27  ;;  %p121_p7 = scmp.eq.s32.totalorder %s65_s4, 0 }
  0x14   : > { %p67_p8 = scmp.eq.s32.totalorder %s66_s5, 0  ;;  %p1560_p9 = por %p76_p6, %p49_p2 }
  0x15   : > { %s123_s7 = sadd.s32 1, %s1419_s13  ;;  %p133_p10 = scmp.ne.s32.totalorder %s1419_s13, %s1415_s12 }
  0x16   : > { %s1568_s8 = scalar_select %p67_p8, %s1427_s15, %s69_s29  }
  0x17   : > { %s1571_s9 = scalar_select %p121_p7, %s1419_s13, %s123_s7  }
  0x18   : > { %p134_p11 = scmp.eq.s32.totalorder %s1119_s23, 11  ;;  %p1122_p13 = scmp.ge.s32.totalorder %s1455_s22, 12 }
  0x1a   : > { %p1573_p12 = por %p134_p11, %p133_p10  ;;  %156 = sbr.rel (%p1122_p13) target bundleno = 76 (0x4c), region = 16 }
  0x1f   : > { %159 = sbr.rel (!%p1546_p5) target bundleno = 42 (0x2a), region = 20  ;;  %s161_s11 = sand.u32 (%p1546_p5), 1, %s1435_s17  }
  0x20   : > { %s1194_s26 = smul.u32 (%p1546_p5), 12, %s1447_s20  ;;  %s1823_s0 = sld [smem:[#allocation7_spill]] (%p1546_p5) }
  0x21   : > { %s1199_s27 = smul.u32 (%p1546_p5), 24, %s161_s11 }
  0x23   : > { %s163_s23 = scalar_lea.vmem (%p1546_p5), [#allocation3], %s1199_s27 }
  0x26   : > { %s169_s5 = scalar_lea.vmem %s1823_s0, %s1194_s26 }
  0x27   : > { %v184_v0 = vld [vmem:[%s169_s5] sm:$0xff]  ;;  %v186_v1 = vld [vmem:[%s169_s5 + $0x48] sm:$0xff]  ;;  %v1126_v3 = vld [vmem:[%s169_s5 + $0x50] sm:$0xf] }
  0x28   : > { %v1124_v2 = vld [vmem:[%s169_s5 + $0x8] sm:$0xf]  ;;  %185 = vst [vmem:[%s163_s23] sm:$0xff] %v184_v0  ;;  %187 = vst [vmem:[%s163_s23 + $0xc] sm:$0xff] %v186_v1 }
  0x29   : > { %1125 = vst [vmem:[%s163_s23 + $0x8] sm:$0xf] %v1124_v2  ;;  %1127 = vst [vmem:[%s163_s23 + $0x14] sm:$0xf] %v1126_v3 }
  0x2a PF: > { %205 = sbr.rel (!%p1560_p9) target bundleno = 76 (0x4c), region = 46  ;;  %s207_s28 = sand.u32 (%p1560_p9), 1, %s1427_s15  }
  0x2b   : > { %s1200_s7 = smul.u32 (%p1560_p9), 384, %s207_s28  ;;  %s1128_s11 = sshll.u32 (%p1560_p9), %s1451_s21, 1 }
  0x2c   : > { %s1195_s26 = smul.u32 (%p1560_p9), 192, %s1447_s20  ;;  %s1824_s1 = sld [smem:[#allocation8_spill]] (%p1560_p9) }
  0x2d   : > { %s1598_s6 = scalar_lea.vmem (%p1560_p9), [#allocation4], %s1200_s7 }
  0x2e   : > { %s213_s29 = sadd.s32 (%p1560_p9), %s1195_s26, %s1128_s11 }
  0x2f   : > { %s1130_s4 = sshll.u32 %s213_s29, 2 }
  0x32   : > { %s1593_s25 = scalar_lea.vmem %s1824_s1, %s1130_s4 }
  0x33   : > { %v338_v4 = vld [vmem:[%s1593_s25] sm:$0xff]  ;;  %v340_v5 = vld [vmem:[%s1593_s25 + $0x10] sm:$0xff] }
  0x34   : > { %v342_v6 = vld [vmem:[%s1593_s25 + $0x20] sm:$0xff]  ;;  %339 = vst [vmem:[%s1598_s6] sm:$0xff] %v338_v4  ;;  %341 = vst [vmem:[%s1598_s6 + $0x8] sm:$0xff] %v340_v5  ;;  %v344_v7 = vld [vmem:[%s1593_s25 + $0x30] sm:$0xff] }
  0x35   : > { %343 = vst [vmem:[%s1598_s6 + $0x10] sm:$0xff] %v342_v6  ;;  %v346_v8 = vld [vmem:[%s1593_s25 + $0x40] sm:$0xff]  ;;  %v348_v9 = vld [vmem:[%s1593_s25 + $0x50] sm:$0xff]  ;;  %345 = vst [vmem:[%s1598_s6 + $0x18] sm:$0xff] %v344_v7 }
  0x36   : > { %347 = vst [vmem:[%s1598_s6 + $0x20] sm:$0xff] %v346_v8  ;;  %349 = vst [vmem:[%s1598_s6 + $0x28] sm:$0xff] %v348_v9  ;;  %v350_v10 = vld [vmem:[%s1593_s25 + $0x60] sm:$0xff]  ;;  %v352_v11 = vld [vmem:[%s1593_s25 + $0x70] sm:$0xff] }
  0x37   : > { %v354_v12 = vld [vmem:[%s1593_s25 + $0x80] sm:$0xff]  ;;  %351 = vst [vmem:[%s1598_s6 + $0x30] sm:$0xff] %v350_v10  ;;  %353 = vst [vmem:[%s1598_s6 + $0x38] sm:$0xff] %v352_v11  ;;  %v356_v13 = vld [vmem:[%s1593_s25 + $0x90] sm:$0xff] }
  0x38   : > { %355 = vst [vmem:[%s1598_s6 + $0x40] sm:$0xff] %v354_v12  ;;  %v358_v14 = vld [vmem:[%s1593_s25 + $0xa0] sm:$0xff]  ;;  %v360_v15 = vld [vmem:[%s1593_s25 + $0xb0] sm:$0xff]  ;;  %357 = vst [vmem:[%s1598_s6 + $0x48] sm:$0xff] %v356_v13 }
  0x39   : > { %359 = vst [vmem:[%s1598_s6 + $0x50] sm:$0xff] %v358_v14  ;;  %361 = vst [vmem:[%s1598_s6 + $0x58] sm:$0xff] %v360_v15  ;;  %v362_v16 = vld [vmem:[%s1593_s25 + $0xc0] sm:$0xff]  ;;  %v364_v17 = vld [vmem:[%s1593_s25 + $0xd0] sm:$0xff] }
  0x3a   : > { %v366_v18 = vld [vmem:[%s1593_s25 + $0xe0] sm:$0xff]  ;;  %363 = vst [vmem:[%s1598_s6 + $0x60] sm:$0xff] %v362_v16  ;;  %365 = vst [vmem:[%s1598_s6 + $0x68] sm:$0xff] %v364_v17  ;;  %v368_v19 = vld [vmem:[%s1593_s25 + $0xf0] sm:$0xff] }
  0x3b   : > { %367 = vst [vmem:[%s1598_s6 + $0x70] sm:$0xff] %v366_v18  ;;  %v370_v20 = vld [vmem:[%s1593_s25 + $0x100] sm:$0xff]  ;;  %v372_v21 = vld [vmem:[%s1593_s25 + $0x110] sm:$0xff]  ;;  %369 = vst [vmem:[%s1598_s6 + $0x78] sm:$0xff] %v368_v19 }
  0x3c   : > { %371 = vst [vmem:[%s1598_s6 + $0x80] sm:$0xff] %v370_v20  ;;  %373 = vst [vmem:[%s1598_s6 + $0x88] sm:$0xff] %v372_v21  ;;  %v374_v22 = vld [vmem:[%s1593_s25 + $0x120] sm:$0xff]  ;;  %v376_v23 = vld [vmem:[%s1593_s25 + $0x130] sm:$0xff] }
  0x3d   : > { %v378_v24 = vld [vmem:[%s1593_s25 + $0x140] sm:$0xff]  ;;  %375 = vst [vmem:[%s1598_s6 + $0x90] sm:$0xff] %v374_v22  ;;  %377 = vst [vmem:[%s1598_s6 + $0x98] sm:$0xff] %v376_v23  ;;  %v380_v25 = vld [vmem:[%s1593_s25 + $0x150] sm:$0xff] }
  0x3e   : > { %379 = vst [vmem:[%s1598_s6 + $0xa0] sm:$0xff] %v378_v24  ;;  %v382_v26 = vld [vmem:[%s1593_s25 + $0x160] sm:$0xff]  ;;  %v384_v27 = vld [vmem:[%s1593_s25 + $0x170] sm:$0xff]  ;;  %381 = vst [vmem:[%s1598_s6 + $0xa8] sm:$0xff] %v380_v25 }
  0x3f   : > { %383 = vst [vmem:[%s1598_s6 + $0xb0] sm:$0xff] %v382_v26  ;;  %385 = vst [vmem:[%s1598_s6 + $0xb8] sm:$0xff] %v384_v27  ;;  %v386_v28 = vld [vmem:[%s1593_s25 + $0x180] sm:$0xff]  ;;  %v388_v29 = vld [vmem:[%s1593_s25 + $0x190] sm:$0xff] }
  0x40   : > { %v390_v30 = vld [vmem:[%s1593_s25 + $0x1a0] sm:$0xff]  ;;  %387 = vst [vmem:[%s1598_s6 + $0xc0] sm:$0xff] %v386_v28  ;;  %389 = vst [vmem:[%s1598_s6 + $0xc8] sm:$0xff] %v388_v29  ;;  %v392_v31 = vld [vmem:[%s1593_s25 + $0x1b0] sm:$0xff] }
  0x41   : > { %391 = vst [vmem:[%s1598_s6 + $0xd0] sm:$0xff] %v390_v30  ;;  %v394_v32 = vld [vmem:[%s1593_s25 + $0x1c0] sm:$0xff]  ;;  %v396_v33 = vld [vmem:[%s1593_s25 + $0x1d0] sm:$0xff]  ;;  %393 = vst [vmem:[%s1598_s6 + $0xd8] sm:$0xff] %v392_v31 }
  0x42   : > { %395 = vst [vmem:[%s1598_s6 + $0xe0] sm:$0xff] %v394_v32  ;;  %397 = vst [vmem:[%s1598_s6 + $0xe8] sm:$0xff] %v396_v33  ;;  %v398_v34 = vld [vmem:[%s1593_s25 + $0x1e0] sm:$0xff]  ;;  %v400_v35 = vld [vmem:[%s1593_s25 + $0x1f0] sm:$0xff] }
  0x43   : > { %v402_v36 = vld [vmem:[%s1593_s25 + $0x200] sm:$0xff]  ;;  %399 = vst [vmem:[%s1598_s6 + $0xf0] sm:$0xff] %v398_v34  ;;  %401 = vst [vmem:[%s1598_s6 + $0xf8] sm:$0xff] %v400_v35  ;;  %v404_v37 = vld [vmem:[%s1593_s25 + $0x210] sm:$0xff] }
  0x44   : > { %403 = vst [vmem:[%s1598_s6 + $0x100] sm:$0xff] %v402_v36  ;;  %v406_v38 = vld [vmem:[%s1593_s25 + $0x220] sm:$0xff]  ;;  %v408_v39 = vld [vmem:[%s1593_s25 + $0x230] sm:$0xff]  ;;  %405 = vst [vmem:[%s1598_s6 + $0x108] sm:$0xff] %v404_v37 }
  0x45   : > { %407 = vst [vmem:[%s1598_s6 + $0x110] sm:$0xff] %v406_v38  ;;  %409 = vst [vmem:[%s1598_s6 + $0x118] sm:$0xff] %v408_v39  ;;  %v410_v40 = vld [vmem:[%s1593_s25 + $0x240] sm:$0xff]  ;;  %v412_v41 = vld [vmem:[%s1593_s25 + $0x250] sm:$0xff] }
  0x46   : > { %v414_v42 = vld [vmem:[%s1593_s25 + $0x260] sm:$0xff]  ;;  %411 = vst [vmem:[%s1598_s6 + $0x120] sm:$0xff] %v410_v40  ;;  %413 = vst [vmem:[%s1598_s6 + $0x128] sm:$0xff] %v412_v41  ;;  %v416_v43 = vld [vmem:[%s1593_s25 + $0x270] sm:$0xff] }
  0x47   : > { %415 = vst [vmem:[%s1598_s6 + $0x130] sm:$0xff] %v414_v42  ;;  %v418_v44 = vld [vmem:[%s1593_s25 + $0x280] sm:$0xff]  ;;  %v420_v45 = vld [vmem:[%s1593_s25 + $0x290] sm:$0xff]  ;;  %417 = vst [vmem:[%s1598_s6 + $0x138] sm:$0xff] %v416_v43 }
  0x48   : > { %419 = vst [vmem:[%s1598_s6 + $0x140] sm:$0xff] %v418_v44  ;;  %421 = vst [vmem:[%s1598_s6 + $0x148] sm:$0xff] %v420_v45  ;;  %v422_v46 = vld [vmem:[%s1593_s25 + $0x2a0] sm:$0xff]  ;;  %v424_v47 = vld [vmem:[%s1593_s25 + $0x2b0] sm:$0xff] }
  0x49   : > { %v426_v48 = vld [vmem:[%s1593_s25 + $0x2c0] sm:$0xff]  ;;  %423 = vst [vmem:[%s1598_s6 + $0x150] sm:$0xff] %v422_v46  ;;  %425 = vst [vmem:[%s1598_s6 + $0x158] sm:$0xff] %v424_v47  ;;  %v428_v49 = vld [vmem:[%s1593_s25 + $0x2d0] sm:$0xff] }
  0x4a   : > { %427 = vst [vmem:[%s1598_s6 + $0x160] sm:$0xff] %v426_v48  ;;  %v430_v50 = vld [vmem:[%s1593_s25 + $0x2e0] sm:$0xff]  ;;  %v432_v51 = vld [vmem:[%s1593_s25 + $0x2f0] sm:$0xff]  ;;  %429 = vst [vmem:[%s1598_s6 + $0x168] sm:$0xff] %v428_v49 }
  0x4b   : > { %431 = vst [vmem:[%s1598_s6 + $0x170] sm:$0xff] %v430_v50  ;;  %433 = vst [vmem:[%s1598_s6 + $0x178] sm:$0xff] %v432_v51 }
  0x4c PF: > { %p1131_p0 = scmp.ge.s32.totalorder %s1455_s22, 1  ;;  %p446_p1 = scmp.lt.s32.totalorder %s1455_s22, 13 }
  0x4e   : > { %p447_p2 = pnand %p1131_p0, %p446_p1 }
  0x4f   : > { %s453_s0 = sand.u32 (!%p447_p2), 1, %s1431_s16   ;;  %s460_s5 = sand.u32 (!%p447_p2), 1, %s1423_s14  }
  0x50   : > { %450 = sbr.rel (%p447_p2) target bundleno = 387 (0x183), region = 88  ;;  %s487_s28 = sand.u32 (!%p447_p2), 1, %s1415_s12  }
  0x51   : > { %s1201_s23 = smul.u32 (!%p447_p2), 24, %s453_s0  ;;  %s1132_s7 = sshll.u32 (!%p447_p2), %s487_s28, 4 }
  0x52   : > { %s1202_s25 = smul.u32 (!%p447_p2), 384, %s460_s5  ;;  %s1133_s11 = sshll.u32 (!%p447_p2), %s1443_s19, 1 }
  0x53   : > { %p495_p3 = scmp.lt.s32.totalorder (!%p447_p2), %s1133_s11, 3  ;;  %s1705_s27 = scalar_lea.vmem (!%p447_p2), [#allocation3], %s1201_s23 }
  0x54   : > { %s1707_s6 = scalar_lea.vmem (!%p447_p2), [#allocation4], %s1202_s25  ;;  %s1709_s1 = scalar_lea.vmem (!%p447_p2), [#allocation5], %s1132_s7 }
  0x55   : > { %s1843_s11 = smov (!%p495_p3, %s1133_s11), 3  ;;  %p1134_p4 = scmp.ne.s32.totalorder %s1439_s18, 0 }
  0x56   : > { %s497_s4 = scalar_lea.vmem %s1814_s2, %s1843_s11 }
  0x57   : > { %505 = sbr.rel (%p1134_p4) target bundleno = 95 (0x5f), region = 100 }
  0x5c   : > { %v1457_v52 = vmov 0.0  }
  0x5d   : > { %506 = vst [vmem:[#allocation2 + $0x10] sm:$0xff] %v1457_v52  ;;  %507 = vst [vmem:[#allocation2] sm:$0xff] %v1457_v52 }
  0x5e   : > { %508 = vst [vmem:[#allocation2 + $0x18] sm:$0xff] %v1457_v52  ;;  %509 = vst [vmem:[#allocation2 + $0x8] sm:$0xff] %v1457_v52 }
  0x5f PF: > { %v1293_v53 = vld [vmem:[%s1707_s6 + $0x74] ss:$8 sps:$4 sm:$0xff]   ;;  %v1295_v54 = vld [vmem:[%s1707_s6 + $0x70] ss:$8 sps:$4 sm:$0xff]   ;;  %v1458_v55 = vmov 0   ;;  %p1186_p5 = scmp.ne.s32.totalorder %s1439_s18, 5 }
  0x60   : > { %897 = vmatprep.mubr.bf16.mxu1 %v1458_v55  ;;  %822 = vmatprep.subr.bf16.mxu0 %v1293_v53  ;;  %v1296_v56 = vld [vmem:[%s1707_s6 + $0x64] ss:$8 sps:$4 sm:$0xff]   ;;  %v1298_v57 = vld [vmem:[%s1707_s6 + $0x60] ss:$8 sps:$4 sm:$0xff]   ;;  %v1299_v58 = vld [vmem:[%s1707_s6 + $0x54] ss:$8 sps:$4 sm:$0xff]  }
  0x61   : > { %823 = vmatpush1.bf16.msra.mxu0 %v1295_v54  ;;  %v1301_v59 = vld [vmem:[%s1707_s6 + $0x50] ss:$8 sps:$4 sm:$0xff]   ;;  %v1302_v60 = vld [vmem:[%s1707_s6 + $0x44] ss:$8 sps:$4 sm:$0xff]   ;;  %v1314_v61 = vld [vmem:[%s1707_s6 + $0x174] ss:$8 sps:$4 sm:$0xff]  }
  0x62   : > { %824 = vmatprep.subr.bf16.mxu0 %v1296_v56  ;;  %v1316_v62 = vld [vmem:[%s1707_s6 + $0x170] ss:$8 sps:$4 sm:$0xff]   ;;  %v1304_v63 = vld [vmem:[%s1707_s6 + $0x40] ss:$8 sps:$4 sm:$0xff]   ;;  %v1305_v0 = vld [vmem:[%s1707_s6 + $0x34] ss:$8 sps:$4 sm:$0xff]   ;;  %865 = vmatprep.subr.bf16.mxu1 %v1314_v61 }
  0x63   : > { %v1320_v1 = vld [vmem:[%s1707_s6 + $0x164] ss:$8 sps:$4 sm:$0xff]   ;;  %866 = vmatpush1.bf16.msra.mxu1 %v1316_v62  ;;  %v1322_v2 = vld [vmem:[%s1707_s6 + $0x160] ss:$8 sps:$4 sm:$0xff]   ;;  %v1307_v3 = vld [vmem:[%s1707_s6 + $0x30] ss:$8 sps:$4 sm:$0xff]  }
  0x64   : > { %867 = vmatprep.subr.bf16.mxu1 %v1320_v1  ;;  %v1326_v4 = vld [vmem:[%s1707_s6 + $0x154] ss:$8 sps:$4 sm:$0xff]   ;;  %v1308_v5 = vld [vmem:[%s1707_s6 + $0x24] ss:$8 sps:$4 sm:$0xff]   ;;  %v1328_v6 = vld [vmem:[%s1707_s6 + $0x150] ss:$8 sps:$4 sm:$0xff]  }
  0x65   : > { %825 = vmatpush1.bf16.msra.mxu0 %v1298_v57  ;;  %v1332_v7 = vld [vmem:[%s1707_s6 + $0x144] ss:$8 sps:$4 sm:$0xff]   ;;  %v1310_v8 = vld [vmem:[%s1707_s6 + $0x20] ss:$8 sps:$4 sm:$0xff]   ;;  %v1311_v9 = vld [vmem:[%s1707_s6 + $0x14] ss:$8 sps:$4 sm:$0xff]  }
  0x66   : > { %826 = vmatprep.subr.bf16.mxu0 %v1299_v58  ;;  %v1334_v10 = vld [vmem:[%s1707_s6 + $0x140] ss:$8 sps:$4 sm:$0xff]   ;;  %v1338_v11 = vld [vmem:[%s1707_s6 + $0x134] ss:$8 sps:$4 sm:$0xff]   ;;  %v1313_v12 = vld [vmem:[%s1707_s6 + $0x10] ss:$8 sps:$4 sm:$0xff]  }
  0x67   : > { %868 = vmatpush1.bf16.msra.mxu1 %v1322_v2  ;;  %v1317_v13 = vld [vmem:[%s1707_s6 + $0x4] ss:$8 sps:$4 sm:$0xff]   ;;  %v1340_v14 = vld [vmem:[%s1707_s6 + $0x130] ss:$8 sps:$4 sm:$0xff]   ;;  %v1319_v16 = vld [vmem:[%s1707_s6] ss:$8 sps:$4 sm:$0xff]  }
  0x68   : > { %869 = vmatprep.subr.bf16.mxu1 %v1326_v4  ;;  %v1344_v15 = vld [vmem:[%s1707_s6 + $0x124] ss:$8 sps:$4 sm:$0xff]   ;;  %v1323_v17 = vld [vmem:[%s1707_s6 + $0xf4] ss:$8 sps:$4 sm:$0xff]   ;;  %v1346_v18 = vld [vmem:[%s1707_s6 + $0x120] ss:$8 sps:$4 sm:$0xff]  }
  0x69   : > { %827 = vmatpush1.bf16.msra.mxu0 %v1301_v59  ;;  %v1350_v19 = vld [vmem:[%s1707_s6 + $0x114] ss:$8 sps:$4 sm:$0xff]   ;;  %v1325_v20 = vld [vmem:[%s1707_s6 + $0xf0] ss:$8 sps:$4 sm:$0xff]   ;;  %v1329_v21 = vld [vmem:[%s1707_s6 + $0xe4] ss:$8 sps:$4 sm:$0xff]  }
  0x6a   : > { %828 = vmatprep.subr.bf16.mxu0 %v1302_v60  ;;  %v1352_v22 = vld [vmem:[%s1707_s6 + $0x110] ss:$8 sps:$4 sm:$0xff]   ;;  %v1356_v23 = vld [vmem:[%s1707_s6 + $0x104] ss:$8 sps:$4 sm:$0xff]   ;;  %v1331_v25 = vld [vmem:[%s1707_s6 + $0xe0] ss:$8 sps:$4 sm:$0xff]  }
  0x6b   : > { %870 = vmatpush1.bf16.msra.mxu1 %v1328_v6  ;;  %v1368_v24 = vld [vmem:[%s1705_s27 + $0x4] ss:$12 sps:$4 sm:$0xff]   ;;  %v1362_v30 = vld [vmem:[%s1705_s27 + $0x8] ss:$12 sps:$4 sm:$0xff]   ;;  %v1366_v40 = vld [vmem:[%s1705_s27] ss:$12 sps:$4 sm:$0xff]  }
  0x6c   : > { %871 = vmatprep.subr.bf16.mxu1 %v1332_v7  ;;  %v1335_v26 = vld [vmem:[%s1707_s6 + $0xd4] ss:$8 sps:$4 sm:$0xff]   ;;  %854 = vmatprep.mubr.bf16.mxu0 %v1368_v24  ;;  %v1358_v27 = vld [vmem:[%s1707_s6 + $0x100] ss:$8 sps:$4 sm:$0xff]   ;;  %v1337_v28 = vld [vmem:[%s1707_s6 + $0xd0] ss:$8 sps:$4 sm:$0xff]  }
  0x6d   : > { %829 = vmatpush1.bf16.msra.mxu0 %v1304_v63  ;;  %v1341_v29 = vld [vmem:[%s1707_s6 + $0xc4] ss:$8 sps:$4 sm:$0xff]   ;;  %v1343_v31 = vld [vmem:[%s1707_s6 + $0xc0] ss:$8 sps:$4 sm:$0xff]   ;;  %v1347_v32 = vld [vmem:[%s1707_s6 + $0xb4] ss:$8 sps:$4 sm:$0xff]  }
  0x6e   : > { %830 = vmatprep.subr.bf16.mxu0 %v1305_v0  ;;  %v1349_v33 = vld [vmem:[%s1707_s6 + $0xb0] ss:$8 sps:$4 sm:$0xff]   ;;  %v1353_v34 = vld [vmem:[%s1707_s6 + $0xa4] ss:$8 sps:$4 sm:$0xff]   ;;  %v1355_v35 = vld [vmem:[%s1707_s6 + $0xa0] ss:$8 sps:$4 sm:$0xff]  }
  0x6f   : > { %872 = vmatpush1.bf16.msra.mxu1 %v1334_v10  ;;  %v1359_v36 = vld [vmem:[%s1707_s6 + $0x94] ss:$8 sps:$4 sm:$0xff]   ;;  %v1361_v37 = vld [vmem:[%s1707_s6 + $0x90] ss:$8 sps:$4 sm:$0xff]   ;;  %v1363_v38 = vld [vmem:[%s1707_s6 + $0x84] ss:$8 sps:$4 sm:$0xff]  }
  0x70   : > { %873 = vmatprep.subr.bf16.mxu1 %v1338_v11  ;;  %v1365_v39 = vld [vmem:[%s1707_s6 + $0x80] ss:$8 sps:$4 sm:$0xff]   ;;  %v511_v47 = vld [vmem:[#allocation2] sm:$0xff]  ;;  %v513_v56 = vld [vmem:[#allocation2 + $0x8] sm:$0xff] }
  0x71   : > { %831 = vmatpush1.bf16.msra.mxu0 %v1307_v3  ;;  %v510_v43 = vld [vmem:[#allocation2 + $0x10] sm:$0xff]  ;;  %v512_v51 = vld [vmem:[#allocation2 + $0x18] sm:$0xff] }
  0x72   : > { %832 = vmatprep.subr.bf16.mxu0 %v1308_v5 }
  0x73   : > { %874 = vmatpush1.bf16.msra.mxu1 %v1340_v14 }
  0x74   : > { %875 = vmatprep.subr.bf16.mxu1 %v1344_v15 }
  0x75   : > { %833 = vmatpush1.bf16.msra.mxu0 %v1310_v8 }
  0x76   : > { %834 = vmatprep.subr.bf16.mxu0 %v1311_v9 }
  0x77   : > { %876 = vmatpush1.bf16.msra.mxu1 %v1346_v18 }
  0x78   : > { %877 = vmatprep.subr.bf16.mxu1 %v1350_v19 }
  0x79   : > { %835 = vmatpush1.bf16.msra.mxu0 %v1313_v12 }
  0x7a   : > { %836 = vmatprep.subr.bf16.mxu0 %v1317_v13 }
  0x7b   : > { %878 = vmatpush1.bf16.msra.mxu1 %v1352_v22 }
  0x7c   : > { %879 = vmatprep.subr.bf16.mxu1 %v1356_v23 }
  0x7d   : > { %837 = vmatpush1.bf16.msra.mxu0 %v1319_v16 }
  0x7e   : > { %838 = vmatprep.subr.bf16.mxu0 %v1323_v17 }
  0x7f   : > { %880 = vmatpush1.bf16.msra.mxu1 %v1358_v27 }
  0x81   : > { %839 = vmatpush2.bf16.msra.mxu0 %v1325_v20 }
  0x82   : > { %840 = vmatprep.subr.bf16.mxu0 %v1329_v21  ;;  %898 = vmatmul.mubr.bf16.vlgmr.msra.gmra.mxu1 %v1362_v30 }
  0x85   : > { %841 = vmatpush2.bf16.msra.mxu0 %v1331_v25 }
  0x86   : > { %842 = vmatprep.subr.bf16.mxu0 %v1335_v26 }
  0x89   : > { %843 = vmatpush2.bf16.msra.mxu0 %v1337_v28 }
  0x8a   : > { %844 = vmatprep.subr.bf16.mxu0 %v1341_v29 }
  0x8d   : > { %845 = vmatpush2.bf16.msra.mxu0 %v1343_v31 }
  0x8e   : > { %846 = vmatprep.subr.bf16.mxu0 %v1347_v32 }
  0x91   : > { %847 = vmatpush2.bf16.msra.mxu0 %v1349_v33 }
  0x92   : > { %848 = vmatprep.subr.bf16.mxu0 %v1353_v34 }
  0x95   : > { %849 = vmatpush2.bf16.msra.mxu0 %v1355_v35 }
  0x96   : > { %850 = vmatprep.subr.bf16.mxu0 %v1359_v36 }
  0x99   : > { %851 = vmatpush2.bf16.msra.mxu0 %v1361_v37 }
  0x9a   : > { %852 = vmatprep.subr.bf16.mxu0 %v1363_v38 }
  0x9d   : > { %853 = vmatpush2.bf16.msra.mxu0 %v1365_v39 }
  0xa0   : > { %855 = vmatmul.mubr.bf16.vlgmr.msra.gmra.mxu0 %v1366_v40 }
 0x142   : > { %v899_v41 = vpop.f32.mrf.mxu1 }
 0x144   : > { %v901_v42 = vpop.f32.mrf.mxu1 }
 0x146   : > { %v903_v46 = vpop.f32.mrf.mxu1 }
 0x148   : > { %v905_v55 = vpop.f32.mrf.mxu1 }
 0x160   : > { %v856_v44 = vpop.f32.mrf.mxu0 }
 0x161   : > { %v900_v45 = vadd.f32 %v899_v41, %v856_v44 }
 0x162   : > { %v858_v48 = vpop.f32.mrf.mxu0 }
 0x163   : > { %v908_v49 = vadd.f32 %v900_v45, %v510_v43  ;;  %v902_v50 = vadd.f32 %v901_v42, %v858_v48 }
 0x164   : > { %v860_v52 = vpop.f32.mrf.mxu0 }
 0x165   : > { %912 = vst [vmem:[#allocation2 + $0x10] sm:$0xff] %v908_v49  ;;  %v909_v53 = vadd.f32 %v902_v50, %v511_v47  ;;  %v904_v54 = vadd.f32 %v903_v46, %v860_v52 }
 0x166   : > { %v862_v57 = vpop.f32.mrf.mxu0 }
 0x167   : > { %913 = vst [vmem:[#allocation2] sm:$0xff] %v909_v53  ;;  %v910_v58 = vadd.f32 %v904_v54, %v512_v51  ;;  %v906_v59 = vadd.f32 %v905_v55, %v862_v57  ;;  %919 = sbr.rel (%p1186_p5) target bundleno = 379 (0x17b), region = 104 }
 0x169   : > { %914 = vst [vmem:[#allocation2 + $0x18] sm:$0xff] %v910_v58  ;;  %v911_v60 = vadd.f32 %v906_v59, %v513_v56 }
 0x16b   : > { %915 = vst [vmem:[#allocation2 + $0x8] sm:$0xff] %v911_v60 }
 0x16c   : > { %v926_v61 = vlaneseq  ;;  %v924_v63 = vld [vmem:[%s497_s4] sm:$0x3]  ;;  %v920_v0 = vld [vmem:[#allocation2 + $0x10] sm:$0xff] }
 0x16e   : > { %v927_v62 = vshrl.u32 %v926_v61, 7  ;;  %v921_v3 = vld [vmem:[#allocation2] sm:$0xff] }
 0x170   : > { %v928_v1 = vsub.s32 0, %v927_v62  ;;  %v932_v2 = vsub.s32 1, %v927_v62  ;;  %v922_v4 = vld [vmem:[#allocation2 + $0x18] sm:$0xff] }
 0x172   : > { %v923_v5 = vld [vmem:[#allocation2 + $0x8] sm:$0xff]  ;;  %v929_v6 = vrot.slane %v924_v63, %v928_v1  ;;  %v933_v7 = vrot.slane %v924_v63, %v932_v2 }
 0x174   : > { %v936_v8 = vadd.f32 %v929_v6, %v920_v0  ;;  %v937_v9 = vadd.f32 %v933_v7, %v921_v3  ;;  %v938_v10 = vadd.f32 %v929_v6, %v922_v4  ;;  %v939_v11 = vadd.f32 %v933_v7, %v923_v5 }
 0x176   : > { %v940_v12 = vmax.f32 %v936_v8, 0.0  ;;  %v941_v13 = vmax.f32 %v937_v9, 0.0  ;;  %v942_v14 = vmax.f32 %v938_v10, 0.0  ;;  %v943_v15 = vmax.f32 %v939_v11, 0.0 }
 0x178   : > { %v1196_v16 = vpack.c.bf16 %v941_v13, %v940_v12  ;;  %v1197_v17 = vpack.c.bf16 %v943_v15, %v942_v14 }
 0x17a   : > { %956 = vst [vmem:[%s1709_s1] sm:$0xff] %v1196_v16  ;;  %957 = vst [vmem:[%s1709_s1 + $0x8] sm:$0xff] %v1197_v17 }
 0x17b PF: > { %964 = sbr.rel (!%p1573_p12) target bundleno = 387 (0x183), region = 108  ;;  %s1198_s16 = sshll.u32 (%p1573_p12), %s1443_s19, 3 }
 0x17c   : > { %s970_s5 = scalar_lea.vmem (%p1573_p12), %s1815_s3, %s1198_s16 }
 0x181   : > { %v1001_v18 = vld [vmem:[%s1709_s1] sm:$0xff]  ;;  %v1003_v19 = vld [vmem:[%s1709_s1 + $0x8] sm:$0xff] }
 0x182   : > { %1002 = vst [vmem:[%s970_s5] sm:$0xff] %v1001_v18  ;;  %1004 = vst [vmem:[%s970_s5 + $0x10] sm:$0xff] %v1003_v19 }
 0x183 PF: > { %s13_s22 = sadd.s32 1, %s1455_s22   ;;  %s1825_s1 = sld [smem:[#allocation6_spill]] }
 0x184   : > { %p10_p6 = scmp.ge.s32.totalorder %s13_s22, 14   ;;  %s1826_s12 = smov %s1419_s13 }
 0x185   : > { %s1827_s13 = smov %s1571_s9  ;;  %s1828_s14 = smov %s1427_s15 }
 0x186   : > { %s1829_s15 = smov %s1568_s8  ;;  %s1830_s16 = smov %s1435_s17 }
 0x187   : > { %s1831_s17 = smov %s1554_s30  ;;  %s1832_s18 = smov %s1447_s20 }
 0x188   : > { %s1833_s19 = smov %s1451_s21  ;;  %s1834_s20 = smov %s1837_s24 }
 0x189   : > { %s1835_s21 = smov %s1825_s1  ;;  %12 = sbr.rel (!%p10_p6) target bundleno = 9 (0x9), region = 194 }

// kernel: multi_task_net_forward.33
= control target key start
LH: loop header
LB: loop body
LE: loop exit
PB: predicated region body
PF: predicated region fallthrough
CT: control target
= control target key end

     0   :  { %s2049_s0 = inlined_call_operand.vmem [shape: bf16[16,4608], index: 0, kind: input, shape index: {}]   ;;  %s2050_s1 = inlined_call_operand.vmem [shape: bf16[4608,512], index: 1, kind: input, shape index: {}]   ;;  %s2051_s2 = inlined_call_operand.vmem [shape: f32[1,512], index: 2, kind: input, shape index: {}]   ;;  %s2052_s3 = inlined_call_operand.vmem [shape: bf16[16,512], index: 3, kind: output, shape index: {}]  }
   0x1   :  { %2054 = sst [smem:[#allocation7_spill]] %s2049_s0 }
   0x2   :  { %2055 = sst [smem:[#allocation8_spill]] %s2050_s1 }
   0x3   :  { %s1667_s12 = smov 0   ;;  %s1669_s13 = smov 0  }
   0x4   :  { %s1671_s14 = smov 0   ;;  %s1673_s15 = smov 0  }
   0x5   :  { %s1675_s16 = smov 0   ;;  %s1677_s17 = smov 0  }
   0x6   :  { %s1679_s18 = smov 0   ;;  %s1681_s19 = smov 0  }
   0x7   :  { %s1683_s20 = smov 0   ;;  %s1685_s21 = smov 0  }
   0x8   :  { %s1687_s22 = smov 0  }
   0x9 LB: > { %s1268_s23 = sadd.s32 4294967295, %s1644_s22   ;;  %s25_s24 = sadd.s32 1, %s1636_s20  ;;  %s1644_s22 = sphi %s1687_s22, %s13_s22   ;;  %s1640_s21 = sphi %s1685_s21, %s2072_s21   ;;  %s1636_s20 = sphi %s1683_s20, %s2071_s20   ;;  %s1632_s19 = sphi %s1681_s19, %s2070_s19   ;;  %s1628_s18 = sphi %s1679_s18, %s2069_s18   ;;  %s1624_s17 = sphi %s1677_s17, %s2068_s17   ;;  %s1620_s16 = sphi %s1675_s16, %s2067_s16   ;;  %s1616_s15 = sphi %s1673_s15, %s2066_s15   ;;  %s1612_s14 = sphi %s1671_s14, %s2065_s14   ;;  %s1608_s13 = sphi %s1669_s13, %s2064_s13   ;;  %s1604_s12 = sphi %s1667_s12, %s2063_s12  }
   0xa   : > { %p26_p0 = scmp.ge.s32.totalorder %s25_s24, 9  ;;  %s28_s25 = sadd.s32 1, %s1640_s21 }
   0xb   : > { %s41_s26 = sadd.s32 1, %s1624_s17  ;;  %p48_p1 = scmp.ne.s32.totalorder %s1624_s17, %s1620_s16 }
   0xc   : > { %s2074_s24 = smov (%p26_p0, %s25_s24), 0  ;;  %s2076_s25 = smov (!%p26_p0, %s28_s25), %s1640_s21 }
   0xd   : > { %s37_s27 = ssub.s32 %s1636_s20, %s2074_s24  ;;  %p49_p2 = scmp.eq.s32.totalorder %s1644_s22, 0 }
   0xe   : > { %p30_p3 = scmp.ge.s32.totalorder %s2076_s25, 2  ;;  %p39_p4 = scmp.eq.s32.totalorder %s37_s27, 0 }
   0xf   : > { %p1734_p5 = por %p49_p2, %p48_p1  ;;  %s69_s29 = sadd.s32 1, %s1616_s15 }
  0x10   : > { %s2078_s25 = smov (%p30_p3, %s2076_s25), 0  ;;  %p76_p6 = scmp.ne.s32.totalorder %s1616_s15, %s1612_s14 }
  0x11   : > { %2057 = sst [smem:[#allocation6_spill]] %s2078_s25  ;;  %s65_s4 = ssub.s32 %s1640_s21, %s2078_s25 }
  0x12   : > { %s1742_s30 = scalar_select %p39_p4, %s1624_s17, %s41_s26  }
  0x13   : > { %s66_s5 = sor.u32 %s65_s4, %s37_s27  ;;  %p121_p7 = scmp.eq.s32.totalorder %s65_s4, 0 }
  0x14   : > { %p67_p8 = scmp.eq.s32.totalorder %s66_s5, 0  ;;  %p1748_p9 = por %p76_p6, %p49_p2 }
  0x15   : > { %s123_s7 = sadd.s32 1, %s1608_s13  ;;  %p133_p10 = scmp.ne.s32.totalorder %s1608_s13, %s1604_s12 }
  0x16   : > { %s1756_s8 = scalar_select %p67_p8, %s1616_s15, %s69_s29  }
  0x17   : > { %s1759_s9 = scalar_select %p121_p7, %s1608_s13, %s123_s7  }
  0x18   : > { %p134_p11 = scmp.eq.s32.totalorder %s1268_s23, 17  ;;  %p1271_p13 = scmp.ge.s32.totalorder %s1644_s22, 18 }
  0x1a   : > { %p1761_p12 = por %p134_p11, %p133_p10  ;;  %156 = sbr.rel (%p1271_p13) target bundleno = 85 (0x55), region = 16 }
  0x1f   : > { %159 = sbr.rel (!%p1734_p5) target bundleno = 43 (0x2b), region = 20  ;;  %s161_s11 = sand.u32 (%p1734_p5), 1, %s1624_s17  }
  0x20   : > { %s1362_s26 = sshll.u32 (%p1734_p5), %s1636_s20, 4  ;;  %s1272_s27 = sshll.u32 (%p1734_p5), %s161_s11, 5 }
  0x21   : > { %s2060_s0 = sld [smem:[#allocation7_spill]] (%p1734_p5)  ;;  %s163_s23 = scalar_lea.vmem (%p1734_p5), [#allocation3], %s1272_s27 }
  0x27   : > { %s169_s5 = scalar_lea.vmem %s2060_s0, %s1362_s26 }
  0x28   : > { %v182_v0 = vld [vmem:[%s169_s5] sm:$0xff]  ;;  %v184_v1 = vld [vmem:[%s169_s5 + $0x8] sm:$0xff]  ;;  %v186_v2 = vld [vmem:[%s169_s5 + $0x90] sm:$0xff] }
  0x29   : > { %183 = vst [vmem:[%s163_s23] sm:$0xff] %v182_v0  ;;  %185 = vst [vmem:[%s163_s23 + $0x8] sm:$0xff] %v184_v1  ;;  %v188_v3 = vld [vmem:[%s169_s5 + $0x98] sm:$0xff] }
  0x2a   : > { %187 = vst [vmem:[%s163_s23 + $0x10] sm:$0xff] %v186_v2  ;;  %189 = vst [vmem:[%s163_s23 + $0x18] sm:$0xff] %v188_v3 }
  0x2b PF: > { %195 = sbr.rel (!%p1748_p9) target bundleno = 85 (0x55), region = 43  ;;  %s197_s28 = sand.u32 (%p1748_p9), 1, %s1616_s15  }
  0x2c   : > { %s1277_s7 = sshll.u32 (%p1748_p9), %s1640_s21, 1  ;;  %s1275_s11 = sshll.u32 (%p1748_p9), %s197_s28, 9 }
  0x2d   : > { %s1363_s26 = sshll.u32 (%p1748_p9), %s1636_s20, 8  ;;  %s2061_s1 = sld [smem:[#allocation8_spill]] (%p1748_p9) }
  0x2e   : > { %s203_s29 = sadd.s32 (%p1748_p9), %s1363_s26, %s1277_s7  ;;  %s1786_s6 = scalar_lea.vmem (%p1748_p9), [#allocation4], %s1275_s11 }
  0x2f   : > { %s1279_s4 = sshll.u32 (%p1748_p9), %s203_s29, 2 }
  0x33   : > { %s1781_s25 = scalar_lea.vmem %s2061_s1, %s1279_s4 }
  0x34   : > { %v360_v4 = vld [vmem:[%s1781_s25] sm:$0xff]  ;;  %v362_v5 = vld [vmem:[%s1781_s25 + $0x10] sm:$0xff] }
  0x35   : > { %v364_v6 = vld [vmem:[%s1781_s25 + $0x20] sm:$0xff]  ;;  %361 = vst [vmem:[%s1786_s6] sm:$0xff] %v360_v4  ;;  %363 = vst [vmem:[%s1786_s6 + $0x8] sm:$0xff] %v362_v5  ;;  %v366_v7 = vld [vmem:[%s1781_s25 + $0x30] sm:$0xff] }
  0x36   : > { %365 = vst [vmem:[%s1786_s6 + $0x10] sm:$0xff] %v364_v6  ;;  %v368_v8 = vld [vmem:[%s1781_s25 + $0x40] sm:$0xff]  ;;  %v370_v9 = vld [vmem:[%s1781_s25 + $0x50] sm:$0xff]  ;;  %367 = vst [vmem:[%s1786_s6 + $0x18] sm:$0xff] %v366_v7 }
  0x37   : > { %369 = vst [vmem:[%s1786_s6 + $0x20] sm:$0xff] %v368_v8  ;;  %371 = vst [vmem:[%s1786_s6 + $0x28] sm:$0xff] %v370_v9  ;;  %v372_v10 = vld [vmem:[%s1781_s25 + $0x60] sm:$0xff]  ;;  %v374_v11 = vld [vmem:[%s1781_s25 + $0x70] sm:$0xff] }
  0x38   : > { %v376_v12 = vld [vmem:[%s1781_s25 + $0x80] sm:$0xff]  ;;  %373 = vst [vmem:[%s1786_s6 + $0x30] sm:$0xff] %v372_v10  ;;  %375 = vst [vmem:[%s1786_s6 + $0x38] sm:$0xff] %v374_v11  ;;  %v378_v13 = vld [vmem:[%s1781_s25 + $0x90] sm:$0xff] }
  0x39   : > { %377 = vst [vmem:[%s1786_s6 + $0x40] sm:$0xff] %v376_v12  ;;  %v380_v14 = vld [vmem:[%s1781_s25 + $0xa0] sm:$0xff]  ;;  %v382_v15 = vld [vmem:[%s1781_s25 + $0xb0] sm:$0xff]  ;;  %379 = vst [vmem:[%s1786_s6 + $0x48] sm:$0xff] %v378_v13 }
  0x3a   : > { %381 = vst [vmem:[%s1786_s6 + $0x50] sm:$0xff] %v380_v14  ;;  %383 = vst [vmem:[%s1786_s6 + $0x58] sm:$0xff] %v382_v15  ;;  %v384_v16 = vld [vmem:[%s1781_s25 + $0xc0] sm:$0xff]  ;;  %v386_v17 = vld [vmem:[%s1781_s25 + $0xd0] sm:$0xff] }
  0x3b   : > { %v388_v18 = vld [vmem:[%s1781_s25 + $0xe0] sm:$0xff]  ;;  %385 = vst [vmem:[%s1786_s6 + $0x60] sm:$0xff] %v384_v16  ;;  %387 = vst [vmem:[%s1786_s6 + $0x68] sm:$0xff] %v386_v17  ;;  %v390_v19 = vld [vmem:[%s1781_s25 + $0xf0] sm:$0xff] }
  0x3c   : > { %389 = vst [vmem:[%s1786_s6 + $0x70] sm:$0xff] %v388_v18  ;;  %v392_v20 = vld [vmem:[%s1781_s25 + $0x100] sm:$0xff]  ;;  %v394_v21 = vld [vmem:[%s1781_s25 + $0x110] sm:$0xff]  ;;  %391 = vst [vmem:[%s1786_s6 + $0x78] sm:$0xff] %v390_v19 }
  0x3d   : > { %393 = vst [vmem:[%s1786_s6 + $0x80] sm:$0xff] %v392_v20  ;;  %395 = vst [vmem:[%s1786_s6 + $0x88] sm:$0xff] %v394_v21  ;;  %v396_v22 = vld [vmem:[%s1781_s25 + $0x120] sm:$0xff]  ;;  %v398_v23 = vld [vmem:[%s1781_s25 + $0x130] sm:$0xff] }
  0x3e   : > { %v400_v24 = vld [vmem:[%s1781_s25 + $0x140] sm:$0xff]  ;;  %397 = vst [vmem:[%s1786_s6 + $0x90] sm:$0xff] %v396_v22  ;;  %399 = vst [vmem:[%s1786_s6 + $0x98] sm:$0xff] %v398_v23  ;;  %v402_v25 = vld [vmem:[%s1781_s25 + $0x150] sm:$0xff] }
  0x3f   : > { %401 = vst [vmem:[%s1786_s6 + $0xa0] sm:$0xff] %v400_v24  ;;  %v404_v26 = vld [vmem:[%s1781_s25 + $0x160] sm:$0xff]  ;;  %v406_v27 = vld [vmem:[%s1781_s25 + $0x170] sm:$0xff]  ;;  %403 = vst [vmem:[%s1786_s6 + $0xa8] sm:$0xff] %v402_v25 }
  0x40   : > { %405 = vst [vmem:[%s1786_s6 + $0xb0] sm:$0xff] %v404_v26  ;;  %407 = vst [vmem:[%s1786_s6 + $0xb8] sm:$0xff] %v406_v27  ;;  %v408_v28 = vld [vmem:[%s1781_s25 + $0x180] sm:$0xff]  ;;  %v410_v29 = vld [vmem:[%s1781_s25 + $0x190] sm:$0xff] }
  0x41   : > { %v412_v30 = vld [vmem:[%s1781_s25 + $0x1a0] sm:$0xff]  ;;  %409 = vst [vmem:[%s1786_s6 + $0xc0] sm:$0xff] %v408_v28  ;;  %411 = vst [vmem:[%s1786_s6 + $0xc8] sm:$0xff] %v410_v29  ;;  %v414_v31 = vld [vmem:[%s1781_s25 + $0x1b0] sm:$0xff] }
  0x42   : > { %413 = vst [vmem:[%s1786_s6 + $0xd0] sm:$0xff] %v412_v30  ;;  %v416_v32 = vld [vmem:[%s1781_s25 + $0x1c0] sm:$0xff]  ;;  %v418_v33 = vld [vmem:[%s1781_s25 + $0x1d0] sm:$0xff]  ;;  %415 = vst [vmem:[%s1786_s6 + $0xd8] sm:$0xff] %v414_v31 }
  0x43   : > { %417 = vst [vmem:[%s1786_s6 + $0xe0] sm:$0xff] %v416_v32  ;;  %419 = vst [vmem:[%s1786_s6 + $0xe8] sm:$0xff] %v418_v33  ;;  %v420_v34 = vld [vmem:[%s1781_s25 + $0x1e0] sm:$0xff]  ;;  %v422_v35 = vld [vmem:[%s1781_s25 + $0x1f0] sm:$0xff] }
  0x44   : > { %v424_v36 = vld [vmem:[%s1781_s25 + $0x200] sm:$0xff]  ;;  %421 = vst [vmem:[%s1786_s6 + $0xf0] sm:$0xff] %v420_v34  ;;  %423 = vst [vmem:[%s1786_s6 + $0xf8] sm:$0xff] %v422_v35  ;;  %v426_v37 = vld [vmem:[%s1781_s25 + $0x210] sm:$0xff] }
  0x45   : > { %425 = vst [vmem:[%s1786_s6 + $0x100] sm:$0xff] %v424_v36  ;;  %v428_v38 = vld [vmem:[%s1781_s25 + $0x220] sm:$0xff]  ;;  %v430_v39 = vld [vmem:[%s1781_s25 + $0x230] sm:$0xff]  ;;  %427 = vst [vmem:[%s1786_s6 + $0x108] sm:$0xff] %v426_v37 }
  0x46   : > { %429 = vst [vmem:[%s1786_s6 + $0x110] sm:$0xff] %v428_v38  ;;  %431 = vst [vmem:[%s1786_s6 + $0x118] sm:$0xff] %v430_v39  ;;  %v432_v40 = vld [vmem:[%s1781_s25 + $0x240] sm:$0xff]  ;;  %v434_v41 = vld [vmem:[%s1781_s25 + $0x250] sm:$0xff] }
  0x47   : > { %v436_v42 = vld [vmem:[%s1781_s25 + $0x260] sm:$0xff]  ;;  %433 = vst [vmem:[%s1786_s6 + $0x120] sm:$0xff] %v432_v40  ;;  %435 = vst [vmem:[%s1786_s6 + $0x128] sm:$0xff] %v434_v41  ;;  %v438_v43 = vld [vmem:[%s1781_s25 + $0x270] sm:$0xff] }
  0x48   : > { %437 = vst [vmem:[%s1786_s6 + $0x130] sm:$0xff] %v436_v42  ;;  %v440_v44 = vld [vmem:[%s1781_s25 + $0x280] sm:$0xff]  ;;  %v442_v45 = vld [vmem:[%s1781_s25 + $0x290] sm:$0xff]  ;;  %439 = vst [vmem:[%s1786_s6 + $0x138] sm:$0xff] %v438_v43 }
  0x49   : > { %441 = vst [vmem:[%s1786_s6 + $0x140] sm:$0xff] %v440_v44  ;;  %443 = vst [vmem:[%s1786_s6 + $0x148] sm:$0xff] %v442_v45  ;;  %v444_v46 = vld [vmem:[%s1781_s25 + $0x2a0] sm:$0xff]  ;;  %v446_v47 = vld [vmem:[%s1781_s25 + $0x2b0] sm:$0xff] }
  0x4a   : > { %v448_v48 = vld [vmem:[%s1781_s25 + $0x2c0] sm:$0xff]  ;;  %445 = vst [vmem:[%s1786_s6 + $0x150] sm:$0xff] %v444_v46  ;;  %447 = vst [vmem:[%s1786_s6 + $0x158] sm:$0xff] %v446_v47  ;;  %v450_v49 = vld [vmem:[%s1781_s25 + $0x2d0] sm:$0xff] }
  0x4b   : > { %449 = vst [vmem:[%s1786_s6 + $0x160] sm:$0xff] %v448_v48  ;;  %v452_v50 = vld [vmem:[%s1781_s25 + $0x2e0] sm:$0xff]  ;;  %v454_v51 = vld [vmem:[%s1781_s25 + $0x2f0] sm:$0xff]  ;;  %451 = vst [vmem:[%s1786_s6 + $0x168] sm:$0xff] %v450_v49 }
  0x4c   : > { %453 = vst [vmem:[%s1786_s6 + $0x170] sm:$0xff] %v452_v50  ;;  %455 = vst [vmem:[%s1786_s6 + $0x178] sm:$0xff] %v454_v51  ;;  %v456_v52 = vld [vmem:[%s1781_s25 + $0x300] sm:$0xff]  ;;  %v458_v53 = vld [vmem:[%s1781_s25 + $0x310] sm:$0xff] }
  0x4d   : > { %v460_v54 = vld [vmem:[%s1781_s25 + $0x320] sm:$0xff]  ;;  %457 = vst [vmem:[%s1786_s6 + $0x180] sm:$0xff] %v456_v52  ;;  %459 = vst [vmem:[%s1786_s6 + $0x188] sm:$0xff] %v458_v53  ;;  %v462_v55 = vld [vmem:[%s1781_s25 + $0x330] sm:$0xff] }
  0x4e   : > { %461 = vst [vmem:[%s1786_s6 + $0x190] sm:$0xff] %v460_v54  ;;  %v464_v56 = vld [vmem:[%s1781_s25 + $0x340] sm:$0xff]  ;;  %v466_v57 = vld [vmem:[%s1781_s25 + $0x350] sm:$0xff]  ;;  %463 = vst [vmem:[%s1786_s6 + $0x198] sm:$0xff] %v462_v55 }
  0x4f   : > { %465 = vst [vmem:[%s1786_s6 + $0x1a0] sm:$0xff] %v464_v56  ;;  %467 = vst [vmem:[%s1786_s6 + $0x1a8] sm:$0xff] %v466_v57  ;;  %v468_v58 = vld [vmem:[%s1781_s25 + $0x360] sm:$0xff]  ;;  %v470_v59 = vld [vmem:[%s1781_s25 + $0x370] sm:$0xff] }
  0x50   : > { %v472_v60 = vld [vmem:[%s1781_s25 + $0x380] sm:$0xff]  ;;  %469 = vst [vmem:[%s1786_s6 + $0x1b0] sm:$0xff] %v468_v58  ;;  %471 = vst [vmem:[%s1786_s6 + $0x1b8] sm:$0xff] %v470_v59  ;;  %v474_v61 = vld [vmem:[%s1781_s25 + $0x390] sm:$0xff] }
  0x51   : > { %473 = vst [vmem:[%s1786_s6 + $0x1c0] sm:$0xff] %v472_v60  ;;  %v476_v62 = vld [vmem:[%s1781_s25 + $0x3a0] sm:$0xff]  ;;  %v478_v63 = vld [vmem:[%s1781_s25 + $0x3b0] sm:$0xff]  ;;  %475 = vst [vmem:[%s1786_s6 + $0x1c8] sm:$0xff] %v474_v61 }
  0x52   : > { %477 = vst [vmem:[%s1786_s6 + $0x1d0] sm:$0xff] %v476_v62  ;;  %479 = vst [vmem:[%s1786_s6 + $0x1d8] sm:$0xff] %v478_v63  ;;  %v480_v0 = vld [vmem:[%s1781_s25 + $0x3c0] sm:$0xff]  ;;  %v482_v1 = vld [vmem:[%s1781_s25 + $0x3d0] sm:$0xff] }
  0x53   : > { %v484_v2 = vld [vmem:[%s1781_s25 + $0x3e0] sm:$0xff]  ;;  %481 = vst [vmem:[%s1786_s6 + $0x1e0] sm:$0xff] %v480_v0  ;;  %483 = vst [vmem:[%s1786_s6 + $0x1e8] sm:$0xff] %v482_v1  ;;  %v486_v3 = vld [vmem:[%s1781_s25 + $0x3f0] sm:$0xff] }
  0x54   : > { %485 = vst [vmem:[%s1786_s6 + $0x1f0] sm:$0xff] %v484_v2  ;;  %487 = vst [vmem:[%s1786_s6 + $0x1f8] sm:$0xff] %v486_v3 }
  0x55 PF: > { %p1280_p0 = scmp.ge.s32.totalorder %s1644_s22, 1  ;;  %p500_p1 = scmp.lt.s32.totalorder %s1644_s22, 19 }
  0x57   : > { %p501_p2 = pnand %p1280_p0, %p500_p1 }
  0x58   : > { %s507_s0 = sand.u32 (!%p501_p2), 1, %s1620_s16   ;;  %s514_s5 = sand.u32 (!%p501_p2), 1, %s1612_s14  }
  0x59   : > { %504 = sbr.rel (%p501_p2) target bundleno = 397 (0x18d), region = 85  ;;  %s1281_s23 = sshll.u32 (!%p501_p2), %s507_s0, 5 }
  0x5a   : > { %s1282_s28 = sshll.u32 (!%p501_p2), %s514_s5, 9  ;;  %s541_s7 = sand.u32 (!%p501_p2), 1, %s1604_s12  }
  0x5b   : > { %s1284_s11 = sshll.u32 (!%p501_p2), %s1632_s19, 1  ;;  %s1283_s25 = sshll.u32 (!%p501_p2), %s541_s7, 4 }
  0x5c   : > { %p549_p3 = scmp.lt.s32.totalorder (!%p501_p2), %s1284_s11, 3  ;;  %s1925_s27 = scalar_lea.vmem (!%p501_p2), [#allocation3], %s1281_s23 }
  0x5d   : > { %s1927_s6 = scalar_lea.vmem (!%p501_p2), [#allocation4], %s1282_s28  ;;  %s1929_s1 = scalar_lea.vmem (!%p501_p2), [#allocation5], %s1283_s25 }
  0x5e   : > { %s2080_s11 = smov (!%p549_p3, %s1284_s11), 3  ;;  %p1285_p4 = scmp.ne.s32.totalorder %s1628_s18, 0 }
  0x5f   : > { %s551_s4 = scalar_lea.vmem %s2051_s2, %s2080_s11 }
  0x60   : > { %558 = sbr.rel (%p1285_p4) target bundleno = 104 (0x68), region = 97 }
  0x65   : > { %v1646_v4 = vmov 0.0  }
  0x66   : > { %559 = vst [vmem:[#allocation2 + $0x10] sm:$0xff] %v1646_v4  ;;  %560 = vst [vmem:[#allocation2] sm:$0xff] %v1646_v4 }
  0x67   : > { %561 = vst [vmem:[#allocation2 + $0x18] sm:$0xff] %v1646_v4  ;;  %562 = vst [vmem:[#allocation2 + $0x8] sm:$0xff] %v1646_v4 }
  0x68 PF: > { %v1456_v5 = vld [vmem:[%s1927_s6 + $0x74] ss:$8 sps:$4 sm:$0xff]   ;;  %v1460_v7 = vld [vmem:[%s1927_s6 + $0x70] ss:$8 sps:$4 sm:$0xff]   ;;  %v1462_v9 = vld [vmem:[%s1927_s6 + $0x64] ss:$8 sps:$4 sm:$0xff]  }
  0x69   : > { %v1458_v6 = vld [vmem:[%s1927_s6 + $0x174] ss:$8 sps:$4 sm:$0xff]   ;;  %975 = vmatprep.subr.bf16.mxu0 %v1456_v5  ;;  %v1461_v8 = vld [vmem:[%s1927_s6 + $0x170] ss:$8 sps:$4 sm:$0xff]   ;;  %v1464_v10 = vld [vmem:[%s1927_s6 + $0x164] ss:$8 sps:$4 sm:$0xff]  }
  0x6a   : > { %1018 = vmatprep.subr.bf16.mxu1 %v1458_v6  ;;  %976 = vmatpush1.bf16.msra.mxu0 %v1460_v7  ;;  %v1466_v11 = vld [vmem:[%s1927_s6 + $0x60] ss:$8 sps:$4 sm:$0xff]   ;;  %v1468_v13 = vld [vmem:[%s1927_s6 + $0x54] ss:$8 sps:$4 sm:$0xff]   ;;  %v1472_v15 = vld [vmem:[%s1927_s6 + $0x50] ss:$8 sps:$4 sm:$0xff]  }
  0x6b   : > { %1019 = vmatpush1.bf16.msra.mxu1 %v1461_v8  ;;  %977 = vmatprep.subr.bf16.mxu0 %v1462_v9  ;;  %v1467_v12 = vld [vmem:[%s1927_s6 + $0x160] ss:$8 sps:$4 sm:$0xff]   ;;  %v1470_v14 = vld [vmem:[%s1927_s6 + $0x154] ss:$8 sps:$4 sm:$0xff]   ;;  %v1473_v16 = vld [vmem:[%s1927_s6 + $0x150] ss:$8 sps:$4 sm:$0xff]  }
  0x6c   : > { %1020 = vmatprep.subr.bf16.mxu1 %v1464_v10  ;;  %v1474_v17 = vld [vmem:[%s1927_s6 + $0x44] ss:$8 sps:$4 sm:$0xff]   ;;  %v1478_v19 = vld [vmem:[%s1927_s6 + $0x40] ss:$8 sps:$4 sm:$0xff]   ;;  %v1480_v21 = vld [vmem:[%s1927_s6 + $0x34] ss:$8 sps:$4 sm:$0xff]  }
  0x6d   : > { %v1476_v18 = vld [vmem:[%s1927_s6 + $0x144] ss:$8 sps:$4 sm:$0xff]   ;;  %v1479_v20 = vld [vmem:[%s1927_s6 + $0x140] ss:$8 sps:$4 sm:$0xff]   ;;  %v1482_v22 = vld [vmem:[%s1927_s6 + $0x134] ss:$8 sps:$4 sm:$0xff]  }
  0x6e   : > { %978 = vmatpush1.bf16.msra.mxu0 %v1466_v11  ;;  %v1484_v23 = vld [vmem:[%s1927_s6 + $0x30] ss:$8 sps:$4 sm:$0xff]   ;;  %v1486_v25 = vld [vmem:[%s1927_s6 + $0x24] ss:$8 sps:$4 sm:$0xff]   ;;  %v1490_v27 = vld [vmem:[%s1927_s6 + $0x20] ss:$8 sps:$4 sm:$0xff]  }
  0x6f   : > { %1021 = vmatpush1.bf16.msra.mxu1 %v1467_v12  ;;  %979 = vmatprep.subr.bf16.mxu0 %v1468_v13  ;;  %v1485_v24 = vld [vmem:[%s1927_s6 + $0x130] ss:$8 sps:$4 sm:$0xff]   ;;  %v1488_v26 = vld [vmem:[%s1927_s6 + $0x124] ss:$8 sps:$4 sm:$0xff]   ;;  %v1491_v28 = vld [vmem:[%s1927_s6 + $0x120] ss:$8 sps:$4 sm:$0xff]  }
  0x70   : > { %1022 = vmatprep.subr.bf16.mxu1 %v1470_v14  ;;  %v1492_v29 = vld [vmem:[%s1927_s6 + $0x14] ss:$8 sps:$4 sm:$0xff]   ;;  %v1496_v31 = vld [vmem:[%s1927_s6 + $0x10] ss:$8 sps:$4 sm:$0xff]   ;;  %v1498_v33 = vld [vmem:[%s1927_s6 + $0x4] ss:$8 sps:$4 sm:$0xff]  }
  0x71   : > { %v1494_v30 = vld [vmem:[%s1927_s6 + $0x114] ss:$8 sps:$4 sm:$0xff]   ;;  %v1497_v32 = vld [vmem:[%s1927_s6 + $0x110] ss:$8 sps:$4 sm:$0xff]   ;;  %v1500_v34 = vld [vmem:[%s1927_s6 + $0x104] ss:$8 sps:$4 sm:$0xff]  }
  0x72   : > { %980 = vmatpush1.bf16.msra.mxu0 %v1472_v15  ;;  %v1502_v35 = vld [vmem:[%s1927_s6] ss:$8 sps:$4 sm:$0xff]   ;;  %v1504_v37 = vld [vmem:[%s1927_s6 + $0xf4] ss:$8 sps:$4 sm:$0xff]   ;;  %v1508_v39 = vld [vmem:[%s1927_s6 + $0xf0] ss:$8 sps:$4 sm:$0xff]  }
  0x73   : > { %1023 = vmatpush1.bf16.msra.mxu1 %v1473_v16  ;;  %981 = vmatprep.subr.bf16.mxu0 %v1474_v17  ;;  %v1503_v36 = vld [vmem:[%s1927_s6 + $0x100] ss:$8 sps:$4 sm:$0xff]   ;;  %v1506_v38 = vld [vmem:[%s1927_s6 + $0x1f4] ss:$8 sps:$4 sm:$0xff]   ;;  %v1509_v40 = vld [vmem:[%s1927_s6 + $0x1f0] ss:$8 sps:$4 sm:$0xff]  }
  0x74   : > { %1024 = vmatprep.subr.bf16.mxu1 %v1476_v18  ;;  %v1510_v41 = vld [vmem:[%s1927_s6 + $0xe4] ss:$8 sps:$4 sm:$0xff]   ;;  %v1514_v43 = vld [vmem:[%s1927_s6 + $0xe0] ss:$8 sps:$4 sm:$0xff]   ;;  %v1516_v45 = vld [vmem:[%s1927_s6 + $0xd4] ss:$8 sps:$4 sm:$0xff]  }
  0x75   : > { %v1512_v42 = vld [vmem:[%s1927_s6 + $0x1e4] ss:$8 sps:$4 sm:$0xff]   ;;  %v1515_v44 = vld [vmem:[%s1927_s6 + $0x1e0] ss:$8 sps:$4 sm:$0xff]   ;;  %v1518_v46 = vld [vmem:[%s1927_s6 + $0x1d4] ss:$8 sps:$4 sm:$0xff]  }
  0x76   : > { %982 = vmatpush1.bf16.msra.mxu0 %v1478_v19  ;;  %v1520_v47 = vld [vmem:[%s1927_s6 + $0xd0] ss:$8 sps:$4 sm:$0xff]   ;;  %v1522_v49 = vld [vmem:[%s1927_s6 + $0xc4] ss:$8 sps:$4 sm:$0xff]   ;;  %v1526_v51 = vld [vmem:[%s1927_s6 + $0xc0] ss:$8 sps:$4 sm:$0xff]  }
  0x77   : > { %1025 = vmatpush1.bf16.msra.mxu1 %v1479_v20  ;;  %983 = vmatprep.subr.bf16.mxu0 %v1480_v21  ;;  %v1521_v48 = vld [vmem:[%s1927_s6 + $0x1d0] ss:$8 sps:$4 sm:$0xff]   ;;  %v1524_v50 = vld [vmem:[%s1927_s6 + $0x1c4] ss:$8 sps:$4 sm:$0xff]   ;;  %v1527_v53 = vld [vmem:[%s1927_s6 + $0x1c0] ss:$8 sps:$4 sm:$0xff]  }
  0x78   : > { %1026 = vmatprep.subr.bf16.mxu1 %v1482_v22  ;;  %v1554_v52 = vld [vmem:[%s1925_s27 + $0x4] ss:$16 sps:$4 sm:$0xff]   ;;  %v1557_v56 = vld [vmem:[%s1925_s27 + $0xc] ss:$16 sps:$4 sm:$0xff]   ;;  %v1532_v57 = vld [vmem:[%s1927_s6 + $0xb0] ss:$8 sps:$4 sm:$0xff]  }
  0x79   : > { %v1528_v54 = vld [vmem:[%s1927_s6 + $0xb4] ss:$8 sps:$4 sm:$0xff]   ;;  %1007 = vmatprep.mubr.bf16.mxu0 %v1554_v52  ;;  %1050 = vmatprep.mubr.bf16.mxu1 %v1557_v56  ;;  %v1533_v58 = vld [vmem:[%s1927_s6 + $0x1b0] ss:$8 sps:$4 sm:$0xff]   ;;  %v1534_v59 = vld [vmem:[%s1927_s6 + $0xa4] ss:$8 sps:$4 sm:$0xff]  }
  0x7a   : > { %984 = vmatpush1.bf16.msra.mxu0 %v1484_v23  ;;  %v1530_v55 = vld [vmem:[%s1927_s6 + $0x1b4] ss:$8 sps:$4 sm:$0xff]   ;;  %v1536_v60 = vld [vmem:[%s1927_s6 + $0x1a4] ss:$8 sps:$4 sm:$0xff]   ;;  %v1538_v61 = vld [vmem:[%s1927_s6 + $0xa0] ss:$8 sps:$4 sm:$0xff]  }
  0x7b   : > { %1027 = vmatpush1.bf16.msra.mxu1 %v1485_v24  ;;  %985 = vmatprep.subr.bf16.mxu0 %v1486_v25  ;;  %v1539_v62 = vld [vmem:[%s1927_s6 + $0x1a0] ss:$8 sps:$4 sm:$0xff]   ;;  %v1540_v63 = vld [vmem:[%s1927_s6 + $0x94] ss:$8 sps:$4 sm:$0xff]   ;;  %v1544_v1 = vld [vmem:[%s1927_s6 + $0x90] ss:$8 sps:$4 sm:$0xff]  }
  0x7c   : > { %1028 = vmatprep.subr.bf16.mxu1 %v1488_v26  ;;  %v1542_v0 = vld [vmem:[%s1927_s6 + $0x194] ss:$8 sps:$4 sm:$0xff]   ;;  %v1545_v2 = vld [vmem:[%s1927_s6 + $0x190] ss:$8 sps:$4 sm:$0xff]   ;;  %v1546_v3 = vld [vmem:[%s1927_s6 + $0x84] ss:$8 sps:$4 sm:$0xff]  }
  0x7d   : > { %v1548_v4 = vld [vmem:[%s1927_s6 + $0x184] ss:$8 sps:$4 sm:$0xff]   ;;  %v1550_v5 = vld [vmem:[%s1927_s6 + $0x80] ss:$8 sps:$4 sm:$0xff]   ;;  %v563_v10 = vld [vmem:[#allocation2 + $0x10] sm:$0xff]  ;;  %p1354_p5 = scmp.ne.s32.totalorder %s1628_s18, 8 }
  0x7e   : > { %986 = vmatpush1.bf16.msra.mxu0 %v1490_v27  ;;  %v1551_v6 = vld [vmem:[%s1927_s6 + $0x180] ss:$8 sps:$4 sm:$0xff]   ;;  %v565_v19 = vld [vmem:[#allocation2 + $0x18] sm:$0xff] }
  0x7f   : > { %1029 = vmatpush1.bf16.msra.mxu1 %v1491_v28  ;;  %987 = vmatprep.subr.bf16.mxu0 %v1492_v29  ;;  %v1552_v7 = vld [vmem:[%s1925_s27] ss:$16 sps:$4 sm:$0xff]   ;;  %v1555_v8 = vld [vmem:[%s1925_s27 + $0x8] ss:$16 sps:$4 sm:$0xff]  }
  0x80   : > { %1030 = vmatprep.subr.bf16.mxu1 %v1494_v30  ;;  %v564_v14 = vld [vmem:[#allocation2] sm:$0xff]  ;;  %v566_v24 = vld [vmem:[#allocation2 + $0x8] sm:$0xff] }
  0x82   : > { %988 = vmatpush1.bf16.msra.mxu0 %v1496_v31 }
  0x83   : > { %1031 = vmatpush1.bf16.msra.mxu1 %v1497_v32  ;;  %989 = vmatprep.subr.bf16.mxu0 %v1498_v33 }
  0x84   : > { %1032 = vmatprep.subr.bf16.mxu1 %v1500_v34 }
  0x86   : > { %990 = vmatpush1.bf16.msra.mxu0 %v1502_v35 }
  0x87   : > { %1033 = vmatpush1.bf16.msra.mxu1 %v1503_v36  ;;  %991 = vmatprep.subr.bf16.mxu0 %v1504_v37 }
  0x88   : > { %1034 = vmatprep.subr.bf16.mxu1 %v1506_v38 }
  0x8a   : > { %992 = vmatpush2.bf16.msra.mxu0 %v1508_v39 }
  0x8b   : > { %1035 = vmatpush2.bf16.msra.mxu1 %v1509_v40  ;;  %993 = vmatprep.subr.bf16.mxu0 %v1510_v41 }
  0x8c   : > { %1036 = vmatprep.subr.bf16.mxu1 %v1512_v42 }
  0x8e   : > { %994 = vmatpush2.bf16.msra.mxu0 %v1514_v43 }
  0x8f   : > { %1037 = vmatpush2.bf16.msra.mxu1 %v1515_v44  ;;  %995 = vmatprep.subr.bf16.mxu0 %v1516_v45 }
  0x90   : > { %1038 = vmatprep.subr.bf16.mxu1 %v1518_v46 }
  0x92   : > { %996 = vmatpush2.bf16.msra.mxu0 %v1520_v47 }
  0x93   : > { %1039 = vmatpush2.bf16.msra.mxu1 %v1521_v48  ;;  %997 = vmatprep.subr.bf16.mxu0 %v1522_v49 }
  0x94   : > { %1040 = vmatprep.subr.bf16.mxu1 %v1524_v50 }
  0x96   : > { %998 = vmatpush2.bf16.msra.mxu0 %v1526_v51 }
  0x97   : > { %1041 = vmatpush2.bf16.msra.mxu1 %v1527_v53  ;;  %999 = vmatprep.subr.bf16.mxu0 %v1528_v54 }
  0x98   : > { %1042 = vmatprep.subr.bf16.mxu1 %v1530_v55 }
  0x9a   : > { %1000 = vmatpush2.bf16.msra.mxu0 %v1532_v57 }
  0x9b   : > { %1043 = vmatpush2.bf16.msra.mxu1 %v1533_v58  ;;  %1001 = vmatprep.subr.bf16.mxu0 %v1534_v59 }
  0x9c   : > { %1044 = vmatprep.subr.bf16.mxu1 %v1536_v60 }
  0x9e   : > { %1002 = vmatpush2.bf16.msra.mxu0 %v1538_v61 }
  0x9f   : > { %1045 = vmatpush2.bf16.msra.mxu1 %v1539_v62  ;;  %1003 = vmatprep.subr.bf16.mxu0 %v1540_v63 }
  0xa0   : > { %1046 = vmatprep.subr.bf16.mxu1 %v1542_v0 }
  0xa2   : > { %1004 = vmatpush2.bf16.msra.mxu0 %v1544_v1 }
  0xa3   : > { %1047 = vmatpush2.bf16.msra.mxu1 %v1545_v2  ;;  %1005 = vmatprep.subr.bf16.mxu0 %v1546_v3 }
  0xa4   : > { %1048 = vmatprep.subr.bf16.mxu1 %v1548_v4 }
  0xa6   : > { %1006 = vmatpush2.bf16.msra.mxu0 %v1550_v5 }
  0xa7   : > { %1049 = vmatpush2.bf16.msra.mxu1 %v1551_v6 }
  0xa9   : > { %1008 = vmatmul.mubr.bf16.vlgmr.msra.gmra.mxu0 %v1552_v7 }
  0xaa   : > { %1051 = vmatmul.mubr.bf16.vlgmr.msra.gmra.mxu1 %v1555_v8 }
 0x169   : > { %v1009_v9 = vpop.f32.mrf.mxu0 }
 0x16a   : > { %v1052_v11 = vpop.f32.mrf.mxu1 }
 0x16b   : > { %v1053_v12 = vadd.f32 %v1052_v11, %v1009_v9  ;;  %v1011_v13 = vpop.f32.mrf.mxu0 }
 0x16c   : > { %v1054_v15 = vpop.f32.mrf.mxu1 }
 0x16d   : > { %v1061_v16 = vadd.f32 %v1053_v12, %v563_v10  ;;  %v1055_v17 = vadd.f32 %v1054_v15, %v1011_v13  ;;  %v1013_v18 = vpop.f32.mrf.mxu0 }
 0x16e   : > { %v1056_v20 = vpop.f32.mrf.mxu1 }
 0x16f   : > { %1065 = vst [vmem:[#allocation2 + $0x10] sm:$0xff] %v1061_v16  ;;  %v1062_v21 = vadd.f32 %v1055_v17, %v564_v14  ;;  %v1057_v22 = vadd.f32 %v1056_v20, %v1013_v18  ;;  %v1015_v23 = vpop.f32.mrf.mxu0 }
 0x170   : > { %v1058_v25 = vpop.f32.mrf.mxu1 }
 0x171   : > { %1066 = vst [vmem:[#allocation2] sm:$0xff] %v1062_v21  ;;  %v1063_v26 = vadd.f32 %v1057_v22, %v565_v19  ;;  %v1059_v27 = vadd.f32 %v1058_v25, %v1015_v23  ;;  %1072 = sbr.rel (%p1354_p5) target bundleno = 389 (0x185), region = 101 }
 0x173   : > { %1067 = vst [vmem:[#allocation2 + $0x18] sm:$0xff] %v1063_v26  ;;  %v1064_v28 = vadd.f32 %v1059_v27, %v566_v24 }
 0x175   : > { %1068 = vst [vmem:[#allocation2 + $0x8] sm:$0xff] %v1064_v28 }
 0x176   : > { %v1079_v29 = vlaneseq  ;;  %v1077_v31 = vld [vmem:[%s551_s4] sm:$0x3]  ;;  %v1073_v32 = vld [vmem:[#allocation2 + $0x10] sm:$0xff] }
 0x178   : > { %v1080_v30 = vshrl.u32 %v1079_v29, 7  ;;  %v1074_v35 = vld [vmem:[#allocation2] sm:$0xff] }
 0x17a   : > { %v1081_v33 = vsub.s32 0, %v1080_v30  ;;  %v1085_v34 = vsub.s32 1, %v1080_v30  ;;  %v1075_v36 = vld [vmem:[#allocation2 + $0x18] sm:$0xff] }
 0x17c   : > { %v1076_v37 = vld [vmem:[#allocation2 + $0x8] sm:$0xff]  ;;  %v1082_v38 = vrot.slane %v1077_v31, %v1081_v33  ;;  %v1086_v39 = vrot.slane %v1077_v31, %v1085_v34 }
 0x17e   : > { %v1089_v40 = vadd.f32 %v1082_v38, %v1073_v32  ;;  %v1090_v41 = vadd.f32 %v1086_v39, %v1074_v35  ;;  %v1091_v42 = vadd.f32 %v1082_v38, %v1075_v36  ;;  %v1092_v43 = vadd.f32 %v1086_v39, %v1076_v37 }
 0x180   : > { %v1093_v44 = vmax.f32 %v1089_v40, 0.0  ;;  %v1094_v45 = vmax.f32 %v1090_v41, 0.0  ;;  %v1095_v46 = vmax.f32 %v1091_v42, 0.0  ;;  %v1096_v47 = vmax.f32 %v1092_v43, 0.0 }
 0x182   : > { %v1364_v48 = vpack.c.bf16 %v1094_v45, %v1093_v44  ;;  %v1365_v49 = vpack.c.bf16 %v1096_v47, %v1095_v46 }
 0x184   : > { %1109 = vst [vmem:[%s1929_s1] sm:$0xff] %v1364_v48  ;;  %1110 = vst [vmem:[%s1929_s1 + $0x8] sm:$0xff] %v1365_v49 }
 0x185 PF: > { %1117 = sbr.rel (!%p1761_p12) target bundleno = 397 (0x18d), region = 105  ;;  %s1366_s16 = sshll.u32 (%p1761_p12), %s1632_s19, 3 }
 0x186   : > { %s1123_s5 = scalar_lea.vmem (%p1761_p12), %s2052_s3, %s1366_s16 }
 0x18b   : > { %v1154_v50 = vld [vmem:[%s1929_s1] sm:$0xff]  ;;  %v1156_v51 = vld [vmem:[%s1929_s1 + $0x8] sm:$0xff] }
 0x18c   : > { %1155 = vst [vmem:[%s1123_s5] sm:$0xff] %v1154_v50  ;;  %1157 = vst [vmem:[%s1123_s5 + $0x10] sm:$0xff] %v1156_v51 }
 0x18d PF: > { %s13_s22 = sadd.s32 1, %s1644_s22   ;;  %s2062_s1 = sld [smem:[#allocation6_spill]] }
 0x18e   : > { %p10_p6 = scmp.ge.s32.totalorder %s13_s22, 20   ;;  %s2063_s12 = smov %s1608_s13 }
 0x18f   : > { %s2064_s13 = smov %s1759_s9  ;;  %s2065_s14 = smov %s1616_s15 }
 0x190   : > { %s2066_s15 = smov %s1756_s8  ;;  %s2067_s16 = smov %s1624_s17 }
 0x191   : > { %s2068_s17 = smov %s1742_s30  ;;  %s2069_s18 = smov %s1636_s20 }
 0x192   : > { %s2070_s19 = smov %s1640_s21  ;;  %s2071_s20 = smov %s2074_s24 }
 0x193   : > { %s2072_s21 = smov %s2062_s1  ;;  %12 = sbr.rel (!%p10_p6) target bundleno = 9 (0x9), region = 185 }

// kernel: multi_task_net_forward.32
= control target key start
LH: loop header
LB: loop body
LE: loop exit
PB: predicated region body
PF: predicated region fallthrough
CT: control target
= control target key end

     0   :  { %s2905_s0 = inlined_call_operand.vmem [shape: bf16[16,4608], index: 0, kind: input, shape index: {}]   ;;  %s2906_s1 = inlined_call_operand.vmem [shape: bf16[4608,512], index: 1, kind: input, shape index: {}]   ;;  %s2907_s2 = inlined_call_operand.vmem [shape: f32[1,512], index: 2, kind: input, shape index: {}]   ;;  %s2908_s3 = inlined_call_operand.vmem [shape: bf16[16,256], index: 3, kind: input, shape index: {}]   ;;  %s2909_s4 = inlined_call_operand.vmem [shape: bf16[256,512], index: 4, kind: input, shape index: {}]   ;;  %s2910_s5 = inlined_call_operand.vmem [shape: f32[1,512], index: 5, kind: input, shape index: {}]   ;;  %s2911_s6 = inlined_call_operand.vmem [shape: bf16[16,512], index: 6, kind: output, shape index: {}]  }
   0x1   :  { %2915 = sst [smem:[#allocation12_spill]] %s2905_s0 }
   0x2   :  { %s2389_s21 = smov 0   ;;  %s2391_s22 = smov 0  }
   0x3   :  { %s2393_s23 = smov 0   ;;  %s2395_s24 = smov 0  }
   0x4   :  { %s2397_s25 = smov 0   ;;  %s2399_s26 = smov 0  }
   0x5   :  { %s2401_s27 = smov 0   ;;  %s2403_s28 = smov 0  }
   0x6   :  { %s2405_s29 = smov 0   ;;  %s2407_s30 = smov 0  }
   0x7   :  { %s2409_s7 = smov 0  }
   0x8 LB: > { %2916 = sst [smem:[#allocation7_spill]] %s2331_s26  ;;  %s1883_s8 = sadd.s32 4294967295, %s2351_s7   ;;  %s2351_s7 = sphi %s2409_s7, %s16_s7   ;;  %s2347_s30 = sphi %s2407_s30, %s2938_s30   ;;  %s2343_s29 = sphi %s2405_s29, %s2937_s29   ;;  %s2339_s28 = sphi %s2403_s28, %s2936_s28   ;;  %s2335_s27 = sphi %s2401_s27, %s2935_s27   ;;  %s2331_s26 = sphi %s2399_s26, %s2928_s26   ;;  %s2327_s25 = sphi %s2397_s25, %s2927_s25   ;;  %s2323_s24 = sphi %s2395_s24, %s2934_s24   ;;  %s2319_s23 = sphi %s2393_s23, %s2933_s23   ;;  %s2315_s22 = sphi %s2391_s22, %s2932_s22   ;;  %s2311_s21 = sphi %s2389_s21, %s2931_s21  }
   0x9   : > { %s28_s9 = sadd.s32 1, %s2343_s29  ;;  %s31_s10 = sadd.s32 1, %s2347_s30 }
   0xa   : > { %p29_p0 = scmp.ge.s32.totalorder %s28_s9, 9  ;;  %s44_s11 = sadd.s32 1, %s2331_s26 }
   0xb   : > { %p51_p1 = scmp.ne.s32.totalorder %s2331_s26, %s2327_s25  ;;  %p52_p2 = scmp.eq.s32.totalorder %s2351_s7, 0 }
   0xc   : > { %s2940_s9 = smov (%p29_p0, %s28_s9), 0  ;;  %s2942_s10 = smov (!%p29_p0, %s31_s10), %s2347_s30 }
   0xd   : > { %2917 = sst [smem:[#allocation8_spill]] %s2940_s9  ;;  %s40_s12 = ssub.s32 %s2343_s29, %s2940_s9 }
   0xe   : > { %p33_p3 = scmp.ge.s32.totalorder %s2942_s10, 2  ;;  %p42_p4 = scmp.eq.s32.totalorder %s40_s12, 0 }
   0xf   : > { %p2458_p5 = por %p52_p2, %p51_p1  ;;  %s72_s14 = sadd.s32 1, %s2323_s24 }
  0x10   : > { %s2944_s10 = smov (%p33_p3, %s2942_s10), 0  ;;  %p79_p6 = scmp.ne.s32.totalorder %s2323_s24, %s2319_s23 }
  0x11   : > { %2919 = sst [smem:[#allocation9_spill]] %s2944_s10  ;;  %s68_s16 = ssub.s32 %s2347_s30, %s2944_s10 }
  0x12   : > { %s2466_s15 = scalar_select %p42_p4, %s2331_s26, %s44_s11  }
  0x13   : > { %s69_s17 = sor.u32 %s68_s16, %s40_s12  ;;  %p148_p7 = scmp.eq.s32.totalorder %s68_s16, 0 }
  0x14   : > { %2920 = sst [smem:[#allocation10_spill]] %s2466_s15  ;;  %p70_p8 = scmp.eq.s32.totalorder %s69_s17, 0 }
  0x15   : > { %p2474_p9 = por %p79_p6, %p52_p2  ;;  %s150_s19 = sadd.s32 1, %s2315_s22 }
  0x16   : > { %p157_p10 = scmp.ne.s32.totalorder %s2315_s22, %s2311_s21  ;;  %p215_p12 = scmp.eq.s32.totalorder %s1883_s8, 17 }
  0x17   : > { %s2482_s20 = scalar_select %p70_p8, %s2323_s24, %s72_s14  }
  0x18   : > { %s2485_s9 = scalar_select %p148_p7, %s2315_s22, %s150_s19  }
  0x19   : > { %2922 = sst [smem:[#allocation11_spill]] %s2482_s20  ;;  %p2489_p11 = por %p157_p10, %p52_p2 }
  0x1a   : > { %p2493_p13 = por %p215_p12, %p157_p10  ;;  %p1887_p0 = scmp.ge.s32.totalorder %s2351_s7, 18 }
  0x1c   : > { %247 = sbr.rel (%p1887_p0) target bundleno = 104 (0x68), region = 20 }
  0x21   : > { %250 = sbr.rel (!%p2458_p5) target bundleno = 45 (0x2d), region = 24  ;;  %s252_s14 = sand.u32 (%p2458_p5), 1, %s2331_s26  }
  0x22   : > { %s2017_s16 = sshll.u32 (%p2458_p5), %s2343_s29, 4  ;;  %s1888_s17 = sshll.u32 (%p2458_p5), %s252_s14, 5 }
  0x23   : > { %s2925_s0 = sld [smem:[#allocation12_spill]] (%p2458_p5)  ;;  %s254_s8 = scalar_lea.vmem (%p2458_p5), [#allocation3], %s1888_s17 }
  0x29   : > { %s260_s15 = scalar_lea.vmem %s2925_s0, %s2017_s16 }
  0x2a   : > { %v273_v0 = vld [vmem:[%s260_s15] sm:$0xff]  ;;  %v275_v1 = vld [vmem:[%s260_s15 + $0x8] sm:$0xff]  ;;  %v277_v2 = vld [vmem:[%s260_s15 + $0x90] sm:$0xff] }
  0x2b   : > { %274 = vst [vmem:[%s254_s8] sm:$0xff] %v273_v0  ;;  %276 = vst [vmem:[%s254_s8 + $0x8] sm:$0xff] %v275_v1  ;;  %v279_v3 = vld [vmem:[%s260_s15 + $0x98] sm:$0xff] }
  0x2c   : > { %278 = vst [vmem:[%s254_s8 + $0x10] sm:$0xff] %v277_v2  ;;  %280 = vst [vmem:[%s254_s8 + $0x18] sm:$0xff] %v279_v3 }
  0x2d PF: > { %286 = sbr.rel (!%p2474_p9) target bundleno = 84 (0x54), region = 47  ;;  %s288_s13 = sand.u32 (%p2474_p9), 1, %s2323_s24  }
  0x2e   : > { %s1893_s14 = sshll.u32 (%p2474_p9), %s2347_s30, 1  ;;  %s1891_s10 = sshll.u32 (%p2474_p9), %s288_s13, 9 }
  0x2f   : > { %s2018_s16 = sshll.u32 (%p2474_p9), %s2343_s29, 8  ;;  %s2518_s15 = scalar_lea.vmem (%p2474_p9), [#allocation4], %s1891_s10 }
  0x30   : > { %s294_s19 = sadd.s32 (%p2474_p9), %s2018_s16, %s1893_s14 }
  0x31   : > { %s1895_s0 = sshll.u32 (%p2474_p9), %s294_s19, 2 }
  0x32   : > { %s2513_s20 = scalar_lea.vmem %s2906_s1, %s1895_s0 }
  0x33   : > { %v451_v4 = vld [vmem:[%s2513_s20] sm:$0xff]  ;;  %v453_v5 = vld [vmem:[%s2513_s20 + $0x10] sm:$0xff] }
  0x34   : > { %v455_v6 = vld [vmem:[%s2513_s20 + $0x20] sm:$0xff]  ;;  %452 = vst [vmem:[%s2518_s15] sm:$0xff] %v451_v4  ;;  %454 = vst [vmem:[%s2518_s15 + $0x8] sm:$0xff] %v453_v5  ;;  %v457_v7 = vld [vmem:[%s2513_s20 + $0x30] sm:$0xff] }
  0x35   : > { %456 = vst [vmem:[%s2518_s15 + $0x10] sm:$0xff] %v455_v6  ;;  %v459_v8 = vld [vmem:[%s2513_s20 + $0x40] sm:$0xff]  ;;  %v461_v9 = vld [vmem:[%s2513_s20 + $0x50] sm:$0xff]  ;;  %458 = vst [vmem:[%s2518_s15 + $0x18] sm:$0xff] %v457_v7 }
  0x36   : > { %460 = vst [vmem:[%s2518_s15 + $0x20] sm:$0xff] %v459_v8  ;;  %462 = vst [vmem:[%s2518_s15 + $0x28] sm:$0xff] %v461_v9  ;;  %v463_v10 = vld [vmem:[%s2513_s20 + $0x60] sm:$0xff]  ;;  %v465_v11 = vld [vmem:[%s2513_s20 + $0x70] sm:$0xff] }
  0x37   : > { %v467_v12 = vld [vmem:[%s2513_s20 + $0x80] sm:$0xff]  ;;  %464 = vst [vmem:[%s2518_s15 + $0x30] sm:$0xff] %v463_v10  ;;  %466 = vst [vmem:[%s2518_s15 + $0x38] sm:$0xff] %v465_v11  ;;  %v469_v13 = vld [vmem:[%s2513_s20 + $0x90] sm:$0xff] }
  0x38   : > { %468 = vst [vmem:[%s2518_s15 + $0x40] sm:$0xff] %v467_v12  ;;  %v471_v14 = vld [vmem:[%s2513_s20 + $0xa0] sm:$0xff]  ;;  %v473_v15 = vld [vmem:[%s2513_s20 + $0xb0] sm:$0xff]  ;;  %470 = vst [vmem:[%s2518_s15 + $0x48] sm:$0xff] %v469_v13 }
  0x39   : > { %472 = vst [vmem:[%s2518_s15 + $0x50] sm:$0xff] %v471_v14  ;;  %474 = vst [vmem:[%s2518_s15 + $0x58] sm:$0xff] %v473_v15  ;;  %v475_v16 = vld [vmem:[%s2513_s20 + $0xc0] sm:$0xff]  ;;  %v477_v17 = vld [vmem:[%s2513_s20 + $0xd0] sm:$0xff] }
  0x3a   : > { %v479_v18 = vld [vmem:[%s2513_s20 + $0xe0] sm:$0xff]  ;;  %476 = vst [vmem:[%s2518_s15 + $0x60] sm:$0xff] %v475_v16  ;;  %478 = vst [vmem:[%s2518_s15 + $0x68] sm:$0xff] %v477_v17  ;;  %v481_v19 = vld [vmem:[%s2513_s20 + $0xf0] sm:$0xff] }
  0x3b   : > { %480 = vst [vmem:[%s2518_s15 + $0x70] sm:$0xff] %v479_v18  ;;  %v483_v20 = vld [vmem:[%s2513_s20 + $0x100] sm:$0xff]  ;;  %v485_v21 = vld [vmem:[%s2513_s20 + $0x110] sm:$0xff]  ;;  %482 = vst [vmem:[%s2518_s15 + $0x78] sm:$0xff] %v481_v19 }
  0x3c   : > { %484 = vst [vmem:[%s2518_s15 + $0x80] sm:$0xff] %v483_v20  ;;  %486 = vst [vmem:[%s2518_s15 + $0x88] sm:$0xff] %v485_v21  ;;  %v487_v22 = vld [vmem:[%s2513_s20 + $0x120] sm:$0xff]  ;;  %v489_v23 = vld [vmem:[%s2513_s20 + $0x130] sm:$0xff] }
  0x3d   : > { %v491_v24 = vld [vmem:[%s2513_s20 + $0x140] sm:$0xff]  ;;  %488 = vst [vmem:[%s2518_s15 + $0x90] sm:$0xff] %v487_v22  ;;  %490 = vst [vmem:[%s2518_s15 + $0x98] sm:$0xff] %v489_v23  ;;  %v493_v25 = vld [vmem:[%s2513_s20 + $0x150] sm:$0xff] }
  0x3e   : > { %492 = vst [vmem:[%s2518_s15 + $0xa0] sm:$0xff] %v491_v24  ;;  %v495_v26 = vld [vmem:[%s2513_s20 + $0x160] sm:$0xff]  ;;  %v497_v27 = vld [vmem:[%s2513_s20 + $0x170] sm:$0xff]  ;;  %494 = vst [vmem:[%s2518_s15 + $0xa8] sm:$0xff] %v493_v25 }
  0x3f   : > { %496 = vst [vmem:[%s2518_s15 + $0xb0] sm:$0xff] %v495_v26  ;;  %498 = vst [vmem:[%s2518_s15 + $0xb8] sm:$0xff] %v497_v27  ;;  %v499_v28 = vld [vmem:[%s2513_s20 + $0x180] sm:$0xff]  ;;  %v501_v29 = vld [vmem:[%s2513_s20 + $0x190] sm:$0xff] }
  0x40   : > { %v503_v30 = vld [vmem:[%s2513_s20 + $0x1a0] sm:$0xff]  ;;  %500 = vst [vmem:[%s2518_s15 + $0xc0] sm:$0xff] %v499_v28  ;;  %502 = vst [vmem:[%s2518_s15 + $0xc8] sm:$0xff] %v501_v29  ;;  %v505_v31 = vld [vmem:[%s2513_s20 + $0x1b0] sm:$0xff] }
  0x41   : > { %504 = vst [vmem:[%s2518_s15 + $0xd0] sm:$0xff] %v503_v30  ;;  %v507_v32 = vld [vmem:[%s2513_s20 + $0x1c0] sm:$0xff]  ;;  %v509_v33 = vld [vmem:[%s2513_s20 + $0x1d0] sm:$0xff]  ;;  %506 = vst [vmem:[%s2518_s15 + $0xd8] sm:$0xff] %v505_v31 }
  0x42   : > { %508 = vst [vmem:[%s2518_s15 + $0xe0] sm:$0xff] %v507_v32  ;;  %510 = vst [vmem:[%s2518_s15 + $0xe8] sm:$0xff] %v509_v33  ;;  %v511_v34 = vld [vmem:[%s2513_s20 + $0x1e0] sm:$0xff]  ;;  %v513_v35 = vld [vmem:[%s2513_s20 + $0x1f0] sm:$0xff] }
  0x43   : > { %v515_v36 = vld [vmem:[%s2513_s20 + $0x200] sm:$0xff]  ;;  %512 = vst [vmem:[%s2518_s15 + $0xf0] sm:$0xff] %v511_v34  ;;  %514 = vst [vmem:[%s2518_s15 + $0xf8] sm:$0xff] %v513_v35  ;;  %v517_v37 = vld [vmem:[%s2513_s20 + $0x210] sm:$0xff] }
  0x44   : > { %516 = vst [vmem:[%s2518_s15 + $0x100] sm:$0xff] %v515_v36  ;;  %v519_v38 = vld [vmem:[%s2513_s20 + $0x220] sm:$0xff]  ;;  %v521_v39 = vld [vmem:[%s2513_s20 + $0x230] sm:$0xff]  ;;  %518 = vst [vmem:[%s2518_s15 + $0x108] sm:$0xff] %v517_v37 }
  0x45   : > { %520 = vst [vmem:[%s2518_s15 + $0x110] sm:$0xff] %v519_v38  ;;  %522 = vst [vmem:[%s2518_s15 + $0x118] sm:$0xff] %v521_v39  ;;  %v523_v40 = vld [vmem:[%s2513_s20 + $0x240] sm:$0xff]  ;;  %v525_v41 = vld [vmem:[%s2513_s20 + $0x250] sm:$0xff] }
  0x46   : > { %v527_v42 = vld [vmem:[%s2513_s20 + $0x260] sm:$0xff]  ;;  %524 = vst [vmem:[%s2518_s15 + $0x120] sm:$0xff] %v523_v40  ;;  %526 = vst [vmem:[%s2518_s15 + $0x128] sm:$0xff] %v525_v41  ;;  %v529_v43 = vld [vmem:[%s2513_s20 + $0x270] sm:$0xff] }
  0x47   : > { %528 = vst [vmem:[%s2518_s15 + $0x130] sm:$0xff] %v527_v42  ;;  %v531_v44 = vld [vmem:[%s2513_s20 + $0x280] sm:$0xff]  ;;  %v533_v45 = vld [vmem:[%s2513_s20 + $0x290] sm:$0xff]  ;;  %530 = vst [vmem:[%s2518_s15 + $0x138] sm:$0xff] %v529_v43 }
  0x48   : > { %532 = vst [vmem:[%s2518_s15 + $0x140] sm:$0xff] %v531_v44  ;;  %534 = vst [vmem:[%s2518_s15 + $0x148] sm:$0xff] %v533_v45  ;;  %v535_v46 = vld [vmem:[%s2513_s20 + $0x2a0] sm:$0xff]  ;;  %v537_v47 = vld [vmem:[%s2513_s20 + $0x2b0] sm:$0xff] }
  0x49   : > { %v539_v48 = vld [vmem:[%s2513_s20 + $0x2c0] sm:$0xff]  ;;  %536 = vst [vmem:[%s2518_s15 + $0x150] sm:$0xff] %v535_v46  ;;  %538 = vst [vmem:[%s2518_s15 + $0x158] sm:$0xff] %v537_v47  ;;  %v541_v49 = vld [vmem:[%s2513_s20 + $0x2d0] sm:$0xff] }
  0x4a   : > { %540 = vst [vmem:[%s2518_s15 + $0x160] sm:$0xff] %v539_v48  ;;  %v543_v50 = vld [vmem:[%s2513_s20 + $0x2e0] sm:$0xff]  ;;  %v545_v51 = vld [vmem:[%s2513_s20 + $0x2f0] sm:$0xff]  ;;  %542 = vst [vmem:[%s2518_s15 + $0x168] sm:$0xff] %v541_v49 }
  0x4b   : > { %544 = vst [vmem:[%s2518_s15 + $0x170] sm:$0xff] %v543_v50  ;;  %546 = vst [vmem:[%s2518_s15 + $0x178] sm:$0xff] %v545_v51  ;;  %v547_v52 = vld [vmem:[%s2513_s20 + $0x300] sm:$0xff]  ;;  %v549_v53 = vld [vmem:[%s2513_s20 + $0x310] sm:$0xff] }
  0x4c   : > { %v551_v54 = vld [vmem:[%s2513_s20 + $0x320] sm:$0xff]  ;;  %548 = vst [vmem:[%s2518_s15 + $0x180] sm:$0xff] %v547_v52  ;;  %550 = vst [vmem:[%s2518_s15 + $0x188] sm:$0xff] %v549_v53  ;;  %v553_v55 = vld [vmem:[%s2513_s20 + $0x330] sm:$0xff] }
  0x4d   : > { %552 = vst [vmem:[%s2518_s15 + $0x190] sm:$0xff] %v551_v54  ;;  %v555_v56 = vld [vmem:[%s2513_s20 + $0x340] sm:$0xff]  ;;  %v557_v57 = vld [vmem:[%s2513_s20 + $0x350] sm:$0xff]  ;;  %554 = vst [vmem:[%s2518_s15 + $0x198] sm:$0xff] %v553_v55 }
  0x4e   : > { %556 = vst [vmem:[%s2518_s15 + $0x1a0] sm:$0xff] %v555_v56  ;;  %558 = vst [vmem:[%s2518_s15 + $0x1a8] sm:$0xff] %v557_v57  ;;  %v559_v58 = vld [vmem:[%s2513_s20 + $0x360] sm:$0xff]  ;;  %v561_v59 = vld [vmem:[%s2513_s20 + $0x370] sm:$0xff] }
  0x4f   : > { %v563_v60 = vld [vmem:[%s2513_s20 + $0x380] sm:$0xff]  ;;  %560 = vst [vmem:[%s2518_s15 + $0x1b0] sm:$0xff] %v559_v58  ;;  %562 = vst [vmem:[%s2518_s15 + $0x1b8] sm:$0xff] %v561_v59  ;;  %v565_v61 = vld [vmem:[%s2513_s20 + $0x390] sm:$0xff] }
  0x50   : > { %564 = vst [vmem:[%s2518_s15 + $0x1c0] sm:$0xff] %v563_v60  ;;  %v567_v62 = vld [vmem:[%s2513_s20 + $0x3a0] sm:$0xff]  ;;  %v569_v63 = vld [vmem:[%s2513_s20 + $0x3b0] sm:$0xff]  ;;  %566 = vst [vmem:[%s2518_s15 + $0x1c8] sm:$0xff] %v565_v61 }
  0x51   : > { %568 = vst [vmem:[%s2518_s15 + $0x1d0] sm:$0xff] %v567_v62  ;;  %570 = vst [vmem:[%s2518_s15 + $0x1d8] sm:$0xff] %v569_v63  ;;  %v571_v0 = vld [vmem:[%s2513_s20 + $0x3c0] sm:$0xff]  ;;  %v573_v1 = vld [vmem:[%s2513_s20 + $0x3d0] sm:$0xff] }
  0x52   : > { %v575_v2 = vld [vmem:[%s2513_s20 + $0x3e0] sm:$0xff]  ;;  %572 = vst [vmem:[%s2518_s15 + $0x1e0] sm:$0xff] %v571_v0  ;;  %574 = vst [vmem:[%s2518_s15 + $0x1e8] sm:$0xff] %v573_v1  ;;  %v577_v3 = vld [vmem:[%s2513_s20 + $0x3f0] sm:$0xff] }
  0x53   : > { %576 = vst [vmem:[%s2518_s15 + $0x1f0] sm:$0xff] %v575_v2  ;;  %578 = vst [vmem:[%s2518_s15 + $0x1f8] sm:$0xff] %v577_v3 }
  0x54 PF: > { %592 = sbr.rel (!%p2489_p11) target bundleno = 104 (0x68), region = 89  ;;  %s594_s0 = sand.u32 (%p2489_p11), 1, %s2315_s22  }
  0x55   : > { %s2019_s26 = sshll.u32 (%p2489_p11), %s2347_s30, 3  ;;  %s1896_s18 = sshll.u32 (%p2489_p11), %s594_s0, 8 }
  0x56   : > { %s2652_s14 = scalar_lea.vmem (%p2489_p11), %s2909_s4, %s2019_s26  ;;  %s2657_s20 = scalar_lea.vmem (%p2489_p11), [#allocation5], %s1896_s18 }
  0x57   : > { %v690_v4 = vld [vmem:[%s2652_s14] sm:$0xff] (%p2489_p11)  ;;  %v692_v5 = vld [vmem:[%s2652_s14 + $0x10] sm:$0xff] (%p2489_p11) }
  0x58   : > { %v694_v6 = vld [vmem:[%s2652_s14 + $0x20] sm:$0xff] (%p2489_p11)  ;;  %691 = vst [vmem:[%s2657_s20] sm:$0xff] (%p2489_p11), %v690_v4  ;;  %693 = vst [vmem:[%s2657_s20 + $0x8] sm:$0xff] (%p2489_p11), %v692_v5  ;;  %v696_v7 = vld [vmem:[%s2652_s14 + $0x30] sm:$0xff] (%p2489_p11) }
  0x59   : > { %695 = vst [vmem:[%s2657_s20 + $0x10] sm:$0xff] %v694_v6  ;;  %v698_v8 = vld [vmem:[%s2652_s14 + $0x40] sm:$0xff]  ;;  %v700_v9 = vld [vmem:[%s2652_s14 + $0x50] sm:$0xff]  ;;  %697 = vst [vmem:[%s2657_s20 + $0x18] sm:$0xff] %v696_v7 }
  0x5a   : > { %699 = vst [vmem:[%s2657_s20 + $0x20] sm:$0xff] %v698_v8  ;;  %701 = vst [vmem:[%s2657_s20 + $0x28] sm:$0xff] %v700_v9  ;;  %v702_v10 = vld [vmem:[%s2652_s14 + $0x60] sm:$0xff]  ;;  %v704_v11 = vld [vmem:[%s2652_s14 + $0x70] sm:$0xff] }
  0x5b   : > { %v706_v12 = vld [vmem:[%s2652_s14 + $0x80] sm:$0xff]  ;;  %703 = vst [vmem:[%s2657_s20 + $0x30] sm:$0xff] %v702_v10  ;;  %705 = vst [vmem:[%s2657_s20 + $0x38] sm:$0xff] %v704_v11  ;;  %v708_v13 = vld [vmem:[%s2652_s14 + $0x90] sm:$0xff] }
  0x5c   : > { %707 = vst [vmem:[%s2657_s20 + $0x40] sm:$0xff] %v706_v12  ;;  %v710_v14 = vld [vmem:[%s2652_s14 + $0xa0] sm:$0xff]  ;;  %v712_v15 = vld [vmem:[%s2652_s14 + $0xb0] sm:$0xff]  ;;  %709 = vst [vmem:[%s2657_s20 + $0x48] sm:$0xff] %v708_v13 }
  0x5d   : > { %711 = vst [vmem:[%s2657_s20 + $0x50] sm:$0xff] %v710_v14  ;;  %713 = vst [vmem:[%s2657_s20 + $0x58] sm:$0xff] %v712_v15  ;;  %v714_v16 = vld [vmem:[%s2652_s14 + $0xc0] sm:$0xff]  ;;  %v716_v17 = vld [vmem:[%s2652_s14 + $0xd0] sm:$0xff] }
  0x5e   : > { %v718_v18 = vld [vmem:[%s2652_s14 + $0xe0] sm:$0xff]  ;;  %715 = vst [vmem:[%s2657_s20 + $0x60] sm:$0xff] %v714_v16  ;;  %717 = vst [vmem:[%s2657_s20 + $0x68] sm:$0xff] %v716_v17  ;;  %v720_v19 = vld [vmem:[%s2652_s14 + $0xf0] sm:$0xff] }
  0x5f   : > { %719 = vst [vmem:[%s2657_s20 + $0x70] sm:$0xff] %v718_v18  ;;  %v722_v20 = vld [vmem:[%s2652_s14 + $0x100] sm:$0xff]  ;;  %v724_v21 = vld [vmem:[%s2652_s14 + $0x110] sm:$0xff]  ;;  %721 = vst [vmem:[%s2657_s20 + $0x78] sm:$0xff] %v720_v19 }
  0x60   : > { %723 = vst [vmem:[%s2657_s20 + $0x80] sm:$0xff] %v722_v20  ;;  %725 = vst [vmem:[%s2657_s20 + $0x88] sm:$0xff] %v724_v21  ;;  %v726_v22 = vld [vmem:[%s2652_s14 + $0x120] sm:$0xff]  ;;  %v728_v23 = vld [vmem:[%s2652_s14 + $0x130] sm:$0xff] }
  0x61   : > { %v730_v24 = vld [vmem:[%s2652_s14 + $0x140] sm:$0xff]  ;;  %727 = vst [vmem:[%s2657_s20 + $0x90] sm:$0xff] %v726_v22  ;;  %729 = vst [vmem:[%s2657_s20 + $0x98] sm:$0xff] %v728_v23  ;;  %v732_v25 = vld [vmem:[%s2652_s14 + $0x150] sm:$0xff] }
  0x62   : > { %731 = vst [vmem:[%s2657_s20 + $0xa0] sm:$0xff] %v730_v24  ;;  %v734_v26 = vld [vmem:[%s2652_s14 + $0x160] sm:$0xff]  ;;  %v736_v27 = vld [vmem:[%s2652_s14 + $0x170] sm:$0xff]  ;;  %733 = vst [vmem:[%s2657_s20 + $0xa8] sm:$0xff] %v732_v25 }
  0x63   : > { %735 = vst [vmem:[%s2657_s20 + $0xb0] sm:$0xff] %v734_v26  ;;  %737 = vst [vmem:[%s2657_s20 + $0xb8] sm:$0xff] %v736_v27  ;;  %v738_v28 = vld [vmem:[%s2652_s14 + $0x180] sm:$0xff]  ;;  %v740_v29 = vld [vmem:[%s2652_s14 + $0x190] sm:$0xff] }
  0x64   : > { %v742_v30 = vld [vmem:[%s2652_s14 + $0x1a0] sm:$0xff]  ;;  %739 = vst [vmem:[%s2657_s20 + $0xc0] sm:$0xff] %v738_v28  ;;  %741 = vst [vmem:[%s2657_s20 + $0xc8] sm:$0xff] %v740_v29  ;;  %v744_v31 = vld [vmem:[%s2652_s14 + $0x1b0] sm:$0xff] }
  0x65   : > { %743 = vst [vmem:[%s2657_s20 + $0xd0] sm:$0xff] %v742_v30  ;;  %v746_v32 = vld [vmem:[%s2652_s14 + $0x1c0] sm:$0xff]  ;;  %v748_v33 = vld [vmem:[%s2652_s14 + $0x1d0] sm:$0xff]  ;;  %745 = vst [vmem:[%s2657_s20 + $0xd8] sm:$0xff] %v744_v31 }
  0x66   : > { %747 = vst [vmem:[%s2657_s20 + $0xe0] sm:$0xff] %v746_v32  ;;  %749 = vst [vmem:[%s2657_s20 + $0xe8] sm:$0xff] %v748_v33  ;;  %v750_v34 = vld [vmem:[%s2652_s14 + $0x1e0] sm:$0xff]  ;;  %v752_v35 = vld [vmem:[%s2652_s14 + $0x1f0] sm:$0xff] }
  0x67   : > { %751 = vst [vmem:[%s2657_s20 + $0xf0] sm:$0xff] %v750_v34  ;;  %753 = vst [vmem:[%s2657_s20 + $0xf8] sm:$0xff] %v752_v35 }
  0x68 PF: > { %p1899_p1 = scmp.ge.s32.totalorder %s2351_s7, 1  ;;  %p766_p2 = scmp.lt.s32.totalorder %s2351_s7, 19 }
  0x6a   : > { %p767_p3 = pnand %p1899_p1, %p766_p2 }
  0x6b   : > { %s773_s11 = sand.u32 (!%p767_p3), 1, %s2327_s25   ;;  %s780_s10 = sand.u32 (!%p767_p3), 1, %s2319_s23  }
  0x6c   : > { %770 = sbr.rel (%p767_p3) target bundleno = 676 (0x2a4), region = 131  ;;  %s1900_s16 = sshll.u32 (!%p767_p3), %s773_s11, 5 }
  0x6d   : > { %s1901_s19 = sshll.u32 (!%p767_p3), %s780_s10, 9  ;;  %s787_s17 = sand.u32 (!%p767_p3), 1, %s2311_s21  }
  0x6e   : > { %s1904_s15 = sshll.u32 (!%p767_p3), %s2339_s28, 1  ;;  %s1902_s0 = sshll.u32 (!%p767_p3), %s787_s17, 8 }
  0x6f   : > { %s1903_s26 = sshll.u32 (!%p767_p3), %s787_s17, 4  ;;  %p842_p4 = scmp.lt.s32.totalorder (!%p767_p3), %s1904_s15, 3 }
  0x70   : > { %s2736_s23 = scalar_lea.vmem (!%p767_p3), [#allocation3], %s1900_s16  ;;  %s2738_s11 = scalar_lea.vmem (!%p767_p3), [#allocation4], %s1901_s19 }
  0x71   : > { %s2946_s15 = smov (!%p842_p4, %s1904_s15), 3  ;;  %s2740_s21 = scalar_lea.vmem [#allocation5], %s1902_s0 }
  0x72   : > { %s844_s13 = scalar_lea.vmem %s2907_s2, %s2946_s15  ;;  %s857_s25 = scalar_lea.vmem %s2910_s5, %s2946_s15 }
  0x73   : > { %s2742_s10 = scalar_lea.vmem [#allocation6], %s1903_s26  ;;  %p1906_p5 = scmp.ne.s32.totalorder %s2335_s27, 0 }
  0x75   : > { %864 = sbr.rel (%p1906_p5) target bundleno = 125 (0x7d), region = 147 }
  0x7a   : > { %v2353_v36 = vmov 0.0  }
  0x7b   : > { %865 = vst [vmem:[#allocation2 + $0x10] sm:$0xff] %v2353_v36  ;;  %866 = vst [vmem:[#allocation2] sm:$0xff] %v2353_v36 }
  0x7c   : > { %867 = vst [vmem:[#allocation2 + $0x18] sm:$0xff] %v2353_v36  ;;  %868 = vst [vmem:[#allocation2 + $0x8] sm:$0xff] %v2353_v36 }
  0x7d PF: > { %v2112_v37 = vld [vmem:[%s2738_s11 + $0x74] ss:$8 sps:$4 sm:$0xff]   ;;  %v2116_v39 = vld [vmem:[%s2738_s11 + $0x70] ss:$8 sps:$4 sm:$0xff]   ;;  %v2118_v41 = vld [vmem:[%s2738_s11 + $0x64] ss:$8 sps:$4 sm:$0xff]  }
  0x7e   : > { %v2114_v38 = vld [vmem:[%s2738_s11 + $0x174] ss:$8 sps:$4 sm:$0xff]   ;;  %1281 = vmatprep.subr.bf16.mxu0 %v2112_v37  ;;  %v2117_v40 = vld [vmem:[%s2738_s11 + $0x170] ss:$8 sps:$4 sm:$0xff]   ;;  %v2120_v42 = vld [vmem:[%s2738_s11 + $0x164] ss:$8 sps:$4 sm:$0xff]  }
  0x7f   : > { %1324 = vmatprep.subr.bf16.mxu1 %v2114_v38  ;;  %1282 = vmatpush1.bf16.msra.mxu0 %v2116_v39  ;;  %v2122_v43 = vld [vmem:[%s2738_s11 + $0x60] ss:$8 sps:$4 sm:$0xff]   ;;  %v2124_v45 = vld [vmem:[%s2738_s11 + $0x54] ss:$8 sps:$4 sm:$0xff]   ;;  %v2128_v47 = vld [vmem:[%s2738_s11 + $0x50] ss:$8 sps:$4 sm:$0xff]  }
  0x80   : > { %1325 = vmatpush1.bf16.msra.mxu1 %v2117_v40  ;;  %1283 = vmatprep.subr.bf16.mxu0 %v2118_v41  ;;  %v2123_v44 = vld [vmem:[%s2738_s11 + $0x160] ss:$8 sps:$4 sm:$0xff]   ;;  %v2126_v46 = vld [vmem:[%s2738_s11 + $0x154] ss:$8 sps:$4 sm:$0xff]   ;;  %v2129_v48 = vld [vmem:[%s2738_s11 + $0x150] ss:$8 sps:$4 sm:$0xff]  }
  0x81   : > { %1326 = vmatprep.subr.bf16.mxu1 %v2120_v42  ;;  %v2130_v49 = vld [vmem:[%s2738_s11 + $0x44] ss:$8 sps:$4 sm:$0xff]   ;;  %v2134_v51 = vld [vmem:[%s2738_s11 + $0x40] ss:$8 sps:$4 sm:$0xff]   ;;  %v2136_v53 = vld [vmem:[%s2738_s11 + $0x34] ss:$8 sps:$4 sm:$0xff]  }
  0x82   : > { %v2132_v50 = vld [vmem:[%s2738_s11 + $0x144] ss:$8 sps:$4 sm:$0xff]   ;;  %v2135_v52 = vld [vmem:[%s2738_s11 + $0x140] ss:$8 sps:$4 sm:$0xff]   ;;  %v2138_v54 = vld [vmem:[%s2738_s11 + $0x134] ss:$8 sps:$4 sm:$0xff]  }
  0x83   : > { %1284 = vmatpush1.bf16.msra.mxu0 %v2122_v43  ;;  %v2140_v55 = vld [vmem:[%s2738_s11 + $0x30] ss:$8 sps:$4 sm:$0xff]   ;;  %v2142_v57 = vld [vmem:[%s2738_s11 + $0x24] ss:$8 sps:$4 sm:$0xff]   ;;  %v2146_v59 = vld [vmem:[%s2738_s11 + $0x20] ss:$8 sps:$4 sm:$0xff]  }
  0x84   : > { %1327 = vmatpush1.bf16.msra.mxu1 %v2123_v44  ;;  %1285 = vmatprep.subr.bf16.mxu0 %v2124_v45  ;;  %v2141_v56 = vld [vmem:[%s2738_s11 + $0x130] ss:$8 sps:$4 sm:$0xff]   ;;  %v2144_v58 = vld [vmem:[%s2738_s11 + $0x124] ss:$8 sps:$4 sm:$0xff]   ;;  %v2147_v60 = vld [vmem:[%s2738_s11 + $0x120] ss:$8 sps:$4 sm:$0xff]  }
  0x85   : > { %1328 = vmatprep.subr.bf16.mxu1 %v2126_v46  ;;  %v2148_v61 = vld [vmem:[%s2738_s11 + $0x14] ss:$8 sps:$4 sm:$0xff]   ;;  %v2152_v63 = vld [vmem:[%s2738_s11 + $0x10] ss:$8 sps:$4 sm:$0xff]   ;;  %v2154_v1 = vld [vmem:[%s2738_s11 + $0x4] ss:$8 sps:$4 sm:$0xff]  }
  0x86   : > { %v2150_v62 = vld [vmem:[%s2738_s11 + $0x114] ss:$8 sps:$4 sm:$0xff]   ;;  %v2153_v0 = vld [vmem:[%s2738_s11 + $0x110] ss:$8 sps:$4 sm:$0xff]   ;;  %v2156_v2 = vld [vmem:[%s2738_s11 + $0x104] ss:$8 sps:$4 sm:$0xff]  }
  0x87   : > { %1286 = vmatpush1.bf16.msra.mxu0 %v2128_v47  ;;  %v2158_v3 = vld [vmem:[%s2738_s11] ss:$8 sps:$4 sm:$0xff]   ;;  %v2160_v5 = vld [vmem:[%s2738_s11 + $0xf4] ss:$8 sps:$4 sm:$0xff]   ;;  %v2164_v7 = vld [vmem:[%s2738_s11 + $0xf0] ss:$8 sps:$4 sm:$0xff]  }
  0x88   : > { %1329 = vmatpush1.bf16.msra.mxu1 %v2129_v48  ;;  %1287 = vmatprep.subr.bf16.mxu0 %v2130_v49  ;;  %v2159_v4 = vld [vmem:[%s2738_s11 + $0x100] ss:$8 sps:$4 sm:$0xff]   ;;  %v2162_v6 = vld [vmem:[%s2738_s11 + $0x1f4] ss:$8 sps:$4 sm:$0xff]   ;;  %v2165_v8 = vld [vmem:[%s2738_s11 + $0x1f0] ss:$8 sps:$4 sm:$0xff]  }
  0x89   : > { %1330 = vmatprep.subr.bf16.mxu1 %v2132_v50  ;;  %v2166_v9 = vld [vmem:[%s2738_s11 + $0xe4] ss:$8 sps:$4 sm:$0xff]   ;;  %v2170_v11 = vld [vmem:[%s2738_s11 + $0xe0] ss:$8 sps:$4 sm:$0xff]   ;;  %v2172_v13 = vld [vmem:[%s2738_s11 + $0xd4] ss:$8 sps:$4 sm:$0xff]  }
  0x8a   : > { %v2168_v10 = vld [vmem:[%s2738_s11 + $0x1e4] ss:$8 sps:$4 sm:$0xff]   ;;  %v2171_v12 = vld [vmem:[%s2738_s11 + $0x1e0] ss:$8 sps:$4 sm:$0xff]   ;;  %v2174_v14 = vld [vmem:[%s2738_s11 + $0x1d4] ss:$8 sps:$4 sm:$0xff]  }
  0x8b   : > { %1288 = vmatpush1.bf16.msra.mxu0 %v2134_v51  ;;  %v2176_v15 = vld [vmem:[%s2738_s11 + $0xd0] ss:$8 sps:$4 sm:$0xff]   ;;  %v2178_v17 = vld [vmem:[%s2738_s11 + $0xc4] ss:$8 sps:$4 sm:$0xff]   ;;  %v2182_v19 = vld [vmem:[%s2738_s11 + $0xc0] ss:$8 sps:$4 sm:$0xff]  }
  0x8c   : > { %1331 = vmatpush1.bf16.msra.mxu1 %v2135_v52  ;;  %1289 = vmatprep.subr.bf16.mxu0 %v2136_v53  ;;  %v2177_v16 = vld [vmem:[%s2738_s11 + $0x1d0] ss:$8 sps:$4 sm:$0xff]   ;;  %v2180_v18 = vld [vmem:[%s2738_s11 + $0x1c4] ss:$8 sps:$4 sm:$0xff]   ;;  %v2183_v21 = vld [vmem:[%s2738_s11 + $0x1c0] ss:$8 sps:$4 sm:$0xff]  }
  0x8d   : > { %1332 = vmatprep.subr.bf16.mxu1 %v2138_v54  ;;  %v2210_v20 = vld [vmem:[%s2736_s23 + $0x4] ss:$16 sps:$4 sm:$0xff]   ;;  %v2213_v24 = vld [vmem:[%s2736_s23 + $0xc] ss:$16 sps:$4 sm:$0xff]   ;;  %v2188_v25 = vld [vmem:[%s2738_s11 + $0xb0] ss:$8 sps:$4 sm:$0xff]  }
  0x8e   : > { %v2184_v22 = vld [vmem:[%s2738_s11 + $0xb4] ss:$8 sps:$4 sm:$0xff]   ;;  %1313 = vmatprep.mubr.bf16.mxu0 %v2210_v20  ;;  %1356 = vmatprep.mubr.bf16.mxu1 %v2213_v24  ;;  %v2189_v26 = vld [vmem:[%s2738_s11 + $0x1b0] ss:$8 sps:$4 sm:$0xff]   ;;  %v2190_v27 = vld [vmem:[%s2738_s11 + $0xa4] ss:$8 sps:$4 sm:$0xff]  }
  0x8f   : > { %1290 = vmatpush1.bf16.msra.mxu0 %v2140_v55  ;;  %v2186_v23 = vld [vmem:[%s2738_s11 + $0x1b4] ss:$8 sps:$4 sm:$0xff]   ;;  %v2192_v28 = vld [vmem:[%s2738_s11 + $0x1a4] ss:$8 sps:$4 sm:$0xff]   ;;  %v2194_v29 = vld [vmem:[%s2738_s11 + $0xa0] ss:$8 sps:$4 sm:$0xff]  }
  0x90   : > { %1333 = vmatpush1.bf16.msra.mxu1 %v2141_v56  ;;  %1291 = vmatprep.subr.bf16.mxu0 %v2142_v57  ;;  %v2195_v30 = vld [vmem:[%s2738_s11 + $0x1a0] ss:$8 sps:$4 sm:$0xff]   ;;  %v2196_v31 = vld [vmem:[%s2738_s11 + $0x94] ss:$8 sps:$4 sm:$0xff]   ;;  %v2200_v33 = vld [vmem:[%s2738_s11 + $0x90] ss:$8 sps:$4 sm:$0xff]  }
  0x91   : > { %1334 = vmatprep.subr.bf16.mxu1 %v2144_v58  ;;  %v2198_v32 = vld [vmem:[%s2738_s11 + $0x194] ss:$8 sps:$4 sm:$0xff]   ;;  %v2201_v34 = vld [vmem:[%s2738_s11 + $0x190] ss:$8 sps:$4 sm:$0xff]   ;;  %v2202_v35 = vld [vmem:[%s2738_s11 + $0x84] ss:$8 sps:$4 sm:$0xff]  }
  0x92   : > { %v2204_v36 = vld [vmem:[%s2738_s11 + $0x184] ss:$8 sps:$4 sm:$0xff]   ;;  %v2206_v37 = vld [vmem:[%s2738_s11 + $0x80] ss:$8 sps:$4 sm:$0xff]   ;;  %v869_v42 = vld [vmem:[#allocation2 + $0x10] sm:$0xff]  ;;  %p1975_p6 = scmp.ne.s32.totalorder %s2335_s27, 8 }
  0x93   : > { %1292 = vmatpush1.bf16.msra.mxu0 %v2146_v59  ;;  %v2207_v38 = vld [vmem:[%s2738_s11 + $0x180] ss:$8 sps:$4 sm:$0xff]   ;;  %v871_v51 = vld [vmem:[#allocation2 + $0x18] sm:$0xff] }
  0x94   : > { %1335 = vmatpush1.bf16.msra.mxu1 %v2147_v60  ;;  %1293 = vmatprep.subr.bf16.mxu0 %v2148_v61  ;;  %v2208_v39 = vld [vmem:[%s2736_s23] ss:$16 sps:$4 sm:$0xff]   ;;  %v2211_v40 = vld [vmem:[%s2736_s23 + $0x8] ss:$16 sps:$4 sm:$0xff]  }
  0x95   : > { %1336 = vmatprep.subr.bf16.mxu1 %v2150_v62  ;;  %v870_v46 = vld [vmem:[#allocation2] sm:$0xff]  ;;  %v872_v56 = vld [vmem:[#allocation2 + $0x8] sm:$0xff] }
  0x97   : > { %1294 = vmatpush1.bf16.msra.mxu0 %v2152_v63 }
  0x98   : > { %1337 = vmatpush1.bf16.msra.mxu1 %v2153_v0  ;;  %1295 = vmatprep.subr.bf16.mxu0 %v2154_v1 }
  0x99   : > { %1338 = vmatprep.subr.bf16.mxu1 %v2156_v2 }
  0x9b   : > { %1296 = vmatpush1.bf16.msra.mxu0 %v2158_v3 }
  0x9c   : > { %1339 = vmatpush1.bf16.msra.mxu1 %v2159_v4  ;;  %1297 = vmatprep.subr.bf16.mxu0 %v2160_v5 }
  0x9d   : > { %1340 = vmatprep.subr.bf16.mxu1 %v2162_v6 }
  0x9f   : > { %1298 = vmatpush2.bf16.msra.mxu0 %v2164_v7 }
  0xa0   : > { %1341 = vmatpush2.bf16.msra.mxu1 %v2165_v8  ;;  %1299 = vmatprep.subr.bf16.mxu0 %v2166_v9 }
  0xa1   : > { %1342 = vmatprep.subr.bf16.mxu1 %v2168_v10 }
  0xa3   : > { %1300 = vmatpush2.bf16.msra.mxu0 %v2170_v11 }
  0xa4   : > { %1343 = vmatpush2.bf16.msra.mxu1 %v2171_v12  ;;  %1301 = vmatprep.subr.bf16.mxu0 %v2172_v13 }
  0xa5   : > { %1344 = vmatprep.subr.bf16.mxu1 %v2174_v14 }
  0xa7   : > { %1302 = vmatpush2.bf16.msra.mxu0 %v2176_v15 }
  0xa8   : > { %1345 = vmatpush2.bf16.msra.mxu1 %v2177_v16  ;;  %1303 = vmatprep.subr.bf16.mxu0 %v2178_v17 }
  0xa9   : > { %1346 = vmatprep.subr.bf16.mxu1 %v2180_v18 }
  0xab   : > { %1304 = vmatpush2.bf16.msra.mxu0 %v2182_v19 }
  0xac   : > { %1347 = vmatpush2.bf16.msra.mxu1 %v2183_v21  ;;  %1305 = vmatprep.subr.bf16.mxu0 %v2184_v22 }
  0xad   : > { %1348 = vmatprep.subr.bf16.mxu1 %v2186_v23 }
  0xaf   : > { %1306 = vmatpush2.bf16.msra.mxu0 %v2188_v25 }
  0xb0   : > { %1349 = vmatpush2.bf16.msra.mxu1 %v2189_v26  ;;  %1307 = vmatprep.subr.bf16.mxu0 %v2190_v27 }
  0xb1   : > { %1350 = vmatprep.subr.bf16.mxu1 %v2192_v28 }
  0xb3   : > { %1308 = vmatpush2.bf16.msra.mxu0 %v2194_v29 }
  0xb4   : > { %1351 = vmatpush2.bf16.msra.mxu1 %v2195_v30  ;;  %1309 = vmatprep.subr.bf16.mxu0 %v2196_v31 }
  0xb5   : > { %1352 = vmatprep.subr.bf16.mxu1 %v2198_v32 }
  0xb7   : > { %1310 = vmatpush2.bf16.msra.mxu0 %v2200_v33 }
  0xb8   : > { %1353 = vmatpush2.bf16.msra.mxu1 %v2201_v34  ;;  %1311 = vmatprep.subr.bf16.mxu0 %v2202_v35 }
  0xb9   : > { %1354 = vmatprep.subr.bf16.mxu1 %v2204_v36 }
  0xbb   : > { %1312 = vmatpush2.bf16.msra.mxu0 %v2206_v37 }
  0xbc   : > { %1355 = vmatpush2.bf16.msra.mxu1 %v2207_v38 }
  0xbe   : > { %1314 = vmatmul.mubr.bf16.vlgmr.msra.gmra.mxu0 %v2208_v39 }
  0xbf   : > { %1357 = vmatmul.mubr.bf16.vlgmr.msra.gmra.mxu1 %v2211_v40 }
 0x17e   : > { %v1315_v41 = vpop.f32.mrf.mxu0 }
 0x17f   : > { %v1358_v43 = vpop.f32.mrf.mxu1 }
 0x180   : > { %v1359_v44 = vadd.f32 %v1358_v43, %v1315_v41  ;;  %v1317_v45 = vpop.f32.mrf.mxu0 }
 0x181   : > { %v1360_v47 = vpop.f32.mrf.mxu1 }
 0x182   : > { %v1367_v48 = vadd.f32 %v1359_v44, %v869_v42  ;;  %v1361_v49 = vadd.f32 %v1360_v47, %v1317_v45  ;;  %v1319_v50 = vpop.f32.mrf.mxu0 }
 0x183   : > { %v1362_v52 = vpop.f32.mrf.mxu1 }
 0x184   : > { %1371 = vst [vmem:[#allocation2 + $0x10] sm:$0xff] %v1367_v48  ;;  %v1368_v53 = vadd.f32 %v1361_v49, %v870_v46  ;;  %v1363_v54 = vadd.f32 %v1362_v52, %v1319_v50  ;;  %v1321_v55 = vpop.f32.mrf.mxu0 }
 0x185   : > { %v1364_v57 = vpop.f32.mrf.mxu1 }
 0x186   : > { %1372 = vst [vmem:[#allocation2] sm:$0xff] %v1368_v53  ;;  %v1369_v58 = vadd.f32 %v1363_v54, %v871_v51  ;;  %v1365_v59 = vadd.f32 %v1364_v57, %v1321_v55  ;;  %1378 = sbr.rel (%p1975_p6) target bundleno = 668 (0x29c), region = 151 }
 0x188   : > { %1373 = vst [vmem:[#allocation2 + $0x18] sm:$0xff] %v1369_v58  ;;  %v1370_v60 = vadd.f32 %v1365_v59, %v872_v56 }
 0x18a   : > { %1374 = vst [vmem:[#allocation2 + $0x8] sm:$0xff] %v1370_v60 }
 0x18b   : > { %v2214_v61 = vld [vmem:[%s2740_s21 + $0x74] ss:$8 sps:$4 sm:$0xff]   ;;  %v2216_v62 = vld [vmem:[%s2740_s21 + $0x70] ss:$8 sps:$4 sm:$0xff]   ;;  %v2217_v63 = vld [vmem:[%s2740_s21 + $0x64] ss:$8 sps:$4 sm:$0xff]   ;;  %v1385_v31 = vlaneseq }
 0x18c   : > { %1603 = vmatprep.subr.bf16.mxu0 %v2214_v61  ;;  %v2219_v0 = vld [vmem:[%s2740_s21 + $0x60] ss:$8 sps:$4 sm:$0xff]   ;;  %v2220_v1 = vld [vmem:[%s2740_s21 + $0x54] ss:$8 sps:$4 sm:$0xff]   ;;  %v2222_v2 = vld [vmem:[%s2740_s21 + $0x50] ss:$8 sps:$4 sm:$0xff]  }
 0x18d   : > { %1604 = vmatpush1.bf16.msra.mxu0 %v2216_v62  ;;  %v2223_v3 = vld [vmem:[%s2740_s21 + $0x44] ss:$8 sps:$4 sm:$0xff]   ;;  %v2225_v4 = vld [vmem:[%s2740_s21 + $0x40] ss:$8 sps:$4 sm:$0xff]   ;;  %v2226_v5 = vld [vmem:[%s2740_s21 + $0x34] ss:$8 sps:$4 sm:$0xff]  }
 0x18e   : > { %1605 = vmatprep.subr.bf16.mxu0 %v2217_v63  ;;  %v2228_v6 = vld [vmem:[%s2740_s21 + $0x30] ss:$8 sps:$4 sm:$0xff]   ;;  %v2229_v7 = vld [vmem:[%s2740_s21 + $0x24] ss:$8 sps:$4 sm:$0xff]   ;;  %v2231_v8 = vld [vmem:[%s2740_s21 + $0x20] ss:$8 sps:$4 sm:$0xff]  }
 0x18f   : > { %v2232_v9 = vld [vmem:[%s2740_s21 + $0x14] ss:$8 sps:$4 sm:$0xff]   ;;  %v2264_v10 = vld [vmem:[%s2908_s3 + $0x4] ss:$8 sps:$4 sm:$0xff]   ;;  %v2234_v11 = vld [vmem:[%s2740_s21 + $0x10] ss:$8 sps:$4 sm:$0xff]  }
 0x190   : > { %v2235_v12 = vld [vmem:[%s2740_s21 + $0x4] ss:$8 sps:$4 sm:$0xff]   ;;  %1635 = vmatprep.mubr.bf16.mxu0 %v2264_v10  ;;  %v2237_v13 = vld [vmem:[%s2740_s21] ss:$8 sps:$4 sm:$0xff]   ;;  %v2238_v14 = vld [vmem:[%s2740_s21 + $0xf4] ss:$8 sps:$4 sm:$0xff]  }
 0x191   : > { %1606 = vmatpush1.bf16.msra.mxu0 %v2219_v0  ;;  %v2240_v15 = vld [vmem:[%s2740_s21 + $0xf0] ss:$8 sps:$4 sm:$0xff]   ;;  %v2241_v16 = vld [vmem:[%s2740_s21 + $0xe4] ss:$8 sps:$4 sm:$0xff]   ;;  %v2243_v17 = vld [vmem:[%s2740_s21 + $0xe0] ss:$8 sps:$4 sm:$0xff]  }
 0x192   : > { %1607 = vmatprep.subr.bf16.mxu0 %v2220_v1  ;;  %v2244_v18 = vld [vmem:[%s2740_s21 + $0xd4] ss:$8 sps:$4 sm:$0xff]   ;;  %v2246_v19 = vld [vmem:[%s2740_s21 + $0xd0] ss:$8 sps:$4 sm:$0xff]   ;;  %v2247_v20 = vld [vmem:[%s2740_s21 + $0xc4] ss:$8 sps:$4 sm:$0xff]  }
 0x193   : > { %v2249_v21 = vld [vmem:[%s2740_s21 + $0xc0] ss:$8 sps:$4 sm:$0xff]   ;;  %v2250_v22 = vld [vmem:[%s2740_s21 + $0xb4] ss:$8 sps:$4 sm:$0xff]   ;;  %v2252_v23 = vld [vmem:[%s2740_s21 + $0xb0] ss:$8 sps:$4 sm:$0xff]  }
 0x194   : > { %v2253_v24 = vld [vmem:[%s2740_s21 + $0xa4] ss:$8 sps:$4 sm:$0xff]   ;;  %v2255_v25 = vld [vmem:[%s2740_s21 + $0xa0] ss:$8 sps:$4 sm:$0xff]   ;;  %v2256_v26 = vld [vmem:[%s2740_s21 + $0x94] ss:$8 sps:$4 sm:$0xff]  }
 0x195   : > { %1608 = vmatpush1.bf16.msra.mxu0 %v2222_v2  ;;  %v2258_v27 = vld [vmem:[%s2740_s21 + $0x90] ss:$8 sps:$4 sm:$0xff]   ;;  %v2259_v28 = vld [vmem:[%s2740_s21 + $0x84] ss:$8 sps:$4 sm:$0xff]   ;;  %v2261_v29 = vld [vmem:[%s2740_s21 + $0x80] ss:$8 sps:$4 sm:$0xff]  }
 0x196   : > { %1609 = vmatprep.subr.bf16.mxu0 %v2223_v3  ;;  %v2262_v30 = vld [vmem:[%s2908_s3] ss:$8 sps:$4 sm:$0xff]   ;;  %v1386_v32 = vshrl.u32 %v1385_v31, 7  ;;  %v1379_v37 = vld [vmem:[#allocation2 + $0x10] sm:$0xff]  ;;  %v1381_v42 = vld [vmem:[#allocation2 + $0x18] sm:$0xff] }
 0x197   : > { %v1383_v34 = vld [vmem:[%s844_s13] sm:$0x3]  ;;  %v1382_v46 = vld [vmem:[#allocation2 + $0x8] sm:$0xff] }
 0x198   : > { %v1387_v33 = vsub.s32 0, %v1386_v32  ;;  %v1391_v35 = vsub.s32 1, %v1386_v32  ;;  %v1650_v39 = vld [vmem:[%s857_s25] sm:$0x3] }
 0x199   : > { %1610 = vmatpush1.bf16.msra.mxu0 %v2225_v4  ;;  %v1380_v40 = vld [vmem:[#allocation2] sm:$0xff] }
 0x19a   : > { %1611 = vmatprep.subr.bf16.mxu0 %v2226_v5  ;;  %v1388_v36 = vrot.slane %v1383_v34, %v1387_v33  ;;  %v1392_v38 = vrot.slane %v1383_v34, %v1391_v35  ;;  %v1655_v43 = vrot.slane %v1650_v39, %v1387_v33  ;;  %v1659_v48 = vrot.slane %v1650_v39, %v1391_v35 }
 0x19c   : > { %v1395_v41 = vadd.f32 %v1388_v36, %v1379_v37  ;;  %v1396_v44 = vadd.f32 %v1392_v38, %v1380_v40  ;;  %v1397_v49 = vadd.f32 %v1388_v36, %v1381_v42  ;;  %v1398_v53 = vadd.f32 %v1392_v38, %v1382_v46 }
 0x19d   : > { %1612 = vmatpush1.bf16.msra.mxu0 %v2228_v6 }
 0x19e   : > { %1613 = vmatprep.subr.bf16.mxu0 %v2229_v7 }
 0x1a1   : > { %1614 = vmatpush1.bf16.msra.mxu0 %v2231_v8 }
 0x1a2   : > { %1615 = vmatprep.subr.bf16.mxu0 %v2232_v9 }
 0x1a5   : > { %1616 = vmatpush1.bf16.msra.mxu0 %v2234_v11 }
 0x1a6   : > { %1617 = vmatprep.subr.bf16.mxu0 %v2235_v12 }
 0x1a9   : > { %1618 = vmatpush1.bf16.msra.mxu0 %v2237_v13 }
 0x1aa   : > { %1619 = vmatprep.subr.bf16.mxu0 %v2238_v14 }
 0x1ad   : > { %1620 = vmatpush2.bf16.msra.mxu0 %v2240_v15 }
 0x1ae   : > { %1621 = vmatprep.subr.bf16.mxu0 %v2241_v16 }
 0x1b1   : > { %1622 = vmatpush2.bf16.msra.mxu0 %v2243_v17 }
 0x1b2   : > { %1623 = vmatprep.subr.bf16.mxu0 %v2244_v18 }
 0x1b5   : > { %1624 = vmatpush2.bf16.msra.mxu0 %v2246_v19 }
 0x1b6   : > { %1625 = vmatprep.subr.bf16.mxu0 %v2247_v20 }
 0x1b9   : > { %1626 = vmatpush2.bf16.msra.mxu0 %v2249_v21 }
 0x1ba   : > { %1627 = vmatprep.subr.bf16.mxu0 %v2250_v22 }
 0x1bd   : > { %1628 = vmatpush2.bf16.msra.mxu0 %v2252_v23 }
 0x1be   : > { %1629 = vmatprep.subr.bf16.mxu0 %v2253_v24 }
 0x1c1   : > { %1630 = vmatpush2.bf16.msra.mxu0 %v2255_v25 }
 0x1c2   : > { %1631 = vmatprep.subr.bf16.mxu0 %v2256_v26 }
 0x1c5   : > { %1632 = vmatpush2.bf16.msra.mxu0 %v2258_v27 }
 0x1c6   : > { %1633 = vmatprep.subr.bf16.mxu0 %v2259_v28 }
 0x1c9   : > { %1634 = vmatpush2.bf16.msra.mxu0 %v2261_v29 }
 0x1cc   : > { %1636 = vmatmul.mubr.bf16.vlgmr.msra.gmra.mxu0 %v2262_v30 }
 0x28c   : > { %v1637_v45 = vpop.f32.mrf.mxu0 }
 0x28d   : > { %v1646_v47 = vadd.f32 %v1637_v45, %v1395_v41 }
 0x28e   : > { %v1639_v50 = vpop.f32.mrf.mxu0 }
 0x28f   : > { %v1662_v51 = vadd.f32 %v1655_v43, %v1646_v47  ;;  %v1647_v52 = vadd.f32 %v1639_v50, %v1396_v44 }
 0x290   : > { %v1641_v54 = vpop.f32.mrf.mxu0 }
 0x291   : > { %v1663_v55 = vadd.f32 %v1659_v48, %v1647_v52  ;;  %v1648_v56 = vadd.f32 %v1641_v54, %v1397_v49  ;;  %v1666_v58 = vmax.f32 %v1662_v51, 0.0 }
 0x292   : > { %v1643_v57 = vpop.f32.mrf.mxu0 }
 0x293   : > { %v1667_v59 = vmax.f32 %v1663_v55, 0.0  ;;  %v1664_v60 = vadd.f32 %v1655_v43, %v1648_v56  ;;  %v1649_v61 = vadd.f32 %v1643_v57, %v1398_v53 }
 0x295   : > { %v2020_v62 = vpack.c.bf16 %v1667_v59, %v1666_v58  ;;  %v1665_v63 = vadd.f32 %v1659_v48, %v1649_v61  ;;  %v1668_v0 = vmax.f32 %v1664_v60, 0.0 }
 0x297   : > { %1682 = vst [vmem:[%s2742_s10] sm:$0xff] %v2020_v62  ;;  %v1669_v1 = vmax.f32 %v1665_v63, 0.0 }
 0x299   : > { %v2021_v2 = vpack.c.bf16 %v1669_v1, %v1668_v0 }
 0x29b   : > { %1683 = vst [vmem:[%s2742_s10 + $0x8] sm:$0xff] %v2021_v2 }
 0x29c PF: > { %1690 = sbr.rel (!%p2493_p13) target bundleno = 676 (0x2a4), region = 155  ;;  %s2022_s15 = sshll.u32 (%p2493_p13), %s2339_s28, 3 }
 0x29d   : > { %s1696_s20 = scalar_lea.vmem (%p2493_p13), %s2911_s6, %s2022_s15 }
 0x29e   : > { %v1727_v3 = vld [vmem:[%s2742_s10] sm:$0xff] (%p2493_p13) }
 0x29f   : > { %1728 = vst [vmem:[%s1696_s20] sm:$0xff] (%p2493_p13), %v1727_v3 }
 0x2a2   : > { %v1729_v4 = vld [vmem:[%s2742_s10 + $0x8] sm:$0xff] }
 0x2a3   : > { %1730 = vst [vmem:[%s1696_s20 + $0x10] sm:$0xff] %v1729_v4 }
 0x2a4 PF: > { %s16_s7 = sadd.s32 1, %s2351_s7   ;;  %s2926_s12 = sld [smem:[#allocation11_spill]] }
 0x2a5   : > { %p13_p7 = scmp.ge.s32.totalorder %s16_s7, 20   ;;  %s2927_s25 = sld [smem:[#allocation7_spill]] }
 0x2a6   : > { %s2928_s26 = sld [smem:[#allocation10_spill]]  ;;  %s2931_s21 = smov %s2315_s22 }
 0x2a7   : > { %s2929_s11 = sld [smem:[#allocation8_spill]]  ;;  %s2932_s22 = smov %s2485_s9 }
 0x2a8   : > { %s2930_s10 = sld [smem:[#allocation9_spill]]  ;;  %s2933_s23 = smov %s2323_s24 }
 0x2a9   : > { %s2935_s27 = smov %s2343_s29  ;;  %s2936_s28 = smov %s2347_s30 }
 0x2aa   : > { %s2934_s24 = smov %s2926_s12  ;;  %15 = sbr.rel (!%p13_p7) target bundleno = 8 (0x8), region = 249 }
 0x2ad   : > { %s2937_s29 = smov %s2929_s11 }
 0x2ae   : > { %s2938_s30 = smov %s2930_s10 }

// kernel: multi_task_net_forward.34
= control target key start
LH: loop header
LB: loop body
LE: loop exit
PB: predicated region body
PF: predicated region fallthrough
CT: control target
= control target key end

     0   :  { %s2209_s0 = inlined_call_operand.vmem [shape: bf16[16,4608], index: 0, kind: input, shape index: {}]   ;;  %s2210_s1 = inlined_call_operand.vmem [shape: bf16[4608,512], index: 1, kind: input, shape index: {}]   ;;  %s2211_s2 = inlined_call_operand.vmem [shape: f32[1,512], index: 2, kind: input, shape index: {}]   ;;  %s2212_s3 = inlined_call_operand.vmem [shape: bf16[16,512], index: 3, kind: input, shape index: {}]   ;;  %s2213_s4 = inlined_call_operand.vmem [shape: bf16[16,512], index: 4, kind: output, shape index: {}]  }
   0x1   :  { %2216 = sst [smem:[#allocation10_spill]] %s2209_s0 }
   0x2   :  { %s1802_s15 = smov 0   ;;  %s1804_s16 = smov 0  }
   0x3   :  { %s1806_s17 = smov 0   ;;  %s1808_s18 = smov 0  }
   0x4   :  { %s1810_s19 = smov 0   ;;  %s1812_s20 = smov 0  }
   0x5   :  { %s1814_s21 = smov 0   ;;  %s1816_s22 = smov 0  }
   0x6   :  { %s1818_s23 = smov 0   ;;  %s1820_s24 = smov 0  }
   0x7   :  { %s1822_s25 = smov 0  }
   0x8 LB: > { %s1393_s26 = sadd.s32 4294967295, %s1774_s25   ;;  %s26_s27 = sadd.s32 1, %s1766_s23  ;;  %s1774_s25 = sphi %s1822_s25, %s14_s25   ;;  %s1770_s24 = sphi %s1820_s24, %s2237_s24   ;;  %s1766_s23 = sphi %s1818_s23, %s2236_s23   ;;  %s1762_s22 = sphi %s1816_s22, %s2235_s22   ;;  %s1758_s21 = sphi %s1814_s21, %s2234_s21   ;;  %s1754_s20 = sphi %s1812_s20, %s2233_s20   ;;  %s1750_s19 = sphi %s1810_s19, %s2232_s19   ;;  %s1746_s18 = sphi %s1808_s18, %s2231_s18   ;;  %s1742_s17 = sphi %s1806_s17, %s2230_s17   ;;  %s1738_s16 = sphi %s1804_s16, %s2229_s16   ;;  %s1734_s15 = sphi %s1802_s15, %s2228_s15  }
   0x9   : > { %p27_p0 = scmp.ge.s32.totalorder %s26_s27, 9  ;;  %s29_s28 = sadd.s32 1, %s1770_s24 }
   0xa   : > { %s42_s29 = sadd.s32 1, %s1754_s20  ;;  %p49_p1 = scmp.ne.s32.totalorder %s1754_s20, %s1750_s19 }
   0xb   : > { %s2239_s27 = smov (%p27_p0, %s26_s27), 0  ;;  %s2241_s28 = smov (!%p27_p0, %s29_s28), %s1770_s24 }
   0xc   : > { %2217 = sst [smem:[#allocation7_spill]] %s2239_s27  ;;  %s38_s30 = ssub.s32 %s1766_s23, %s2239_s27 }
   0xd   : > { %p50_p2 = scmp.eq.s32.totalorder %s1774_s25, 0  ;;  %p31_p3 = scmp.ge.s32.totalorder %s2241_s28, 2 }
   0xe   : > { %p40_p4 = scmp.eq.s32.totalorder %s38_s30, 0  ;;  %s70_s6 = sadd.s32 1, %s1746_s18 }
   0xf   : > { %p1871_p5 = por %p50_p2, %p49_p1  ;;  %s2243_s28 = smov (%p31_p3, %s2241_s28), 0 }
  0x10   : > { %2219 = sst [smem:[#allocation8_spill]] %s2243_s28  ;;  %s66_s8 = ssub.s32 %s1770_s24, %s2243_s28 }
  0x11   : > { %s1879_s7 = scalar_select %p40_p4, %s1754_s20, %s42_s29  }
  0x12   : > { %p77_p6 = scmp.ne.s32.totalorder %s1746_s18, %s1742_s17  ;;  %s67_s9 = sor.u32 %s66_s8, %s38_s30 }
  0x13   : > { %2220 = sst [smem:[#allocation9_spill]] %s1879_s7  ;;  %p122_p7 = scmp.eq.s32.totalorder %s66_s8, 0 }
  0x14   : > { %p68_p8 = scmp.eq.s32.totalorder %s67_s9, 0  ;;  %p1887_p9 = por %p77_p6, %p50_p2 }
  0x15   : > { %s124_s11 = sadd.s32 1, %s1738_s16  ;;  %p131_p10 = scmp.ne.s32.totalorder %s1738_s16, %s1734_s15 }
  0x16   : > { %s1895_s12 = scalar_select %p68_p8, %s1746_s18, %s70_s6  }
  0x17   : > { %s1898_s13 = scalar_select %p122_p7, %s1738_s16, %s124_s11  }
  0x18   : > { %p1902_p11 = por %p131_p10, %p50_p2  ;;  %p163_p12 = scmp.eq.s32.totalorder %s1393_s26, 17 }
  0x19   : > { %p1396_p0 = scmp.ge.s32.totalorder %s1774_s25, 18 }
  0x1a   : > { %p1906_p13 = por %p163_p12, %p131_p10 }
  0x1b   : > { %185 = sbr.rel (%p1396_p0) target bundleno = 88 (0x58), region = 16 }
  0x20   : > { %188 = sbr.rel (!%p1871_p5) target bundleno = 44 (0x2c), region = 20  ;;  %s190_s30 = sand.u32 (%p1871_p5), 1, %s1754_s20  }
  0x21   : > { %s1491_s6 = sshll.u32 (%p1871_p5), %s1766_s23, 4  ;;  %s1397_s8 = sshll.u32 (%p1871_p5), %s190_s30, 5 }
  0x22   : > { %s2224_s0 = sld [smem:[#allocation10_spill]] (%p1871_p5)  ;;  %s192_s26 = scalar_lea.vmem (%p1871_p5), [#allocation3], %s1397_s8 }
  0x28   : > { %s198_s28 = scalar_lea.vmem %s2224_s0, %s1491_s6 }
  0x29   : > { %v211_v0 = vld [vmem:[%s198_s28] sm:$0xff]  ;;  %v213_v1 = vld [vmem:[%s198_s28 + $0x8] sm:$0xff]  ;;  %v215_v2 = vld [vmem:[%s198_s28 + $0x90] sm:$0xff] }
  0x2a   : > { %212 = vst [vmem:[%s192_s26] sm:$0xff] %v211_v0  ;;  %214 = vst [vmem:[%s192_s26 + $0x8] sm:$0xff] %v213_v1  ;;  %v217_v3 = vld [vmem:[%s198_s28 + $0x98] sm:$0xff] }
  0x2b   : > { %216 = vst [vmem:[%s192_s26 + $0x10] sm:$0xff] %v215_v2  ;;  %218 = vst [vmem:[%s192_s26 + $0x18] sm:$0xff] %v217_v3 }
  0x2c PF: > { %224 = sbr.rel (!%p1887_p9) target bundleno = 83 (0x53), region = 43  ;;  %s226_s5 = sand.u32 (%p1887_p9), 1, %s1746_s18  }
  0x2d   : > { %s1402_s30 = sshll.u32 (%p1887_p9), %s1770_s24, 1  ;;  %s1400_s9 = sshll.u32 (%p1887_p9), %s226_s5, 9 }
  0x2e   : > { %s1492_s6 = sshll.u32 (%p1887_p9), %s1766_s23, 8  ;;  %s1931_s28 = scalar_lea.vmem (%p1887_p9), [#allocation4], %s1400_s9 }
  0x2f   : > { %s232_s11 = sadd.s32 (%p1887_p9), %s1492_s6, %s1402_s30 }
  0x30   : > { %s1404_s0 = sshll.u32 (%p1887_p9), %s232_s11, 2 }
  0x31   : > { %s1926_s7 = scalar_lea.vmem %s2210_s1, %s1404_s0 }
  0x32   : > { %v389_v4 = vld [vmem:[%s1926_s7] sm:$0xff]  ;;  %v391_v5 = vld [vmem:[%s1926_s7 + $0x10] sm:$0xff] }
  0x33   : > { %v393_v6 = vld [vmem:[%s1926_s7 + $0x20] sm:$0xff]  ;;  %390 = vst [vmem:[%s1931_s28] sm:$0xff] %v389_v4  ;;  %392 = vst [vmem:[%s1931_s28 + $0x8] sm:$0xff] %v391_v5  ;;  %v395_v7 = vld [vmem:[%s1926_s7 + $0x30] sm:$0xff] }
  0x34   : > { %394 = vst [vmem:[%s1931_s28 + $0x10] sm:$0xff] %v393_v6  ;;  %v397_v8 = vld [vmem:[%s1926_s7 + $0x40] sm:$0xff]  ;;  %v399_v9 = vld [vmem:[%s1926_s7 + $0x50] sm:$0xff]  ;;  %396 = vst [vmem:[%s1931_s28 + $0x18] sm:$0xff] %v395_v7 }
  0x35   : > { %398 = vst [vmem:[%s1931_s28 + $0x20] sm:$0xff] %v397_v8  ;;  %400 = vst [vmem:[%s1931_s28 + $0x28] sm:$0xff] %v399_v9  ;;  %v401_v10 = vld [vmem:[%s1926_s7 + $0x60] sm:$0xff]  ;;  %v403_v11 = vld [vmem:[%s1926_s7 + $0x70] sm:$0xff] }
  0x36   : > { %v405_v12 = vld [vmem:[%s1926_s7 + $0x80] sm:$0xff]  ;;  %402 = vst [vmem:[%s1931_s28 + $0x30] sm:$0xff] %v401_v10  ;;  %404 = vst [vmem:[%s1931_s28 + $0x38] sm:$0xff] %v403_v11  ;;  %v407_v13 = vld [vmem:[%s1926_s7 + $0x90] sm:$0xff] }
  0x37   : > { %406 = vst [vmem:[%s1931_s28 + $0x40] sm:$0xff] %v405_v12  ;;  %v409_v14 = vld [vmem:[%s1926_s7 + $0xa0] sm:$0xff]  ;;  %v411_v15 = vld [vmem:[%s1926_s7 + $0xb0] sm:$0xff]  ;;  %408 = vst [vmem:[%s1931_s28 + $0x48] sm:$0xff] %v407_v13 }
  0x38   : > { %410 = vst [vmem:[%s1931_s28 + $0x50] sm:$0xff] %v409_v14  ;;  %412 = vst [vmem:[%s1931_s28 + $0x58] sm:$0xff] %v411_v15  ;;  %v413_v16 = vld [vmem:[%s1926_s7 + $0xc0] sm:$0xff]  ;;  %v415_v17 = vld [vmem:[%s1926_s7 + $0xd0] sm:$0xff] }
  0x39   : > { %v417_v18 = vld [vmem:[%s1926_s7 + $0xe0] sm:$0xff]  ;;  %414 = vst [vmem:[%s1931_s28 + $0x60] sm:$0xff] %v413_v16  ;;  %416 = vst [vmem:[%s1931_s28 + $0x68] sm:$0xff] %v415_v17  ;;  %v419_v19 = vld [vmem:[%s1926_s7 + $0xf0] sm:$0xff] }
  0x3a   : > { %418 = vst [vmem:[%s1931_s28 + $0x70] sm:$0xff] %v417_v18  ;;  %v421_v20 = vld [vmem:[%s1926_s7 + $0x100] sm:$0xff]  ;;  %v423_v21 = vld [vmem:[%s1926_s7 + $0x110] sm:$0xff]  ;;  %420 = vst [vmem:[%s1931_s28 + $0x78] sm:$0xff] %v419_v19 }
  0x3b   : > { %422 = vst [vmem:[%s1931_s28 + $0x80] sm:$0xff] %v421_v20  ;;  %424 = vst [vmem:[%s1931_s28 + $0x88] sm:$0xff] %v423_v21  ;;  %v425_v22 = vld [vmem:[%s1926_s7 + $0x120] sm:$0xff]  ;;  %v427_v23 = vld [vmem:[%s1926_s7 + $0x130] sm:$0xff] }
  0x3c   : > { %v429_v24 = vld [vmem:[%s1926_s7 + $0x140] sm:$0xff]  ;;  %426 = vst [vmem:[%s1931_s28 + $0x90] sm:$0xff] %v425_v22  ;;  %428 = vst [vmem:[%s1931_s28 + $0x98] sm:$0xff] %v427_v23  ;;  %v431_v25 = vld [vmem:[%s1926_s7 + $0x150] sm:$0xff] }
  0x3d   : > { %430 = vst [vmem:[%s1931_s28 + $0xa0] sm:$0xff] %v429_v24  ;;  %v433_v26 = vld [vmem:[%s1926_s7 + $0x160] sm:$0xff]  ;;  %v435_v27 = vld [vmem:[%s1926_s7 + $0x170] sm:$0xff]  ;;  %432 = vst [vmem:[%s1931_s28 + $0xa8] sm:$0xff] %v431_v25 }
  0x3e   : > { %434 = vst [vmem:[%s1931_s28 + $0xb0] sm:$0xff] %v433_v26  ;;  %436 = vst [vmem:[%s1931_s28 + $0xb8] sm:$0xff] %v435_v27  ;;  %v437_v28 = vld [vmem:[%s1926_s7 + $0x180] sm:$0xff]  ;;  %v439_v29 = vld [vmem:[%s1926_s7 + $0x190] sm:$0xff] }
  0x3f   : > { %v441_v30 = vld [vmem:[%s1926_s7 + $0x1a0] sm:$0xff]  ;;  %438 = vst [vmem:[%s1931_s28 + $0xc0] sm:$0xff] %v437_v28  ;;  %440 = vst [vmem:[%s1931_s28 + $0xc8] sm:$0xff] %v439_v29  ;;  %v443_v31 = vld [vmem:[%s1926_s7 + $0x1b0] sm:$0xff] }
  0x40   : > { %442 = vst [vmem:[%s1931_s28 + $0xd0] sm:$0xff] %v441_v30  ;;  %v445_v32 = vld [vmem:[%s1926_s7 + $0x1c0] sm:$0xff]  ;;  %v447_v33 = vld [vmem:[%s1926_s7 + $0x1d0] sm:$0xff]  ;;  %444 = vst [vmem:[%s1931_s28 + $0xd8] sm:$0xff] %v443_v31 }
  0x41   : > { %446 = vst [vmem:[%s1931_s28 + $0xe0] sm:$0xff] %v445_v32  ;;  %448 = vst [vmem:[%s1931_s28 + $0xe8] sm:$0xff] %v447_v33  ;;  %v449_v34 = vld [vmem:[%s1926_s7 + $0x1e0] sm:$0xff]  ;;  %v451_v35 = vld [vmem:[%s1926_s7 + $0x1f0] sm:$0xff] }
  0x42   : > { %v453_v36 = vld [vmem:[%s1926_s7 + $0x200] sm:$0xff]  ;;  %450 = vst [vmem:[%s1931_s28 + $0xf0] sm:$0xff] %v449_v34  ;;  %452 = vst [vmem:[%s1931_s28 + $0xf8] sm:$0xff] %v451_v35  ;;  %v455_v37 = vld [vmem:[%s1926_s7 + $0x210] sm:$0xff] }
  0x43   : > { %454 = vst [vmem:[%s1931_s28 + $0x100] sm:$0xff] %v453_v36  ;;  %v457_v38 = vld [vmem:[%s1926_s7 + $0x220] sm:$0xff]  ;;  %v459_v39 = vld [vmem:[%s1926_s7 + $0x230] sm:$0xff]  ;;  %456 = vst [vmem:[%s1931_s28 + $0x108] sm:$0xff] %v455_v37 }
  0x44   : > { %458 = vst [vmem:[%s1931_s28 + $0x110] sm:$0xff] %v457_v38  ;;  %460 = vst [vmem:[%s1931_s28 + $0x118] sm:$0xff] %v459_v39  ;;  %v461_v40 = vld [vmem:[%s1926_s7 + $0x240] sm:$0xff]  ;;  %v463_v41 = vld [vmem:[%s1926_s7 + $0x250] sm:$0xff] }
  0x45   : > { %v465_v42 = vld [vmem:[%s1926_s7 + $0x260] sm:$0xff]  ;;  %462 = vst [vmem:[%s1931_s28 + $0x120] sm:$0xff] %v461_v40  ;;  %464 = vst [vmem:[%s1931_s28 + $0x128] sm:$0xff] %v463_v41  ;;  %v467_v43 = vld [vmem:[%s1926_s7 + $0x270] sm:$0xff] }
  0x46   : > { %466 = vst [vmem:[%s1931_s28 + $0x130] sm:$0xff] %v465_v42  ;;  %v469_v44 = vld [vmem:[%s1926_s7 + $0x280] sm:$0xff]  ;;  %v471_v45 = vld [vmem:[%s1926_s7 + $0x290] sm:$0xff]  ;;  %468 = vst [vmem:[%s1931_s28 + $0x138] sm:$0xff] %v467_v43 }
  0x47   : > { %470 = vst [vmem:[%s1931_s28 + $0x140] sm:$0xff] %v469_v44  ;;  %472 = vst [vmem:[%s1931_s28 + $0x148] sm:$0xff] %v471_v45  ;;  %v473_v46 = vld [vmem:[%s1926_s7 + $0x2a0] sm:$0xff]  ;;  %v475_v47 = vld [vmem:[%s1926_s7 + $0x2b0] sm:$0xff] }
  0x48   : > { %v477_v48 = vld [vmem:[%s1926_s7 + $0x2c0] sm:$0xff]  ;;  %474 = vst [vmem:[%s1931_s28 + $0x150] sm:$0xff] %v473_v46  ;;  %476 = vst [vmem:[%s1931_s28 + $0x158] sm:$0xff] %v475_v47  ;;  %v479_v49 = vld [vmem:[%s1926_s7 + $0x2d0] sm:$0xff] }
  0x49   : > { %478 = vst [vmem:[%s1931_s28 + $0x160] sm:$0xff] %v477_v48  ;;  %v481_v50 = vld [vmem:[%s1926_s7 + $0x2e0] sm:$0xff]  ;;  %v483_v51 = vld [vmem:[%s1926_s7 + $0x2f0] sm:$0xff]  ;;  %480 = vst [vmem:[%s1931_s28 + $0x168] sm:$0xff] %v479_v49 }
  0x4a   : > { %482 = vst [vmem:[%s1931_s28 + $0x170] sm:$0xff] %v481_v50  ;;  %484 = vst [vmem:[%s1931_s28 + $0x178] sm:$0xff] %v483_v51  ;;  %v485_v52 = vld [vmem:[%s1926_s7 + $0x300] sm:$0xff]  ;;  %v487_v53 = vld [vmem:[%s1926_s7 + $0x310] sm:$0xff] }
  0x4b   : > { %v489_v54 = vld [vmem:[%s1926_s7 + $0x320] sm:$0xff]  ;;  %486 = vst [vmem:[%s1931_s28 + $0x180] sm:$0xff] %v485_v52  ;;  %488 = vst [vmem:[%s1931_s28 + $0x188] sm:$0xff] %v487_v53  ;;  %v491_v55 = vld [vmem:[%s1926_s7 + $0x330] sm:$0xff] }
  0x4c   : > { %490 = vst [vmem:[%s1931_s28 + $0x190] sm:$0xff] %v489_v54  ;;  %v493_v56 = vld [vmem:[%s1926_s7 + $0x340] sm:$0xff]  ;;  %v495_v57 = vld [vmem:[%s1926_s7 + $0x350] sm:$0xff]  ;;  %492 = vst [vmem:[%s1931_s28 + $0x198] sm:$0xff] %v491_v55 }
  0x4d   : > { %494 = vst [vmem:[%s1931_s28 + $0x1a0] sm:$0xff] %v493_v56  ;;  %496 = vst [vmem:[%s1931_s28 + $0x1a8] sm:$0xff] %v495_v57  ;;  %v497_v58 = vld [vmem:[%s1926_s7 + $0x360] sm:$0xff]  ;;  %v499_v59 = vld [vmem:[%s1926_s7 + $0x370] sm:$0xff] }
  0x4e   : > { %v501_v60 = vld [vmem:[%s1926_s7 + $0x380] sm:$0xff]  ;;  %498 = vst [vmem:[%s1931_s28 + $0x1b0] sm:$0xff] %v497_v58  ;;  %500 = vst [vmem:[%s1931_s28 + $0x1b8] sm:$0xff] %v499_v59  ;;  %v503_v61 = vld [vmem:[%s1926_s7 + $0x390] sm:$0xff] }
  0x4f   : > { %502 = vst [vmem:[%s1931_s28 + $0x1c0] sm:$0xff] %v501_v60  ;;  %v505_v62 = vld [vmem:[%s1926_s7 + $0x3a0] sm:$0xff]  ;;  %v507_v63 = vld [vmem:[%s1926_s7 + $0x3b0] sm:$0xff]  ;;  %504 = vst [vmem:[%s1931_s28 + $0x1c8] sm:$0xff] %v503_v61 }
  0x50   : > { %506 = vst [vmem:[%s1931_s28 + $0x1d0] sm:$0xff] %v505_v62  ;;  %508 = vst [vmem:[%s1931_s28 + $0x1d8] sm:$0xff] %v507_v63  ;;  %v509_v0 = vld [vmem:[%s1926_s7 + $0x3c0] sm:$0xff]  ;;  %v511_v1 = vld [vmem:[%s1926_s7 + $0x3d0] sm:$0xff] }
  0x51   : > { %v513_v2 = vld [vmem:[%s1926_s7 + $0x3e0] sm:$0xff]  ;;  %510 = vst [vmem:[%s1931_s28 + $0x1e0] sm:$0xff] %v509_v0  ;;  %512 = vst [vmem:[%s1931_s28 + $0x1e8] sm:$0xff] %v511_v1  ;;  %v515_v3 = vld [vmem:[%s1926_s7 + $0x3f0] sm:$0xff] }
  0x52   : > { %514 = vst [vmem:[%s1931_s28 + $0x1f0] sm:$0xff] %v513_v2  ;;  %516 = vst [vmem:[%s1931_s28 + $0x1f8] sm:$0xff] %v515_v3 }
  0x53 PF: > { %530 = sbr.rel (!%p1902_p11) target bundleno = 88 (0x58), region = 85  ;;  %s532_s0 = sand.u32 (%p1902_p11), 1, %s1738_s16  }
  0x54   : > { %s1493_s27 = sshll.u32 (%p1902_p11), %s1770_s24, 3  ;;  %s1405_s10 = sshll.u32 (%p1902_p11), %s532_s0, 4 }
  0x55   : > { %s540_s30 = scalar_lea.vmem (%p1902_p11), %s2212_s3, %s1493_s27  ;;  %s534_s9 = scalar_lea.vmem (%p1902_p11), [#allocation5], %s1405_s10 }
  0x56   : > { %v571_v4 = vld [vmem:[%s540_s30] sm:$0xff] (%p1902_p11)  ;;  %v573_v5 = vld [vmem:[%s540_s30 + $0x10] sm:$0xff] (%p1902_p11) }
  0x57   : > { %572 = vst [vmem:[%s534_s9] sm:$0xff] (%p1902_p11), %v571_v4  ;;  %574 = vst [vmem:[%s534_s9 + $0x8] sm:$0xff] (%p1902_p11), %v573_v5 }
  0x58 PF: > { %p1408_p1 = scmp.ge.s32.totalorder %s1774_s25, 1  ;;  %p579_p2 = scmp.lt.s32.totalorder %s1774_s25, 19 }
  0x5a   : > { %p580_p3 = pnand %p1408_p1, %p579_p2 }
  0x5b   : > { %s586_s7 = sand.u32 (!%p580_p3), 1, %s1750_s19   ;;  %s593_s14 = sand.u32 (!%p580_p3), 1, %s1742_s17  }
  0x5c   : > { %583 = sbr.rel (%p580_p3) target bundleno = 403 (0x193), region = 123  ;;  %s1409_s6 = sshll.u32 (!%p580_p3), %s586_s7, 5 }
  0x5d   : > { %s1410_s11 = sshll.u32 (!%p580_p3), %s593_s14, 9  ;;  %s600_s8 = sand.u32 (!%p580_p3), 1, %s1734_s15  }
  0x5e   : > { %s1413_s28 = sshll.u32 (!%p580_p3), %s1762_s22, 1  ;;  %s2071_s0 = sshll.u32 (!%p580_p3), %s600_s8, 4 }
  0x5f   : > { %p641_p4 = scmp.lt.s32.totalorder (!%p580_p3), %s1413_s28, 3  ;;  %s2079_s5 = scalar_lea.vmem (!%p580_p3), [#allocation3], %s1409_s6 }
  0x60   : > { %s2081_s19 = scalar_lea.vmem (!%p580_p3), [#allocation4], %s1410_s11  ;;  %s602_s17 = scalar_lea.vmem (!%p580_p3), [#allocation5], %s2071_s0 }
  0x61   : > { %s2245_s28 = smov (!%p641_p4, %s1413_s28), 3  ;;  %s2085_s30 = scalar_lea.vmem [#allocation6], %s2071_s0 }
  0x62   : > { %s643_s26 = scalar_lea.vmem %s2211_s2, %s2245_s28  ;;  %p1414_p5 = scmp.ne.s32.totalorder %s1758_s21, 0 }
  0x64   : > { %652 = sbr.rel (%p1414_p5) target bundleno = 108 (0x6c), region = 139 }
  0x69   : > { %v1776_v6 = vmov 0.0  }
  0x6a   : > { %653 = vst [vmem:[#allocation2 + $0x10] sm:$0xff] %v1776_v6  ;;  %654 = vst [vmem:[#allocation2] sm:$0xff] %v1776_v6 }
  0x6b   : > { %655 = vst [vmem:[#allocation2 + $0x18] sm:$0xff] %v1776_v6  ;;  %656 = vst [vmem:[#allocation2 + $0x8] sm:$0xff] %v1776_v6 }
  0x6c PF: > { %v1586_v7 = vld [vmem:[%s2081_s19 + $0x74] ss:$8 sps:$4 sm:$0xff]   ;;  %v1590_v9 = vld [vmem:[%s2081_s19 + $0x70] ss:$8 sps:$4 sm:$0xff]   ;;  %v1592_v11 = vld [vmem:[%s2081_s19 + $0x64] ss:$8 sps:$4 sm:$0xff]  }
  0x6d   : > { %v1588_v8 = vld [vmem:[%s2081_s19 + $0x174] ss:$8 sps:$4 sm:$0xff]   ;;  %1069 = vmatprep.subr.bf16.mxu0 %v1586_v7  ;;  %v1591_v10 = vld [vmem:[%s2081_s19 + $0x170] ss:$8 sps:$4 sm:$0xff]   ;;  %v1594_v12 = vld [vmem:[%s2081_s19 + $0x164] ss:$8 sps:$4 sm:$0xff]  }
  0x6e   : > { %1112 = vmatprep.subr.bf16.mxu1 %v1588_v8  ;;  %1070 = vmatpush1.bf16.msra.mxu0 %v1590_v9  ;;  %v1596_v13 = vld [vmem:[%s2081_s19 + $0x60] ss:$8 sps:$4 sm:$0xff]   ;;  %v1598_v15 = vld [vmem:[%s2081_s19 + $0x54] ss:$8 sps:$4 sm:$0xff]   ;;  %v1602_v17 = vld [vmem:[%s2081_s19 + $0x50] ss:$8 sps:$4 sm:$0xff]  }
  0x6f   : > { %1113 = vmatpush1.bf16.msra.mxu1 %v1591_v10  ;;  %1071 = vmatprep.subr.bf16.mxu0 %v1592_v11  ;;  %v1597_v14 = vld [vmem:[%s2081_s19 + $0x160] ss:$8 sps:$4 sm:$0xff]   ;;  %v1600_v16 = vld [vmem:[%s2081_s19 + $0x154] ss:$8 sps:$4 sm:$0xff]   ;;  %v1603_v18 = vld [vmem:[%s2081_s19 + $0x150] ss:$8 sps:$4 sm:$0xff]  }
  0x70   : > { %1114 = vmatprep.subr.bf16.mxu1 %v1594_v12  ;;  %v1604_v19 = vld [vmem:[%s2081_s19 + $0x44] ss:$8 sps:$4 sm:$0xff]   ;;  %v1608_v21 = vld [vmem:[%s2081_s19 + $0x40] ss:$8 sps:$4 sm:$0xff]   ;;  %v1610_v23 = vld [vmem:[%s2081_s19 + $0x34] ss:$8 sps:$4 sm:$0xff]  }
  0x71   : > { %v1606_v20 = vld [vmem:[%s2081_s19 + $0x144] ss:$8 sps:$4 sm:$0xff]   ;;  %v1609_v22 = vld [vmem:[%s2081_s19 + $0x140] ss:$8 sps:$4 sm:$0xff]   ;;  %v1612_v24 = vld [vmem:[%s2081_s19 + $0x134] ss:$8 sps:$4 sm:$0xff]  }
  0x72   : > { %1072 = vmatpush1.bf16.msra.mxu0 %v1596_v13  ;;  %v1614_v25 = vld [vmem:[%s2081_s19 + $0x30] ss:$8 sps:$4 sm:$0xff]   ;;  %v1616_v27 = vld [vmem:[%s2081_s19 + $0x24] ss:$8 sps:$4 sm:$0xff]   ;;  %v1620_v29 = vld [vmem:[%s2081_s19 + $0x20] ss:$8 sps:$4 sm:$0xff]  }
  0x73   : > { %1115 = vmatpush1.bf16.msra.mxu1 %v1597_v14  ;;  %1073 = vmatprep.subr.bf16.mxu0 %v1598_v15  ;;  %v1615_v26 = vld [vmem:[%s2081_s19 + $0x130] ss:$8 sps:$4 sm:$0xff]   ;;  %v1618_v28 = vld [vmem:[%s2081_s19 + $0x124] ss:$8 sps:$4 sm:$0xff]   ;;  %v1621_v30 = vld [vmem:[%s2081_s19 + $0x120] ss:$8 sps:$4 sm:$0xff]  }
  0x74   : > { %1116 = vmatprep.subr.bf16.mxu1 %v1600_v16  ;;  %v1622_v31 = vld [vmem:[%s2081_s19 + $0x14] ss:$8 sps:$4 sm:$0xff]   ;;  %v1626_v33 = vld [vmem:[%s2081_s19 + $0x10] ss:$8 sps:$4 sm:$0xff]   ;;  %v1628_v35 = vld [vmem:[%s2081_s19 + $0x4] ss:$8 sps:$4 sm:$0xff]  }
  0x75   : > { %v1624_v32 = vld [vmem:[%s2081_s19 + $0x114] ss:$8 sps:$4 sm:$0xff]   ;;  %v1627_v34 = vld [vmem:[%s2081_s19 + $0x110] ss:$8 sps:$4 sm:$0xff]   ;;  %v1630_v36 = vld [vmem:[%s2081_s19 + $0x104] ss:$8 sps:$4 sm:$0xff]  }
  0x76   : > { %1074 = vmatpush1.bf16.msra.mxu0 %v1602_v17  ;;  %v1632_v37 = vld [vmem:[%s2081_s19] ss:$8 sps:$4 sm:$0xff]   ;;  %v1634_v39 = vld [vmem:[%s2081_s19 + $0xf4] ss:$8 sps:$4 sm:$0xff]   ;;  %v1638_v41 = vld [vmem:[%s2081_s19 + $0xf0] ss:$8 sps:$4 sm:$0xff]  }
  0x77   : > { %1117 = vmatpush1.bf16.msra.mxu1 %v1603_v18  ;;  %1075 = vmatprep.subr.bf16.mxu0 %v1604_v19  ;;  %v1633_v38 = vld [vmem:[%s2081_s19 + $0x100] ss:$8 sps:$4 sm:$0xff]   ;;  %v1636_v40 = vld [vmem:[%s2081_s19 + $0x1f4] ss:$8 sps:$4 sm:$0xff]   ;;  %v1639_v42 = vld [vmem:[%s2081_s19 + $0x1f0] ss:$8 sps:$4 sm:$0xff]  }
  0x78   : > { %1118 = vmatprep.subr.bf16.mxu1 %v1606_v20  ;;  %v1640_v43 = vld [vmem:[%s2081_s19 + $0xe4] ss:$8 sps:$4 sm:$0xff]   ;;  %v1644_v45 = vld [vmem:[%s2081_s19 + $0xe0] ss:$8 sps:$4 sm:$0xff]   ;;  %v1646_v47 = vld [vmem:[%s2081_s19 + $0xd4] ss:$8 sps:$4 sm:$0xff]  }
  0x79   : > { %v1642_v44 = vld [vmem:[%s2081_s19 + $0x1e4] ss:$8 sps:$4 sm:$0xff]   ;;  %v1645_v46 = vld [vmem:[%s2081_s19 + $0x1e0] ss:$8 sps:$4 sm:$0xff]   ;;  %v1648_v48 = vld [vmem:[%s2081_s19 + $0x1d4] ss:$8 sps:$4 sm:$0xff]  }
  0x7a   : > { %1076 = vmatpush1.bf16.msra.mxu0 %v1608_v21  ;;  %v1650_v49 = vld [vmem:[%s2081_s19 + $0xd0] ss:$8 sps:$4 sm:$0xff]   ;;  %v1652_v51 = vld [vmem:[%s2081_s19 + $0xc4] ss:$8 sps:$4 sm:$0xff]   ;;  %v1656_v53 = vld [vmem:[%s2081_s19 + $0xc0] ss:$8 sps:$4 sm:$0xff]  }
  0x7b   : > { %1119 = vmatpush1.bf16.msra.mxu1 %v1609_v22  ;;  %1077 = vmatprep.subr.bf16.mxu0 %v1610_v23  ;;  %v1651_v50 = vld [vmem:[%s2081_s19 + $0x1d0] ss:$8 sps:$4 sm:$0xff]   ;;  %v1654_v52 = vld [vmem:[%s2081_s19 + $0x1c4] ss:$8 sps:$4 sm:$0xff]   ;;  %v1657_v55 = vld [vmem:[%s2081_s19 + $0x1c0] ss:$8 sps:$4 sm:$0xff]  }
  0x7c   : > { %1120 = vmatprep.subr.bf16.mxu1 %v1612_v24  ;;  %v1684_v54 = vld [vmem:[%s2079_s5 + $0x4] ss:$16 sps:$4 sm:$0xff]   ;;  %v1687_v58 = vld [vmem:[%s2079_s5 + $0xc] ss:$16 sps:$4 sm:$0xff]   ;;  %v1662_v59 = vld [vmem:[%s2081_s19 + $0xb0] ss:$8 sps:$4 sm:$0xff]  }
  0x7d   : > { %v1658_v56 = vld [vmem:[%s2081_s19 + $0xb4] ss:$8 sps:$4 sm:$0xff]   ;;  %1101 = vmatprep.mubr.bf16.mxu0 %v1684_v54  ;;  %1144 = vmatprep.mubr.bf16.mxu1 %v1687_v58  ;;  %v1663_v60 = vld [vmem:[%s2081_s19 + $0x1b0] ss:$8 sps:$4 sm:$0xff]   ;;  %v1664_v61 = vld [vmem:[%s2081_s19 + $0xa4] ss:$8 sps:$4 sm:$0xff]  }
  0x7e   : > { %1078 = vmatpush1.bf16.msra.mxu0 %v1614_v25  ;;  %v1660_v57 = vld [vmem:[%s2081_s19 + $0x1b4] ss:$8 sps:$4 sm:$0xff]   ;;  %v1666_v62 = vld [vmem:[%s2081_s19 + $0x1a4] ss:$8 sps:$4 sm:$0xff]   ;;  %v1668_v63 = vld [vmem:[%s2081_s19 + $0xa0] ss:$8 sps:$4 sm:$0xff]  }
  0x7f   : > { %1121 = vmatpush1.bf16.msra.mxu1 %v1615_v26  ;;  %1079 = vmatprep.subr.bf16.mxu0 %v1616_v27  ;;  %v1669_v0 = vld [vmem:[%s2081_s19 + $0x1a0] ss:$8 sps:$4 sm:$0xff]   ;;  %v1670_v1 = vld [vmem:[%s2081_s19 + $0x94] ss:$8 sps:$4 sm:$0xff]   ;;  %v1674_v3 = vld [vmem:[%s2081_s19 + $0x90] ss:$8 sps:$4 sm:$0xff]  }
  0x80   : > { %1122 = vmatprep.subr.bf16.mxu1 %v1618_v28  ;;  %v1672_v2 = vld [vmem:[%s2081_s19 + $0x194] ss:$8 sps:$4 sm:$0xff]   ;;  %v1675_v4 = vld [vmem:[%s2081_s19 + $0x190] ss:$8 sps:$4 sm:$0xff]   ;;  %v1676_v5 = vld [vmem:[%s2081_s19 + $0x84] ss:$8 sps:$4 sm:$0xff]  }
  0x81   : > { %v1678_v6 = vld [vmem:[%s2081_s19 + $0x184] ss:$8 sps:$4 sm:$0xff]   ;;  %v1680_v7 = vld [vmem:[%s2081_s19 + $0x80] ss:$8 sps:$4 sm:$0xff]   ;;  %v657_v12 = vld [vmem:[#allocation2 + $0x10] sm:$0xff]  ;;  %p1483_p6 = scmp.ne.s32.totalorder %s1758_s21, 8 }
  0x82   : > { %1080 = vmatpush1.bf16.msra.mxu0 %v1620_v29  ;;  %v1681_v8 = vld [vmem:[%s2081_s19 + $0x180] ss:$8 sps:$4 sm:$0xff]   ;;  %v659_v21 = vld [vmem:[#allocation2 + $0x18] sm:$0xff] }
  0x83   : > { %1123 = vmatpush1.bf16.msra.mxu1 %v1621_v30  ;;  %1081 = vmatprep.subr.bf16.mxu0 %v1622_v31  ;;  %v1682_v9 = vld [vmem:[%s2079_s5] ss:$16 sps:$4 sm:$0xff]   ;;  %v1685_v10 = vld [vmem:[%s2079_s5 + $0x8] ss:$16 sps:$4 sm:$0xff]  }
  0x84   : > { %1124 = vmatprep.subr.bf16.mxu1 %v1624_v32  ;;  %v658_v16 = vld [vmem:[#allocation2] sm:$0xff]  ;;  %v660_v26 = vld [vmem:[#allocation2 + $0x8] sm:$0xff] }
  0x86   : > { %1082 = vmatpush1.bf16.msra.mxu0 %v1626_v33 }
  0x87   : > { %1125 = vmatpush1.bf16.msra.mxu1 %v1627_v34  ;;  %1083 = vmatprep.subr.bf16.mxu0 %v1628_v35 }
  0x88   : > { %1126 = vmatprep.subr.bf16.mxu1 %v1630_v36 }
  0x8a   : > { %1084 = vmatpush1.bf16.msra.mxu0 %v1632_v37 }
  0x8b   : > { %1127 = vmatpush1.bf16.msra.mxu1 %v1633_v38  ;;  %1085 = vmatprep.subr.bf16.mxu0 %v1634_v39 }
  0x8c   : > { %1128 = vmatprep.subr.bf16.mxu1 %v1636_v40 }
  0x8e   : > { %1086 = vmatpush2.bf16.msra.mxu0 %v1638_v41 }
  0x8f   : > { %1129 = vmatpush2.bf16.msra.mxu1 %v1639_v42  ;;  %1087 = vmatprep.subr.bf16.mxu0 %v1640_v43 }
  0x90   : > { %1130 = vmatprep.subr.bf16.mxu1 %v1642_v44 }
  0x92   : > { %1088 = vmatpush2.bf16.msra.mxu0 %v1644_v45 }
  0x93   : > { %1131 = vmatpush2.bf16.msra.mxu1 %v1645_v46  ;;  %1089 = vmatprep.subr.bf16.mxu0 %v1646_v47 }
  0x94   : > { %1132 = vmatprep.subr.bf16.mxu1 %v1648_v48 }
  0x96   : > { %1090 = vmatpush2.bf16.msra.mxu0 %v1650_v49 }
  0x97   : > { %1133 = vmatpush2.bf16.msra.mxu1 %v1651_v50  ;;  %1091 = vmatprep.subr.bf16.mxu0 %v1652_v51 }
  0x98   : > { %1134 = vmatprep.subr.bf16.mxu1 %v1654_v52 }
  0x9a   : > { %1092 = vmatpush2.bf16.msra.mxu0 %v1656_v53 }
  0x9b   : > { %1135 = vmatpush2.bf16.msra.mxu1 %v1657_v55  ;;  %1093 = vmatprep.subr.bf16.mxu0 %v1658_v56 }
  0x9c   : > { %1136 = vmatprep.subr.bf16.mxu1 %v1660_v57 }
  0x9e   : > { %1094 = vmatpush2.bf16.msra.mxu0 %v1662_v59 }
  0x9f   : > { %1137 = vmatpush2.bf16.msra.mxu1 %v1663_v60  ;;  %1095 = vmatprep.subr.bf16.mxu0 %v1664_v61 }
  0xa0   : > { %1138 = vmatprep.subr.bf16.mxu1 %v1666_v62 }
  0xa2   : > { %1096 = vmatpush2.bf16.msra.mxu0 %v1668_v63 }
  0xa3   : > { %1139 = vmatpush2.bf16.msra.mxu1 %v1669_v0  ;;  %1097 = vmatprep.subr.bf16.mxu0 %v1670_v1 }
  0xa4   : > { %1140 = vmatprep.subr.bf16.mxu1 %v1672_v2 }
  0xa6   : > { %1098 = vmatpush2.bf16.msra.mxu0 %v1674_v3 }
  0xa7   : > { %1141 = vmatpush2.bf16.msra.mxu1 %v1675_v4  ;;  %1099 = vmatprep.subr.bf16.mxu0 %v1676_v5 }
  0xa8   : > { %1142 = vmatprep.subr.bf16.mxu1 %v1678_v6 }
  0xaa   : > { %1100 = vmatpush2.bf16.msra.mxu0 %v1680_v7 }
  0xab   : > { %1143 = vmatpush2.bf16.msra.mxu1 %v1681_v8 }
  0xad   : > { %1102 = vmatmul.mubr.bf16.vlgmr.msra.gmra.mxu0 %v1682_v9 }
  0xae   : > { %1145 = vmatmul.mubr.bf16.vlgmr.msra.gmra.mxu1 %v1685_v10 }
 0x16d   : > { %v1103_v11 = vpop.f32.mrf.mxu0 }
 0x16e   : > { %v1146_v13 = vpop.f32.mrf.mxu1 }
 0x16f   : > { %v1147_v14 = vadd.f32 %v1146_v13, %v1103_v11  ;;  %v1105_v15 = vpop.f32.mrf.mxu0 }
 0x170   : > { %v1148_v17 = vpop.f32.mrf.mxu1 }
 0x171   : > { %v1155_v18 = vadd.f32 %v1147_v14, %v657_v12  ;;  %v1149_v19 = vadd.f32 %v1148_v17, %v1105_v15  ;;  %v1107_v20 = vpop.f32.mrf.mxu0 }
 0x172   : > { %v1150_v22 = vpop.f32.mrf.mxu1 }
 0x173   : > { %1159 = vst [vmem:[#allocation2 + $0x10] sm:$0xff] %v1155_v18  ;;  %v1156_v23 = vadd.f32 %v1149_v19, %v658_v16  ;;  %v1151_v24 = vadd.f32 %v1150_v22, %v1107_v20  ;;  %v1109_v25 = vpop.f32.mrf.mxu0 }
 0x174   : > { %v1152_v27 = vpop.f32.mrf.mxu1 }
 0x175   : > { %1160 = vst [vmem:[#allocation2] sm:$0xff] %v1156_v23  ;;  %v1157_v28 = vadd.f32 %v1151_v24, %v659_v21  ;;  %v1153_v29 = vadd.f32 %v1152_v27, %v1109_v25  ;;  %1166 = sbr.rel (%p1483_p6) target bundleno = 395 (0x18b), region = 143 }
 0x177   : > { %1161 = vst [vmem:[#allocation2 + $0x18] sm:$0xff] %v1157_v28  ;;  %v1158_v30 = vadd.f32 %v1153_v29, %v660_v26 }
 0x179   : > { %1162 = vst [vmem:[#allocation2 + $0x8] sm:$0xff] %v1158_v30 }
 0x17a   : > { %v1173_v31 = vlaneseq  ;;  %v1187_v33 = vld [vmem:[%s602_s17] sm:$0xff]  ;;  %v1188_v35 = vld [vmem:[%s602_s17 + $0x8] sm:$0xff] }
 0x17b   : > { %v1171_v34 = vld [vmem:[%s643_s26] sm:$0x3]  ;;  %v1167_v36 = vld [vmem:[#allocation2 + $0x10] sm:$0xff]  ;;  %v1189_v40 = vunpack.c.l.bf16 %v1187_v33  ;;  %v1190_v41 = vunpack.c.h.bf16 %v1187_v33  ;;  %v1191_v46 = vunpack.c.l.bf16 %v1188_v35  ;;  %v1192_v47 = vunpack.c.h.bf16 %v1188_v35 }
 0x17c   : > { %v1174_v32 = vshrl.u32 %v1173_v31, 7  ;;  %v1168_v39 = vld [vmem:[#allocation2] sm:$0xff] }
 0x17e   : > { %v1175_v37 = vsub.s32 0, %v1174_v32  ;;  %v1179_v38 = vsub.s32 1, %v1174_v32  ;;  %v1169_v42 = vld [vmem:[#allocation2 + $0x18] sm:$0xff] }
 0x180   : > { %v1170_v43 = vld [vmem:[#allocation2 + $0x8] sm:$0xff]  ;;  %v1176_v44 = vrot.slane %v1171_v34, %v1175_v37  ;;  %v1180_v45 = vrot.slane %v1171_v34, %v1179_v38 }
 0x182   : > { %v1183_v48 = vadd.f32 %v1176_v44, %v1167_v36  ;;  %v1184_v49 = vadd.f32 %v1180_v45, %v1168_v39  ;;  %v1185_v50 = vadd.f32 %v1176_v44, %v1169_v42  ;;  %v1186_v51 = vadd.f32 %v1180_v45, %v1170_v43 }
 0x184   : > { %v1193_v52 = vadd.f32 %v1189_v40, %v1183_v48  ;;  %v1194_v53 = vadd.f32 %v1190_v41, %v1184_v49  ;;  %v1195_v54 = vadd.f32 %v1191_v46, %v1185_v50  ;;  %v1196_v55 = vadd.f32 %v1192_v47, %v1186_v51 }
 0x186   : > { %v1197_v56 = vmax.f32 %v1193_v52, 0.0  ;;  %v1198_v57 = vmax.f32 %v1194_v53, 0.0  ;;  %v1199_v58 = vmax.f32 %v1195_v54, 0.0  ;;  %v1200_v59 = vmax.f32 %v1196_v55, 0.0 }
 0x188   : > { %v1494_v60 = vpack.c.bf16 %v1198_v57, %v1197_v56  ;;  %v1495_v61 = vpack.c.bf16 %v1200_v59, %v1199_v58 }
 0x18a   : > { %1213 = vst [vmem:[%s2085_s30] sm:$0xff] %v1494_v60  ;;  %1214 = vst [vmem:[%s2085_s30 + $0x8] sm:$0xff] %v1495_v61 }
 0x18b PF: > { %1221 = sbr.rel (!%p1906_p13) target bundleno = 403 (0x193), region = 147  ;;  %s1496_s21 = sshll.u32 (%p1906_p13), %s1762_s22, 3 }
 0x18c   : > { %s1227_s6 = scalar_lea.vmem (%p1906_p13), %s2213_s4, %s1496_s21 }
 0x191   : > { %v1258_v62 = vld [vmem:[%s2085_s30] sm:$0xff]  ;;  %v1260_v63 = vld [vmem:[%s2085_s30 + $0x8] sm:$0xff] }
 0x192   : > { %1259 = vst [vmem:[%s1227_s6] sm:$0xff] %v1258_v62  ;;  %1261 = vst [vmem:[%s1227_s6 + $0x10] sm:$0xff] %v1260_v63 }
 0x193 PF: > { %s14_s25 = sadd.s32 1, %s1774_s25   ;;  %s2225_s29 = sld [smem:[#allocation9_spill]] }
 0x194   : > { %p11_p7 = scmp.ge.s32.totalorder %s14_s25, 20   ;;  %s2226_s11 = sld [smem:[#allocation7_spill]] }
 0x195   : > { %s2227_s8 = sld [smem:[#allocation8_spill]]  ;;  %s2228_s15 = smov %s1738_s16 }
 0x196   : > { %s2229_s16 = smov %s1898_s13  ;;  %s2230_s17 = smov %s1746_s18 }
 0x197   : > { %s2231_s18 = smov %s1895_s12  ;;  %s2232_s19 = smov %s1754_s20 }
 0x198   : > { %s2234_s21 = smov %s1766_s23  ;;  %s2235_s22 = smov %s1770_s24 }
 0x199   : > { %s2233_s20 = smov %s2225_s29  ;;  %13 = sbr.rel (!%p11_p7) target bundleno = 8 (0x8), region = 235 }
 0x19a   : > { %s2236_s23 = smov %s2226_s11 }
 0x19b   : > { %s2237_s24 = smov %s2227_s8 }

// kernel: multi_task_net_forward.35
= control target key start
LH: loop header
LB: loop body
LE: loop exit
PB: predicated region body
PF: predicated region fallthrough
CT: control target
= control target key end

     0   :  { %6 = vsyncpa [#allocation4], 0  ;;  %s469_s0 = inlined_call_operand.vmem [shape: bf16[2,1,512], index: 0, kind: input, shape index: {}]   ;;  %s470_s1 = inlined_call_operand.hbm [shape: f32[2,512], index: 1, kind: output, shape index: {}]  }
   0x1   :  { %8 = vsyncpa [#allocation4 + $0x1], 0  ;;  %s374_s6 = smov 0   ;;  %s376_s7 = smov 0  }
   0x2   :  { %s378_s8 = smov 0   ;;  %s380_s9 = smov 0  }
   0x3 LB: > { %s250_s10 = sadd.s32 4294967295, %s361_s9   ;;  %s251_s11 = sadd.s32 4294967294, %s361_s9   ;;  %s361_s9 = sphi %s380_s9, %s476_s9   ;;  %s357_s8 = sphi %s378_s8, %s475_s8   ;;  %s353_s7 = sphi %s376_s7, %s474_s7   ;;  %s349_s6 = sphi %s374_s6, %s473_s6  }
   0x4   : > { %s397_s12 = sadd.s32 1, %s361_s9   ;;  %s21_s13 = sadd.s32 1, %s357_s8 }
   0x5   : > { %s18_s14 = ssub.s32 %s361_s9, %s397_s12  ;;  %p28_p0 = scmp.ne.s32.totalorder %s357_s8, %s353_s7 }
   0x6   : > { %p19_p1 = scmp.eq.s32.totalorder %s18_s14, 0  ;;  %p29_p2 = scmp.eq.s32.totalorder %s361_s9, 0 }
   0x7   : > { %p58_p3 = scmp.eq.s32.totalorder %s250_s10, 3  ;;  %p63_p4 = scmp.ne.s32.totalorder %s353_s7, %s349_s6 }
   0x8   : > { %s410_s15 = scalar_select %p19_p1, %s357_s8, %s21_s13  }
   0x9   : > { %p30_p5 = por %p29_p2, %p28_p0  ;;  %p412_p6 = por %p58_p3, %p28_p0 }
   0xa   : > { %p64_p7 = scmp.eq.s32.totalorder %s251_s11, 3  ;;  %p253_p9 = scmp.ge.s32.totalorder %s361_s9, 4 }
   0xc   : > { %p416_p8 = por %p64_p7, %p63_p4  ;;  %80 = sbr.rel (%p253_p9) target bundleno = 22 (0x16), region = 16 }
  0x11   : > { %83 = sbr.rel (!%p30_p5) target bundleno = 22 (0x16), region = 20  ;;  %s85_s18 = sand.u32 (%p30_p5), 1, %s357_s8  }
  0x12   : > { %s88_s21 = scalar_lea.vmem (%p30_p5), %s469_s0, %s361_s9  ;;  %s254_s22 = sshll.u32 (%p30_p5), %s85_s18, 1 }
  0x13   : > { %v105_v0 = vld [vmem:[%s88_s21] sm:$0x1] (%p30_p5)  ;;  %v107_v1 = vld [vmem:[%s88_s21 + $0x4] sm:$0x1] (%p30_p5)  ;;  %s87_s23 = scalar_lea.vmem (%p30_p5), [#allocation2], %s254_s22 }
  0x14   : > { %106 = vst [vmem:[%s87_s23] sm:$0x1] (%p30_p5), %v105_v0  ;;  %108 = vst [vmem:[%s87_s23 + $0x1] sm:$0x1] (%p30_p5), %v107_v1 }
  0x16 PF: > { %p255_p10 = scmp.ge.s32.totalorder %s361_s9, 1  ;;  %p127_p11 = scmp.lt.s32.totalorder %s361_s9, 5 }
  0x18   : > { %p128_p12 = pnand %p255_p10, %p127_p11 }
  0x19   : > { %s134_s24 = sand.u32 (!%p128_p12), 1, %s353_s7   ;;  %s259_s29 = sshll.u32 (!%p128_p12), %s250_s10, 5 }
  0x1a   : > { %131 = sbr.rel (%p128_p12) target bundleno = 53 (0x35), region = 54  ;;  %s256_s25 = sshll.u32 (!%p128_p12), %s134_s24, 1 }
  0x1b   : > { %s136_s26 = scalar_lea.vmem (!%p128_p12), [#allocation2], %s256_s25  ;;  %s152_s27 = scalar_lea.vmem (!%p128_p12), [#allocation3], %s256_s25 }
  0x1c   : > { %s187_s28 = sshll.u32 (!%p128_p12), %s152_s27, 4  ;;  %s185_s3 = scalar_lea.hbm (!%p128_p12), %s470_s1, %s259_s29  ;;  %s431_s28 = int_to_ptr.vmem [resolvable:$true] %s187_s28 }
  0x1d   : > { %s174_s4 = scalar_lea.sflag (!%p128_p12), [#allocation4], %s134_s24  ;;  %s301_s5 = scalar_lea.vmem (!%p128_p12), %s431_s28, 32 }
  0x1e   : > { %p302_p13 = scmp.ne.s32.totalorder (!%p128_p12), %s431_s28, %s301_s5  ;;  %s363_s10 = smov (!%p128_p12), [#allocation3]  }
  0x1f   : > { %v161_v2 = vlaneseq  ;;  %v153_v4 = vld [vmem:[%s136_s26] sm:$0x1]  ;;  %v154_v5 = vld [vmem:[%s136_s26 + $0x1] sm:$0x1]  ;;  %vm169_vm0 = vcmask 1041409   ;;  %s305_s11 = sshll.u32 %s363_s10, 4  ;;  %s306_s11 = int_to_ptr.vmem [resolvable:$false] %s305_s11 }
  0x20   : > { %v155_v6 = vunpack.c.l.bf16 %v153_v4  ;;  %v156_v7 = vunpack.c.l.bf16 %v154_v5  ;;  %p303_p0 = pnand %p302_p13, %p412_p6  ;;  %s307_s13 = scalar_lea.vmem %s306_s11, 64 }
  0x21   : > { %v162_v3 = vshrl.u32 %v161_v2, 7  ;;  %p308_p2 = scmp.lt.s32.totalorder %s431_s28, %s306_s11  ;;  %p309_p3 = scmp.lt.s32.totalorder %s307_s13, %s301_s5 }
  0x22   : > { %p304_p1 = pneg %p303_p0 }
  0x23   : > { %v163_v8 = vsub.s32 0, %v162_v3  ;;  %p310_p4 = por %p309_p3, %p308_p2 }
  0x25   : > { %v164_v9 = vrot.slane %v155_v6, %v163_v8  ;;  %v168_v10 = vrot.slane %v156_v7, %v163_v8  ;;  %p311_p5 = pnand %p310_p4, %p304_p1 }
  0x27   : > { %v170_v11 = vsel %vm169_vm0, %v168_v10, %v164_v9 }
  0x28   : > { %172 = vst [vmem:[%s152_s27] sm:$0x3] %v170_v11 }
  0x29   : > { %314 = shalt.err (!%p311_p5)
}
  0x2a   : > { %s315_s14 = scalar_lea.hbm %s185_s3, 32  ;;  %s319_s20 = scalar_lea.hbm %s470_s1, 128 }
  0x2b   : > { %p316_p7 = scmp.ne.s32.totalorder %s185_s3, %s315_s14  ;;  %p320_p11 = scmp.lt.s32.totalorder %s185_s3, %s470_s1 }
  0x2c   : > { %p321_p12 = scmp.lt.s32.totalorder %s319_s20, %s315_s14 }
  0x2d   : > { %p317_p9 = pnand %p316_p7, %p412_p6 }
  0x2e   : > { %p322_p13 = por %p321_p12, %p320_p11 }
  0x2f   : > { %p318_p10 = pneg %p317_p9 }
  0x31   : > { %p323_p0 = pnand %p322_p13, %p318_p10 }
  0x33   : > { %326 = shalt.err (!%p323_p0)
}
  0x34   : > { %262 = dma.vmem_to_hbm [thread:$0]  (%p412_p6), %s431_s28, 32, %s185_s3, %s174_s4  }
  0x35 PF: > { %p268_p1 = scmp.ge.s32.totalorder %s361_s9, 2  ;;  %s199_s23 = sand.u32 1, %s349_s6  }
  0x36   : > { %s200_s24 = scalar_lea.sflag [#allocation4], %s199_s23 }
  0x37   : > { %p265_p2 = pnand %p268_p1, %p416_p8 }
  0x39   : > { %p266_p3 = pneg %p265_p2 }
  0x3b   : > { %344 = dma.done.wait (%p266_p3), %s200_s24, 32  }
  0x3c   : > { %346 = vsyncadd (%p266_p3), %s200_s24, 4294967264  ;;  %p11_p4 = scmp.ge.s32.totalorder %s397_s12, 6   ;;  %s473_s6 = smov %s353_s7 }
  0x3d   : > { %s474_s7 = smov %s357_s8  ;;  %s475_s8 = smov %s410_s15 }
  0x3e   : > { %s476_s9 = smov %s397_s12  ;;  %13 = sbr.rel (!%p11_p4) target bundleno = 3 (0x3), region = 98 }
  0x43   :  { %205 = vsyncpa [#allocation4], 1 }
  0x44   :  { %207 = vsyncpa [#allocation4 + $0x1], 1 }

</bundles_post_ra>
